<compile_context>
chip_gen: v6e
topology: v6e:2x2x1
jax: 0.10.0
libtpu: 0.0.40
codegen_flags: <defaults>
</compile_context>

<pallas_src>
import jax
import jax.numpy as jnp
from jax.experimental import pallas as pl
from jax.experimental.pallas import tpu as pltpu

LATENT_DIM = 256
LEAKY_SLOPE = 0.01  # nn.LeakyReLU() default negative_slope


def _leaky(y):
    return jnp.where(y > 0, y, LEAKY_SLOPE * y)


# ----------------------------- Pallas kernels ------------------------------ #

def _conv_pool_kernel(p_ref, w_ref, b_ref, o_ref):
    """Fused im2col-conv + bias + LeakyReLU + 2x2 max-pool.

    p_ref: [4, Mp, K]  -- group g holds the patches of pool-window offset g
    w_ref: [K, C], b_ref: [1, C], o_ref: [Mp, C] (pooled NHWC rows).
    """
    w = w_ref[...]
    b = b_ref[...]
    best = _leaky(jnp.dot(p_ref[0], w, preferred_element_type=jnp.float32) + b)
    for g in range(1, 4):
        y = _leaky(jnp.dot(p_ref[g], w, preferred_element_type=jnp.float32) + b)
        best = jnp.maximum(best, y)
    o_ref[...] = best.astype(o_ref.dtype)


def _fc_dropout_kernel(x_ref, w_ref, b_ref, m_ref, o_ref, acc_ref):
    """K-tiled Linear + LeakyReLU + dropout-mask apply (grid = (N-tiles, K-tiles))."""
    k = pl.program_id(1)

    @pl.when(k == 0)
    def _():
        acc_ref[...] = jnp.zeros_like(acc_ref)

    acc_ref[...] += jnp.dot(x_ref[...], w_ref[...],
                            preferred_element_type=jnp.float32)

    @pl.when(k == pl.num_programs(1) - 1)
    def _():
        y = _leaky(acc_ref[...] + b_ref[...]) * m_ref[...]
        o_ref[...] = y.astype(o_ref.dtype)


def _heads_reparam_kernel(h_ref, w_ref, b_ref, eps_ref,
                          z_ref, mean_ref, logvar_ref):
    """Fused mean/logvar heads (concatenated weight) + reparameterization."""
    y = jnp.dot(h_ref[...], w_ref[...], preferred_element_type=jnp.float32)
    y = y + b_ref[...]
    mean = y[:, :LATENT_DIM]
    logvar = y[:, LATENT_DIM:]
    mean_ref[...] = mean.astype(mean_ref.dtype)
    logvar_ref[...] = logvar.astype(logvar_ref.dtype)
    z_ref[...] = (mean + jnp.exp(0.5 * logvar) * eps_ref[...]).astype(z_ref.dtype)


# ------------------------------ Pallas wrappers ----------------------------- #

def conv_leaky_pool_pallas(p4, w, b):
    """p4: [4, Mp, K], w: [K, C], b: [C] -> pooled activations [Mp, C]."""
    G, Mp, K = p4.shape
    K2, C = w.shape
    assert G == 4 and K == K2
    b2 = b.reshape(1, C)
    return pl.pallas_call(
        _conv_pool_kernel,
        out_shape=jax.ShapeDtypeStruct((Mp, C), jnp.float32),
        grid=(1,),
        in_specs=[
            pl.BlockSpec((4, Mp, K), lambda i: (0, 0, 0)),
            pl.BlockSpec((K, C), lambda i: (0, 0)),
            pl.BlockSpec((1, C), lambda i: (0, 0)),
        ],
        out_specs=pl.BlockSpec((Mp, C), lambda i: (0, 0)),
        compiler_params=pltpu.CompilerParams(
            dimension_semantics=("arbitrary",)),
    )(p4, w, b2)


def fc_leaky_dropout_pallas(x, w, b, mask, *, tn=512, tk=512):
    """x: [M, K], w: [K, N], b: [N], mask: [M, N] -> [M, N].

    Grid (N//tn, K//tk); N axis is megacore-parallel, K is the reduction with a
    VMEM f32 accumulator. ~1 MB weight blocks -> fits default scoped VMEM on
    v5e/v6e/v7x with double buffering.
    """
    M, K = x.shape
    K2, N = w.shape
    assert K == K2 and K % tk == 0 and N % tn == 0
    b2 = b.reshape(1, N)
    return pl.pallas_call(
        _fc_dropout_kernel,
        out_shape=jax.ShapeDtypeStruct((M, N), jnp.float32),
        grid=(N // tn, K // tk),
        in_specs=[
            pl.BlockSpec((M, tk), lambda j, k: (0, k)),
            pl.BlockSpec((tk, tn), lambda j, k: (k, j)),
            pl.BlockSpec((1, tn), lambda j, k: (0, j)),
            pl.BlockSpec((M, tn), lambda j, k: (0, j)),
        ],
        out_specs=pl.BlockSpec((M, tn), lambda j, k: (0, j)),
        scratch_shapes=[pltpu.VMEM((M, tn), jnp.float32)],
        compiler_params=pltpu.CompilerParams(
            dimension_semantics=("parallel", "arbitrary")),
    )(x, w, b2, mask)


def heads_reparam_pallas(h, w_heads, b_heads, eps):
    """h: [M, 1024], w_heads: [1024, 512] (mean|logvar), eps: [M, 256]
    -> (z, mean, logvar), each [M, 256]."""
    M, K = h.shape
    K2, N2 = w_heads.shape
    assert K == K2 and N2 == 2 * LATENT_DIM
    b2 = b_heads.reshape(1, N2)
    out_shapes = (
        jax.ShapeDtypeStruct((M, LATENT_DIM), jnp.float32),  # z
        jax.ShapeDtypeStruct((M, LATENT_DIM), jnp.float32),  # mean
        jax.ShapeDtypeStruct((M, LATENT_DIM), jnp.float32),  # logvar
    )
    lat_spec = pl.BlockSpec((M, LATENT_DIM), lambda i: (0, 0))
    return pl.pallas_call(
        _heads_reparam_kernel,
        out_shape=out_shapes,
        grid=(1,),
        in_specs=[
            pl.BlockSpec((M, K), lambda i: (0, 0)),
            pl.BlockSpec((K, N2), lambda i: (0, 0)),
            pl.BlockSpec((1, N2), lambda i: (0, 0)),
            lat_spec,
        ],
        out_specs=(lat_spec, lat_spec, lat_spec),
        compiler_params=pltpu.CompilerParams(
            dimension_semantics=("arbitrary",)),
    )(h, w_heads, b2, eps)


# --------------------------------- glue ------------------------------------ #

def im2col_pool_groups(x_nhwc, k, pad_k_to=None):
    """Valid conv (stride 1) patches, partitioned into the 4 positions of every
    2x2 max-pool window: returns p4 [4, N*Hp*Wp, k*k*C] with patch feature order
    (kh, kw, cin), matching the stored weight layout."""
    N, H, W, C = x_nhwc.shape
    Ho, Wo = H - k + 1, W - k + 1
    Hp, Wp = Ho // 2, Wo // 2
    cols = []
    for di in range(k):
        for dj in range(k):
            cols.append(x_nhwc[:, di:di + Ho, dj:dj + Wo, :])
    p = jnp.stack(cols, axis=3).reshape(N, Ho, Wo, k * k * C)
    p = p[:, :Hp * 2, :Wp * 2, :]                      # floor semantics
    p = p.reshape(N, Hp, 2, Wp, 2, k * k * C)
    p = jnp.transpose(p, (2, 4, 0, 1, 3, 5)).reshape(4, N * Hp * Wp, k * k * C)
    if pad_k_to is not None and pad_k_to > k * k * C:
        p = jnp.pad(p, ((0, 0), (0, 0), (0, pad_k_to - k * k * C)))
    return p, (N, Hp, Wp)


def init_params(key):
    ks = jax.random.split(key, 10)

    def w(k, shape, scale):
        return jax.random.normal(k, shape, jnp.float32) * scale

    # Conv weights stored as [kh*kw*cin, cout] to match im2col patch order.
    # TODO(synk): importing real PyTorch Conv2d weights [cout,cin,kh,kw] would
    # require w.transpose(2, 3, 1, 0).reshape(kh*kw*cin, cout) first.
    w1 = w(ks[0], (3, 3, 3, 32), 0.10).reshape(3 * 3 * 3, 32)
    w1_padded = jnp.zeros((32, 32), jnp.float32).at[:27, :].set(w1)  # K 27->32

    w_mean = w(ks[6], (1024, LATENT_DIM), 0.02)
    w_logvar = w(ks[8], (1024, LATENT_DIM), 0.02)
    b_mean = w(ks[7], (LATENT_DIM,), 0.02)
    b_logvar = w(ks[9], (LATENT_DIM,), 0.02)

    return {
        "w1": w1_padded,
        "b1": w(ks[1], (32,), 0.10),
        "w2": w(ks[2], (4, 4, 32, 128), 0.05).reshape(4 * 4 * 32, 128),
        "b2": w(ks[3], (128,), 0.05),
        "w_fc": w(ks[4], (128 * 6 * 6, 1024), 0.02),
        "b_fc": w(ks[5], (1024,), 0.02),
        # fused mean|logvar head
        "w_heads": jnp.concatenate([w_mean, w_logvar], axis=1),   # [1024, 512]
        "b_heads": jnp.concatenate([b_mean, b_logvar], axis=0),   # [512]
    }


def encoder_forward(params, x_nchw, key):
    N = x_nchw.shape[0]
    x = jnp.transpose(x_nchw, (0, 2, 3, 1))  # NCHW -> NHWC

    # Conv2d(3, 32, 3) + LeakyReLU + MaxPool2d(2,2): 32x32 -> 30x30 -> 15x15
    p4, (n, hp, wp) = im2col_pool_groups(x, 3, pad_k_to=32)      # [4, N*225, 32]
    y = conv_leaky_pool_pallas(p4, params["w1"], params["b1"])
    y = y.reshape(n, hp, wp, 32)                                  # [N,15,15,32]

    # Conv2d(32, 128, 4) + LeakyReLU + MaxPool2d(2,2): 15x15 -> 12x12 -> 6x6
    p4, (n, hp, wp) = im2col_pool_groups(y, 4)                    # [4, N*36, 512]
    y = conv_leaky_pool_pallas(p4, params["w2"], params["b2"])
    y = y.reshape(n, hp, wp, 128)                                 # [N,6,6,128]

    # x.view(-1, 128*6*6) flattens in NCHW order
    flat = jnp.transpose(y, (0, 3, 1, 2)).reshape(N, 128 * 6 * 6)

    # Linear(4608, 1024) + LeakyReLU + Dropout(p=0.5), fused & K-tiled.
    # TODO(synk): dropout/eps use jax.random, not PyTorch's RNG stream
    # (statistically equivalent inverted dropout, not bit-identical).
    k_drop, k_eps = jax.random.split(key)
    mask = jax.random.bernoulli(k_drop, 0.5, (N, 1024)).astype(jnp.float32) * 2.0
    h = fc_leaky_dropout_pallas(flat, params["w_fc"], params["b_fc"], mask)

    # mean / logvar heads + z = mean + exp(0.5*logvar)*eps, fused in one kernel
    eps = jax.random.normal(k_eps, (N, LATENT_DIM), jnp.float32)
    z, mean, logvar = heads_reparam_pallas(
        h, params["w_heads"], params["b_heads"], eps)
    return z, (mean, logvar)


if __name__ == "__main__":
    key = jax.random.PRNGKey(0)
    k_param, k_x, k_fwd = jax.random.split(key, 3)

    params = init_params(k_param)
    # Input spatial size must be 32x32 so the flatten matches 128*6*6.
    x = jax.random.normal(k_x, (2, 3, 32, 32), jnp.float32)  # NCHW, like PyTorch

    fwd = jax.jit(encoder_forward)
    z, (mean, logvar) = fwd(params, x, k_fwd)
    jax.block_until_ready((z, mean, logvar))

    assert z.shape == (2, LATENT_DIM)
    assert mean.shape == (2, LATENT_DIM)
    assert logvar.shape == (2, LATENT_DIM)
    assert jnp.all(jnp.isfinite(z)) and jnp.all(jnp.isfinite(mean))
    assert jnp.all(jnp.isfinite(logvar))
    print("KERNEL_OK")
</pallas_src>

<mosaic_0001>
module attributes {stable_mosaic.version = 11 : i64} {
  func.func @_conv_pool_kernel(%arg0: i32, %arg1: memref<4x450x32xf32, #tpu.memory_space<vmem>>, %arg2: memref<32x32xf32, #tpu.memory_space<vmem>>, %arg3: memref<1x32xf32, #tpu.memory_space<vmem>>, %arg4: memref<450x32xf32, #tpu.memory_space<vmem>>) attributes {dimension_semantics = [#tpu.dimension_semantics<arbitrary>], iteration_bounds = array<i64: 1>, scalar_prefetch = 0 : i64, scratch_operands = 0 : i64, tpu.core_type = #tpu.core_type<tc>, window_params = [{pipeline_mode = #tpu.pipeline_mode<synchronous>, transform_indices = @transform_0, window_bounds = array<i64: 4, 450, 32>}, {pipeline_mode = #tpu.pipeline_mode<synchronous>, transform_indices = @transform_1, window_bounds = array<i64: 32, 32>}, {pipeline_mode = #tpu.pipeline_mode<synchronous>, transform_indices = @transform_2, window_bounds = array<i64: 1, 32>}, {pipeline_mode = #tpu.pipeline_mode<synchronous>, transform_indices = @transform_3, window_bounds = array<i64: 450, 32>}]} {
    %c0 = arith.constant 0 : index
    %c0_0 = arith.constant 0 : index
    %0 = vector.load %arg2[%c0, %c0_0] : memref<32x32xf32, #tpu.memory_space<vmem>>, vector<32x32xf32>
    %c0_1 = arith.constant 0 : index
    %c0_2 = arith.constant 0 : index
    %1 = vector.load %arg3[%c0_1, %c0_2] : memref<1x32xf32, #tpu.memory_space<vmem>>, vector<1x32xf32>
    %c0_3 = arith.constant 0 : index
    %c0_4 = arith.constant 0 : index
    %c0_5 = arith.constant 0 : index
    %2 = vector.load %arg1[%c0_3, %c0_4, %c0_5] : memref<4x450x32xf32, #tpu.memory_space<vmem>>, vector<1x450x32xf32>
    %3 = vector.shape_cast %2 : vector<1x450x32xf32> to vector<450x32xf32>
    %cst = arith.constant dense<0.000000e+00> : vector<450x32xf32>
    %4 = tpu.matmul %3, %0, %cst {dimension_numbers = #tpu.dot_dimension_numbers<[1], [0], [0], [1], [0, 0, 1, 1], [], []>} : vector<450x32xf32>, vector<32x32xf32>, vector<450x32xf32> -> vector<450x32xf32>
    %5 = vector.broadcast %1 : vector<1x32xf32> to vector<450x32xf32>
    %6 = arith.addf %4, %5 : vector<450x32xf32>
    %cst_6 = arith.constant 0.000000e+00 : f32
    %7 = vector.broadcast %cst_6 : f32 to vector<450x32xf32>
    %8 = arith.cmpf ogt, %6, %7 : vector<450x32xf32>
    %cst_7 = arith.constant 0.00999999977 : f32
    %9 = vector.broadcast %cst_7 : f32 to vector<450x32xf32>
    %10 = arith.mulf %9, %6 : vector<450x32xf32>
    %11 = arith.select %8, %6, %10 : vector<450x32xi1>, vector<450x32xf32>
    %c1 = arith.constant 1 : index
    %c0_8 = arith.constant 0 : index
    %c0_9 = arith.constant 0 : index
    %12 = vector.load %arg1[%c1, %c0_8, %c0_9] : memref<4x450x32xf32, #tpu.memory_space<vmem>>, vector<1x450x32xf32>
    %13 = vector.shape_cast %12 : vector<1x450x32xf32> to vector<450x32xf32>
    %cst_10 = arith.constant dense<0.000000e+00> : vector<450x32xf32>
    %14 = tpu.matmul %13, %0, %cst_10 {dimension_numbers = #tpu.dot_dimension_numbers<[1], [0], [0], [1], [0, 0, 1, 1], [], []>} : vector<450x32xf32>, vector<32x32xf32>, vector<450x32xf32> -> vector<450x32xf32>
    %15 = vector.broadcast %1 : vector<1x32xf32> to vector<450x32xf32>
    %16 = arith.addf %14, %15 : vector<450x32xf32>
    %cst_11 = arith.constant 0.000000e+00 : f32
    %17 = vector.broadcast %cst_11 : f32 to vector<450x32xf32>
    %18 = arith.cmpf ogt, %16, %17 : vector<450x32xf32>
    %cst_12 = arith.constant 0.00999999977 : f32
    %19 = vector.broadcast %cst_12 : f32 to vector<450x32xf32>
    %20 = arith.mulf %19, %16 : vector<450x32xf32>
    %21 = arith.select %18, %16, %20 : vector<450x32xi1>, vector<450x32xf32>
    %22 = arith.maximumf %11, %21 : vector<450x32xf32>
    %c2 = arith.constant 2 : index
    %c0_13 = arith.constant 0 : index
    %c0_14 = arith.constant 0 : index
    %23 = vector.load %arg1[%c2, %c0_13, %c0_14] : memref<4x450x32xf32, #tpu.memory_space<vmem>>, vector<1x450x32xf32>
    %24 = vector.shape_cast %23 : vector<1x450x32xf32> to vector<450x32xf32>
    %cst_15 = arith.constant dense<0.000000e+00> : vector<450x32xf32>
    %25 = tpu.matmul %24, %0, %cst_15 {dimension_numbers = #tpu.dot_dimension_numbers<[1], [0], [0], [1], [0, 0, 1, 1], [], []>} : vector<450x32xf32>, vector<32x32xf32>, vector<450x32xf32> -> vector<450x32xf32>
    %26 = vector.broadcast %1 : vector<1x32xf32> to vector<450x32xf32>
    %27 = arith.addf %25, %26 : vector<450x32xf32>
    %cst_16 = arith.constant 0.000000e+00 : f32
    %28 = vector.broadcast %cst_16 : f32 to vector<450x32xf32>
    %29 = arith.cmpf ogt, %27, %28 : vector<450x32xf32>
    %cst_17 = arith.constant 0.00999999977 : f32
    %30 = vector.broadcast %cst_17 : f32 to vector<450x32xf32>
    %31 = arith.mulf %30, %27 : vector<450x32xf32>
    %32 = arith.select %29, %27, %31 : vector<450x32xi1>, vector<450x32xf32>
    %33 = arith.maximumf %22, %32 : vector<450x32xf32>
    %c3 = arith.constant 3 : index
    %c0_18 = arith.constant 0 : index
    %c0_19 = arith.constant 0 : index
    %34 = vector.load %arg1[%c3, %c0_18, %c0_19] : memref<4x450x32xf32, #tpu.memory_space<vmem>>, vector<1x450x32xf32>
    %35 = vector.shape_cast %34 : vector<1x450x32xf32> to vector<450x32xf32>
    %cst_20 = arith.constant dense<0.000000e+00> : vector<450x32xf32>
    %36 = tpu.matmul %35, %0, %cst_20 {dimension_numbers = #tpu.dot_dimension_numbers<[1], [0], [0], [1], [0, 0, 1, 1], [], []>} : vector<450x32xf32>, vector<32x32xf32>, vector<450x32xf32> -> vector<450x32xf32>
    %37 = vector.broadcast %1 : vector<1x32xf32> to vector<450x32xf32>
    %38 = arith.addf %36, %37 : vector<450x32xf32>
    %cst_21 = arith.constant 0.000000e+00 : f32
    %39 = vector.broadcast %cst_21 : f32 to vector<450x32xf32>
    %40 = arith.cmpf ogt, %38, %39 : vector<450x32xf32>
    %cst_22 = arith.constant 0.00999999977 : f32
    %41 = vector.broadcast %cst_22 : f32 to vector<450x32xf32>
    %42 = arith.mulf %41, %38 : vector<450x32xf32>
    %43 = arith.select %40, %38, %42 : vector<450x32xi1>, vector<450x32xf32>
    %44 = arith.maximumf %33, %43 : vector<450x32xf32>
    %c0_23 = arith.constant 0 : index
    %c0_24 = arith.constant 0 : index
    %45 = vector.load %arg4[%c0_23, %c0_24] : memref<450x32xf32, #tpu.memory_space<vmem>>, vector<450x32xf32>
    tpu.vector_store %arg4[%c0_23, %c0_24], %44 {strides = array<i32>} : memref<450x32xf32, #tpu.memory_space<vmem>>, vector<450x32xf32>,
    return
  }
  func.func @transform_0(%arg0: i32) -> (i32, i32, i32) {
    %c0_i32 = arith.constant 0 : i32
    %c0_i32_0 = arith.constant 0 : i32
    %c0_i32_1 = arith.constant 0 : i32
    %c0_i32_2 = arith.constant 0 : i32
    return %c0_i32, %c0_i32_0, %c0_i32_1 : i32, i32, i32
  }
  func.func @transform_1(%arg0: i32) -> (i32, i32) {
    %c0_i32 = arith.constant 0 : i32
    %c0_i32_0 = arith.constant 0 : i32
    %c0_i32_1 = arith.constant 0 : i32
    return %c0_i32, %c0_i32_0 : i32, i32
  }
  func.func @transform_2(%arg0: i32) -> (i32, i32) {
    %c0_i32 = arith.constant 0 : i32
    %c0_i32_0 = arith.constant 0 : i32
    %c0_i32_1 = arith.constant 0 : i32
    return %c0_i32, %c0_i32_0 : i32, i32
  }
  func.func @transform_3(%arg0: i32) -> (i32, i32) {
    %c0_i32 = arith.constant 0 : i32
    %c0_i32_0 = arith.constant 0 : i32
    %c0_i32_1 = arith.constant 0 : i32
    return %c0_i32, %c0_i32_0 : i32, i32
  }
}

module attributes {stable_mosaic.version = 11 : i64} {
  func.func @_conv_pool_kernel(%arg0: i32, %arg1: memref<4x72x512xf32, #tpu.memory_space<vmem>>, %arg2: memref<512x128xf32, #tpu.memory_space<vmem>>, %arg3: memref<1x128xf32, #tpu.memory_space<vmem>>, %arg4: memref<72x128xf32, #tpu.memory_space<vmem>>) attributes {dimension_semantics = [#tpu.dimension_semantics<arbitrary>], iteration_bounds = array<i64: 1>, scalar_prefetch = 0 : i64, scratch_operands = 0 : i64, tpu.core_type = #tpu.core_type<tc>, window_params = [{pipeline_mode = #tpu.pipeline_mode<synchronous>, transform_indices = @transform_0, window_bounds = array<i64: 4, 72, 512>}, {pipeline_mode = #tpu.pipeline_mode<synchronous>, transform_indices = @transform_1, window_bounds = array<i64: 512, 128>}, {pipeline_mode = #tpu.pipeline_mode<synchronous>, transform_indices = @transform_2, window_bounds = array<i64: 1, 128>}, {pipeline_mode = #tpu.pipeline_mode<synchronous>, transform_indices = @transform_3, window_bounds = array<i64: 72, 128>}]} {
    %c0 = arith.constant 0 : index
    %c0_0 = arith.constant 0 : index
    %0 = vector.load %arg2[%c0, %c0_0] : memref<512x128xf32, #tpu.memory_space<vmem>>, vector<512x128xf32>
    %c0_1 = arith.constant 0 : index
    %c0_2 = arith.constant 0 : index
    %1 = vector.load %arg3[%c0_1, %c0_2] : memref<1x128xf32, #tpu.memory_space<vmem>>, vector<1x128xf32>
    %c0_3 = arith.constant 0 : index
    %c0_4 = arith.constant 0 : index
    %c0_5 = arith.constant 0 : index
    %2 = vector.load %arg1[%c0_3, %c0_4, %c0_5] : memref<4x72x512xf32, #tpu.memory_space<vmem>>, vector<1x72x512xf32>
    %3 = vector.shape_cast %2 : vector<1x72x512xf32> to vector<72x512xf32>
    %cst = arith.constant dense<0.000000e+00> : vector<72x128xf32>
    %4 = tpu.matmul %3, %0, %cst {dimension_numbers = #tpu.dot_dimension_numbers<[1], [0], [0], [1], [0, 0, 1, 1], [], []>} : vector<72x512xf32>, vector<512x128xf32>, vector<72x128xf32> -> vector<72x128xf32>
    %5 = vector.broadcast %1 : vector<1x128xf32> to vector<72x128xf32>
    %6 = arith.addf %4, %5 : vector<72x128xf32>
    %cst_6 = arith.constant 0.000000e+00 : f32
    %7 = vector.broadcast %cst_6 : f32 to vector<72x128xf32>
    %8 = arith.cmpf ogt, %6, %7 : vector<72x128xf32>
    %cst_7 = arith.constant 0.00999999977 : f32
    %9 = vector.broadcast %cst_7 : f32 to vector<72x128xf32>
    %10 = arith.mulf %9, %6 : vector<72x128xf32>
    %11 = arith.select %8, %6, %10 : vector<72x128xi1>, vector<72x128xf32>
    %c1 = arith.constant 1 : index
    %c0_8 = arith.constant 0 : index
    %c0_9 = arith.constant 0 : index
    %12 = vector.load %arg1[%c1, %c0_8, %c0_9] : memref<4x72x512xf32, #tpu.memory_space<vmem>>, vector<1x72x512xf32>
    %13 = vector.shape_cast %12 : vector<1x72x512xf32> to vector<72x512xf32>
    %cst_10 = arith.constant dense<0.000000e+00> : vector<72x128xf32>
    %14 = tpu.matmul %13, %0, %cst_10 {dimension_numbers = #tpu.dot_dimension_numbers<[1], [0], [0], [1], [0, 0, 1, 1], [], []>} : vector<72x512xf32>, vector<512x128xf32>, vector<72x128xf32> -> vector<72x128xf32>
    %15 = vector.broadcast %1 : vector<1x128xf32> to vector<72x128xf32>
    %16 = arith.addf %14, %15 : vector<72x128xf32>
    %cst_11 = arith.constant 0.000000e+00 : f32
    %17 = vector.broadcast %cst_11 : f32 to vector<72x128xf32>
    %18 = arith.cmpf ogt, %16, %17 : vector<72x128xf32>
    %cst_12 = arith.constant 0.00999999977 : f32
    %19 = vector.broadcast %cst_12 : f32 to vector<72x128xf32>
    %20 = arith.mulf %19, %16 : vector<72x128xf32>
    %21 = arith.select %18, %16, %20 : vector<72x128xi1>, vector<72x128xf32>
    %22 = arith.maximumf %11, %21 : vector<72x128xf32>
    %c2 = arith.constant 2 : index
    %c0_13 = arith.constant 0 : index
    %c0_14 = arith.constant 0 : index
    %23 = vector.load %arg1[%c2, %c0_13, %c0_14] : memref<4x72x512xf32, #tpu.memory_space<vmem>>, vector<1x72x512xf32>
    %24 = vector.shape_cast %23 : vector<1x72x512xf32> to vector<72x512xf32>
    %cst_15 = arith.constant dense<0.000000e+00> : vector<72x128xf32>
    %25 = tpu.matmul %24, %0, %cst_15 {dimension_numbers = #tpu.dot_dimension_numbers<[1], [0], [0], [1], [0, 0, 1, 1], [], []>} : vector<72x512xf32>, vector<512x128xf32>, vector<72x128xf32> -> vector<72x128xf32>
    %26 = vector.broadcast %1 : vector<1x128xf32> to vector<72x128xf32>
    %27 = arith.addf %25, %26 : vector<72x128xf32>
    %cst_16 = arith.constant 0.000000e+00 : f32
    %28 = vector.broadcast %cst_16 : f32 to vector<72x128xf32>
    %29 = arith.cmpf ogt, %27, %28 : vector<72x128xf32>
    %cst_17 = arith.constant 0.00999999977 : f32
    %30 = vector.broadcast %cst_17 : f32 to vector<72x128xf32>
    %31 = arith.mulf %30, %27 : vector<72x128xf32>
    %32 = arith.select %29, %27, %31 : vector<72x128xi1>, vector<72x128xf32>
    %33 = arith.maximumf %22, %32 : vector<72x128xf32>
    %c3 = arith.constant 3 : index
    %c0_18 = arith.constant 0 : index
    %c0_19 = arith.constant 0 : index
    %34 = vector.load %arg1[%c3, %c0_18, %c0_19] : memref<4x72x512xf32, #tpu.memory_space<vmem>>, vector<1x72x512xf32>
    %35 = vector.shape_cast %34 : vector<1x72x512xf32> to vector<72x512xf32>
    %cst_20 = arith.constant dense<0.000000e+00> : vector<72x128xf32>
    %36 = tpu.matmul %35, %0, %cst_20 {dimension_numbers = #tpu.dot_dimension_numbers<[1], [0], [0], [1], [0, 0, 1, 1], [], []>} : vector<72x512xf32>, vector<512x128xf32>, vector<72x128xf32> -> vector<72x128xf32>
    %37 = vector.broadcast %1 : vector<1x128xf32> to vector<72x128xf32>
    %38 = arith.addf %36, %37 : vector<72x128xf32>
    %cst_21 = arith.constant 0.000000e+00 : f32
    %39 = vector.broadcast %cst_21 : f32 to vector<72x128xf32>
    %40 = arith.cmpf ogt, %38, %39 : vector<72x128xf32>
    %cst_22 = arith.constant 0.00999999977 : f32
    %41 = vector.broadcast %cst_22 : f32 to vector<72x128xf32>
    %42 = arith.mulf %41, %38 : vector<72x128xf32>
    %43 = arith.select %40, %38, %42 : vector<72x128xi1>, vector<72x128xf32>
    %44 = arith.maximumf %33, %43 : vector<72x128xf32>
    %c0_23 = arith.constant 0 : index
    %c0_24 = arith.constant 0 : index
    %45 = vector.load %arg4[%c0_23, %c0_24] : memref<72x128xf32, #tpu.memory_space<vmem>>, vector<72x128xf32>
    tpu.vector_store %arg4[%c0_23, %c0_24], %44 {strides = array<i32>} : memref<72x128xf32, #tpu.memory_space<vmem>>, vector<72x128xf32>,
    return
  }
  func.func @transform_0(%arg0: i32) -> (i32, i32, i32) {
    %c0_i32 = arith.constant 0 : i32
    %c0_i32_0 = arith.constant 0 : i32
    %c0_i32_1 = arith.constant 0 : i32
    %c0_i32_2 = arith.constant 0 : i32
    return %c0_i32, %c0_i32_0, %c0_i32_1 : i32, i32, i32
  }
  func.func @transform_1(%arg0: i32) -> (i32, i32) {
    %c0_i32 = arith.constant 0 : i32
    %c0_i32_0 = arith.constant 0 : i32
    %c0_i32_1 = arith.constant 0 : i32
    return %c0_i32, %c0_i32_0 : i32, i32
  }
  func.func @transform_2(%arg0: i32) -> (i32, i32) {
    %c0_i32 = arith.constant 0 : i32
    %c0_i32_0 = arith.constant 0 : i32
    %c0_i32_1 = arith.constant 0 : i32
    return %c0_i32, %c0_i32_0 : i32, i32
  }
  func.func @transform_3(%arg0: i32) -> (i32, i32) {
    %c0_i32 = arith.constant 0 : i32
    %c0_i32_0 = arith.constant 0 : i32
    %c0_i32_1 = arith.constant 0 : i32
    return %c0_i32, %c0_i32_0 : i32, i32
  }
}

module attributes {stable_mosaic.version = 11 : i64} {
  func.func @_fc_dropout_kernel(%arg0: i32, %arg1: i32, %arg2: memref<2x512xf32, #tpu.memory_space<vmem>>, %arg3: memref<512x512xf32, #tpu.memory_space<vmem>>, %arg4: memref<1x512xf32, #tpu.memory_space<vmem>>, %arg5: memref<2x512xf32, #tpu.memory_space<vmem>>, %arg6: memref<2x512xf32, #tpu.memory_space<vmem>>, %arg7: memref<2x512xf32, #tpu.memory_space<vmem>>) attributes {dimension_semantics = [#tpu.dimension_semantics<parallel>, #tpu.dimension_semantics<arbitrary>], iteration_bounds = array<i64: 2, 9>, scalar_prefetch = 0 : i64, scratch_operands = 1 : i64, tpu.core_type = #tpu.core_type<tc>, window_params = [{transform_indices = @transform_0, window_bounds = array<i64: 2, 512>}, {transform_indices = @transform_1, window_bounds = array<i64: 512, 512>}, {transform_indices = @transform_2, window_bounds = array<i64: 1, 512>}, {transform_indices = @transform_3, window_bounds = array<i64: 2, 512>}, {transform_indices = @transform_4, window_bounds = array<i64: 2, 512>}]} {
    %c0_i32 = arith.constant 0 : i32
    %0 = arith.cmpi eq, %arg1, %c0_i32 : i32
    %1 = arith.extui %0 : i1 to i32
    %c0_i32_0 = arith.constant 0 : i32
    %2 = arith.cmpi ne, %1, %c0_i32_0 : i32
    scf.if %2 {
      %cst_9 = arith.constant 0.000000e+00 : f32
      %12 = vector.broadcast %cst_9 : f32 to vector<2x512xf32>
      %c0_10 = arith.constant 0 : index
      %c0_11 = arith.constant 0 : index
      %13 = vector.load %arg7[%c0_10, %c0_11] : memref<2x512xf32, #tpu.memory_space<vmem>>, vector<2x512xf32>
      tpu.vector_store %arg7[%c0_10, %c0_11], %12 {strides = array<i32>} : memref<2x512xf32, #tpu.memory_space<vmem>>, vector<2x512xf32>,
    } else {
    }
    %c0 = arith.constant 0 : index
    %c0_1 = arith.constant 0 : index
    %3 = vector.load %arg7[%c0, %c0_1] : memref<2x512xf32, #tpu.memory_space<vmem>>, vector<2x512xf32>
    %c0_2 = arith.constant 0 : index
    %c0_3 = arith.constant 0 : index
    %4 = vector.load %arg2[%c0_2, %c0_3] : memref<2x512xf32, #tpu.memory_space<vmem>>, vector<2x512xf32>
    %c0_4 = arith.constant 0 : index
    %c0_5 = arith.constant 0 : index
    %5 = vector.load %arg3[%c0_4, %c0_5] : memref<512x512xf32, #tpu.memory_space<vmem>>, vector<512x512xf32>
    %cst = arith.constant dense<0.000000e+00> : vector<2x512xf32>
    %6 = tpu.matmul %4, %5, %cst {dimension_numbers = #tpu.dot_dimension_numbers<[1], [0], [0], [1], [0, 0, 1, 1], [], []>} : vector<2x512xf32>, vector<512x512xf32>, vector<2x512xf32> -> vector<2x512xf32>
    %7 = arith.addf %3, %6 : vector<2x512xf32>
    %c0_6 = arith.constant 0 : index
    %c0_7 = arith.constant 0 : index
    %8 = vector.load %arg7[%c0_6, %c0_7] : memref<2x512xf32, #tpu.memory_space<vmem>>, vector<2x512xf32>
    tpu.vector_store %arg7[%c0_6, %c0_7], %7 {strides = array<i32>} : memref<2x512xf32, #tpu.memory_space<vmem>>, vector<2x512xf32>,
    %c8_i32 = arith.constant 8 : i32
    %9 = arith.cmpi eq, %arg1, %c8_i32 : i32
    %10 = arith.extui %9 : i1 to i32
    %c0_i32_8 = arith.constant 0 : i32
    %11 = arith.cmpi ne, %10, %c0_i32_8 : i32
    scf.if %11 {
      %c0_9 = arith.constant 0 : index
      %c0_10 = arith.constant 0 : index
      %12 = vector.load %arg7[%c0_9, %c0_10] : memref<2x512xf32, #tpu.memory_space<vmem>>, vector<2x512xf32>
      %c0_11 = arith.constant 0 : index
      %c0_12 = arith.constant 0 : index
      %13 = vector.load %arg4[%c0_11, %c0_12] : memref<1x512xf32, #tpu.memory_space<vmem>>, vector<1x512xf32>
      %14 = vector.broadcast %13 : vector<1x512xf32> to vector<2x512xf32>
      %15 = arith.addf %12, %14 : vector<2x512xf32>
      %cst_13 = arith.constant 0.000000e+00 : f32
      %16 = vector.broadcast %cst_13 : f32 to vector<2x512xf32>
      %17 = arith.cmpf ogt, %15, %16 : vector<2x512xf32>
      %cst_14 = arith.constant 0.00999999977 : f32
      %18 = vector.broadcast %cst_14 : f32 to vector<2x512xf32>
      %19 = arith.mulf %18, %15 : vector<2x512xf32>
      %20 = arith.select %17, %15, %19 : vector<2x512xi1>, vector<2x512xf32>
      %c0_15 = arith.constant 0 : index
      %c0_16 = arith.constant 0 : index
      %21 = vector.load %arg5[%c0_15, %c0_16] : memref<2x512xf32, #tpu.memory_space<vmem>>, vector<2x512xf32>
      %22 = arith.mulf %20, %21 : vector<2x512xf32>
      %c0_17 = arith.constant 0 : index
      %c0_18 = arith.constant 0 : index
      %23 = vector.load %arg6[%c0_17, %c0_18] : memref<2x512xf32, #tpu.memory_space<vmem>>, vector<2x512xf32>
      tpu.vector_store %arg6[%c0_17, %c0_18], %22 {strides = array<i32>} : memref<2x512xf32, #tpu.memory_space<vmem>>, vector<2x512xf32>,
    } else {
    }
    return
  }
  func.func @transform_0(%arg0: i32, %arg1: i32) -> (i32, i32) {
    %c0_i32 = arith.constant 0 : i32
    %c0_i32_0 = arith.constant 0 : i32
    return %c0_i32, %arg1 : i32, i32
  }
  func.func @transform_1(%arg0: i32, %arg1: i32) -> (i32, i32) {
    %c0_i32 = arith.constant 0 : i32
    return %arg1, %arg0 : i32, i32
  }
  func.func @transform_2(%arg0: i32, %arg1: i32) -> (i32, i32) {
    %c0_i32 = arith.constant 0 : i32
    %c0_i32_0 = arith.constant 0 : i32
    return %c0_i32, %arg0 : i32, i32
  }
  func.func @transform_3(%arg0: i32, %arg1: i32) -> (i32, i32) {
    %c0_i32 = arith.constant 0 : i32
    %c0_i32_0 = arith.constant 0 : i32
    return %c0_i32, %arg0 : i32, i32
  }
  func.func @transform_4(%arg0: i32, %arg1: i32) -> (i32, i32) {
    %c0_i32 = arith.constant 0 : i32
    %c0_i32_0 = arith.constant 0 : i32
    return %c0_i32, %arg0 : i32, i32
  }
}

module attributes {stable_mosaic.version = 11 : i64} {
  func.func @_heads_reparam_kernel(%arg0: i32, %arg1: memref<2x1024xf32, #tpu.memory_space<vmem>>, %arg2: memref<1024x512xf32, #tpu.memory_space<vmem>>, %arg3: memref<1x512xf32, #tpu.memory_space<vmem>>, %arg4: memref<2x256xf32, #tpu.memory_space<vmem>>, %arg5: memref<2x256xf32, #tpu.memory_space<vmem>>, %arg6: memref<2x256xf32, #tpu.memory_space<vmem>>, %arg7: memref<2x256xf32, #tpu.memory_space<vmem>>) attributes {dimension_semantics = [#tpu.dimension_semantics<arbitrary>], iteration_bounds = array<i64: 1>, scalar_prefetch = 0 : i64, scratch_operands = 0 : i64, tpu.core_type = #tpu.core_type<tc>, window_params = [{pipeline_mode = #tpu.pipeline_mode<synchronous>, transform_indices = @transform_0, window_bounds = array<i64: 2, 1024>}, {pipeline_mode = #tpu.pipeline_mode<synchronous>, transform_indices = @transform_1, window_bounds = array<i64: 1024, 512>}, {pipeline_mode = #tpu.pipeline_mode<synchronous>, transform_indices = @transform_2, window_bounds = array<i64: 1, 512>}, {pipeline_mode = #tpu.pipeline_mode<synchronous>, transform_indices = @transform_3, window_bounds = array<i64: 2, 256>}, {pipeline_mode = #tpu.pipeline_mode<synchronous>, transform_indices = @transform_4, window_bounds = array<i64: 2, 256>}, {pipeline_mode = #tpu.pipeline_mode<synchronous>, transform_indices = @transform_5, window_bounds = array<i64: 2, 256>}, {pipeline_mode = #tpu.pipeline_mode<synchronous>, transform_indices = @transform_6, window_bounds = array<i64: 2, 256>}]} {
    %c0 = arith.constant 0 : index
    %c0_0 = arith.constant 0 : index
    %0 = vector.load %arg1[%c0, %c0_0] : memref<2x1024xf32, #tpu.memory_space<vmem>>, vector<2x1024xf32>
    %c0_1 = arith.constant 0 : index
    %c0_2 = arith.constant 0 : index
    %1 = vector.load %arg2[%c0_1, %c0_2] : memref<1024x512xf32, #tpu.memory_space<vmem>>, vector<1024x512xf32>
    %cst = arith.constant dense<0.000000e+00> : vector<2x512xf32>
    %2 = tpu.matmul %0, %1, %cst {dimension_numbers = #tpu.dot_dimension_numbers<[1], [0], [0], [1], [0, 0, 1, 1], [], []>} : vector<2x1024xf32>, vector<1024x512xf32>, vector<2x512xf32> -> vector<2x512xf32>
    %c0_3 = arith.constant 0 : index
    %c0_4 = arith.constant 0 : index
    %3 = vector.load %arg3[%c0_3, %c0_4] : memref<1x512xf32, #tpu.memory_space<vmem>>, vector<1x512xf32>
    %4 = vector.broadcast %3 : vector<1x512xf32> to vector<2x512xf32>
    %5 = arith.addf %2, %4 : vector<2x512xf32>
    %6 = vector.extract_strided_slice %5 {offsets = [0, 0], sizes = [2, 256], strides = [1, 1]} : vector<2x512xf32> to vector<2x256xf32>
    %7 = vector.extract_strided_slice %5 {offsets = [0, 256], sizes = [2, 256], strides = [1, 1]} : vector<2x512xf32> to vector<2x256xf32>
    %c0_5 = arith.constant 0 : index
    %c0_6 = arith.constant 0 : index
    %8 = vector.load %arg6[%c0_5, %c0_6] : memref<2x256xf32, #tpu.memory_space<vmem>>, vector<2x256xf32>
    tpu.vector_store %arg6[%c0_5, %c0_6], %6 {strides = array<i32>} : memref<2x256xf32, #tpu.memory_space<vmem>>, vector<2x256xf32>,
    %c0_7 = arith.constant 0 : index
    %c0_8 = arith.constant 0 : index
    %9 = vector.load %arg7[%c0_7, %c0_8] : memref<2x256xf32, #tpu.memory_space<vmem>>, vector<2x256xf32>
    tpu.vector_store %arg7[%c0_7, %c0_8], %7 {strides = array<i32>} : memref<2x256xf32, #tpu.memory_space<vmem>>, vector<2x256xf32>,
    %cst_9 = arith.constant 5.000000e-01 : f32
    %10 = vector.broadcast %cst_9 : f32 to vector<2x256xf32>
    %11 = arith.mulf %10, %7 : vector<2x256xf32>
    %12 = math.exp %11 : vector<2x256xf32>
    %c0_10 = arith.constant 0 : index
    %c0_11 = arith.constant 0 : index
    %13 = vector.load %arg4[%c0_10, %c0_11] : memref<2x256xf32, #tpu.memory_space<vmem>>, vector<2x256xf32>
    %14 = arith.mulf %12, %13 : vector<2x256xf32>
    %15 = arith.addf %6, %14 : vector<2x256xf32>
    %c0_12 = arith.constant 0 : index
    %c0_13 = arith.constant 0 : index
    %16 = vector.load %arg5[%c0_12, %c0_13] : memref<2x256xf32, #tpu.memory_space<vmem>>, vector<2x256xf32>
    tpu.vector_store %arg5[%c0_12, %c0_13], %15 {strides = array<i32>} : memref<2x256xf32, #tpu.memory_space<vmem>>, vector<2x256xf32>,
    return
  }
  func.func @transform_0(%arg0: i32) -> (i32, i32) {
    %c0_i32 = arith.constant 0 : i32
    %c0_i32_0 = arith.constant 0 : i32
    %c0_i32_1 = arith.constant 0 : i32
    return %c0_i32, %c0_i32_0 : i32, i32
  }
  func.func @transform_1(%arg0: i32) -> (i32, i32) {
    %c0_i32 = arith.constant 0 : i32
    %c0_i32_0 = arith.constant 0 : i32
    %c0_i32_1 = arith.constant 0 : i32
    return %c0_i32, %c0_i32_0 : i32, i32
  }
  func.func @transform_2(%arg0: i32) -> (i32, i32) {
    %c0_i32 = arith.constant 0 : i32
    %c0_i32_0 = arith.constant 0 : i32
    %c0_i32_1 = arith.constant 0 : i32
    return %c0_i32, %c0_i32_0 : i32, i32
  }
  func.func @transform_3(%arg0: i32) -> (i32, i32) {
    %c0_i32 = arith.constant 0 : i32
    %c0_i32_0 = arith.constant 0 : i32
    %c0_i32_1 = arith.constant 0 : i32
    return %c0_i32, %c0_i32_0 : i32, i32
  }
  func.func @transform_4(%arg0: i32) -> (i32, i32) {
    %c0_i32 = arith.constant 0 : i32
    %c0_i32_0 = arith.constant 0 : i32
    %c0_i32_1 = arith.constant 0 : i32
    return %c0_i32, %c0_i32_0 : i32, i32
  }
  func.func @transform_5(%arg0: i32) -> (i32, i32) {
    %c0_i32 = arith.constant 0 : i32
    %c0_i32_0 = arith.constant 0 : i32
    %c0_i32_1 = arith.constant 0 : i32
    return %c0_i32, %c0_i32_0 : i32, i32
  }
  func.func @transform_6(%arg0: i32) -> (i32, i32) {
    %c0_i32 = arith.constant 0 : i32
    %c0_i32_0 = arith.constant 0 : i32
    %c0_i32_1 = arith.constant 0 : i32
    return %c0_i32, %c0_i32_0 : i32, i32
  }
}

</mosaic_0001>

<bundles_post_ra>
// kernel: encoder_forward.6
= control target key start
LH: loop header
LB: loop body
LE: loop exit
PB: predicated region body
PF: predicated region fallthrough
CT: control target
= control target key end

     0   :  { %v4623_v0 = vmov 0.0   ;;  %vm82_vm0 = vcmask 261120   ;;  %vm4624_vm1 = vmmov 0   ;;  %s7036_s1 = inlined_call_operand.vmem [shape: f32[32,32], index: 1, kind: input, shape index: {}]   ;;  %s7037_s0 = inlined_call_operand.vmem [shape: f32[4,450,32], index: 0, kind: input, shape index: {}]   ;;  %s7038_s2 = inlined_call_operand.vmem [shape: f32[1,32], index: 2, kind: input, shape index: {}]   ;;  %s7039_s3 = inlined_call_operand.vmem [shape: f32[450,32], index: 3, kind: output, shape index: {}]  }
   0x1   :  { %3902 = vmatprep.subr.mxu0 %v4623_v0  ;;  %4081 = vmatprep.subr.mxu1 %v4623_v0  ;;  %v17_v1 = vld [vmem:[%s7036_s1 + $0x18] sm:$0xff]  ;;  %v16_v2 = vld [vmem:[%s7036_s1 + $0x10] sm:$0xff]  ;;  %v15_v3 = vld [vmem:[%s7036_s1 + $0x8] sm:$0xff] }
   0x2   :  { %3903 = vmatpush3.msra.mxu0 %v17_v1  ;;  %4082 = vmatpush3.msra.mxu1 %v17_v1  ;;  %v14_v4 = vld [vmem:[%s7036_s1] sm:$0xff]  ;;  %v3316_v6 = vld [vmem:[%s7037_s0 + $0x1c8] sm:$0xff]  ;;  %v3317_v8 = vld [vmem:[%s7037_s0 + $0x1d0] sm:$0xff] }
   0x3   :  { %3904 = vmatprep.subr.mxu0 %v4623_v0  ;;  %4083 = vmatprep.subr.mxu1 %v4623_v0  ;;  %v19_v5 = vld [vmem:[%s7037_s0] sm:$0xff]  ;;  %v20_v7 = vld [vmem:[%s7037_s0 + $0x8] sm:$0xff]  ;;  %v21_v9 = vld [vmem:[%s7037_s0 + $0x10] sm:$0xff] }
   0x4   :  { %3905 = vmatpush3.msra.mxu0 %v16_v2  ;;  %4084 = vmatpush3.msra.mxu1 %v16_v2  ;;  %v3318_v10 = vld [vmem:[%s7037_s0 + $0x1d8] sm:$0xff]  ;;  %v3319_v12 = vld [vmem:[%s7037_s0 + $0x1e0] sm:$0xff]  ;;  %v3320_v14 = vld [vmem:[%s7037_s0 + $0x1e8] sm:$0xff] }
   0x5   :  { %3906 = vmatprep.subr.mxu0 %v4623_v0  ;;  %4085 = vmatprep.subr.mxu1 %v4623_v0  ;;  %v22_v11 = vld [vmem:[%s7037_s0 + $0x18] sm:$0xff]  ;;  %v23_v13 = vld [vmem:[%s7037_s0 + $0x20] sm:$0xff]  ;;  %v24_v15 = vld [vmem:[%s7037_s0 + $0x28] sm:$0xff] }
   0x6   :  { %3907 = vmatpush3.msra.mxu0 %v15_v3  ;;  %4086 = vmatpush3.msra.mxu1 %v15_v3  ;;  %v3321_v16 = vld [vmem:[%s7037_s0 + $0x1f0] sm:$0xff]  ;;  %v3322_v18 = vld [vmem:[%s7037_s0 + $0x1f8] sm:$0xff]  ;;  %v3323_v20 = vld [vmem:[%s7037_s0 + $0x200] sm:$0xff] }
   0x7   :  { %3908 = vmatprep.subr.mxu0 %v4623_v0  ;;  %4087 = vmatprep.subr.mxu1 %v4623_v0  ;;  %v25_v17 = vld [vmem:[%s7037_s0 + $0x30] sm:$0xff]  ;;  %v26_v19 = vld [vmem:[%s7037_s0 + $0x38] sm:$0xff]  ;;  %v27_v21 = vld [vmem:[%s7037_s0 + $0x40] sm:$0xff] }
   0x8   :  { %3909 = vmatpush3.msra.mxu0 %v14_v4  ;;  %3910 = vmatprep.mubr.msk.f32.mxu0 %vm4624_vm1, %v4623_v0  ;;  %v3324_v22 = vld [vmem:[%s7037_s0 + $0x208] sm:$0xff]  ;;  %v3325_v24 = vld [vmem:[%s7037_s0 + $0x210] sm:$0xff]  ;;  %v3326_v26 = vld [vmem:[%s7037_s0 + $0x218] sm:$0xff] }
   0x9   :  { %4088 = vmatpush3.msra.mxu1 %v14_v4  ;;  %4089 = vmatprep.mubr.msk.f32.mxu1 %vm4624_vm1, %v4623_v0  ;;  %v28_v23 = vld [vmem:[%s7037_s0 + $0x48] sm:$0xff]  ;;  %v29_v25 = vld [vmem:[%s7037_s0 + $0x50] sm:$0xff]  ;;  %v30_v27 = vld [vmem:[%s7037_s0 + $0x58] sm:$0xff] }
   0xa   :  { %3911 = vmatmul.mubr.msk.f32.vlgmr.msra.gmra.mxu0 %vm82_vm0, %v19_v5  ;;  %4090 = vmatmul.mubr.msk.f32.vlgmr.msra.gmra.mxu1 %vm82_vm0, %v3316_v6  ;;  %v3327_v28 = vld [vmem:[%s7037_s0 + $0x220] sm:$0xff]  ;;  %v3328_v30 = vld [vmem:[%s7037_s0 + $0x228] sm:$0xff]  ;;  %v3329_v32 = vld [vmem:[%s7037_s0 + $0x230] sm:$0xff] }
   0xb   :  { %4260 = vmatprep.subr.mxu0 %v4623_v0  ;;  %4439 = vmatprep.subr.mxu1 %v4623_v0  ;;  %v31_v29 = vld [vmem:[%s7037_s0 + $0x60] sm:$0xff]  ;;  %v32_v31 = vld [vmem:[%s7037_s0 + $0x68] sm:$0xff]  ;;  %v33_v33 = vld [vmem:[%s7037_s0 + $0x70] sm:$0xff] }
   0xc   :  { %4261 = vmatpush3.msra.mxu0 %v17_v1  ;;  %3913 = vmatprep.mubr.msk.f32.mxu0 %vm4624_vm1, %v4623_v0  ;;  %v3330_v34 = vld [vmem:[%s7037_s0 + $0x238] sm:$0xff]  ;;  %v3331_v36 = vld [vmem:[%s7037_s0 + $0x240] sm:$0xff]  ;;  %v3332_v38 = vld [vmem:[%s7037_s0 + $0x248] sm:$0xff] }
   0xd   :  { %4092 = vmatprep.mubr.msk.f32.mxu1 %vm4624_vm1, %v4623_v0  ;;  %4440 = vmatpush3.msra.mxu1 %v17_v1  ;;  %v34_v35 = vld [vmem:[%s7037_s0 + $0x78] sm:$0xff]  ;;  %v35_v37 = vld [vmem:[%s7037_s0 + $0x80] sm:$0xff]  ;;  %v36_v39 = vld [vmem:[%s7037_s0 + $0x88] sm:$0xff] }
   0xe   :  { %3914 = vmatmul.mubr.msk.f32.gmra.mxu0 %vm82_vm0, %v20_v7  ;;  %4093 = vmatmul.mubr.msk.f32.gmra.mxu1 %vm82_vm0, %v3317_v8  ;;  %v3333_v40 = vld [vmem:[%s7037_s0 + $0x250] sm:$0xff]  ;;  %v3334_v42 = vld [vmem:[%s7037_s0 + $0x258] sm:$0xff]  ;;  %v3335_v44 = vld [vmem:[%s7037_s0 + $0x260] sm:$0xff] }
   0xf   :  { %3916 = vmatprep.mubr.msk.f32.mxu0 %vm4624_vm1, %v4623_v0  ;;  %4095 = vmatprep.mubr.msk.f32.mxu1 %vm4624_vm1, %v4623_v0  ;;  %v37_v41 = vld [vmem:[%s7037_s0 + $0x90] sm:$0xff]  ;;  %v38_v43 = vld [vmem:[%s7037_s0 + $0x98] sm:$0xff]  ;;  %v39_v45 = vld [vmem:[%s7037_s0 + $0xa0] sm:$0xff] }
  0x10   :  { %4262 = vmatprep.subr.mxu0 %v4623_v0  ;;  %4441 = vmatprep.subr.mxu1 %v4623_v0  ;;  %v3336_v46 = vld [vmem:[%s7037_s0 + $0x268] sm:$0xff]  ;;  %v3337_v48 = vld [vmem:[%s7037_s0 + $0x270] sm:$0xff]  ;;  %v3338_v50 = vld [vmem:[%s7037_s0 + $0x278] sm:$0xff] }
  0x11   :  { %4263 = vmatpush3.msra.mxu0 %v16_v2  ;;  %4442 = vmatpush3.msra.mxu1 %v16_v2  ;;  %v40_v47 = vld [vmem:[%s7037_s0 + $0xa8] sm:$0xff]  ;;  %v41_v49 = vld [vmem:[%s7037_s0 + $0xb0] sm:$0xff]  ;;  %v42_v51 = vld [vmem:[%s7037_s0 + $0xb8] sm:$0xff] }
  0x12   :  { %3917 = vmatmul.mubr.msk.f32.gmra.mxu0 %vm82_vm0, %v21_v9  ;;  %4096 = vmatmul.mubr.msk.f32.gmra.mxu1 %vm82_vm0, %v3318_v10  ;;  %v3339_v52 = vld [vmem:[%s7037_s0 + $0x280] sm:$0xff]  ;;  %v3340_v54 = vld [vmem:[%s7037_s0 + $0x288] sm:$0xff]  ;;  %v3341_v56 = vld [vmem:[%s7037_s0 + $0x290] sm:$0xff] }
  0x13   :  { %3919 = vmatprep.mubr.msk.f32.mxu0 %vm4624_vm1, %v4623_v0  ;;  %4098 = vmatprep.mubr.msk.f32.mxu1 %vm4624_vm1, %v4623_v0  ;;  %v43_v53 = vld [vmem:[%s7037_s0 + $0xc0] sm:$0xff]  ;;  %v44_v55 = vld [vmem:[%s7037_s0 + $0xc8] sm:$0xff]  ;;  %v45_v57 = vld [vmem:[%s7037_s0 + $0xd0] sm:$0xff] }
  0x14   :  { %4264 = vmatprep.subr.mxu0 %v4623_v0  ;;  %4443 = vmatprep.subr.mxu1 %v4623_v0  ;;  %v3342_v58 = vld [vmem:[%s7037_s0 + $0x298] sm:$0xff]  ;;  %v3343_v60 = vld [vmem:[%s7037_s0 + $0x2a0] sm:$0xff]  ;;  %v3344_v62 = vld [vmem:[%s7037_s0 + $0x2a8] sm:$0xff] }
  0x15   :  { %4265 = vmatpush3.msra.mxu0 %v15_v3  ;;  %4444 = vmatpush3.msra.mxu1 %v15_v3  ;;  %v46_v59 = vld [vmem:[%s7037_s0 + $0xd8] sm:$0xff]  ;;  %v47_v61 = vld [vmem:[%s7037_s0 + $0xe0] sm:$0xff]  ;;  %v48_v63 = vld [vmem:[%s7037_s0 + $0xe8] sm:$0xff] }
  0x16   :  { %3920 = vmatmul.mubr.msk.f32.gmra.mxu0 %vm82_vm0, %v22_v11  ;;  %4099 = vmatmul.mubr.msk.f32.gmra.mxu1 %vm82_vm0, %v3319_v12  ;;  %v3345_v1 = vld [vmem:[%s7037_s0 + $0x2b0] sm:$0xff]  ;;  %v3346_v3 = vld [vmem:[%s7037_s0 + $0x2b8] sm:$0xff]  ;;  %v3347_v5 = vld [vmem:[%s7037_s0 + $0x2c0] sm:$0xff] }
  0x17   :  { %3922 = vmatprep.mubr.msk.f32.mxu0 %vm4624_vm1, %v4623_v0  ;;  %4101 = vmatprep.mubr.msk.f32.mxu1 %vm4624_vm1, %v4623_v0  ;;  %v49_v2 = vld [vmem:[%s7037_s0 + $0xf0] sm:$0xff]  ;;  %v51_v6 = vld [vmem:[%s7037_s0 + $0x100] sm:$0xff]  ;;  %v3348_v7 = vld [vmem:[%s7037_s0 + $0x2c8] sm:$0xff] }
  0x18   :  { %4266 = vmatprep.subr.mxu0 %v4623_v0  ;;  %4445 = vmatprep.subr.mxu1 %v4623_v0  ;;  %v52_v8 = vld [vmem:[%s7037_s0 + $0x108] sm:$0xff]  ;;  %v3349_v9 = vld [vmem:[%s7037_s0 + $0x2d0] sm:$0xff]  ;;  %v3350_v11 = vld [vmem:[%s7037_s0 + $0x2d8] sm:$0xff] }
  0x19   :  { %4267 = vmatpush3.msra.mxu0 %v14_v4  ;;  %4446 = vmatpush3.msra.mxu1 %v14_v4  ;;  %v50_v4 = vld [vmem:[%s7037_s0 + $0xf8] sm:$0xff]  ;;  %v53_v10 = vld [vmem:[%s7037_s0 + $0x110] sm:$0xff] }
  0x1a   :  { %3923 = vmatmul.mubr.msk.f32.gmra.mxu0 %vm82_vm0, %v23_v13  ;;  %4102 = vmatmul.mubr.msk.f32.gmra.mxu1 %vm82_vm0, %v3320_v14  ;;  %v54_v12 = vld [vmem:[%s7037_s0 + $0x118] sm:$0xff]  ;;  %v3351_v13 = vld [vmem:[%s7037_s0 + $0x2e0] sm:$0xff] }
  0x1b   :  { %3925 = vmatprep.mubr.msk.f32.mxu0 %vm4624_vm1, %v4623_v0  ;;  %4104 = vmatprep.mubr.msk.f32.mxu1 %vm4624_vm1, %v4623_v0  ;;  %v55_v14 = vld [vmem:[%s7037_s0 + $0x120] sm:$0xff] }
  0x1e   :  { %3926 = vmatmul.mubr.msk.f32.gmra.mxu0 %vm82_vm0, %v24_v15  ;;  %4105 = vmatmul.mubr.msk.f32.gmra.mxu1 %vm82_vm0, %v3321_v16  ;;  %v3352_v15 = vld [vmem:[%s7037_s0 + $0x2e8] sm:$0xff] }
  0x1f   :  { %3928 = vmatprep.mubr.msk.f32.mxu0 %vm4624_vm1, %v4623_v0  ;;  %4107 = vmatprep.mubr.msk.f32.mxu1 %vm4624_vm1, %v4623_v0  ;;  %v56_v16 = vld [vmem:[%s7037_s0 + $0x128] sm:$0xff] }
  0x22   :  { %3929 = vmatmul.mubr.msk.f32.gmra.mxu0 %vm82_vm0, %v25_v17  ;;  %4108 = vmatmul.mubr.msk.f32.gmra.mxu1 %vm82_vm0, %v3322_v18  ;;  %v3353_v17 = vld [vmem:[%s7037_s0 + $0x2f0] sm:$0xff] }
  0x23   :  { %3931 = vmatprep.mubr.msk.f32.mxu0 %vm4624_vm1, %v4623_v0  ;;  %4110 = vmatprep.mubr.msk.f32.mxu1 %vm4624_vm1, %v4623_v0  ;;  %v57_v18 = vld [vmem:[%s7037_s0 + $0x130] sm:$0xff] }
  0x26   :  { %3932 = vmatmul.mubr.msk.f32.gmra.mxu0 %vm82_vm0, %v26_v19  ;;  %4111 = vmatmul.mubr.msk.f32.gmra.mxu1 %vm82_vm0, %v3323_v20  ;;  %v3354_v19 = vld [vmem:[%s7037_s0 + $0x2f8] sm:$0xff] }
  0x27   :  { %3934 = vmatprep.mubr.msk.f32.mxu0 %vm4624_vm1, %v4623_v0  ;;  %4113 = vmatprep.mubr.msk.f32.mxu1 %vm4624_vm1, %v4623_v0  ;;  %v58_v20 = vld [vmem:[%s7037_s0 + $0x138] sm:$0xff] }
  0x2a   :  { %3935 = vmatmul.mubr.msk.f32.gmra.mxu0 %vm82_vm0, %v27_v21  ;;  %4114 = vmatmul.mubr.msk.f32.gmra.mxu1 %vm82_vm0, %v3324_v22  ;;  %v3355_v21 = vld [vmem:[%s7037_s0 + $0x300] sm:$0xff] }
  0x2b   :  { %3937 = vmatprep.mubr.msk.f32.mxu0 %vm4624_vm1, %v4623_v0  ;;  %4116 = vmatprep.mubr.msk.f32.mxu1 %vm4624_vm1, %v4623_v0  ;;  %v59_v22 = vld [vmem:[%s7037_s0 + $0x140] sm:$0xff] }
  0x2e   :  { %3938 = vmatmul.mubr.msk.f32.gmra.mxu0 %vm82_vm0, %v28_v23  ;;  %4117 = vmatmul.mubr.msk.f32.gmra.mxu1 %vm82_vm0, %v3325_v24  ;;  %v3356_v23 = vld [vmem:[%s7037_s0 + $0x308] sm:$0xff] }
  0x2f   :  { %3940 = vmatprep.mubr.msk.f32.mxu0 %vm4624_vm1, %v4623_v0  ;;  %4119 = vmatprep.mubr.msk.f32.mxu1 %vm4624_vm1, %v4623_v0  ;;  %v60_v24 = vld [vmem:[%s7037_s0 + $0x148] sm:$0xff] }
  0x32   :  { %3941 = vmatmul.mubr.msk.f32.gmra.mxu0 %vm82_vm0, %v29_v25  ;;  %4120 = vmatmul.mubr.msk.f32.gmra.mxu1 %vm82_vm0, %v3326_v26  ;;  %v3357_v25 = vld [vmem:[%s7037_s0 + $0x310] sm:$0xff] }
  0x33   :  { %3943 = vmatprep.mubr.msk.f32.mxu0 %vm4624_vm1, %v4623_v0  ;;  %4122 = vmatprep.mubr.msk.f32.mxu1 %vm4624_vm1, %v4623_v0  ;;  %v61_v26 = vld [vmem:[%s7037_s0 + $0x150] sm:$0xff] }
  0x36   :  { %3944 = vmatmul.mubr.msk.f32.gmra.mxu0 %vm82_vm0, %v30_v27  ;;  %4123 = vmatmul.mubr.msk.f32.gmra.mxu1 %vm82_vm0, %v3327_v28  ;;  %v3358_v27 = vld [vmem:[%s7037_s0 + $0x318] sm:$0xff] }
  0x37   :  { %3946 = vmatprep.mubr.msk.f32.mxu0 %vm4624_vm1, %v4623_v0  ;;  %4125 = vmatprep.mubr.msk.f32.mxu1 %vm4624_vm1, %v4623_v0  ;;  %v62_v28 = vld [vmem:[%s7037_s0 + $0x158] sm:$0xff] }
  0x3a   :  { %3947 = vmatmul.mubr.msk.f32.gmra.mxu0 %vm82_vm0, %v31_v29  ;;  %4126 = vmatmul.mubr.msk.f32.gmra.mxu1 %vm82_vm0, %v3328_v30  ;;  %v3359_v29 = vld [vmem:[%s7037_s0 + $0x320] sm:$0xff] }
  0x3b   :  { %3949 = vmatprep.mubr.msk.f32.mxu0 %vm4624_vm1, %v4623_v0  ;;  %4128 = vmatprep.mubr.msk.f32.mxu1 %vm4624_vm1, %v4623_v0  ;;  %v63_v30 = vld [vmem:[%s7037_s0 + $0x160] sm:$0xff] }
  0x3e   :  { %3950 = vmatmul.mubr.msk.f32.gmra.mxu0 %vm82_vm0, %v32_v31  ;;  %4129 = vmatmul.mubr.msk.f32.gmra.mxu1 %vm82_vm0, %v3329_v32  ;;  %v3360_v31 = vld [vmem:[%s7037_s0 + $0x328] sm:$0xff] }
  0x3f   :  { %3952 = vmatprep.mubr.msk.f32.mxu0 %vm4624_vm1, %v4623_v0  ;;  %4131 = vmatprep.mubr.msk.f32.mxu1 %vm4624_vm1, %v4623_v0  ;;  %v64_v32 = vld [vmem:[%s7037_s0 + $0x168] sm:$0xff] }
  0x42   :  { %3953 = vmatmul.mubr.msk.f32.gmra.mxu0 %vm82_vm0, %v33_v33  ;;  %4132 = vmatmul.mubr.msk.f32.gmra.mxu1 %vm82_vm0, %v3330_v34  ;;  %v3361_v33 = vld [vmem:[%s7037_s0 + $0x330] sm:$0xff] }
  0x43   :  { %3955 = vmatprep.mubr.msk.f32.mxu0 %vm4624_vm1, %v4623_v0  ;;  %4134 = vmatprep.mubr.msk.f32.mxu1 %vm4624_vm1, %v4623_v0  ;;  %v65_v34 = vld [vmem:[%s7037_s0 + $0x170] sm:$0xff] }
  0x46   :  { %3956 = vmatmul.mubr.msk.f32.gmra.mxu0 %vm82_vm0, %v34_v35  ;;  %4135 = vmatmul.mubr.msk.f32.gmra.mxu1 %vm82_vm0, %v3331_v36  ;;  %v3362_v35 = vld [vmem:[%s7037_s0 + $0x338] sm:$0xff] }
  0x47   :  { %3958 = vmatprep.mubr.msk.f32.mxu0 %vm4624_vm1, %v4623_v0  ;;  %4137 = vmatprep.mubr.msk.f32.mxu1 %vm4624_vm1, %v4623_v0  ;;  %v66_v36 = vld [vmem:[%s7037_s0 + $0x178] sm:$0xff] }
  0x4a   :  { %3959 = vmatmul.mubr.msk.f32.gmra.mxu0 %vm82_vm0, %v35_v37  ;;  %4138 = vmatmul.mubr.msk.f32.gmra.mxu1 %vm82_vm0, %v3332_v38  ;;  %v3363_v37 = vld [vmem:[%s7037_s0 + $0x340] sm:$0xff] }
  0x4b   :  { %3961 = vmatprep.mubr.msk.f32.mxu0 %vm4624_vm1, %v4623_v0  ;;  %4140 = vmatprep.mubr.msk.f32.mxu1 %vm4624_vm1, %v4623_v0  ;;  %v67_v38 = vld [vmem:[%s7037_s0 + $0x180] sm:$0xff] }
  0x4e   :  { %3962 = vmatmul.mubr.msk.f32.gmra.mxu0 %vm82_vm0, %v36_v39  ;;  %4141 = vmatmul.mubr.msk.f32.gmra.mxu1 %vm82_vm0, %v3333_v40  ;;  %v3364_v39 = vld [vmem:[%s7037_s0 + $0x348] sm:$0xff]  ;;  %v5262_v40 = vld [vmem:[%s7038_s2] ss:$0 sm:$0xff] }
  0x4f   :  { %3964 = vmatprep.mubr.msk.f32.mxu0 %vm4624_vm1, %v4623_v0  ;;  %4143 = vmatprep.mubr.msk.f32.mxu1 %vm4624_vm1, %v4623_v0 }
  0x52   :  { %3965 = vmatmul.mubr.msk.f32.gmra.mxu0 %vm82_vm0, %v37_v41  ;;  %4144 = vmatmul.mubr.msk.f32.gmra.mxu1 %vm82_vm0, %v3334_v42 }
  0x53   :  { %3967 = vmatprep.mubr.msk.f32.mxu0 %vm4624_vm1, %v4623_v0  ;;  %4146 = vmatprep.mubr.msk.f32.mxu1 %vm4624_vm1, %v4623_v0 }
  0x56   :  { %3968 = vmatmul.mubr.msk.f32.gmra.mxu0 %vm82_vm0, %v38_v43  ;;  %4147 = vmatmul.mubr.msk.f32.gmra.mxu1 %vm82_vm0, %v3335_v44 }
  0x57   :  { %3970 = vmatprep.mubr.msk.f32.mxu0 %vm4624_vm1, %v4623_v0  ;;  %4149 = vmatprep.mubr.msk.f32.mxu1 %vm4624_vm1, %v4623_v0 }
  0x5a   :  { %3971 = vmatmul.mubr.msk.f32.gmra.mxu0 %vm82_vm0, %v39_v45  ;;  %4150 = vmatmul.mubr.msk.f32.gmra.mxu1 %vm82_vm0, %v3336_v46  ;;  %v68_v45 = vld [vmem:[%s7037_s0 + $0x188] sm:$0xff]  ;;  %v3365_v46 = vld [vmem:[%s7037_s0 + $0x350] sm:$0xff] }
  0x5b   :  { %3973 = vmatprep.mubr.msk.f32.mxu0 %vm4624_vm1, %v4623_v0  ;;  %4152 = vmatprep.mubr.msk.f32.mxu1 %vm4624_vm1, %v4623_v0 }
  0x5e   :  { %3974 = vmatmul.mubr.msk.f32.gmra.mxu0 %vm82_vm0, %v40_v47  ;;  %4153 = vmatmul.mubr.msk.f32.gmra.mxu1 %vm82_vm0, %v3337_v48 }
  0x5f   :  { %3976 = vmatprep.mubr.msk.f32.mxu0 %vm4624_vm1, %v4623_v0  ;;  %4155 = vmatprep.mubr.msk.f32.mxu1 %vm4624_vm1, %v4623_v0 }
  0x62   :  { %3977 = vmatmul.mubr.msk.f32.gmra.mxu0 %vm82_vm0, %v41_v49  ;;  %4156 = vmatmul.mubr.msk.f32.gmra.mxu1 %vm82_vm0, %v3338_v50 }
  0x63   :  { %3979 = vmatprep.mubr.msk.f32.mxu0 %vm4624_vm1, %v4623_v0  ;;  %4158 = vmatprep.mubr.msk.f32.mxu1 %vm4624_vm1, %v4623_v0 }
  0x66   :  { %3980 = vmatmul.mubr.msk.f32.gmra.mxu0 %vm82_vm0, %v42_v51  ;;  %4159 = vmatmul.mubr.msk.f32.gmra.mxu1 %vm82_vm0, %v3339_v52 }
  0x67   :  { %3982 = vmatprep.mubr.msk.f32.mxu0 %vm4624_vm1, %v4623_v0  ;;  %4161 = vmatprep.mubr.msk.f32.mxu1 %vm4624_vm1, %v4623_v0 }
  0x6a   :  { %3983 = vmatmul.mubr.msk.f32.gmra.mxu0 %vm82_vm0, %v43_v53  ;;  %4162 = vmatmul.mubr.msk.f32.gmra.mxu1 %vm82_vm0, %v3340_v54 }
  0x6b   :  { %3985 = vmatprep.mubr.msk.f32.mxu0 %vm4624_vm1, %v4623_v0  ;;  %4164 = vmatprep.mubr.msk.f32.mxu1 %vm4624_vm1, %v4623_v0 }
  0x6e   :  { %3986 = vmatmul.mubr.msk.f32.gmra.mxu0 %vm82_vm0, %v44_v55  ;;  %4165 = vmatmul.mubr.msk.f32.gmra.mxu1 %vm82_vm0, %v3341_v56 }
  0x6f   :  { %3988 = vmatprep.mubr.msk.f32.mxu0 %vm4624_vm1, %v4623_v0  ;;  %4167 = vmatprep.mubr.msk.f32.mxu1 %vm4624_vm1, %v4623_v0 }
  0x72   :  { %3989 = vmatmul.mubr.msk.f32.gmra.mxu0 %vm82_vm0, %v45_v57  ;;  %4168 = vmatmul.mubr.msk.f32.gmra.mxu1 %vm82_vm0, %v3342_v58  ;;  %v69_v57 = vld [vmem:[%s7037_s0 + $0x190] sm:$0xff]  ;;  %v3366_v58 = vld [vmem:[%s7037_s0 + $0x358] sm:$0xff] }
  0x73   :  { %3991 = vmatprep.mubr.msk.f32.mxu0 %vm4624_vm1, %v4623_v0  ;;  %4170 = vmatprep.mubr.msk.f32.mxu1 %vm4624_vm1, %v4623_v0 }
  0x76   :  { %3992 = vmatmul.mubr.msk.f32.gmra.mxu0 %vm82_vm0, %v46_v59  ;;  %4171 = vmatmul.mubr.msk.f32.gmra.mxu1 %vm82_vm0, %v3343_v60 }
  0x77   :  { %3994 = vmatprep.mubr.msk.f32.mxu0 %vm4624_vm1, %v4623_v0  ;;  %4173 = vmatprep.mubr.msk.f32.mxu1 %vm4624_vm1, %v4623_v0 }
  0x7a   :  { %3995 = vmatmul.mubr.msk.f32.gmra.mxu0 %vm82_vm0, %v47_v61  ;;  %4174 = vmatmul.mubr.msk.f32.gmra.mxu1 %vm82_vm0, %v3344_v62 }
  0x7b   :  { %3997 = vmatprep.mubr.msk.f32.mxu0 %vm4624_vm1, %v4623_v0  ;;  %4176 = vmatprep.mubr.msk.f32.mxu1 %vm4624_vm1, %v4623_v0 }
  0x7e   :  { %3998 = vmatmul.mubr.msk.f32.gmra.mxu0 %vm82_vm0, %v48_v63  ;;  %4177 = vmatmul.mubr.msk.f32.gmra.mxu1 %vm82_vm0, %v3345_v1 }
  0x7f   :  { %4000 = vmatprep.mubr.msk.f32.mxu0 %vm4624_vm1, %v4623_v0  ;;  %4179 = vmatprep.mubr.msk.f32.mxu1 %vm4624_vm1, %v4623_v0 }
  0x82   :  { %4001 = vmatmul.mubr.msk.f32.gmra.mxu0 %vm82_vm0, %v49_v2  ;;  %4180 = vmatmul.mubr.msk.f32.gmra.mxu1 %vm82_vm0, %v3346_v3 }
  0x83   :  { %4003 = vmatprep.mubr.msk.f32.mxu0 %vm4624_vm1, %v4623_v0  ;;  %4182 = vmatprep.mubr.msk.f32.mxu1 %vm4624_vm1, %v4623_v0 }
  0x86   :  { %4004 = vmatmul.mubr.msk.f32.gmra.mxu0 %vm82_vm0, %v50_v4  ;;  %4183 = vmatmul.mubr.msk.f32.gmra.mxu1 %vm82_vm0, %v3347_v5 }
  0x87   :  { %4006 = vmatprep.mubr.msk.f32.mxu0 %vm4624_vm1, %v4623_v0  ;;  %4185 = vmatprep.mubr.msk.f32.mxu1 %vm4624_vm1, %v4623_v0 }
  0x8a   :  { %4007 = vmatmul.mubr.msk.f32.gmra.mxu0 %vm82_vm0, %v51_v6  ;;  %4186 = vmatmul.mubr.msk.f32.gmra.mxu1 %vm82_vm0, %v3348_v7  ;;  %v70_v7 = vld [vmem:[%s7037_s0 + $0x198] sm:$0xff] }
  0x8b   :  { %4009 = vmatprep.mubr.msk.f32.mxu0 %vm4624_vm1, %v4623_v0  ;;  %4188 = vmatprep.mubr.msk.f32.mxu1 %vm4624_vm1, %v4623_v0 }
  0x8e   :  { %4010 = vmatmul.mubr.msk.f32.gmra.mxu0 %vm82_vm0, %v52_v8  ;;  %4189 = vmatmul.mubr.msk.f32.gmra.mxu1 %vm82_vm0, %v3349_v9  ;;  %v3367_v8 = vld [vmem:[%s7037_s0 + $0x360] sm:$0xff] }
  0x8f   :  { %4012 = vmatprep.mubr.msk.f32.mxu0 %vm4624_vm1, %v4623_v0  ;;  %4191 = vmatprep.mubr.msk.f32.mxu1 %vm4624_vm1, %v4623_v0 }
  0x92   :  { %4013 = vmatmul.mubr.msk.f32.gmra.mxu0 %vm82_vm0, %v53_v10  ;;  %4192 = vmatmul.mubr.msk.f32.gmra.mxu1 %vm82_vm0, %v3350_v11 }
  0x93   :  { %4015 = vmatprep.mubr.msk.f32.mxu0 %vm4624_vm1, %v4623_v0  ;;  %4194 = vmatprep.mubr.msk.f32.mxu1 %vm4624_vm1, %v4623_v0 }
  0x96   :  { %4016 = vmatmul.mubr.msk.f32.gmra.mxu0 %vm82_vm0, %v54_v12  ;;  %4195 = vmatmul.mubr.msk.f32.gmra.mxu1 %vm82_vm0, %v3351_v13 }
  0x97   :  { %4018 = vmatprep.mubr.msk.f32.mxu0 %vm4624_vm1, %v4623_v0  ;;  %4197 = vmatprep.mubr.msk.f32.mxu1 %vm4624_vm1, %v4623_v0 }
  0x9a   :  { %4019 = vmatmul.mubr.msk.f32.gmra.mxu0 %vm82_vm0, %v55_v14  ;;  %4198 = vmatmul.mubr.msk.f32.gmra.mxu1 %vm82_vm0, %v3352_v15 }
  0x9b   :  { %4021 = vmatprep.mubr.msk.f32.mxu0 %vm4624_vm1, %v4623_v0  ;;  %4200 = vmatprep.mubr.msk.f32.mxu1 %vm4624_vm1, %v4623_v0 }
  0x9e   :  { %4022 = vmatmul.mubr.msk.f32.gmra.mxu0 %vm82_vm0, %v56_v16  ;;  %4201 = vmatmul.mubr.msk.f32.gmra.mxu1 %vm82_vm0, %v3353_v17 }
  0x9f   :  { %4024 = vmatprep.mubr.msk.f32.mxu0 %vm4624_vm1, %v4623_v0  ;;  %4203 = vmatprep.mubr.msk.f32.mxu1 %vm4624_vm1, %v4623_v0 }
  0xa2   :  { %4025 = vmatmul.mubr.msk.f32.gmra.mxu0 %vm82_vm0, %v57_v18  ;;  %4204 = vmatmul.mubr.msk.f32.gmra.mxu1 %vm82_vm0, %v3354_v19 }
  0xa3   :  { %4027 = vmatprep.mubr.msk.f32.mxu0 %vm4624_vm1, %v4623_v0  ;;  %4206 = vmatprep.mubr.msk.f32.mxu1 %vm4624_vm1, %v4623_v0 }
  0xa6   :  { %4028 = vmatmul.mubr.msk.f32.gmra.mxu0 %vm82_vm0, %v58_v20  ;;  %4207 = vmatmul.mubr.msk.f32.gmra.mxu1 %vm82_vm0, %v3355_v21  ;;  %v71_v20 = vld [vmem:[%s7037_s0 + $0x1a0] sm:$0xff]  ;;  %v3368_v21 = vld [vmem:[%s7037_s0 + $0x368] sm:$0xff] }
  0xa7   :  { %4030 = vmatprep.mubr.msk.f32.mxu0 %vm4624_vm1, %v4623_v0  ;;  %4209 = vmatprep.mubr.msk.f32.mxu1 %vm4624_vm1, %v4623_v0 }
  0xaa   :  { %4031 = vmatmul.mubr.msk.f32.gmra.mxu0 %vm82_vm0, %v59_v22  ;;  %4210 = vmatmul.mubr.msk.f32.gmra.mxu1 %vm82_vm0, %v3356_v23 }
  0xab   :  { %4033 = vmatprep.mubr.msk.f32.mxu0 %vm4624_vm1, %v4623_v0  ;;  %4212 = vmatprep.mubr.msk.f32.mxu1 %vm4624_vm1, %v4623_v0 }
  0xae   :  { %4034 = vmatmul.mubr.msk.f32.gmra.mxu0 %vm82_vm0, %v60_v24  ;;  %4213 = vmatmul.mubr.msk.f32.gmra.mxu1 %vm82_vm0, %v3357_v25 }
  0xaf   :  { %4036 = vmatprep.mubr.msk.f32.mxu0 %vm4624_vm1, %v4623_v0  ;;  %4215 = vmatprep.mubr.msk.f32.mxu1 %vm4624_vm1, %v4623_v0 }
  0xb2   :  { %4037 = vmatmul.mubr.msk.f32.gmra.mxu0 %vm82_vm0, %v61_v26  ;;  %4216 = vmatmul.mubr.msk.f32.gmra.mxu1 %vm82_vm0, %v3358_v27 }
  0xb3   :  { %4039 = vmatprep.mubr.msk.f32.mxu0 %vm4624_vm1, %v4623_v0  ;;  %4218 = vmatprep.mubr.msk.f32.mxu1 %vm4624_vm1, %v4623_v0 }
  0xb6   :  { %4040 = vmatmul.mubr.msk.f32.gmra.mxu0 %vm82_vm0, %v62_v28  ;;  %4219 = vmatmul.mubr.msk.f32.gmra.mxu1 %vm82_vm0, %v3359_v29 }
  0xb7   :  { %4042 = vmatprep.mubr.msk.f32.mxu0 %vm4624_vm1, %v4623_v0  ;;  %4221 = vmatprep.mubr.msk.f32.mxu1 %vm4624_vm1, %v4623_v0 }
  0xba   :  { %4043 = vmatmul.mubr.msk.f32.gmra.mxu0 %vm82_vm0, %v63_v30  ;;  %4222 = vmatmul.mubr.msk.f32.gmra.mxu1 %vm82_vm0, %v3360_v31 }
  0xbb   :  { %4045 = vmatprep.mubr.msk.f32.mxu0 %vm4624_vm1, %v4623_v0  ;;  %4224 = vmatprep.mubr.msk.f32.mxu1 %vm4624_vm1, %v4623_v0 }
  0xbe   :  { %4046 = vmatmul.mubr.msk.f32.gmra.mxu0 %vm82_vm0, %v64_v32  ;;  %4225 = vmatmul.mubr.msk.f32.gmra.mxu1 %vm82_vm0, %v3361_v33  ;;  %v72_v33 = vld [vmem:[%s7037_s0 + $0x1a8] sm:$0xff] }
  0xbf   :  { %4048 = vmatprep.mubr.msk.f32.mxu0 %vm4624_vm1, %v4623_v0  ;;  %4227 = vmatprep.mubr.msk.f32.mxu1 %vm4624_vm1, %v4623_v0 }
  0xc2   :  { %4049 = vmatmul.mubr.msk.f32.gmra.mxu0 %vm82_vm0, %v65_v34  ;;  %4228 = vmatmul.mubr.msk.f32.gmra.mxu1 %vm82_vm0, %v3362_v35  ;;  %v3369_v34 = vld [vmem:[%s7037_s0 + $0x370] sm:$0xff] }
  0xc3   :  { %4051 = vmatprep.mubr.msk.f32.mxu0 %vm4624_vm1, %v4623_v0  ;;  %4230 = vmatprep.mubr.msk.f32.mxu1 %vm4624_vm1, %v4623_v0 }
  0xc6   :  { %4052 = vmatmul.mubr.msk.f32.gmra.mxu0 %vm82_vm0, %v66_v36  ;;  %4231 = vmatmul.mubr.msk.f32.gmra.mxu1 %vm82_vm0, %v3363_v37 }
  0xc7   :  { %4054 = vmatprep.mubr.msk.f32.mxu0 %vm4624_vm1, %v4623_v0  ;;  %4233 = vmatprep.mubr.msk.f32.mxu1 %vm4624_vm1, %v4623_v0 }
  0xca   :  { %v320_v41 = vpop.f32.mrf.mxu0  ;;  %4055 = vmatmul.mubr.msk.f32.gmra.mxu0 %vm82_vm0, %v67_v38  ;;  %v1070_v42 = vpop.f32.mrf.mxu1  ;;  %4234 = vmatmul.mubr.msk.f32.gmra.mxu1 %vm82_vm0, %v3364_v39 }
  0xcb   :  { %v321_v43 = vadd.f32 %v5262_v40, %v320_v41  ;;  %v1071_v44 = vadd.f32 %v5262_v40, %v1070_v42  ;;  %4057 = vmatprep.mubr.msk.f32.mxu0 %vm4624_vm1, %v4623_v0  ;;  %4236 = vmatprep.mubr.msk.f32.mxu1 %vm4624_vm1, %v4623_v0 }
  0xcc   :  { %v3912_v47 = vpop.f32.mrf.mxu0  ;;  %v4091_v48 = vpop.f32.mrf.mxu1 }
  0xcd   :  { %vm604_vm2 = vcmp.gt.f32.partialorder %v321_v43, 0.0  ;;  %v661_v49 = vmul.f32 0.01, %v321_v43  ;;  %vm1354_vm3 = vcmp.gt.f32.partialorder %v1071_v44, 0.0  ;;  %v1411_v50 = vmul.f32 0.01, %v1071_v44 }
  0xce   :  { %v325_v51 = vpop.f32.mrf.mxu0  ;;  %4058 = vmatmul.mubr.msk.f32.gmra.mxu0 %vm82_vm0, %v68_v45  ;;  %v1075_v52 = vpop.f32.mrf.mxu1  ;;  %4237 = vmatmul.mubr.msk.f32.gmra.mxu1 %vm82_vm0, %v3365_v46  ;;  %v73_v47 = vld [vmem:[%s7037_s0 + $0x1b0] sm:$0xff]  ;;  %v3370_v48 = vld [vmem:[%s7037_s0 + $0x378] sm:$0xff] }
  0xcf   :  { %v5280_v53 = vsel %vm604_vm2, %v321_v43, %v661_v49  ;;  %v5282_v54 = vsel %vm1354_vm3, %v1071_v44, %v1411_v50  ;;  %v326_v55 = vadd.f32 %v5262_v40, %v325_v51  ;;  %v1076_v56 = vadd.f32 %v5262_v40, %v1075_v52  ;;  %4060 = vmatprep.mubr.msk.f32.mxu0 %vm4624_vm1, %v4623_v0 }
  0xd0   :  { %v3915_v60 = vpop.f32.mrf.mxu0  ;;  %v4094_v61 = vpop.f32.mrf.mxu1  ;;  %4239 = vmatprep.mubr.msk.f32.mxu1 %vm4624_vm1, %v4623_v0 }
  0xd1   :  { %vm605_vm4 = vcmp.gt.f32.partialorder %v326_v55, 0.0  ;;  %v662_v62 = vmul.f32 0.01, %v326_v55  ;;  %vm1355_vm5 = vcmp.gt.f32.partialorder %v1076_v56, 0.0  ;;  %v1412_v63 = vmul.f32 0.01, %v1076_v56 }
  0xd2   :  { %v330_v1 = vpop.f32.mrf.mxu0  ;;  %4061 = vmatmul.mubr.msk.f32.gmra.mxu0 %vm82_vm0, %v69_v57  ;;  %v1080_v2 = vpop.f32.mrf.mxu1  ;;  %4240 = vmatmul.mubr.msk.f32.gmra.mxu1 %vm82_vm0, %v3366_v58 }
  0xd3   :  { %v5300_v3 = vsel %vm605_vm4, %v326_v55, %v662_v62  ;;  %v5302_v4 = vsel %vm1355_vm5, %v1076_v56, %v1412_v63  ;;  %v331_v5 = vadd.f32 %v5262_v40, %v330_v1  ;;  %v1081_v6 = vadd.f32 %v5262_v40, %v1080_v2  ;;  %4063 = vmatprep.mubr.msk.f32.mxu0 %vm4624_vm1, %v4623_v0  ;;  %v74_v63 = vld [vmem:[%s7037_s0 + $0x1b8] sm:$0xff]  ;;  %v3371_v1 = vld [vmem:[%s7037_s0 + $0x380] sm:$0xff] }
  0xd4   :  { %v3918_v10 = vpop.f32.mrf.mxu0  ;;  %v4097_v11 = vpop.f32.mrf.mxu1  ;;  %4242 = vmatprep.mubr.msk.f32.mxu1 %vm4624_vm1, %v4623_v0 }
  0xd5   :  { %vm606_vm6 = vcmp.gt.f32.partialorder %v331_v5, 0.0  ;;  %v663_v12 = vmul.f32 0.01, %v331_v5  ;;  %vm1356_vm7 = vcmp.gt.f32.partialorder %v1081_v6, 0.0  ;;  %v1413_v13 = vmul.f32 0.01, %v1081_v6 }
  0xd6   :  { %v335_v14 = vpop.f32.mrf.mxu0  ;;  %4064 = vmatmul.mubr.msk.f32.gmra.mxu0 %vm82_vm0, %v70_v7  ;;  %v1085_v15 = vpop.f32.mrf.mxu1  ;;  %4243 = vmatmul.mubr.msk.f32.gmra.mxu1 %vm82_vm0, %v3367_v8 }
  0xd7   :  { %v5320_v16 = vsel %vm606_vm6, %v331_v5, %v663_v12  ;;  %v5322_v17 = vsel %vm1356_vm7, %v1081_v6, %v1413_v13  ;;  %v336_v18 = vadd.f32 %v5262_v40, %v335_v14  ;;  %v1086_v19 = vadd.f32 %v5262_v40, %v1085_v15  ;;  %4066 = vmatprep.mubr.msk.f32.mxu0 %vm4624_vm1, %v4623_v0 }
  0xd8   :  { %v3921_v23 = vpop.f32.mrf.mxu0  ;;  %v4100_v24 = vpop.f32.mrf.mxu1  ;;  %4245 = vmatprep.mubr.msk.f32.mxu1 %vm4624_vm1, %v4623_v0 }
  0xd9   :  { %vm607_vm8 = vcmp.gt.f32.partialorder %v336_v18, 0.0  ;;  %v664_v25 = vmul.f32 0.01, %v336_v18  ;;  %vm1357_vm9 = vcmp.gt.f32.partialorder %v1086_v19, 0.0  ;;  %v1414_v26 = vmul.f32 0.01, %v1086_v19 }
  0xda   :  { %v340_v27 = vpop.f32.mrf.mxu0  ;;  %4067 = vmatmul.mubr.msk.f32.gmra.mxu0 %vm82_vm0, %v71_v20  ;;  %v1090_v28 = vpop.f32.mrf.mxu1  ;;  %4246 = vmatmul.mubr.msk.f32.gmra.mxu1 %vm82_vm0, %v3368_v21 }
  0xdb   :  { %v5340_v29 = vsel %vm607_vm8, %v336_v18, %v664_v25  ;;  %v5342_v30 = vsel %vm1357_vm9, %v1086_v19, %v1414_v26  ;;  %v341_v31 = vadd.f32 %v5262_v40, %v340_v27  ;;  %v1091_v32 = vadd.f32 %v5262_v40, %v1090_v28  ;;  %4069 = vmatprep.mubr.msk.f32.mxu0 %vm4624_vm1, %v4623_v0  ;;  %v75_v18 = vld [vmem:[%s7037_s0 + $0x1c0] sm:$0x3]  ;;  %v3372_v19 = vld [vmem:[%s7037_s0 + $0x388] sm:$0x3] }
  0xdc   :  { %v3924_v36 = vpop.f32.mrf.mxu0  ;;  %v4103_v37 = vpop.f32.mrf.mxu1  ;;  %4248 = vmatprep.mubr.msk.f32.mxu1 %vm4624_vm1, %v4623_v0 }
  0xdd   :  { %vm608_vm10 = vcmp.gt.f32.partialorder %v341_v31, 0.0  ;;  %v665_v38 = vmul.f32 0.01, %v341_v31  ;;  %vm1358_vm11 = vcmp.gt.f32.partialorder %v1091_v32, 0.0  ;;  %v1415_v39 = vmul.f32 0.01, %v1091_v32 }
  0xde   :  { %v345_v41 = vpop.f32.mrf.mxu0  ;;  %4070 = vmatmul.mubr.msk.f32.gmra.mxu0 %vm82_vm0, %v72_v33  ;;  %v1095_v42 = vpop.f32.mrf.mxu1  ;;  %4249 = vmatmul.mubr.msk.f32.gmra.mxu1 %vm82_vm0, %v3369_v34  ;;  %v3430_v34 = vld [vmem:[%s7037_s0 + $0x390] sm:$0xff]  ;;  %v3544_v36 = vld [vmem:[%s7037_s0 + $0x558] sm:$0xff] }
  0xdf   :  { %v5360_v43 = vsel %vm608_vm10, %v341_v31, %v665_v38  ;;  %v5362_v44 = vsel %vm1358_vm11, %v1091_v32, %v1415_v39  ;;  %v346_v45 = vadd.f32 %v5262_v40, %v345_v41  ;;  %v1096_v46 = vadd.f32 %v5262_v40, %v1095_v42  ;;  %4072 = vmatprep.mubr.msk.f32.mxu0 %vm4624_vm1, %v4623_v0 }
  0xe0   :  { %v3927_v50 = vpop.f32.mrf.mxu0  ;;  %v4106_v51 = vpop.f32.mrf.mxu1  ;;  %4251 = vmatprep.mubr.msk.f32.mxu1 %vm4624_vm1, %v4623_v0 }
  0xe1   :  { %vm609_vm12 = vcmp.gt.f32.partialorder %v346_v45, 0.0  ;;  %v666_v52 = vmul.f32 0.01, %v346_v45  ;;  %vm1359_vm13 = vcmp.gt.f32.partialorder %v1096_v46, 0.0  ;;  %v1416_v55 = vmul.f32 0.01, %v1096_v46 }
  0xe2   :  { %v350_v56 = vpop.f32.mrf.mxu0  ;;  %4073 = vmatmul.mubr.msk.f32.gmra.mxu0 %vm82_vm0, %v73_v47  ;;  %v1100_v57 = vpop.f32.mrf.mxu1  ;;  %4252 = vmatmul.mubr.msk.f32.gmra.mxu1 %vm82_vm0, %v3370_v48 }
  0xe3   :  { %v5380_v58 = vsel %vm609_vm12, %v346_v45, %v666_v52  ;;  %v5382_v60 = vsel %vm1359_vm13, %v1096_v46, %v1416_v55  ;;  %v351_v61 = vadd.f32 %v5262_v40, %v350_v56  ;;  %v1101_v62 = vadd.f32 %v5262_v40, %v1100_v57  ;;  %4075 = vmatprep.mubr.msk.f32.mxu0 %vm4624_vm1, %v4623_v0  ;;  %v3431_v52 = vld [vmem:[%s7037_s0 + $0x398] sm:$0xff]  ;;  %v3545_v55 = vld [vmem:[%s7037_s0 + $0x560] sm:$0xff] }
  0xe4   :  { %v3930_v5 = vpop.f32.mrf.mxu0  ;;  %v4109_v6 = vpop.f32.mrf.mxu1  ;;  %4254 = vmatprep.mubr.msk.f32.mxu1 %vm4624_vm1, %v4623_v0 }
  0xe5   :  { %vm610_vm14 = vcmp.gt.f32.partialorder %v351_v61, 0.0  ;;  %v667_v7 = vmul.f32 0.01, %v351_v61  ;;  %vm1360_vm15 = vcmp.gt.f32.partialorder %v1101_v62, 0.0  ;;  %v1417_v8 = vmul.f32 0.01, %v1101_v62 }
  0xe6   :  { %v355_v10 = vpop.f32.mrf.mxu0  ;;  %4076 = vmatmul.mubr.msk.f32.gmra.mxu0 %vm82_vm0, %v74_v63  ;;  %v1105_v11 = vpop.f32.mrf.mxu1  ;;  %4255 = vmatmul.mubr.msk.f32.gmra.mxu1 %vm82_vm0, %v3371_v1 }
  0xe7   :  { %v5400_v12 = vsel %vm610_vm14, %v351_v61, %v667_v7  ;;  %v5402_v13 = vsel %vm1360_vm15, %v1101_v62, %v1417_v8  ;;  %v356_v14 = vadd.f32 %v5262_v40, %v355_v10  ;;  %v1106_v15 = vadd.f32 %v5262_v40, %v1105_v11  ;;  %4078 = vmatprep.mubr.msk.f32.mxu0 %vm4624_vm1, %v4623_v0  ;;  %v3432_v11 = vld [vmem:[%s7037_s0 + $0x3a0] sm:$0xff] }
  0xe8   :  { %v3933_v21 = vpop.f32.mrf.mxu0  ;;  %v4112_v23 = vpop.f32.mrf.mxu1  ;;  %4257 = vmatprep.mubr.msk.f32.mxu1 %vm4624_vm1, %v4623_v0 }
  0xe9   :  { %vm611_vm2 = vcmp.gt.f32.partialorder %v356_v14, 0.0  ;;  %v668_v24 = vmul.f32 0.01, %v356_v14  ;;  %vm1361_vm3 = vcmp.gt.f32.partialorder %v1106_v15, 0.0  ;;  %v1418_v25 = vmul.f32 0.01, %v1106_v15 }
  0xea   :  { %v360_v26 = vpop.f32.mrf.mxu0  ;;  %4079 = vmatmul.mubr.msk.f32.gmra.mxu0 %vm82_vm0, %v75_v18  ;;  %v1110_v27 = vpop.f32.mrf.mxu1  ;;  %4258 = vmatmul.mubr.msk.f32.gmra.mxu1 %vm82_vm0, %v3372_v19 }
  0xeb   :  { %v5420_v28 = vsel %vm611_vm2, %v356_v14, %v668_v24  ;;  %v5422_v31 = vsel %vm1361_vm3, %v1106_v15, %v1418_v25  ;;  %v361_v32 = vadd.f32 %v5262_v40, %v360_v26  ;;  %v1111_v33 = vadd.f32 %v5262_v40, %v1110_v27  ;;  %4268 = vmatprep.mubr.msk.f32.mxu0 %vm4624_vm1, %v4623_v0  ;;  %v3546_v14 = vld [vmem:[%s7037_s0 + $0x568] sm:$0xff] }
  0xec   :  { %v3936_v38 = vpop.f32.mrf.mxu0  ;;  %v4115_v39 = vpop.f32.mrf.mxu1  ;;  %4447 = vmatprep.mubr.msk.f32.mxu1 %vm4624_vm1, %v4623_v0 }
  0xed   :  { %vm612_vm4 = vcmp.gt.f32.partialorder %v361_v32, 0.0  ;;  %v669_v41 = vmul.f32 0.01, %v361_v32  ;;  %vm1362_vm5 = vcmp.gt.f32.partialorder %v1111_v33, 0.0  ;;  %v1419_v42 = vmul.f32 0.01, %v1111_v33 }
  0xee   :  { %v365_v45 = vpop.f32.mrf.mxu0  ;;  %v1115_v46 = vpop.f32.mrf.mxu1  ;;  %4269 = vmatmul.mubr.msk.f32.vlgmr.msra.gmra.mxu0 %vm82_vm0, %v3430_v34  ;;  %4448 = vmatmul.mubr.msk.f32.vlgmr.msra.gmra.mxu1 %vm82_vm0, %v3544_v36  ;;  %v3433_v34 = vld [vmem:[%s7037_s0 + $0x3a8] sm:$0xff]  ;;  %v3547_v36 = vld [vmem:[%s7037_s0 + $0x570] sm:$0xff] }
  0xef   :  { %v5440_v47 = vsel %vm612_vm4, %v361_v32, %v669_v41  ;;  %v5442_v48 = vsel %vm1362_vm5, %v1111_v33, %v1419_v42  ;;  %v366_v50 = vadd.f32 %v5262_v40, %v365_v45  ;;  %v1116_v51 = vadd.f32 %v5262_v40, %v1115_v46  ;;  %4271 = vmatprep.mubr.msk.f32.mxu0 %vm4624_vm1, %v4623_v0 }
  0xf0   :  { %v3939_v57 = vpop.f32.mrf.mxu0  ;;  %v4118_v61 = vpop.f32.mrf.mxu1  ;;  %4450 = vmatprep.mubr.msk.f32.mxu1 %vm4624_vm1, %v4623_v0 }
  0xf1   :  { %vm613_vm6 = vcmp.gt.f32.partialorder %v366_v50, 0.0  ;;  %v670_v62 = vmul.f32 0.01, %v366_v50  ;;  %vm1363_vm7 = vcmp.gt.f32.partialorder %v1116_v51, 0.0  ;;  %v1420_v63 = vmul.f32 0.01, %v1116_v51 }
  0xf2   :  { %v370_v1 = vpop.f32.mrf.mxu0  ;;  %v1120_v5 = vpop.f32.mrf.mxu1  ;;  %4272 = vmatmul.mubr.msk.f32.gmra.mxu0 %vm82_vm0, %v3431_v52  ;;  %4451 = vmatmul.mubr.msk.f32.gmra.mxu1 %vm82_vm0, %v3545_v55  ;;  %v3434_v61 = vld [vmem:[%s7037_s0 + $0x3b0] sm:$0xff] }
  0xf3   :  { %v5460_v6 = vsel %vm613_vm6, %v366_v50, %v670_v62  ;;  %v5462_v7 = vsel %vm1363_vm7, %v1116_v51, %v1420_v63  ;;  %v371_v8 = vadd.f32 %v5262_v40, %v370_v1  ;;  %v1121_v10 = vadd.f32 %v5262_v40, %v1120_v5  ;;  %4274 = vmatprep.mubr.msk.f32.mxu0 %vm4624_vm1, %v4623_v0  ;;  %v3548_v62 = vld [vmem:[%s7037_s0 + $0x578] sm:$0xff] }
  0xf4   :  { %v3942_v18 = vpop.f32.mrf.mxu0  ;;  %v4121_v19 = vpop.f32.mrf.mxu1  ;;  %4453 = vmatprep.mubr.msk.f32.mxu1 %vm4624_vm1, %v4623_v0 }
  0xf5   :  { %vm614_vm8 = vcmp.gt.f32.partialorder %v371_v8, 0.0  ;;  %v671_v21 = vmul.f32 0.01, %v371_v8  ;;  %vm1364_vm9 = vcmp.gt.f32.partialorder %v1121_v10, 0.0  ;;  %v1421_v23 = vmul.f32 0.01, %v1121_v10 }
  0xf6   :  { %v375_v24 = vpop.f32.mrf.mxu0  ;;  %v1125_v25 = vpop.f32.mrf.mxu1  ;;  %4275 = vmatmul.mubr.msk.f32.gmra.mxu0 %vm82_vm0, %v3432_v11  ;;  %4454 = vmatmul.mubr.msk.f32.gmra.mxu1 %vm82_vm0, %v3546_v14 }
  0xf7   :  { %v5480_v26 = vsel %vm614_vm8, %v371_v8, %v671_v21  ;;  %v5482_v27 = vsel %vm1364_vm9, %v1121_v10, %v1421_v23  ;;  %v376_v32 = vadd.f32 %v5262_v40, %v375_v24  ;;  %v1126_v33 = vadd.f32 %v5262_v40, %v1125_v25  ;;  %4277 = vmatprep.mubr.msk.f32.mxu0 %vm4624_vm1, %v4623_v0  ;;  %v3435_v24 = vld [vmem:[%s7037_s0 + $0x3b8] sm:$0xff]  ;;  %v3549_v25 = vld [vmem:[%s7037_s0 + $0x580] sm:$0xff] }
  0xf8   :  { %v3945_v39 = vpop.f32.mrf.mxu0  ;;  %v4124_v41 = vpop.f32.mrf.mxu1  ;;  %4456 = vmatprep.mubr.msk.f32.mxu1 %vm4624_vm1, %v4623_v0 }
  0xf9   :  { %vm615_vm10 = vcmp.gt.f32.partialorder %v376_v32, 0.0  ;;  %v672_v42 = vmul.f32 0.01, %v376_v32  ;;  %vm1365_vm11 = vcmp.gt.f32.partialorder %v1126_v33, 0.0  ;;  %v1422_v45 = vmul.f32 0.01, %v1126_v33 }
  0xfa   :  { %v380_v46 = vpop.f32.mrf.mxu0  ;;  %v1130_v50 = vpop.f32.mrf.mxu1  ;;  %4278 = vmatmul.mubr.msk.f32.gmra.mxu0 %vm82_vm0, %v3433_v34  ;;  %4457 = vmatmul.mubr.msk.f32.gmra.mxu1 %vm82_vm0, %v3547_v36 }
  0xfb   :  { %v5500_v51 = vsel %vm615_vm10, %v376_v32, %v672_v42  ;;  %v5502_v52 = vsel %vm1365_vm11, %v1126_v33, %v1422_v45  ;;  %v381_v55 = vadd.f32 %v5262_v40, %v380_v46  ;;  %v1131_v57 = vadd.f32 %v5262_v40, %v1130_v50  ;;  %4280 = vmatprep.mubr.msk.f32.mxu0 %vm4624_vm1, %v4623_v0 }
  0xfc   :  { %v3948_v1 = vpop.f32.mrf.mxu0  ;;  %v4127_v5 = vpop.f32.mrf.mxu1  ;;  %4459 = vmatprep.mubr.msk.f32.mxu1 %vm4624_vm1, %v4623_v0 }
  0xfd   :  { %vm616_vm12 = vcmp.gt.f32.partialorder %v381_v55, 0.0  ;;  %v673_v8 = vmul.f32 0.01, %v381_v55  ;;  %vm1366_vm13 = vcmp.gt.f32.partialorder %v1131_v57, 0.0  ;;  %v1423_v10 = vmul.f32 0.01, %v1131_v57 }
  0xfe   :  { %v385_v11 = vpop.f32.mrf.mxu0  ;;  %v1135_v14 = vpop.f32.mrf.mxu1  ;;  %4281 = vmatmul.mubr.msk.f32.gmra.mxu0 %vm82_vm0, %v3434_v61  ;;  %4460 = vmatmul.mubr.msk.f32.gmra.mxu1 %vm82_vm0, %v3548_v62  ;;  %v3550_v61 = vld [vmem:[%s7037_s0 + $0x588] sm:$0xff] }
  0xff   :  { %v5520_v18 = vsel %vm616_vm12, %v381_v55, %v673_v8  ;;  %v5522_v19 = vsel %vm1366_vm13, %v1131_v57, %v1423_v10  ;;  %v386_v21 = vadd.f32 %v5262_v40, %v385_v11  ;;  %v1136_v23 = vadd.f32 %v5262_v40, %v1135_v14  ;;  %4283 = vmatprep.mubr.msk.f32.mxu0 %vm4624_vm1, %v4623_v0  ;;  %v3436_v57 = vld [vmem:[%s7037_s0 + $0x3c0] sm:$0xff] }
 0x100   :  { %v3951_v33 = vpop.f32.mrf.mxu0  ;;  %v4130_v34 = vpop.f32.mrf.mxu1  ;;  %4462 = vmatprep.mubr.msk.f32.mxu1 %vm4624_vm1, %v4623_v0 }
 0x101   :  { %vm617_vm14 = vcmp.gt.f32.partialorder %v386_v21, 0.0  ;;  %v674_v36 = vmul.f32 0.01, %v386_v21  ;;  %vm1367_vm15 = vcmp.gt.f32.partialorder %v1136_v23, 0.0  ;;  %v1424_v39 = vmul.f32 0.01, %v1136_v23 }
 0x102   :  { %v390_v41 = vpop.f32.mrf.mxu0  ;;  %v1140_v42 = vpop.f32.mrf.mxu1  ;;  %4284 = vmatmul.mubr.msk.f32.gmra.mxu0 %vm82_vm0, %v3435_v24  ;;  %4463 = vmatmul.mubr.msk.f32.gmra.mxu1 %vm82_vm0, %v3549_v25  ;;  %v3437_v33 = vld [vmem:[%s7037_s0 + $0x3c8] sm:$0xff]  ;;  %v3551_v34 = vld [vmem:[%s7037_s0 + $0x590] sm:$0xff] }
 0x103   :  { %v5540_v45 = vsel %vm617_vm14, %v386_v21, %v674_v36  ;;  %v5542_v46 = vsel %vm1367_vm15, %v1136_v23, %v1424_v39  ;;  %v391_v50 = vadd.f32 %v5262_v40, %v390_v41  ;;  %v1141_v55 = vadd.f32 %v5262_v40, %v1140_v42  ;;  %4286 = vmatprep.mubr.msk.f32.mxu0 %vm4624_vm1, %v4623_v0 }
 0x104   :  { %v3954_v1 = vpop.f32.mrf.mxu0  ;;  %v4133_v5 = vpop.f32.mrf.mxu1  ;;  %4465 = vmatprep.mubr.msk.f32.mxu1 %vm4624_vm1, %v4623_v0 }
 0x105   :  { %vm618_vm2 = vcmp.gt.f32.partialorder %v391_v50, 0.0  ;;  %v675_v8 = vmul.f32 0.01, %v391_v50  ;;  %vm1368_vm3 = vcmp.gt.f32.partialorder %v1141_v55, 0.0  ;;  %v1425_v10 = vmul.f32 0.01, %v1141_v55 }
 0x106   :  { %v395_v11 = vpop.f32.mrf.mxu0  ;;  %v1145_v14 = vpop.f32.mrf.mxu1  ;;  %4287 = vmatmul.mubr.msk.f32.gmra.mxu0 %vm82_vm0, %v3436_v57  ;;  %4466 = vmatmul.mubr.msk.f32.gmra.mxu1 %vm82_vm0, %v3550_v61 }
 0x107   :  { %v5560_v21 = vsel %vm618_vm2, %v391_v50, %v675_v8  ;;  %v5562_v23 = vsel %vm1368_vm3, %v1141_v55, %v1425_v10  ;;  %v396_v24 = vadd.f32 %v5262_v40, %v395_v11  ;;  %v1146_v25 = vadd.f32 %v5262_v40, %v1145_v14  ;;  %4289 = vmatprep.mubr.msk.f32.mxu0 %vm4624_vm1, %v4623_v0  ;;  %v3438_v10 = vld [vmem:[%s7037_s0 + $0x3d0] sm:$0xff]  ;;  %v3552_v11 = vld [vmem:[%s7037_s0 + $0x598] sm:$0xff] }
 0x108   :  { %v3957_v39 = vpop.f32.mrf.mxu0  ;;  %v4136_v41 = vpop.f32.mrf.mxu1  ;;  %4468 = vmatprep.mubr.msk.f32.mxu1 %vm4624_vm1, %v4623_v0 }
 0x109   :  { %vm619_vm4 = vcmp.gt.f32.partialorder %v396_v24, 0.0  ;;  %v676_v42 = vmul.f32 0.01, %v396_v24  ;;  %vm1369_vm5 = vcmp.gt.f32.partialorder %v1146_v25, 0.0  ;;  %v1426_v50 = vmul.f32 0.01, %v1146_v25 }
 0x10a   :  { %v400_v55 = vpop.f32.mrf.mxu0  ;;  %v1150_v57 = vpop.f32.mrf.mxu1  ;;  %4290 = vmatmul.mubr.msk.f32.gmra.mxu0 %vm82_vm0, %v3437_v33  ;;  %4469 = vmatmul.mubr.msk.f32.gmra.mxu1 %vm82_vm0, %v3551_v34 }
 0x10b   :  { %v5580_v61 = vsel %vm619_vm4, %v396_v24, %v676_v42  ;;  %v5582_v1 = vsel %vm1369_vm5, %v1146_v25, %v1426_v50  ;;  %v401_v5 = vadd.f32 %v5262_v40, %v400_v55  ;;  %v1151_v8 = vadd.f32 %v5262_v40, %v1150_v57  ;;  %4292 = vmatprep.mubr.msk.f32.mxu0 %vm4624_vm1, %v4623_v0 }
 0x10c   :  { %v3960_v24 = vpop.f32.mrf.mxu0  ;;  %v4139_v25 = vpop.f32.mrf.mxu1  ;;  %4471 = vmatprep.mubr.msk.f32.mxu1 %vm4624_vm1, %v4623_v0 }
 0x10d   :  { %vm620_vm6 = vcmp.gt.f32.partialorder %v401_v5, 0.0  ;;  %v677_v33 = vmul.f32 0.01, %v401_v5  ;;  %vm1370_vm7 = vcmp.gt.f32.partialorder %v1151_v8, 0.0  ;;  %v1427_v34 = vmul.f32 0.01, %v1151_v8 }
 0x10e   :  { %v405_v39 = vpop.f32.mrf.mxu0  ;;  %v1155_v41 = vpop.f32.mrf.mxu1  ;;  %4293 = vmatmul.mubr.msk.f32.gmra.mxu0 %vm82_vm0, %v3438_v10  ;;  %4472 = vmatmul.mubr.msk.f32.gmra.mxu1 %vm82_vm0, %v3552_v11  ;;  %v3439_v24 = vld [vmem:[%s7037_s0 + $0x3d8] sm:$0xff]  ;;  %v3553_v10 = vld [vmem:[%s7037_s0 + $0x5a0] sm:$0xff] }
 0x10f   :  { %v5600_v42 = vsel %vm620_vm6, %v401_v5, %v677_v33  ;;  %v5602_v50 = vsel %vm1370_vm7, %v1151_v8, %v1427_v34  ;;  %v406_v55 = vadd.f32 %v5262_v40, %v405_v39  ;;  %v1156_v57 = vadd.f32 %v5262_v40, %v1155_v41  ;;  %4295 = vmatprep.mubr.msk.f32.mxu0 %vm4624_vm1, %v4623_v0  ;;  %v3440_v5 = vld [vmem:[%s7037_s0 + $0x3e0] sm:$0xff] }
 0x110   :  { %v3963_v8 = vpop.f32.mrf.mxu0  ;;  %v4142_v11 = vpop.f32.mrf.mxu1  ;;  %4474 = vmatprep.mubr.msk.f32.mxu1 %vm4624_vm1, %v4623_v0 }
 0x111   :  { %vm621_vm8 = vcmp.gt.f32.partialorder %v406_v55, 0.0  ;;  %v678_v25 = vmul.f32 0.01, %v406_v55  ;;  %vm1371_vm9 = vcmp.gt.f32.partialorder %v1156_v57, 0.0  ;;  %v1428_v33 = vmul.f32 0.01, %v1156_v57 }
 0x112   :  { %v410_v34 = vpop.f32.mrf.mxu0  ;;  %v1160_v39 = vpop.f32.mrf.mxu1  ;;  %4296 = vmatmul.mubr.msk.f32.gmra.mxu0 %vm82_vm0, %v3439_v24  ;;  %4475 = vmatmul.mubr.msk.f32.gmra.mxu1 %vm82_vm0, %v3553_v10  ;;  %v3554_v24 = vld [vmem:[%s7037_s0 + $0x5a8] sm:$0xff] }
 0x113   :  { %v5620_v41 = vsel %vm621_vm8, %v406_v55, %v678_v25  ;;  %v5622_v14 = vsel %vm1371_vm9, %v1156_v57, %v1428_v33  ;;  %v411_v8 = vadd.f32 %v5262_v40, %v410_v34  ;;  %v1161_v11 = vadd.f32 %v5262_v40, %v1160_v39  ;;  %4298 = vmatprep.mubr.msk.f32.mxu0 %vm4624_vm1, %v4623_v0  ;;  %v3441_v55 = vld [vmem:[%s7037_s0 + $0x3e8] sm:$0xff] }
 0x114   :  { %v3966_v57 = vpop.f32.mrf.mxu0  ;;  %v4145_v10 = vpop.f32.mrf.mxu1  ;;  %4477 = vmatprep.mubr.msk.f32.mxu1 %vm4624_vm1, %v4623_v0 }
 0x115   :  { %vm622_vm10 = vcmp.gt.f32.partialorder %v411_v8, 0.0  ;;  %v679_v25 = vmul.f32 0.01, %v411_v8  ;;  %vm1372_vm11 = vcmp.gt.f32.partialorder %v1161_v11, 0.0  ;;  %v1429_v33 = vmul.f32 0.01, %v1161_v11 }
 0x116   :  { %v415_v34 = vpop.f32.mrf.mxu0  ;;  %v1165_v39 = vpop.f32.mrf.mxu1  ;;  %4299 = vmatmul.mubr.msk.f32.gmra.mxu0 %vm82_vm0, %v3440_v5  ;;  %4478 = vmatmul.mubr.msk.f32.gmra.mxu1 %vm82_vm0, %v3554_v24  ;;  %v3555_v5 = vld [vmem:[%s7037_s0 + $0x5b0] sm:$0xff] }
 0x117   :  { %v5640_v36 = vsel %vm622_vm10, %v411_v8, %v679_v25  ;;  %v5642_v62 = vsel %vm1372_vm11, %v1161_v11, %v1429_v33  ;;  %v416_v57 = vadd.f32 %v5262_v40, %v415_v34  ;;  %v1166_v10 = vadd.f32 %v5262_v40, %v1165_v39  ;;  %4301 = vmatprep.mubr.msk.f32.mxu0 %vm4624_vm1, %v4623_v0  ;;  %v3442_v8 = vld [vmem:[%s7037_s0 + $0x3f0] sm:$0xff] }
 0x118   :  { %v3969_v11 = vpop.f32.mrf.mxu0  ;;  %v4148_v24 = vpop.f32.mrf.mxu1  ;;  %4480 = vmatprep.mubr.msk.f32.mxu1 %vm4624_vm1, %v4623_v0 }
 0x119   :  { %vm623_vm12 = vcmp.gt.f32.partialorder %v416_v57, 0.0  ;;  %v680_v25 = vmul.f32 0.01, %v416_v57  ;;  %vm1373_vm13 = vcmp.gt.f32.partialorder %v1166_v10, 0.0  ;;  %v1430_v33 = vmul.f32 0.01, %v1166_v10 }
 0x11a   :  { %v420_v34 = vpop.f32.mrf.mxu0  ;;  %v1170_v39 = vpop.f32.mrf.mxu1  ;;  %4302 = vmatmul.mubr.msk.f32.gmra.mxu0 %vm82_vm0, %v3441_v55  ;;  %4481 = vmatmul.mubr.msk.f32.gmra.mxu1 %vm82_vm0, %v3555_v5  ;;  %v3556_v55 = vld [vmem:[%s7037_s0 + $0x5b8] sm:$0xff] }
 0x11b   :  { %v5660_v32 = vsel %vm623_vm12, %v416_v57, %v680_v25  ;;  %v5662_v63 = vsel %vm1373_vm13, %v1166_v10, %v1430_v33  ;;  %v421_v11 = vadd.f32 %v5262_v40, %v420_v34  ;;  %v1171_v24 = vadd.f32 %v5262_v40, %v1170_v39  ;;  %4304 = vmatprep.mubr.msk.f32.mxu0 %vm4624_vm1, %v4623_v0  ;;  %v3443_v57 = vld [vmem:[%s7037_s0 + $0x3f8] sm:$0xff] }
 0x11c   :  { %v3972_v10 = vpop.f32.mrf.mxu0  ;;  %v4151_v5 = vpop.f32.mrf.mxu1  ;;  %4483 = vmatprep.mubr.msk.f32.mxu1 %vm4624_vm1, %v4623_v0 }
 0x11d   :  { %vm624_vm14 = vcmp.gt.f32.partialorder %v421_v11, 0.0  ;;  %v681_v25 = vmul.f32 0.01, %v421_v11  ;;  %vm1374_vm15 = vcmp.gt.f32.partialorder %v1171_v24, 0.0  ;;  %v1431_v33 = vmul.f32 0.01, %v1171_v24 }
 0x11e   :  { %v425_v34 = vpop.f32.mrf.mxu0  ;;  %v1175_v39 = vpop.f32.mrf.mxu1  ;;  %4305 = vmatmul.mubr.msk.f32.gmra.mxu0 %vm82_vm0, %v3442_v8  ;;  %4484 = vmatmul.mubr.msk.f32.gmra.mxu1 %vm82_vm0, %v3556_v55  ;;  %v3557_v8 = vld [vmem:[%s7037_s0 + $0x5c0] sm:$0xff] }
 0x11f   :  { %v5680_v38 = vsel %vm624_vm14, %v421_v11, %v681_v25  ;;  %v5682_v15 = vsel %vm1374_vm15, %v1171_v24, %v1431_v33  ;;  %v426_v10 = vadd.f32 %v5262_v40, %v425_v34  ;;  %v1176_v5 = vadd.f32 %v5262_v40, %v1175_v39  ;;  %4307 = vmatprep.mubr.msk.f32.mxu0 %vm4624_vm1, %v4623_v0  ;;  %v3444_v11 = vld [vmem:[%s7037_s0 + $0x400] sm:$0xff] }
 0x120   :  { %v3975_v24 = vpop.f32.mrf.mxu0  ;;  %v4154_v55 = vpop.f32.mrf.mxu1  ;;  %4486 = vmatprep.mubr.msk.f32.mxu1 %vm4624_vm1, %v4623_v0 }
 0x121   :  { %vm625_vm2 = vcmp.gt.f32.partialorder %v426_v10, 0.0  ;;  %v682_v25 = vmul.f32 0.01, %v426_v10  ;;  %vm1375_vm3 = vcmp.gt.f32.partialorder %v1176_v5, 0.0  ;;  %v1432_v33 = vmul.f32 0.01, %v1176_v5 }
 0x122   :  { %v430_v34 = vpop.f32.mrf.mxu0  ;;  %v1180_v39 = vpop.f32.mrf.mxu1  ;;  %4308 = vmatmul.mubr.msk.f32.gmra.mxu0 %vm82_vm0, %v3443_v57  ;;  %4487 = vmatmul.mubr.msk.f32.gmra.mxu1 %vm82_vm0, %v3557_v8  ;;  %v3558_v57 = vld [vmem:[%s7037_s0 + $0x5c8] sm:$0xff] }
 0x123   :  { %v5700_v56 = vsel %vm625_vm2, %v426_v10, %v682_v25  ;;  %v5702_v37 = vsel %vm1375_vm3, %v1176_v5, %v1432_v33  ;;  %v431_v24 = vadd.f32 %v5262_v40, %v430_v34  ;;  %v1181_v55 = vadd.f32 %v5262_v40, %v1180_v39  ;;  %4310 = vmatprep.mubr.msk.f32.mxu0 %vm4624_vm1, %v4623_v0  ;;  %v3445_v10 = vld [vmem:[%s7037_s0 + $0x408] sm:$0xff] }
 0x124   :  { %v3978_v5 = vpop.f32.mrf.mxu0  ;;  %v4157_v8 = vpop.f32.mrf.mxu1  ;;  %4489 = vmatprep.mubr.msk.f32.mxu1 %vm4624_vm1, %v4623_v0 }
 0x125   :  { %vm626_vm4 = vcmp.gt.f32.partialorder %v431_v24, 0.0  ;;  %v683_v25 = vmul.f32 0.01, %v431_v24  ;;  %vm1376_vm5 = vcmp.gt.f32.partialorder %v1181_v55, 0.0  ;;  %v1433_v33 = vmul.f32 0.01, %v1181_v55 }
 0x126   :  { %v435_v34 = vpop.f32.mrf.mxu0  ;;  %v1185_v39 = vpop.f32.mrf.mxu1  ;;  %4311 = vmatmul.mubr.msk.f32.gmra.mxu0 %vm82_vm0, %v3444_v11  ;;  %4490 = vmatmul.mubr.msk.f32.gmra.mxu1 %vm82_vm0, %v3558_v57  ;;  %v3559_v11 = vld [vmem:[%s7037_s0 + $0x5d0] sm:$0xff] }
 0x127   :  { %v5720_v20 = vsel %vm626_vm4, %v431_v24, %v683_v25  ;;  %v5722_v2 = vsel %vm1376_vm5, %v1181_v55, %v1433_v33  ;;  %v436_v5 = vadd.f32 %v5262_v40, %v435_v34  ;;  %v1186_v8 = vadd.f32 %v5262_v40, %v1185_v39  ;;  %4313 = vmatprep.mubr.msk.f32.mxu0 %vm4624_vm1, %v4623_v0  ;;  %v3446_v24 = vld [vmem:[%s7037_s0 + $0x410] sm:$0xff] }
 0x128   :  { %7109 = vst [vmem:[#allocation2_spill] sm:$0xff] %v5722_v2  ;;  %v3981_v55 = vpop.f32.mrf.mxu0  ;;  %v4160_v57 = vpop.f32.mrf.mxu1  ;;  %4492 = vmatprep.mubr.msk.f32.mxu1 %vm4624_vm1, %v4623_v0 }
 0x129   :  { %vm627_vm6 = vcmp.gt.f32.partialorder %v436_v5, 0.0  ;;  %v684_v25 = vmul.f32 0.01, %v436_v5  ;;  %vm1377_vm7 = vcmp.gt.f32.partialorder %v1186_v8, 0.0  ;;  %v1434_v33 = vmul.f32 0.01, %v1186_v8 }
 0x12a   :  { %v440_v34 = vpop.f32.mrf.mxu0  ;;  %v1190_v39 = vpop.f32.mrf.mxu1  ;;  %4314 = vmatmul.mubr.msk.f32.gmra.mxu0 %vm82_vm0, %v3445_v10  ;;  %4493 = vmatmul.mubr.msk.f32.gmra.mxu1 %vm82_vm0, %v3559_v11  ;;  %v3560_v10 = vld [vmem:[%s7037_s0 + $0x5d8] sm:$0xff] }
 0x12b   :  { %v5740_v49 = vsel %vm627_vm6, %v436_v5, %v684_v25  ;;  %v5742_v35 = vsel %vm1377_vm7, %v1186_v8, %v1434_v33  ;;  %v441_v55 = vadd.f32 %v5262_v40, %v440_v34  ;;  %v1191_v57 = vadd.f32 %v5262_v40, %v1190_v39  ;;  %4316 = vmatprep.mubr.msk.f32.mxu0 %vm4624_vm1, %v4623_v0  ;;  %v3447_v5 = vld [vmem:[%s7037_s0 + $0x418] sm:$0xff] }
 0x12c   :  { %7110 = vst [vmem:[#allocation3_spill] sm:$0xff] %v5740_v49  ;;  %7111 = vst [vmem:[#allocation4_spill] sm:$0xff] %v5742_v35  ;;  %v3984_v8 = vpop.f32.mrf.mxu0  ;;  %v4163_v11 = vpop.f32.mrf.mxu1  ;;  %4495 = vmatprep.mubr.msk.f32.mxu1 %vm4624_vm1, %v4623_v0 }
 0x12d   :  { %vm628_vm8 = vcmp.gt.f32.partialorder %v441_v55, 0.0  ;;  %v685_v25 = vmul.f32 0.01, %v441_v55  ;;  %vm1378_vm9 = vcmp.gt.f32.partialorder %v1191_v57, 0.0  ;;  %v1435_v33 = vmul.f32 0.01, %v1191_v57 }
 0x12e   :  { %v445_v34 = vpop.f32.mrf.mxu0  ;;  %v1195_v39 = vpop.f32.mrf.mxu1  ;;  %4317 = vmatmul.mubr.msk.f32.gmra.mxu0 %vm82_vm0, %v3446_v24  ;;  %4496 = vmatmul.mubr.msk.f32.gmra.mxu1 %vm82_vm0, %v3560_v10  ;;  %v3561_v24 = vld [vmem:[%s7037_s0 + $0x5e0] sm:$0xff] }
 0x12f   :  { %v5760_v22 = vsel %vm628_vm8, %v441_v55, %v685_v25  ;;  %v5762_v9 = vsel %vm1378_vm9, %v1191_v57, %v1435_v33  ;;  %v446_v8 = vadd.f32 %v5262_v40, %v445_v34  ;;  %v1196_v11 = vadd.f32 %v5262_v40, %v1195_v39  ;;  %4319 = vmatprep.mubr.msk.f32.mxu0 %vm4624_vm1, %v4623_v0  ;;  %v3448_v55 = vld [vmem:[%s7037_s0 + $0x420] sm:$0xff] }
 0x130   :  { %7112 = vst [vmem:[#allocation5_spill] sm:$0xff] %v5760_v22  ;;  %7113 = vst [vmem:[#allocation6_spill] sm:$0xff] %v5762_v9  ;;  %v3987_v57 = vpop.f32.mrf.mxu0  ;;  %v4166_v10 = vpop.f32.mrf.mxu1  ;;  %4498 = vmatprep.mubr.msk.f32.mxu1 %vm4624_vm1, %v4623_v0 }
 0x131   :  { %vm629_vm10 = vcmp.gt.f32.partialorder %v446_v8, 0.0  ;;  %v686_v25 = vmul.f32 0.01, %v446_v8  ;;  %vm1379_vm11 = vcmp.gt.f32.partialorder %v1196_v11, 0.0  ;;  %v1436_v33 = vmul.f32 0.01, %v1196_v11 }
 0x132   :  { %v450_v34 = vpop.f32.mrf.mxu0  ;;  %v1200_v39 = vpop.f32.mrf.mxu1  ;;  %4320 = vmatmul.mubr.msk.f32.gmra.mxu0 %vm82_vm0, %v3447_v5  ;;  %4499 = vmatmul.mubr.msk.f32.gmra.mxu1 %vm82_vm0, %v3561_v24  ;;  %v3562_v5 = vld [vmem:[%s7037_s0 + $0x5e8] sm:$0xff] }
 0x133   :  { %v5780_v59 = vsel %vm629_vm10, %v446_v8, %v686_v25  ;;  %v5782_v35 = vsel %vm1379_vm11, %v1196_v11, %v1436_v33  ;;  %v451_v57 = vadd.f32 %v5262_v40, %v450_v34  ;;  %v1201_v10 = vadd.f32 %v5262_v40, %v1200_v39  ;;  %4322 = vmatprep.mubr.msk.f32.mxu0 %vm4624_vm1, %v4623_v0 }
 0x134   :  { %7114 = vst [vmem:[#allocation7_spill] sm:$0xff] %v5780_v59  ;;  %7115 = vst [vmem:[#allocation8_spill] sm:$0xff] %v5782_v35  ;;  %v3990_v11 = vpop.f32.mrf.mxu0  ;;  %v4169_v24 = vpop.f32.mrf.mxu1  ;;  %4501 = vmatprep.mubr.msk.f32.mxu1 %vm4624_vm1, %v4623_v0 }
 0x135   :  { %vm630_vm12 = vcmp.gt.f32.partialorder %v451_v57, 0.0  ;;  %v687_v40 = vmul.f32 0.01, %v451_v57  ;;  %vm1380_vm13 = vcmp.gt.f32.partialorder %v1201_v10, 0.0  ;;  %v1437_v25 = vmul.f32 0.01, %v1201_v10 }
 0x136   :  { %v455_v33 = vpop.f32.mrf.mxu0  ;;  %v1205_v34 = vpop.f32.mrf.mxu1  ;;  %4323 = vmatmul.mubr.msk.f32.gmra.mxu0 %vm82_vm0, %v3448_v55  ;;  %4502 = vmatmul.mubr.msk.f32.gmra.mxu1 %vm82_vm0, %v3562_v5  ;;  %v5807_v11 = vld [vmem:[%s7038_s2] ss:$0 sm:$0xff]  ;;  %v3449_v55 = vld [vmem:[%s7037_s0 + $0x428] sm:$0xff] }
 0x137   :  { %v5800_v39 = vsel %vm630_vm12, %v451_v57, %v687_v40  ;;  %v5802_v9 = vsel %vm1380_vm13, %v1201_v10, %v1437_v25  ;;  %v456_v24 = vadd.f32 %v5807_v11, %v455_v33  ;;  %v1206_v8 = vadd.f32 %v5807_v11, %v1205_v34  ;;  %4325 = vmatprep.mubr.msk.f32.mxu0 %vm4624_vm1, %v4623_v0  ;;  %v3563_v57 = vld [vmem:[%s7037_s0 + $0x5f0] sm:$0xff] }
 0x138   :  { %7116 = vst [vmem:[#allocation9_spill] sm:$0xff] %v5800_v39  ;;  %7117 = vst [vmem:[#allocation10_spill] sm:$0xff] %v5802_v9  ;;  %v3993_v5 = vpop.f32.mrf.mxu0  ;;  %v4172_v40 = vpop.f32.mrf.mxu1  ;;  %4504 = vmatprep.mubr.msk.f32.mxu1 %vm4624_vm1, %v4623_v0  ;;  %v3450_v10 = vld [vmem:[%s7037_s0 + $0x430] sm:$0xff] }
 0x139   :  { %vm631_vm14 = vcmp.gt.f32.partialorder %v456_v24, 0.0  ;;  %v688_v25 = vmul.f32 0.01, %v456_v24  ;;  %vm1381_vm15 = vcmp.gt.f32.partialorder %v1206_v8, 0.0  ;;  %v1438_v33 = vmul.f32 0.01, %v1206_v8 }
 0x13a   :  { %v460_v34 = vpop.f32.mrf.mxu0  ;;  %v1210_v35 = vpop.f32.mrf.mxu1  ;;  %4326 = vmatmul.mubr.msk.f32.gmra.mxu0 %vm82_vm0, %v3449_v55  ;;  %4505 = vmatmul.mubr.msk.f32.gmra.mxu1 %vm82_vm0, %v3563_v57  ;;  %v3564_v55 = vld [vmem:[%s7037_s0 + $0x5f8] sm:$0xff] }
 0x13b   :  { %v5825_v59 = vsel %vm631_vm14, %v456_v24, %v688_v25  ;;  %v5827_v22 = vsel %vm1381_vm15, %v1206_v8, %v1438_v33  ;;  %v461_v5 = vadd.f32 %v5807_v11, %v460_v34  ;;  %v1211_v40 = vadd.f32 %v5807_v11, %v1210_v35  ;;  %4328 = vmatprep.mubr.msk.f32.mxu0 %vm4624_vm1, %v4623_v0  ;;  %v3451_v24 = vld [vmem:[%s7037_s0 + $0x438] sm:$0xff] }
 0x13c   :  { %7118 = vst [vmem:[#allocation11_spill] sm:$0xff] %v5825_v59  ;;  %7119 = vst [vmem:[#allocation12_spill] sm:$0xff] %v5827_v22  ;;  %v3996_v8 = vpop.f32.mrf.mxu0  ;;  %v4175_v57 = vpop.f32.mrf.mxu1  ;;  %4507 = vmatprep.mubr.msk.f32.mxu1 %vm4624_vm1, %v4623_v0 }
 0x13d   :  { %vm632_vm2 = vcmp.gt.f32.partialorder %v461_v5, 0.0  ;;  %v689_v35 = vmul.f32 0.01, %v461_v5  ;;  %vm1382_vm3 = vcmp.gt.f32.partialorder %v1211_v40, 0.0  ;;  %v1439_v25 = vmul.f32 0.01, %v1211_v40 }
 0x13e   :  { %v465_v33 = vpop.f32.mrf.mxu0  ;;  %v1215_v34 = vpop.f32.mrf.mxu1  ;;  %4329 = vmatmul.mubr.msk.f32.gmra.mxu0 %vm82_vm0, %v3450_v10  ;;  %4508 = vmatmul.mubr.msk.f32.gmra.mxu1 %vm82_vm0, %v3564_v55  ;;  %v3565_v10 = vld [vmem:[%s7037_s0 + $0x600] sm:$0xff] }
 0x13f   :  { %v5845_v9 = vsel %vm632_vm2, %v461_v5, %v689_v35  ;;  %v5847_v39 = vsel %vm1382_vm3, %v1211_v40, %v1439_v25  ;;  %v466_v8 = vadd.f32 %v5807_v11, %v465_v33  ;;  %v1216_v57 = vadd.f32 %v5807_v11, %v1215_v34  ;;  %4331 = vmatprep.mubr.msk.f32.mxu0 %vm4624_vm1, %v4623_v0  ;;  %v3452_v5 = vld [vmem:[%s7037_s0 + $0x440] sm:$0xff] }
 0x140   :  { %7120 = vst [vmem:[#allocation13_spill] sm:$0xff] %v5845_v9  ;;  %7121 = vst [vmem:[#allocation14_spill] sm:$0xff] %v5847_v39  ;;  %v3999_v40 = vpop.f32.mrf.mxu0  ;;  %v4178_v55 = vpop.f32.mrf.mxu1  ;;  %4510 = vmatprep.mubr.msk.f32.mxu1 %vm4624_vm1, %v4623_v0 }
 0x141   :  { %vm633_vm4 = vcmp.gt.f32.partialorder %v466_v8, 0.0  ;;  %v690_v35 = vmul.f32 0.01, %v466_v8  ;;  %vm1383_vm5 = vcmp.gt.f32.partialorder %v1216_v57, 0.0  ;;  %v1440_v25 = vmul.f32 0.01, %v1216_v57 }
 0x142   :  { %v470_v33 = vpop.f32.mrf.mxu0  ;;  %v1220_v34 = vpop.f32.mrf.mxu1  ;;  %4332 = vmatmul.mubr.msk.f32.gmra.mxu0 %vm82_vm0, %v3451_v24  ;;  %4511 = vmatmul.mubr.msk.f32.gmra.mxu1 %vm82_vm0, %v3565_v10  ;;  %v3566_v24 = vld [vmem:[%s7037_s0 + $0x608] sm:$0xff] }
 0x143   :  { %v5865_v22 = vsel %vm633_vm4, %v466_v8, %v690_v35  ;;  %v5867_v59 = vsel %vm1383_vm5, %v1216_v57, %v1440_v25  ;;  %v471_v40 = vadd.f32 %v5807_v11, %v470_v33  ;;  %v1221_v55 = vadd.f32 %v5807_v11, %v1220_v34  ;;  %4334 = vmatprep.mubr.msk.f32.mxu0 %vm4624_vm1, %v4623_v0  ;;  %v3453_v8 = vld [vmem:[%s7037_s0 + $0x448] sm:$0xff] }
 0x144   :  { %7122 = vst [vmem:[#allocation15_spill] sm:$0xff] %v5865_v22  ;;  %7123 = vst [vmem:[#allocation16_spill] sm:$0xff] %v5867_v59  ;;  %v4002_v57 = vpop.f32.mrf.mxu0  ;;  %v4181_v10 = vpop.f32.mrf.mxu1  ;;  %4513 = vmatprep.mubr.msk.f32.mxu1 %vm4624_vm1, %v4623_v0 }
 0x145   :  { %vm634_vm6 = vcmp.gt.f32.partialorder %v471_v40, 0.0  ;;  %v691_v35 = vmul.f32 0.01, %v471_v40  ;;  %vm1384_vm7 = vcmp.gt.f32.partialorder %v1221_v55, 0.0  ;;  %v1441_v25 = vmul.f32 0.01, %v1221_v55 }
 0x146   :  { %v475_v33 = vpop.f32.mrf.mxu0  ;;  %v1225_v34 = vpop.f32.mrf.mxu1  ;;  %4335 = vmatmul.mubr.msk.f32.gmra.mxu0 %vm82_vm0, %v3452_v5  ;;  %4514 = vmatmul.mubr.msk.f32.gmra.mxu1 %vm82_vm0, %v3566_v24  ;;  %v3567_v5 = vld [vmem:[%s7037_s0 + $0x610] sm:$0xff] }
 0x147   :  { %v5885_v39 = vsel %vm634_vm6, %v471_v40, %v691_v35  ;;  %v5887_v9 = vsel %vm1384_vm7, %v1221_v55, %v1441_v25  ;;  %v476_v57 = vadd.f32 %v5807_v11, %v475_v33  ;;  %v1226_v10 = vadd.f32 %v5807_v11, %v1225_v34  ;;  %4337 = vmatprep.mubr.msk.f32.mxu0 %vm4624_vm1, %v4623_v0  ;;  %v3454_v40 = vld [vmem:[%s7037_s0 + $0x450] sm:$0xff] }
 0x148   :  { %7124 = vst [vmem:[#allocation17_spill] sm:$0xff] %v5885_v39  ;;  %7125 = vst [vmem:[#allocation18_spill] sm:$0xff] %v5887_v9  ;;  %v4005_v55 = vpop.f32.mrf.mxu0  ;;  %v4184_v24 = vpop.f32.mrf.mxu1  ;;  %4516 = vmatprep.mubr.msk.f32.mxu1 %vm4624_vm1, %v4623_v0 }
 0x149   :  { %vm635_vm8 = vcmp.gt.f32.partialorder %v476_v57, 0.0  ;;  %v692_v35 = vmul.f32 0.01, %v476_v57  ;;  %vm1385_vm9 = vcmp.gt.f32.partialorder %v1226_v10, 0.0  ;;  %v1442_v25 = vmul.f32 0.01, %v1226_v10 }
 0x14a   :  { %v480_v33 = vpop.f32.mrf.mxu0  ;;  %v1230_v34 = vpop.f32.mrf.mxu1  ;;  %4338 = vmatmul.mubr.msk.f32.gmra.mxu0 %vm82_vm0, %v3453_v8  ;;  %4517 = vmatmul.mubr.msk.f32.gmra.mxu1 %vm82_vm0, %v3567_v5  ;;  %v3568_v8 = vld [vmem:[%s7037_s0 + $0x618] sm:$0xff] }
 0x14b   :  { %v5905_v59 = vsel %vm635_vm8, %v476_v57, %v692_v35  ;;  %v5907_v22 = vsel %vm1385_vm9, %v1226_v10, %v1442_v25  ;;  %v481_v55 = vadd.f32 %v5807_v11, %v480_v33  ;;  %v1231_v24 = vadd.f32 %v5807_v11, %v1230_v34  ;;  %4340 = vmatprep.mubr.msk.f32.mxu0 %vm4624_vm1, %v4623_v0  ;;  %v3455_v57 = vld [vmem:[%s7037_s0 + $0x458] sm:$0xff] }
 0x14c   :  { %7126 = vst [vmem:[#allocation19_spill] sm:$0xff] %v5905_v59  ;;  %7127 = vst [vmem:[#allocation20_spill] sm:$0xff] %v5907_v22  ;;  %v4008_v10 = vpop.f32.mrf.mxu0  ;;  %v4187_v5 = vpop.f32.mrf.mxu1  ;;  %4519 = vmatprep.mubr.msk.f32.mxu1 %vm4624_vm1, %v4623_v0 }
 0x14d   :  { %vm636_vm10 = vcmp.gt.f32.partialorder %v481_v55, 0.0  ;;  %v693_v35 = vmul.f32 0.01, %v481_v55  ;;  %vm1386_vm11 = vcmp.gt.f32.partialorder %v1231_v24, 0.0  ;;  %v1443_v25 = vmul.f32 0.01, %v1231_v24 }
 0x14e   :  { %v485_v33 = vpop.f32.mrf.mxu0  ;;  %v1235_v34 = vpop.f32.mrf.mxu1  ;;  %4341 = vmatmul.mubr.msk.f32.gmra.mxu0 %vm82_vm0, %v3454_v40  ;;  %4520 = vmatmul.mubr.msk.f32.gmra.mxu1 %vm82_vm0, %v3568_v8  ;;  %v3569_v40 = vld [vmem:[%s7037_s0 + $0x620] sm:$0xff] }
 0x14f   :  { %v5925_v9 = vsel %vm636_vm10, %v481_v55, %v693_v35  ;;  %v5927_v39 = vsel %vm1386_vm11, %v1231_v24, %v1443_v25  ;;  %v486_v10 = vadd.f32 %v5807_v11, %v485_v33  ;;  %v1236_v5 = vadd.f32 %v5807_v11, %v1235_v34  ;;  %4343 = vmatprep.mubr.msk.f32.mxu0 %vm4624_vm1, %v4623_v0  ;;  %v3456_v55 = vld [vmem:[%s7037_s0 + $0x460] sm:$0xff] }
 0x150   :  { %7128 = vst [vmem:[#allocation21_spill] sm:$0xff] %v5925_v9  ;;  %7129 = vst [vmem:[#allocation22_spill] sm:$0xff] %v5927_v39  ;;  %v4011_v24 = vpop.f32.mrf.mxu0  ;;  %v4190_v8 = vpop.f32.mrf.mxu1  ;;  %4522 = vmatprep.mubr.msk.f32.mxu1 %vm4624_vm1, %v4623_v0 }
 0x151   :  { %vm637_vm12 = vcmp.gt.f32.partialorder %v486_v10, 0.0  ;;  %v694_v35 = vmul.f32 0.01, %v486_v10  ;;  %vm1387_vm13 = vcmp.gt.f32.partialorder %v1236_v5, 0.0  ;;  %v1444_v25 = vmul.f32 0.01, %v1236_v5 }
 0x152   :  { %v490_v33 = vpop.f32.mrf.mxu0  ;;  %v1240_v34 = vpop.f32.mrf.mxu1  ;;  %4344 = vmatmul.mubr.msk.f32.gmra.mxu0 %vm82_vm0, %v3455_v57  ;;  %4523 = vmatmul.mubr.msk.f32.gmra.mxu1 %vm82_vm0, %v3569_v40  ;;  %v3570_v57 = vld [vmem:[%s7037_s0 + $0x628] sm:$0xff] }
 0x153   :  { %v5945_v22 = vsel %vm637_vm12, %v486_v10, %v694_v35  ;;  %v5947_v59 = vsel %vm1387_vm13, %v1236_v5, %v1444_v25  ;;  %v491_v24 = vadd.f32 %v5807_v11, %v490_v33  ;;  %v1241_v8 = vadd.f32 %v5807_v11, %v1240_v34  ;;  %4346 = vmatprep.mubr.msk.f32.mxu0 %vm4624_vm1, %v4623_v0  ;;  %v3457_v10 = vld [vmem:[%s7037_s0 + $0x468] sm:$0xff] }
 0x154   :  { %7130 = vst [vmem:[#allocation23_spill] sm:$0xff] %v5945_v22  ;;  %7131 = vst [vmem:[#allocation24_spill] sm:$0xff] %v5947_v59  ;;  %v4014_v5 = vpop.f32.mrf.mxu0  ;;  %v4193_v40 = vpop.f32.mrf.mxu1  ;;  %4525 = vmatprep.mubr.msk.f32.mxu1 %vm4624_vm1, %v4623_v0 }
 0x155   :  { %vm638_vm14 = vcmp.gt.f32.partialorder %v491_v24, 0.0  ;;  %v695_v35 = vmul.f32 0.01, %v491_v24  ;;  %vm1388_vm15 = vcmp.gt.f32.partialorder %v1241_v8, 0.0  ;;  %v1445_v25 = vmul.f32 0.01, %v1241_v8 }
 0x156   :  { %v495_v33 = vpop.f32.mrf.mxu0  ;;  %v1245_v34 = vpop.f32.mrf.mxu1  ;;  %4347 = vmatmul.mubr.msk.f32.gmra.mxu0 %vm82_vm0, %v3456_v55  ;;  %4526 = vmatmul.mubr.msk.f32.gmra.mxu1 %vm82_vm0, %v3570_v57  ;;  %v3571_v55 = vld [vmem:[%s7037_s0 + $0x630] sm:$0xff] }
 0x157   :  { %v5965_v39 = vsel %vm638_vm14, %v491_v24, %v695_v35  ;;  %v5967_v9 = vsel %vm1388_vm15, %v1241_v8, %v1445_v25  ;;  %v496_v5 = vadd.f32 %v5807_v11, %v495_v33  ;;  %v1246_v40 = vadd.f32 %v5807_v11, %v1245_v34  ;;  %4349 = vmatprep.mubr.msk.f32.mxu0 %vm4624_vm1, %v4623_v0  ;;  %v3458_v24 = vld [vmem:[%s7037_s0 + $0x470] sm:$0xff] }
 0x158   :  { %7132 = vst [vmem:[#allocation25_spill] sm:$0xff] %v5965_v39  ;;  %7133 = vst [vmem:[#allocation26_spill] sm:$0xff] %v5967_v9  ;;  %v4017_v8 = vpop.f32.mrf.mxu0  ;;  %v4196_v57 = vpop.f32.mrf.mxu1  ;;  %4528 = vmatprep.mubr.msk.f32.mxu1 %vm4624_vm1, %v4623_v0 }
 0x159   :  { %vm639_vm2 = vcmp.gt.f32.partialorder %v496_v5, 0.0  ;;  %v696_v35 = vmul.f32 0.01, %v496_v5  ;;  %vm1389_vm3 = vcmp.gt.f32.partialorder %v1246_v40, 0.0  ;;  %v1446_v25 = vmul.f32 0.01, %v1246_v40 }
 0x15a   :  { %v500_v33 = vpop.f32.mrf.mxu0  ;;  %v1250_v34 = vpop.f32.mrf.mxu1  ;;  %4350 = vmatmul.mubr.msk.f32.gmra.mxu0 %vm82_vm0, %v3457_v10  ;;  %4529 = vmatmul.mubr.msk.f32.gmra.mxu1 %vm82_vm0, %v3571_v55  ;;  %v3572_v10 = vld [vmem:[%s7037_s0 + $0x638] sm:$0xff] }
 0x15b   :  { %v5985_v59 = vsel %vm639_vm2, %v496_v5, %v696_v35  ;;  %v5987_v22 = vsel %vm1389_vm3, %v1246_v40, %v1446_v25  ;;  %v501_v8 = vadd.f32 %v5807_v11, %v500_v33  ;;  %v1251_v57 = vadd.f32 %v5807_v11, %v1250_v34  ;;  %4352 = vmatprep.mubr.msk.f32.mxu0 %vm4624_vm1, %v4623_v0  ;;  %v3459_v5 = vld [vmem:[%s7037_s0 + $0x478] sm:$0xff] }
 0x15c   :  { %7134 = vst [vmem:[#allocation27_spill] sm:$0xff] %v5985_v59  ;;  %7135 = vst [vmem:[#allocation28_spill] sm:$0xff] %v5987_v22  ;;  %v4020_v40 = vpop.f32.mrf.mxu0  ;;  %v4199_v55 = vpop.f32.mrf.mxu1  ;;  %4531 = vmatprep.mubr.msk.f32.mxu1 %vm4624_vm1, %v4623_v0 }
 0x15d   :  { %vm640_vm4 = vcmp.gt.f32.partialorder %v501_v8, 0.0  ;;  %v697_v35 = vmul.f32 0.01, %v501_v8  ;;  %vm1390_vm5 = vcmp.gt.f32.partialorder %v1251_v57, 0.0  ;;  %v1447_v25 = vmul.f32 0.01, %v1251_v57 }
 0x15e   :  { %v505_v33 = vpop.f32.mrf.mxu0  ;;  %v1255_v34 = vpop.f32.mrf.mxu1  ;;  %4353 = vmatmul.mubr.msk.f32.gmra.mxu0 %vm82_vm0, %v3458_v24  ;;  %4532 = vmatmul.mubr.msk.f32.gmra.mxu1 %vm82_vm0, %v3572_v10  ;;  %v3573_v24 = vld [vmem:[%s7037_s0 + $0x640] sm:$0xff] }
 0x15f   :  { %v6005_v9 = vsel %vm640_vm4, %v501_v8, %v697_v35  ;;  %v6007_v39 = vsel %vm1390_vm5, %v1251_v57, %v1447_v25  ;;  %v506_v40 = vadd.f32 %v5807_v11, %v505_v33  ;;  %v1256_v55 = vadd.f32 %v5807_v11, %v1255_v34  ;;  %4355 = vmatprep.mubr.msk.f32.mxu0 %vm4624_vm1, %v4623_v0  ;;  %v3460_v8 = vld [vmem:[%s7037_s0 + $0x480] sm:$0xff] }
 0x160   :  { %7136 = vst [vmem:[#allocation29_spill] sm:$0xff] %v6005_v9  ;;  %7137 = vst [vmem:[#allocation30_spill] sm:$0xff] %v6007_v39  ;;  %v4023_v57 = vpop.f32.mrf.mxu0  ;;  %v4202_v10 = vpop.f32.mrf.mxu1  ;;  %4534 = vmatprep.mubr.msk.f32.mxu1 %vm4624_vm1, %v4623_v0 }
 0x161   :  { %vm641_vm6 = vcmp.gt.f32.partialorder %v506_v40, 0.0  ;;  %v698_v35 = vmul.f32 0.01, %v506_v40  ;;  %vm1391_vm7 = vcmp.gt.f32.partialorder %v1256_v55, 0.0  ;;  %v1448_v25 = vmul.f32 0.01, %v1256_v55 }
 0x162   :  { %v510_v33 = vpop.f32.mrf.mxu0  ;;  %v1260_v34 = vpop.f32.mrf.mxu1  ;;  %4356 = vmatmul.mubr.msk.f32.gmra.mxu0 %vm82_vm0, %v3459_v5  ;;  %4535 = vmatmul.mubr.msk.f32.gmra.mxu1 %vm82_vm0, %v3573_v24  ;;  %v3574_v5 = vld [vmem:[%s7037_s0 + $0x648] sm:$0xff] }
 0x163   :  { %v6025_v22 = vsel %vm641_vm6, %v506_v40, %v698_v35  ;;  %v6027_v59 = vsel %vm1391_vm7, %v1256_v55, %v1448_v25  ;;  %v511_v57 = vadd.f32 %v5807_v11, %v510_v33  ;;  %v1261_v10 = vadd.f32 %v5807_v11, %v1260_v34  ;;  %4358 = vmatprep.mubr.msk.f32.mxu0 %vm4624_vm1, %v4623_v0  ;;  %v3461_v40 = vld [vmem:[%s7037_s0 + $0x488] sm:$0xff] }
 0x164   :  { %7138 = vst [vmem:[#allocation31_spill] sm:$0xff] %v6025_v22  ;;  %7139 = vst [vmem:[#allocation32_spill] sm:$0xff] %v6027_v59  ;;  %v4026_v55 = vpop.f32.mrf.mxu0  ;;  %v4205_v24 = vpop.f32.mrf.mxu1  ;;  %4537 = vmatprep.mubr.msk.f32.mxu1 %vm4624_vm1, %v4623_v0 }
 0x165   :  { %vm642_vm8 = vcmp.gt.f32.partialorder %v511_v57, 0.0  ;;  %v699_v35 = vmul.f32 0.01, %v511_v57  ;;  %vm1392_vm9 = vcmp.gt.f32.partialorder %v1261_v10, 0.0  ;;  %v1449_v25 = vmul.f32 0.01, %v1261_v10 }
 0x166   :  { %v515_v33 = vpop.f32.mrf.mxu0  ;;  %v1265_v34 = vpop.f32.mrf.mxu1  ;;  %4359 = vmatmul.mubr.msk.f32.gmra.mxu0 %vm82_vm0, %v3460_v8  ;;  %4538 = vmatmul.mubr.msk.f32.gmra.mxu1 %vm82_vm0, %v3574_v5  ;;  %v3575_v8 = vld [vmem:[%s7037_s0 + $0x650] sm:$0xff] }
 0x167   :  { %v6045_v39 = vsel %vm642_vm8, %v511_v57, %v699_v35  ;;  %v6047_v9 = vsel %vm1392_vm9, %v1261_v10, %v1449_v25  ;;  %v516_v55 = vadd.f32 %v5807_v11, %v515_v33  ;;  %v1266_v24 = vadd.f32 %v5807_v11, %v1265_v34  ;;  %4361 = vmatprep.mubr.msk.f32.mxu0 %vm4624_vm1, %v4623_v0  ;;  %v3462_v57 = vld [vmem:[%s7037_s0 + $0x490] sm:$0xff] }
 0x168   :  { %7140 = vst [vmem:[#allocation33_spill] sm:$0xff] %v6045_v39  ;;  %7141 = vst [vmem:[#allocation34_spill] sm:$0xff] %v6047_v9  ;;  %v4029_v10 = vpop.f32.mrf.mxu0  ;;  %v4208_v5 = vpop.f32.mrf.mxu1  ;;  %4540 = vmatprep.mubr.msk.f32.mxu1 %vm4624_vm1, %v4623_v0 }
 0x169   :  { %vm643_vm10 = vcmp.gt.f32.partialorder %v516_v55, 0.0  ;;  %v700_v35 = vmul.f32 0.01, %v516_v55  ;;  %vm1393_vm11 = vcmp.gt.f32.partialorder %v1266_v24, 0.0  ;;  %v1450_v25 = vmul.f32 0.01, %v1266_v24 }
 0x16a   :  { %v520_v33 = vpop.f32.mrf.mxu0  ;;  %v1270_v34 = vpop.f32.mrf.mxu1  ;;  %4362 = vmatmul.mubr.msk.f32.gmra.mxu0 %vm82_vm0, %v3461_v40  ;;  %4541 = vmatmul.mubr.msk.f32.gmra.mxu1 %vm82_vm0, %v3575_v8  ;;  %v3576_v40 = vld [vmem:[%s7037_s0 + $0x658] sm:$0xff] }
 0x16b   :  { %v6065_v59 = vsel %vm643_vm10, %v516_v55, %v700_v35  ;;  %v6067_v22 = vsel %vm1393_vm11, %v1266_v24, %v1450_v25  ;;  %v521_v10 = vadd.f32 %v5807_v11, %v520_v33  ;;  %v1271_v5 = vadd.f32 %v5807_v11, %v1270_v34  ;;  %4364 = vmatprep.mubr.msk.f32.mxu0 %vm4624_vm1, %v4623_v0  ;;  %v3463_v55 = vld [vmem:[%s7037_s0 + $0x498] sm:$0xff] }
 0x16c   :  { %7142 = vst [vmem:[#allocation35_spill] sm:$0xff] %v6065_v59  ;;  %7143 = vst [vmem:[#allocation36_spill] sm:$0xff] %v6067_v22  ;;  %v4032_v24 = vpop.f32.mrf.mxu0  ;;  %v4211_v8 = vpop.f32.mrf.mxu1  ;;  %4543 = vmatprep.mubr.msk.f32.mxu1 %vm4624_vm1, %v4623_v0 }
 0x16d   :  { %vm644_vm12 = vcmp.gt.f32.partialorder %v521_v10, 0.0  ;;  %v701_v35 = vmul.f32 0.01, %v521_v10  ;;  %vm1394_vm13 = vcmp.gt.f32.partialorder %v1271_v5, 0.0  ;;  %v1451_v25 = vmul.f32 0.01, %v1271_v5 }
 0x16e   :  { %v525_v33 = vpop.f32.mrf.mxu0  ;;  %v1275_v34 = vpop.f32.mrf.mxu1  ;;  %4365 = vmatmul.mubr.msk.f32.gmra.mxu0 %vm82_vm0, %v3462_v57  ;;  %4544 = vmatmul.mubr.msk.f32.gmra.mxu1 %vm82_vm0, %v3576_v40  ;;  %v3577_v57 = vld [vmem:[%s7037_s0 + $0x660] sm:$0xff] }
 0x16f   :  { %v6085_v9 = vsel %vm644_vm12, %v521_v10, %v701_v35  ;;  %v6087_v39 = vsel %vm1394_vm13, %v1271_v5, %v1451_v25  ;;  %v526_v24 = vadd.f32 %v5807_v11, %v525_v33  ;;  %v1276_v8 = vadd.f32 %v5807_v11, %v1275_v34  ;;  %4367 = vmatprep.mubr.msk.f32.mxu0 %vm4624_vm1, %v4623_v0  ;;  %v3464_v10 = vld [vmem:[%s7037_s0 + $0x4a0] sm:$0xff] }
 0x170   :  { %7144 = vst [vmem:[#allocation37_spill] sm:$0xff] %v6085_v9  ;;  %7145 = vst [vmem:[#allocation38_spill] sm:$0xff] %v6087_v39  ;;  %v4035_v5 = vpop.f32.mrf.mxu0  ;;  %v4214_v40 = vpop.f32.mrf.mxu1  ;;  %4546 = vmatprep.mubr.msk.f32.mxu1 %vm4624_vm1, %v4623_v0 }
 0x171   :  { %vm645_vm14 = vcmp.gt.f32.partialorder %v526_v24, 0.0  ;;  %v702_v35 = vmul.f32 0.01, %v526_v24  ;;  %vm1395_vm15 = vcmp.gt.f32.partialorder %v1276_v8, 0.0  ;;  %v1452_v25 = vmul.f32 0.01, %v1276_v8 }
 0x172   :  { %v530_v33 = vpop.f32.mrf.mxu0  ;;  %v1280_v34 = vpop.f32.mrf.mxu1  ;;  %4368 = vmatmul.mubr.msk.f32.gmra.mxu0 %vm82_vm0, %v3463_v55  ;;  %4547 = vmatmul.mubr.msk.f32.gmra.mxu1 %vm82_vm0, %v3577_v57  ;;  %v3578_v55 = vld [vmem:[%s7037_s0 + $0x668] sm:$0xff] }
 0x173   :  { %v6105_v22 = vsel %vm645_vm14, %v526_v24, %v702_v35  ;;  %v6107_v59 = vsel %vm1395_vm15, %v1276_v8, %v1452_v25  ;;  %v531_v5 = vadd.f32 %v5807_v11, %v530_v33  ;;  %v1281_v40 = vadd.f32 %v5807_v11, %v1280_v34  ;;  %4370 = vmatprep.mubr.msk.f32.mxu0 %vm4624_vm1, %v4623_v0  ;;  %v3465_v24 = vld [vmem:[%s7037_s0 + $0x4a8] sm:$0xff] }
 0x174   :  { %7146 = vst [vmem:[#allocation39_spill] sm:$0xff] %v6105_v22  ;;  %7147 = vst [vmem:[#allocation40_spill] sm:$0xff] %v6107_v59  ;;  %v4038_v8 = vpop.f32.mrf.mxu0  ;;  %v4217_v57 = vpop.f32.mrf.mxu1  ;;  %4549 = vmatprep.mubr.msk.f32.mxu1 %vm4624_vm1, %v4623_v0 }
 0x175   :  { %vm646_vm2 = vcmp.gt.f32.partialorder %v531_v5, 0.0  ;;  %v703_v35 = vmul.f32 0.01, %v531_v5  ;;  %vm1396_vm3 = vcmp.gt.f32.partialorder %v1281_v40, 0.0  ;;  %v1453_v25 = vmul.f32 0.01, %v1281_v40 }
 0x176   :  { %v535_v33 = vpop.f32.mrf.mxu0  ;;  %v1285_v34 = vpop.f32.mrf.mxu1  ;;  %4371 = vmatmul.mubr.msk.f32.gmra.mxu0 %vm82_vm0, %v3464_v10  ;;  %4550 = vmatmul.mubr.msk.f32.gmra.mxu1 %vm82_vm0, %v3578_v55  ;;  %v3579_v10 = vld [vmem:[%s7037_s0 + $0x670] sm:$0xff] }
 0x177   :  { %v6125_v39 = vsel %vm646_vm2, %v531_v5, %v703_v35  ;;  %v6127_v9 = vsel %vm1396_vm3, %v1281_v40, %v1453_v25  ;;  %v536_v8 = vadd.f32 %v5807_v11, %v535_v33  ;;  %v1286_v57 = vadd.f32 %v5807_v11, %v1285_v34  ;;  %4373 = vmatprep.mubr.msk.f32.mxu0 %vm4624_vm1, %v4623_v0  ;;  %v3466_v5 = vld [vmem:[%s7037_s0 + $0x4b0] sm:$0xff] }
 0x178   :  { %7148 = vst [vmem:[#allocation41_spill] sm:$0xff] %v6125_v39  ;;  %7149 = vst [vmem:[#allocation42_spill] sm:$0xff] %v6127_v9  ;;  %v4041_v40 = vpop.f32.mrf.mxu0  ;;  %v4220_v55 = vpop.f32.mrf.mxu1  ;;  %4552 = vmatprep.mubr.msk.f32.mxu1 %vm4624_vm1, %v4623_v0 }
 0x179   :  { %vm647_vm4 = vcmp.gt.f32.partialorder %v536_v8, 0.0  ;;  %v704_v35 = vmul.f32 0.01, %v536_v8  ;;  %vm1397_vm5 = vcmp.gt.f32.partialorder %v1286_v57, 0.0  ;;  %v1454_v25 = vmul.f32 0.01, %v1286_v57 }
 0x17a   :  { %v540_v33 = vpop.f32.mrf.mxu0  ;;  %v1290_v34 = vpop.f32.mrf.mxu1  ;;  %4374 = vmatmul.mubr.msk.f32.gmra.mxu0 %vm82_vm0, %v3465_v24  ;;  %4553 = vmatmul.mubr.msk.f32.gmra.mxu1 %vm82_vm0, %v3579_v10  ;;  %v3580_v24 = vld [vmem:[%s7037_s0 + $0x678] sm:$0xff] }
 0x17b   :  { %v6145_v59 = vsel %vm647_vm4, %v536_v8, %v704_v35  ;;  %v6147_v22 = vsel %vm1397_vm5, %v1286_v57, %v1454_v25  ;;  %v541_v40 = vadd.f32 %v5807_v11, %v540_v33  ;;  %v1291_v55 = vadd.f32 %v5807_v11, %v1290_v34  ;;  %4376 = vmatprep.mubr.msk.f32.mxu0 %vm4624_vm1, %v4623_v0  ;;  %v3467_v8 = vld [vmem:[%s7037_s0 + $0x4b8] sm:$0xff] }
 0x17c   :  { %7150 = vst [vmem:[#allocation43_spill] sm:$0xff] %v6145_v59  ;;  %7151 = vst [vmem:[#allocation44_spill] sm:$0xff] %v6147_v22  ;;  %v4044_v57 = vpop.f32.mrf.mxu0  ;;  %v4223_v10 = vpop.f32.mrf.mxu1  ;;  %4555 = vmatprep.mubr.msk.f32.mxu1 %vm4624_vm1, %v4623_v0 }
 0x17d   :  { %vm648_vm6 = vcmp.gt.f32.partialorder %v541_v40, 0.0  ;;  %v705_v35 = vmul.f32 0.01, %v541_v40  ;;  %vm1398_vm7 = vcmp.gt.f32.partialorder %v1291_v55, 0.0  ;;  %v1455_v25 = vmul.f32 0.01, %v1291_v55 }
 0x17e   :  { %v545_v33 = vpop.f32.mrf.mxu0  ;;  %v1295_v34 = vpop.f32.mrf.mxu1  ;;  %4377 = vmatmul.mubr.msk.f32.gmra.mxu0 %vm82_vm0, %v3466_v5  ;;  %4556 = vmatmul.mubr.msk.f32.gmra.mxu1 %vm82_vm0, %v3580_v24  ;;  %v3581_v5 = vld [vmem:[%s7037_s0 + $0x680] sm:$0xff] }
 0x17f   :  { %v6165_v9 = vsel %vm648_vm6, %v541_v40, %v705_v35  ;;  %v6167_v39 = vsel %vm1398_vm7, %v1291_v55, %v1455_v25  ;;  %v546_v57 = vadd.f32 %v5807_v11, %v545_v33  ;;  %v1296_v10 = vadd.f32 %v5807_v11, %v1295_v34  ;;  %4379 = vmatprep.mubr.msk.f32.mxu0 %vm4624_vm1, %v4623_v0  ;;  %v3468_v40 = vld [vmem:[%s7037_s0 + $0x4c0] sm:$0xff] }
 0x180   :  { %7152 = vst [vmem:[#allocation45_spill] sm:$0xff] %v6165_v9  ;;  %7153 = vst [vmem:[#allocation46_spill] sm:$0xff] %v6167_v39  ;;  %v4047_v55 = vpop.f32.mrf.mxu0  ;;  %v4226_v24 = vpop.f32.mrf.mxu1  ;;  %4558 = vmatprep.mubr.msk.f32.mxu1 %vm4624_vm1, %v4623_v0 }
 0x181   :  { %vm649_vm8 = vcmp.gt.f32.partialorder %v546_v57, 0.0  ;;  %v706_v35 = vmul.f32 0.01, %v546_v57  ;;  %vm1399_vm9 = vcmp.gt.f32.partialorder %v1296_v10, 0.0  ;;  %v1456_v25 = vmul.f32 0.01, %v1296_v10 }
 0x182   :  { %v550_v33 = vpop.f32.mrf.mxu0  ;;  %v1300_v34 = vpop.f32.mrf.mxu1  ;;  %4380 = vmatmul.mubr.msk.f32.gmra.mxu0 %vm82_vm0, %v3467_v8  ;;  %4559 = vmatmul.mubr.msk.f32.gmra.mxu1 %vm82_vm0, %v3581_v5  ;;  %v3582_v8 = vld [vmem:[%s7037_s0 + $0x688] sm:$0xff] }
 0x183   :  { %v6185_v22 = vsel %vm649_vm8, %v546_v57, %v706_v35  ;;  %v6187_v59 = vsel %vm1399_vm9, %v1296_v10, %v1456_v25  ;;  %v551_v55 = vadd.f32 %v5807_v11, %v550_v33  ;;  %v1301_v24 = vadd.f32 %v5807_v11, %v1300_v34  ;;  %4382 = vmatprep.mubr.msk.f32.mxu0 %vm4624_vm1, %v4623_v0  ;;  %v3469_v57 = vld [vmem:[%s7037_s0 + $0x4c8] sm:$0xff] }
 0x184   :  { %7154 = vst [vmem:[#allocation47_spill] sm:$0xff] %v6185_v22  ;;  %7155 = vst [vmem:[#allocation48_spill] sm:$0xff] %v6187_v59  ;;  %v4050_v10 = vpop.f32.mrf.mxu0  ;;  %v4229_v5 = vpop.f32.mrf.mxu1  ;;  %4561 = vmatprep.mubr.msk.f32.mxu1 %vm4624_vm1, %v4623_v0 }
 0x185   :  { %vm650_vm10 = vcmp.gt.f32.partialorder %v551_v55, 0.0  ;;  %v707_v35 = vmul.f32 0.01, %v551_v55  ;;  %vm1400_vm11 = vcmp.gt.f32.partialorder %v1301_v24, 0.0  ;;  %v1457_v25 = vmul.f32 0.01, %v1301_v24 }
 0x186   :  { %v555_v33 = vpop.f32.mrf.mxu0  ;;  %v1305_v34 = vpop.f32.mrf.mxu1  ;;  %4383 = vmatmul.mubr.msk.f32.gmra.mxu0 %vm82_vm0, %v3468_v40  ;;  %4562 = vmatmul.mubr.msk.f32.gmra.mxu1 %vm82_vm0, %v3582_v8  ;;  %v3583_v40 = vld [vmem:[%s7037_s0 + $0x690] sm:$0xff] }
 0x187   :  { %v6205_v39 = vsel %vm650_vm10, %v551_v55, %v707_v35  ;;  %v6207_v9 = vsel %vm1400_vm11, %v1301_v24, %v1457_v25  ;;  %v556_v10 = vadd.f32 %v5807_v11, %v555_v33  ;;  %v1306_v5 = vadd.f32 %v5807_v11, %v1305_v34  ;;  %4385 = vmatprep.mubr.msk.f32.mxu0 %vm4624_vm1, %v4623_v0  ;;  %v3470_v55 = vld [vmem:[%s7037_s0 + $0x4d0] sm:$0xff] }
 0x188   :  { %7156 = vst [vmem:[#allocation49_spill] sm:$0xff] %v6205_v39  ;;  %7157 = vst [vmem:[#allocation50_spill] sm:$0xff] %v6207_v9  ;;  %v4053_v24 = vpop.f32.mrf.mxu0  ;;  %v4232_v8 = vpop.f32.mrf.mxu1  ;;  %4564 = vmatprep.mubr.msk.f32.mxu1 %vm4624_vm1, %v4623_v0 }
 0x189   :  { %vm651_vm12 = vcmp.gt.f32.partialorder %v556_v10, 0.0  ;;  %v708_v35 = vmul.f32 0.01, %v556_v10  ;;  %vm1401_vm13 = vcmp.gt.f32.partialorder %v1306_v5, 0.0  ;;  %v1458_v25 = vmul.f32 0.01, %v1306_v5 }
 0x18a   :  { %v560_v33 = vpop.f32.mrf.mxu0  ;;  %v1310_v34 = vpop.f32.mrf.mxu1  ;;  %4386 = vmatmul.mubr.msk.f32.gmra.mxu0 %vm82_vm0, %v3469_v57  ;;  %4565 = vmatmul.mubr.msk.f32.gmra.mxu1 %vm82_vm0, %v3583_v40  ;;  %v3584_v57 = vld [vmem:[%s7037_s0 + $0x698] sm:$0xff] }
 0x18b   :  { %v6225_v59 = vsel %vm651_vm12, %v556_v10, %v708_v35  ;;  %v6227_v22 = vsel %vm1401_vm13, %v1306_v5, %v1458_v25  ;;  %v561_v24 = vadd.f32 %v5807_v11, %v560_v33  ;;  %v1311_v8 = vadd.f32 %v5807_v11, %v1310_v34  ;;  %4388 = vmatprep.mubr.msk.f32.mxu0 %vm4624_vm1, %v4623_v0  ;;  %v3471_v10 = vld [vmem:[%s7037_s0 + $0x4d8] sm:$0xff] }
 0x18c   :  { %7158 = vst [vmem:[#allocation51_spill] sm:$0xff] %v6225_v59  ;;  %7159 = vst [vmem:[#allocation52_spill] sm:$0xff] %v6227_v22  ;;  %v4056_v5 = vpop.f32.mrf.mxu0  ;;  %v4235_v40 = vpop.f32.mrf.mxu1  ;;  %4567 = vmatprep.mubr.msk.f32.mxu1 %vm4624_vm1, %v4623_v0 }
 0x18d   :  { %vm652_vm14 = vcmp.gt.f32.partialorder %v561_v24, 0.0  ;;  %v709_v35 = vmul.f32 0.01, %v561_v24  ;;  %vm1402_vm15 = vcmp.gt.f32.partialorder %v1311_v8, 0.0  ;;  %v1459_v25 = vmul.f32 0.01, %v1311_v8 }
 0x18e   :  { %v565_v33 = vpop.f32.mrf.mxu0  ;;  %v1315_v34 = vpop.f32.mrf.mxu1  ;;  %4389 = vmatmul.mubr.msk.f32.gmra.mxu0 %vm82_vm0, %v3470_v55  ;;  %4568 = vmatmul.mubr.msk.f32.gmra.mxu1 %vm82_vm0, %v3584_v57  ;;  %v3585_v55 = vld [vmem:[%s7037_s0 + $0x6a0] sm:$0xff] }
 0x18f   :  { %v6245_v9 = vsel %vm652_vm14, %v561_v24, %v709_v35  ;;  %v6247_v39 = vsel %vm1402_vm15, %v1311_v8, %v1459_v25  ;;  %v566_v5 = vadd.f32 %v5807_v11, %v565_v33  ;;  %v1316_v40 = vadd.f32 %v5807_v11, %v1315_v34  ;;  %4391 = vmatprep.mubr.msk.f32.mxu0 %vm4624_vm1, %v4623_v0  ;;  %v3472_v24 = vld [vmem:[%s7037_s0 + $0x4e0] sm:$0xff] }
 0x190   :  { %7160 = vst [vmem:[#allocation53_spill] sm:$0xff] %v6245_v9  ;;  %7161 = vst [vmem:[#allocation54_spill] sm:$0xff] %v6247_v39  ;;  %v4059_v8 = vpop.f32.mrf.mxu0  ;;  %v4238_v57 = vpop.f32.mrf.mxu1  ;;  %4570 = vmatprep.mubr.msk.f32.mxu1 %vm4624_vm1, %v4623_v0 }
 0x191   :  { %vm653_vm2 = vcmp.gt.f32.partialorder %v566_v5, 0.0  ;;  %v710_v35 = vmul.f32 0.01, %v566_v5  ;;  %vm1403_vm3 = vcmp.gt.f32.partialorder %v1316_v40, 0.0  ;;  %v1460_v25 = vmul.f32 0.01, %v1316_v40 }
 0x192   :  { %v570_v33 = vpop.f32.mrf.mxu0  ;;  %v1320_v34 = vpop.f32.mrf.mxu1  ;;  %4392 = vmatmul.mubr.msk.f32.gmra.mxu0 %vm82_vm0, %v3471_v10  ;;  %4571 = vmatmul.mubr.msk.f32.gmra.mxu1 %vm82_vm0, %v3585_v55  ;;  %v3586_v10 = vld [vmem:[%s7037_s0 + $0x6a8] sm:$0xff] }
 0x193   :  { %v6265_v22 = vsel %vm653_vm2, %v566_v5, %v710_v35  ;;  %v6267_v59 = vsel %vm1403_vm3, %v1316_v40, %v1460_v25  ;;  %v571_v8 = vadd.f32 %v5807_v11, %v570_v33  ;;  %v1321_v57 = vadd.f32 %v5807_v11, %v1320_v34  ;;  %4394 = vmatprep.mubr.msk.f32.mxu0 %vm4624_vm1, %v4623_v0  ;;  %v3473_v5 = vld [vmem:[%s7037_s0 + $0x4e8] sm:$0xff] }
 0x194   :  { %7162 = vst [vmem:[#allocation55_spill] sm:$0xff] %v6265_v22  ;;  %7163 = vst [vmem:[#allocation56_spill] sm:$0xff] %v6267_v59  ;;  %v4062_v40 = vpop.f32.mrf.mxu0  ;;  %v4241_v55 = vpop.f32.mrf.mxu1  ;;  %4573 = vmatprep.mubr.msk.f32.mxu1 %vm4624_vm1, %v4623_v0 }
 0x195   :  { %vm654_vm4 = vcmp.gt.f32.partialorder %v571_v8, 0.0  ;;  %v711_v35 = vmul.f32 0.01, %v571_v8  ;;  %vm1404_vm5 = vcmp.gt.f32.partialorder %v1321_v57, 0.0  ;;  %v1461_v25 = vmul.f32 0.01, %v1321_v57 }
 0x196   :  { %v575_v33 = vpop.f32.mrf.mxu0  ;;  %v1325_v34 = vpop.f32.mrf.mxu1  ;;  %4395 = vmatmul.mubr.msk.f32.gmra.mxu0 %vm82_vm0, %v3472_v24  ;;  %4574 = vmatmul.mubr.msk.f32.gmra.mxu1 %vm82_vm0, %v3586_v10  ;;  %v3587_v24 = vld [vmem:[%s7037_s0 + $0x6b0] sm:$0xff] }
 0x197   :  { %v6285_v39 = vsel %vm654_vm4, %v571_v8, %v711_v35  ;;  %v6287_v9 = vsel %vm1404_vm5, %v1321_v57, %v1461_v25  ;;  %v576_v40 = vadd.f32 %v5807_v11, %v575_v33  ;;  %v1326_v55 = vadd.f32 %v5807_v11, %v1325_v34  ;;  %4397 = vmatprep.mubr.msk.f32.mxu0 %vm4624_vm1, %v4623_v0  ;;  %v3474_v8 = vld [vmem:[%s7037_s0 + $0x4f0] sm:$0xff] }
 0x198   :  { %7164 = vst [vmem:[#allocation57_spill] sm:$0xff] %v6285_v39  ;;  %7165 = vst [vmem:[#allocation58_spill] sm:$0xff] %v6287_v9  ;;  %v4065_v57 = vpop.f32.mrf.mxu0  ;;  %v4244_v10 = vpop.f32.mrf.mxu1  ;;  %4576 = vmatprep.mubr.msk.f32.mxu1 %vm4624_vm1, %v4623_v0 }
 0x199   :  { %vm655_vm6 = vcmp.gt.f32.partialorder %v576_v40, 0.0  ;;  %v712_v35 = vmul.f32 0.01, %v576_v40  ;;  %vm1405_vm7 = vcmp.gt.f32.partialorder %v1326_v55, 0.0  ;;  %v1462_v25 = vmul.f32 0.01, %v1326_v55 }
 0x19a   :  { %v580_v33 = vpop.f32.mrf.mxu0  ;;  %v1330_v34 = vpop.f32.mrf.mxu1  ;;  %4398 = vmatmul.mubr.msk.f32.gmra.mxu0 %vm82_vm0, %v3473_v5  ;;  %4577 = vmatmul.mubr.msk.f32.gmra.mxu1 %vm82_vm0, %v3587_v24  ;;  %v3588_v5 = vld [vmem:[%s7037_s0 + $0x6b8] sm:$0xff] }
 0x19b   :  { %v6305_v59 = vsel %vm655_vm6, %v576_v40, %v712_v35  ;;  %v6307_v22 = vsel %vm1405_vm7, %v1326_v55, %v1462_v25  ;;  %v581_v57 = vadd.f32 %v5807_v11, %v580_v33  ;;  %v1331_v10 = vadd.f32 %v5807_v11, %v1330_v34  ;;  %4400 = vmatprep.mubr.msk.f32.mxu0 %vm4624_vm1, %v4623_v0  ;;  %v3475_v40 = vld [vmem:[%s7037_s0 + $0x4f8] sm:$0xff] }
 0x19c   :  { %7166 = vst [vmem:[#allocation59_spill] sm:$0xff] %v6305_v59  ;;  %7167 = vst [vmem:[#allocation60_spill] sm:$0xff] %v6307_v22  ;;  %v4068_v55 = vpop.f32.mrf.mxu0  ;;  %v4247_v24 = vpop.f32.mrf.mxu1  ;;  %4579 = vmatprep.mubr.msk.f32.mxu1 %vm4624_vm1, %v4623_v0 }
 0x19d   :  { %vm656_vm8 = vcmp.gt.f32.partialorder %v581_v57, 0.0  ;;  %v713_v35 = vmul.f32 0.01, %v581_v57  ;;  %vm1406_vm9 = vcmp.gt.f32.partialorder %v1331_v10, 0.0  ;;  %v1463_v25 = vmul.f32 0.01, %v1331_v10 }
 0x19e   :  { %v585_v33 = vpop.f32.mrf.mxu0  ;;  %v1335_v34 = vpop.f32.mrf.mxu1  ;;  %4401 = vmatmul.mubr.msk.f32.gmra.mxu0 %vm82_vm0, %v3474_v8  ;;  %4580 = vmatmul.mubr.msk.f32.gmra.mxu1 %vm82_vm0, %v3588_v5  ;;  %v3589_v8 = vld [vmem:[%s7037_s0 + $0x6c0] sm:$0xff] }
 0x19f   :  { %v6325_v9 = vsel %vm656_vm8, %v581_v57, %v713_v35  ;;  %v6327_v39 = vsel %vm1406_vm9, %v1331_v10, %v1463_v25  ;;  %v586_v55 = vadd.f32 %v5807_v11, %v585_v33  ;;  %v1336_v24 = vadd.f32 %v5807_v11, %v1335_v34  ;;  %4403 = vmatprep.mubr.msk.f32.mxu0 %vm4624_vm1, %v4623_v0 }
 0x1a0   :  { %7168 = vst [vmem:[#allocation61_spill] sm:$0xff] %v6325_v9  ;;  %7169 = vst [vmem:[#allocation62_spill] sm:$0xff] %v6327_v39  ;;  %v4071_v10 = vpop.f32.mrf.mxu0  ;;  %v4250_v5 = vpop.f32.mrf.mxu1  ;;  %4582 = vmatprep.mubr.msk.f32.mxu1 %vm4624_vm1, %v4623_v0 }
 0x1a1   :  { %vm657_vm10 = vcmp.gt.f32.partialorder %v586_v55, 0.0  ;;  %v714_v11 = vmul.f32 0.01, %v586_v55  ;;  %vm1407_vm11 = vcmp.gt.f32.partialorder %v1336_v24, 0.0  ;;  %v1464_v35 = vmul.f32 0.01, %v1336_v24 }
 0x1a2   :  { %v590_v25 = vpop.f32.mrf.mxu0  ;;  %v1340_v33 = vpop.f32.mrf.mxu1  ;;  %4404 = vmatmul.mubr.msk.f32.gmra.mxu0 %vm82_vm0, %v3475_v40  ;;  %4583 = vmatmul.mubr.msk.f32.gmra.mxu1 %vm82_vm0, %v3589_v8  ;;  %v6352_v10 = vld [vmem:[%s7038_s2] ss:$0 sm:$0xff] }
 0x1a3   :  { %v6345_v34 = vsel %vm657_vm10, %v586_v55, %v714_v11  ;;  %v6347_v22 = vsel %vm1407_vm11, %v1336_v24, %v1464_v35  ;;  %v591_v5 = vadd.f32 %v6352_v10, %v590_v25  ;;  %v1341_v57 = vadd.f32 %v6352_v10, %v1340_v33  ;;  %4406 = vmatprep.mubr.msk.f32.mxu0 %vm4624_vm1, %v4623_v0  ;;  %v3476_v40 = vld [vmem:[%s7037_s0 + $0x500] sm:$0xff]  ;;  %v3590_v55 = vld [vmem:[%s7037_s0 + $0x6c8] sm:$0xff] }
 0x1a4   :  { %7170 = vst [vmem:[#allocation63_spill] sm:$0xff] %v6345_v34  ;;  %7171 = vst [vmem:[#allocation64_spill] sm:$0xff] %v6347_v22  ;;  %v4074_v8 = vpop.f32.mrf.mxu0  ;;  %v4253_v11 = vpop.f32.mrf.mxu1  ;;  %4585 = vmatprep.mubr.msk.f32.mxu1 %vm4624_vm1, %v4623_v0  ;;  %v3477_v24 = vld [vmem:[%s7037_s0 + $0x508] sm:$0xff] }
 0x1a5   :  { %vm658_vm12 = vcmp.gt.f32.partialorder %v591_v5, 0.0  ;;  %v715_v35 = vmul.f32 0.01, %v591_v5  ;;  %vm1408_vm13 = vcmp.gt.f32.partialorder %v1341_v57, 0.0  ;;  %v1465_v25 = vmul.f32 0.01, %v1341_v57 }
 0x1a6   :  { %v595_v33 = vpop.f32.mrf.mxu0  ;;  %v1345_v39 = vpop.f32.mrf.mxu1  ;;  %4407 = vmatmul.mubr.msk.f32.gmra.mxu0 %vm82_vm0, %v3476_v40  ;;  %4586 = vmatmul.mubr.msk.f32.gmra.mxu1 %vm82_vm0, %v3590_v55  ;;  %v3591_v40 = vld [vmem:[%s7037_s0 + $0x6d0] sm:$0xff] }
 0x1a7   :  { %v6370_v9 = vsel %vm658_vm12, %v591_v5, %v715_v35  ;;  %v6372_v59 = vsel %vm1408_vm13, %v1341_v57, %v1465_v25  ;;  %v596_v8 = vadd.f32 %v6352_v10, %v595_v33  ;;  %v1346_v11 = vadd.f32 %v6352_v10, %v1345_v39  ;;  %4409 = vmatprep.mubr.msk.f32.mxu0 %vm4624_vm1, %v4623_v0  ;;  %v3478_v5 = vld [vmem:[%s7037_s0 + $0x510] sm:$0xff] }
 0x1a8   :  { %7172 = vst [vmem:[#allocation65_spill] sm:$0xff] %v6370_v9  ;;  %7173 = vst [vmem:[#allocation66_spill] sm:$0xff] %v6372_v59  ;;  %v4077_v57 = vpop.f32.mrf.mxu0  ;;  %v4256_v55 = vpop.f32.mrf.mxu1  ;;  %4588 = vmatprep.mubr.msk.f32.mxu1 %vm4624_vm1, %v4623_v0 }
 0x1a9   :  { %vm659_vm14 = vcmp.gt.f32.partialorder %v596_v8, 0.0  ;;  %v716_v39 = vmul.f32 0.01, %v596_v8  ;;  %vm1409_vm15 = vcmp.gt.f32.partialorder %v1346_v11, 0.0  ;;  %v1466_v35 = vmul.f32 0.01, %v1346_v11 }
 0x1aa   :  { %v600_v25 = vpop.f32.mrf.mxu0  ;;  %v1350_v33 = vpop.f32.mrf.mxu1  ;;  %4410 = vmatmul.mubr.msk.f32.gmra.mxu0 %vm82_vm0, %v3477_v24  ;;  %4589 = vmatmul.mubr.msk.f32.gmra.mxu1 %vm82_vm0, %v3591_v40  ;;  %v3592_v24 = vld [vmem:[%s7037_s0 + $0x6d8] sm:$0xff] }
 0x1ab   :  { %v6390_v22 = vsel %vm659_vm14, %v596_v8, %v716_v39  ;;  %v6392_v34 = vsel %vm1409_vm15, %v1346_v11, %v1466_v35  ;;  %v601_v57 = vadd.f32 %v6352_v10, %v600_v25  ;;  %v1351_v55 = vadd.f32 %v6352_v10, %v1350_v33  ;;  %4412 = vmatprep.mubr.msk.f32.mxu0 %vm4624_vm1, %v4623_v0  ;;  %v3479_v8 = vld [vmem:[%s7037_s0 + $0x518] sm:$0xff] }
 0x1ac   :  { %7174 = vst [vmem:[#allocation67_spill] sm:$0xff] %v6390_v22  ;;  %7175 = vst [vmem:[#allocation68_spill] sm:$0xff] %v6392_v34  ;;  %v4080_v11 = vpop.f32.mrf.mxu0  ;;  %v4259_v40 = vpop.f32.mrf.mxu1  ;;  %4591 = vmatprep.mubr.msk.f32.mxu1 %vm4624_vm1, %v4623_v0 }
 0x1ad   :  { %vm660_vm2 = vcmp.gt.f32.partialorder %v601_v57, 0.0  ;;  %v717_v39 = vmul.f32 0.01, %v601_v57  ;;  %vm1410_vm3 = vcmp.gt.f32.partialorder %v1351_v55, 0.0  ;;  %v1467_v35 = vmul.f32 0.01, %v1351_v55 }
 0x1ae   :  { %v1877_v25 = vpop.f32.mrf.mxu0  ;;  %4413 = vmatmul.mubr.msk.f32.gmra.mxu0 %vm82_vm0, %v3478_v5  ;;  %v2684_v33 = vpop.f32.mrf.mxu1  ;;  %4592 = vmatmul.mubr.msk.f32.gmra.mxu1 %vm82_vm0, %v3592_v24  ;;  %v3593_v5 = vld [vmem:[%s7037_s0 + $0x6e0] sm:$0xff] }
 0x1af   :  { %v6410_v59 = vsel %vm660_vm2, %v601_v57, %v717_v39  ;;  %v6412_v9 = vsel %vm1410_vm3, %v1351_v55, %v1467_v35  ;;  %v1878_v11 = vadd.f32 %v6352_v10, %v1877_v25  ;;  %v2685_v40 = vadd.f32 %v6352_v10, %v2684_v33  ;;  %4415 = vmatprep.mubr.msk.f32.mxu0 %vm4624_vm1, %v4623_v0 }
 0x1b0   :  { %7176 = vst [vmem:[#allocation69_spill] sm:$0xff] %v6410_v59  ;;  %7177 = vst [vmem:[#allocation70_spill] sm:$0xff] %v6412_v9  ;;  %v4270_v55 = vpop.f32.mrf.mxu0  ;;  %v4449_v24 = vpop.f32.mrf.mxu1  ;;  %4594 = vmatprep.mubr.msk.f32.mxu1 %vm4624_vm1, %v4623_v0 }
 0x1b1   :  { %vm2161_vm4 = vcmp.gt.f32.partialorder %v1878_v11, 0.0  ;;  %v2218_v39 = vmul.f32 0.01, %v1878_v11  ;;  %v3025_v35 = vmul.f32 0.01, %v2685_v40  ;;  %vm2968_vm5 = vcmp.gt.f32.partialorder %v2685_v40, 0.0 }
 0x1b2   :  { %v1882_v25 = vpop.f32.mrf.mxu0  ;;  %4416 = vmatmul.mubr.msk.f32.gmra.mxu0 %vm82_vm0, %v3479_v8  ;;  %v2689_v33 = vpop.f32.mrf.mxu1  ;;  %4595 = vmatmul.mubr.msk.f32.gmra.mxu1 %vm82_vm0, %v3593_v5  ;;  %v3480_v55 = vld [vmem:[%s7037_s0 + $0x520] sm:$0xff]  ;;  %v3594_v24 = vld [vmem:[%s7037_s0 + $0x6e8] sm:$0xff]  ;;  %v7178_v8 = vmax.f32 %v5280_v53, %v5282_v54 }
 0x1b3   :  { %v2275_v34 = vsel %vm2161_vm4, %v1878_v11, %v2218_v39  ;;  %v1883_v22 = vadd.f32 %v6352_v10, %v1882_v25  ;;  %v2690_v57 = vadd.f32 %v6352_v10, %v2689_v33  ;;  %4418 = vmatprep.mubr.msk.f32.mxu0 %vm4624_vm1, %v4623_v0  ;;  %4597 = vmatprep.mubr.msk.f32.mxu1 %vm4624_vm1, %v4623_v0 }
 0x1b4   :  { %v2332_v5 = vmax.f32 %v7178_v8, %v2275_v34  ;;  %v4273_v11 = vpop.f32.mrf.mxu0  ;;  %v4452_v39 = vpop.f32.mrf.mxu1  ;;  %v3082_v25 = vsel %vm2968_vm5, %v2685_v40, %v3025_v35  ;;  %v3481_v40 = vld [vmem:[%s7037_s0 + $0x528] sm:$0xff]  ;;  %v3595_v35 = vld [vmem:[%s7037_s0 + $0x6f0] sm:$0xff] }
 0x1b5   :  { %vm2162_vm6 = vcmp.gt.f32.partialorder %v1883_v22, 0.0  ;;  %v2219_v33 = vmul.f32 0.01, %v1883_v22  ;;  %v3026_v9 = vmul.f32 0.01, %v2690_v57  ;;  %vm2969_vm7 = vcmp.gt.f32.partialorder %v2690_v57, 0.0 }
 0x1b6   :  { %v3139_v59 = vmax.f32 %v2332_v5, %v3082_v25  ;;  %v1887_v49 = vpop.f32.mrf.mxu0  ;;  %4419 = vmatmul.mubr.msk.f32.gmra.mxu0 %vm82_vm0, %v3480_v55  ;;  %v2694_v2 = vpop.f32.mrf.mxu1  ;;  %4598 = vmatmul.mubr.msk.f32.gmra.mxu1 %vm82_vm0, %v3594_v24 }
 0x1b7   :  { %v2276_v53 = vsel %vm2162_vm6, %v1883_v22, %v2219_v33  ;;  %v1888_v54 = vadd.f32 %v6352_v10, %v1887_v49  ;;  %v2695_v34 = vadd.f32 %v6352_v10, %v2694_v2  ;;  %4421 = vmatprep.mubr.msk.f32.mxu0 %vm4624_vm1, %v4623_v0  ;;  %v7179_v22 = vmax.f32 %v5300_v3, %v5302_v4 }
 0x1b8   :  { %3196 = vst.msk [vmem:[%s7039_s3] sm:$0xff] %vm82_vm0, %v3139_v59  ;;  %v4276_v2 = vpop.f32.mrf.mxu0  ;;  %v4455_v55 = vpop.f32.mrf.mxu1  ;;  %4600 = vmatprep.mubr.msk.f32.mxu1 %vm4624_vm1, %v4623_v0  ;;  %v3083_v24 = vsel %vm2969_vm7, %v2690_v57, %v3026_v9  ;;  %v3482_v9 = vld [vmem:[%s7037_s0 + $0x530] sm:$0xff]  ;;  %v3596_v57 = vld [vmem:[%s7037_s0 + $0x6f8] sm:$0xff]  ;;  %v7180_v33 = vmax.f32 %v5320_v16, %v5322_v17 }
 0x1b9   :  { %v2333_v49 = vmax.f32 %v7179_v22, %v2276_v53  ;;  %vm2163_vm8 = vcmp.gt.f32.partialorder %v1888_v54, 0.0  ;;  %v2220_v8 = vmul.f32 0.01, %v1888_v54  ;;  %v3027_v5 = vmul.f32 0.01, %v2695_v34 }
 0x1ba   :  { %vm2970_vm9 = vcmp.gt.f32.partialorder %v2695_v34, 0.0  ;;  %v1892_v39 = vpop.f32.mrf.mxu0  ;;  %4422 = vmatmul.mubr.msk.f32.gmra.mxu0 %vm82_vm0, %v3481_v40  ;;  %v2699_v59 = vpop.f32.mrf.mxu1  ;;  %4601 = vmatmul.mubr.msk.f32.gmra.mxu1 %vm82_vm0, %v3595_v35 }
 0x1bb   :  { %v3140_v11 = vmax.f32 %v2333_v49, %v3083_v24  ;;  %v2277_v3 = vsel %vm2163_vm8, %v1888_v54, %v2220_v8  ;;  %v1893_v4 = vadd.f32 %v6352_v10, %v1892_v39  ;;  %v2700_v25 = vadd.f32 %v6352_v10, %v2699_v59  ;;  %4424 = vmatprep.mubr.msk.f32.mxu0 %vm4624_vm1, %v4623_v0 }
 0x1bc   :  { %v2334_v53 = vmax.f32 %v7180_v33, %v2277_v3  ;;  %v4279_v54 = vpop.f32.mrf.mxu0  ;;  %v4458_v40 = vpop.f32.mrf.mxu1  ;;  %4603 = vmatprep.mubr.msk.f32.mxu1 %vm4624_vm1, %v4623_v0  ;;  %v3084_v35 = vsel %vm2970_vm9, %v2695_v34, %v3027_v5  ;;  %v3483_v34 = vld [vmem:[%s7037_s0 + $0x538] sm:$0xff]  ;;  %v3597_v5 = vld [vmem:[%s7037_s0 + $0x700] sm:$0xff] }
 0x1bd   :  { %3197 = vst.msk [vmem:[%s7039_s3 + $0x8] sm:$0xff] %vm82_vm0, %v3140_v11  ;;  %vm2164_vm10 = vcmp.gt.f32.partialorder %v1893_v4, 0.0  ;;  %v2221_v22 = vmul.f32 0.01, %v1893_v4  ;;  %v3028_v49 = vmul.f32 0.01, %v2700_v25  ;;  %v7181_v11 = vmax.f32 %v5340_v29, %v5342_v30 }
 0x1be   :  { %v3141_v2 = vmax.f32 %v2334_v53, %v3084_v35  ;;  %vm2971_vm11 = vcmp.gt.f32.partialorder %v2700_v25, 0.0  ;;  %v1897_v55 = vpop.f32.mrf.mxu0  ;;  %4425 = vmatmul.mubr.msk.f32.gmra.mxu0 %vm82_vm0, %v3482_v9  ;;  %v2704_v24 = vpop.f32.mrf.mxu1  ;;  %4604 = vmatmul.mubr.msk.f32.gmra.mxu1 %vm82_vm0, %v3596_v57  ;;  %v3598_v35 = vld [vmem:[%s7037_s0 + $0x708] sm:$0xff] }
 0x1bf   :  { %v2278_v16 = vsel %vm2164_vm10, %v1893_v4, %v2221_v22  ;;  %v1898_v17 = vadd.f32 %v6352_v10, %v1897_v55  ;;  %v2705_v8 = vadd.f32 %v6352_v10, %v2704_v24  ;;  %4427 = vmatprep.mubr.msk.f32.mxu0 %vm4624_vm1, %v4623_v0  ;;  %4606 = vmatprep.mubr.msk.f32.mxu1 %vm4624_vm1, %v4623_v0 }
 0x1c0   :  { %3198 = vst.msk [vmem:[%s7039_s3 + $0x10] sm:$0xff] %vm82_vm0, %v3141_v2  ;;  %v2335_v39 = vmax.f32 %v7181_v11, %v2278_v16  ;;  %v4282_v59 = vpop.f32.mrf.mxu0  ;;  %v4461_v3 = vpop.f32.mrf.mxu1  ;;  %v3085_v4 = vsel %vm2971_vm11, %v2700_v25, %v3028_v49  ;;  %v3484_v25 = vld [vmem:[%s7037_s0 + $0x540] sm:$0xff]  ;;  %v7182_v22 = vmax.f32 %v5360_v43, %v5362_v44 }
 0x1c1   :  { %vm2165_vm12 = vcmp.gt.f32.partialorder %v1898_v17, 0.0  ;;  %v2222_v9 = vmul.f32 0.01, %v1898_v17  ;;  %v3029_v57 = vmul.f32 0.01, %v2705_v8  ;;  %vm2972_vm13 = vcmp.gt.f32.partialorder %v2705_v8, 0.0 }
 0x1c2   :  { %v3142_v33 = vmax.f32 %v2335_v39, %v3085_v4  ;;  %v1902_v53 = vpop.f32.mrf.mxu0  ;;  %4428 = vmatmul.mubr.msk.f32.gmra.mxu0 %vm82_vm0, %v3483_v34  ;;  %v2709_v54 = vpop.f32.mrf.mxu1  ;;  %4607 = vmatmul.mubr.msk.f32.gmra.mxu1 %vm82_vm0, %v3597_v5  ;;  %v3599_v59 = vld [vmem:[%s7037_s0 + $0x710] sm:$0xff]  ;;  %v7183_v3 = vmax.f32 %v5380_v58, %v5382_v60 }
 0x1c3   :  { %v2279_v29 = vsel %vm2165_vm12, %v1898_v17, %v2222_v9  ;;  %v1903_v30 = vadd.f32 %v6352_v10, %v1902_v53  ;;  %v2710_v40 = vadd.f32 %v6352_v10, %v2709_v54  ;;  %4430 = vmatprep.mubr.msk.f32.mxu0 %vm4624_vm1, %v4623_v0  ;;  %4609 = vmatprep.mubr.msk.f32.mxu1 %vm4624_vm1, %v4623_v0 }
 0x1c4   :  { %3199 = vst.msk [vmem:[%s7039_s3 + $0x18] sm:$0xff] %vm82_vm0, %v3142_v33  ;;  %v2336_v49 = vmax.f32 %v7182_v22, %v2279_v29  ;;  %v4285_v2 = vpop.f32.mrf.mxu0  ;;  %v4464_v55 = vpop.f32.mrf.mxu1  ;;  %v3086_v24 = vsel %vm2972_vm13, %v2705_v8, %v3029_v57  ;;  %v3485_v8 = vld [vmem:[%s7037_s0 + $0x548] sm:$0xff]  ;;  %v3600_v22 = vld [vmem:[%s7037_s0 + $0x718] sm:$0x3] }
 0x1c5   :  { %vm2166_vm14 = vcmp.gt.f32.partialorder %v1903_v30, 0.0  ;;  %v2223_v16 = vmul.f32 0.01, %v1903_v30  ;;  %v3030_v17 = vmul.f32 0.01, %v2710_v40  ;;  %vm2973_vm15 = vcmp.gt.f32.partialorder %v2710_v40, 0.0 }
 0x1c6   :  { %v3143_v34 = vmax.f32 %v2336_v49, %v3086_v24  ;;  %v1907_v5 = vpop.f32.mrf.mxu0  ;;  %4431 = vmatmul.mubr.msk.f32.gmra.mxu0 %vm82_vm0, %v3484_v25  ;;  %v2714_v11 = vpop.f32.mrf.mxu1  ;;  %4610 = vmatmul.mubr.msk.f32.gmra.mxu1 %vm82_vm0, %v3598_v35  ;;  %v7184_v49 = vmax.f32 %v5400_v12, %v5402_v13 }
 0x1c7   :  { %v2280_v43 = vsel %vm2166_vm14, %v1903_v30, %v2223_v16  ;;  %v1908_v44 = vadd.f32 %v6352_v10, %v1907_v5  ;;  %v2715_v39 = vadd.f32 %v6352_v10, %v2714_v11  ;;  %4433 = vmatprep.mubr.msk.f32.mxu0 %vm4624_vm1, %v4623_v0  ;;  %4612 = vmatprep.mubr.msk.f32.mxu1 %vm4624_vm1, %v4623_v0 }
 0x1c8   :  { %3200 = vst.msk [vmem:[%s7039_s3 + $0x20] sm:$0xff] %vm82_vm0, %v3143_v34  ;;  %v2337_v4 = vmax.f32 %v7183_v3, %v2280_v43  ;;  %v4288_v9 = vpop.f32.mrf.mxu0  ;;  %v4467_v57 = vpop.f32.mrf.mxu1  ;;  %v3087_v33 = vsel %vm2973_vm15, %v2710_v40, %v3030_v17  ;;  %v3486_v40 = vld [vmem:[%s7037_s0 + $0x550] sm:$0x3] }
 0x1c9   :  { %vm2167_vm2 = vcmp.gt.f32.partialorder %v1908_v44, 0.0  ;;  %v2224_v53 = vmul.f32 0.01, %v1908_v44  ;;  %v3031_v54 = vmul.f32 0.01, %v2715_v39  ;;  %vm2974_vm3 = vcmp.gt.f32.partialorder %v2715_v39, 0.0 }
 0x1ca   :  { %v3144_v29 = vmax.f32 %v2337_v4, %v3087_v33  ;;  %v1912_v30 = vpop.f32.mrf.mxu0  ;;  %4434 = vmatmul.mubr.msk.f32.gmra.mxu0 %vm82_vm0, %v3485_v8  ;;  %v2719_v25 = vpop.f32.mrf.mxu1  ;;  %4613 = vmatmul.mubr.msk.f32.gmra.mxu1 %vm82_vm0, %v3599_v59 }
 0x1cb   :  { %v2281_v58 = vsel %vm2167_vm2, %v1908_v44, %v2224_v53  ;;  %v1913_v60 = vadd.f32 %v6352_v10, %v1912_v30  ;;  %v2720_v35 = vadd.f32 %v6352_v10, %v2719_v25  ;;  %4436 = vmatprep.mubr.msk.f32.mxu0 %vm4624_vm1, %v4623_v0  ;;  %4615 = vmatprep.mubr.msk.f32.mxu1 %vm4624_vm1, %v4623_v0 }
 0x1cc   :  { %3201 = vst.msk [vmem:[%s7039_s3 + $0x28] sm:$0xff] %vm82_vm0, %v3144_v29  ;;  %v2338_v2 = vmax.f32 %v7184_v49, %v2281_v58  ;;  %v4291_v55 = vpop.f32.mrf.mxu0  ;;  %v4470_v24 = vpop.f32.mrf.mxu1  ;;  %v3088_v16 = vsel %vm2974_vm3, %v2715_v39, %v3031_v54  ;;  %v7185_v0 = vmax.f32 %v5420_v28, %v5422_v31  ;;  %v7186_v28 = vmax.f32 %v5440_v47, %v5442_v48 }
 0x1cd   :  { %vm2168_vm4 = vcmp.gt.f32.partialorder %v1913_v60, 0.0  ;;  %v2225_v17 = vmul.f32 0.01, %v1913_v60  ;;  %v3032_v34 = vmul.f32 0.01, %v2720_v35  ;;  %vm2975_vm5 = vcmp.gt.f32.partialorder %v2720_v35, 0.0 }
 0x1ce   :  { %v3145_v5 = vmax.f32 %v2338_v2, %v3088_v16  ;;  %v1917_v11 = vpop.f32.mrf.mxu0  ;;  %4437 = vmatmul.mubr.msk.f32.gmra.mxu0 %vm82_vm0, %v3486_v40  ;;  %v2724_v43 = vpop.f32.mrf.mxu1  ;;  %4616 = vmatmul.mubr.msk.f32.gmra.mxu1 %vm82_vm0, %v3600_v22  ;;  %v7187_v47 = vmax.f32 %v5460_v6, %v5462_v7  ;;  %v7188_v6 = vmax.f32 %v5480_v26, %v5482_v27 }
 0x1cf   :  { %v2282_v12 = vsel %vm2168_vm4, %v1913_v60, %v2225_v17  ;;  %v1918_v13 = vadd.f32 %v6352_v10, %v1917_v11  ;;  %v2725_v44 = vadd.f32 %v6352_v10, %v2724_v43  ;;  %v3089_v3 = vsel %vm2975_vm5, %v2720_v35, %v3032_v34 }
 0x1d0   :  { %3202 = vst.msk [vmem:[%s7039_s3 + $0x30] sm:$0xff] %vm82_vm0, %v3145_v5  ;;  %v2339_v39 = vmax.f32 %v7185_v0, %v2282_v12  ;;  %v4294_v8 = vpop.f32.mrf.mxu0  ;;  %v4473_v59 = vpop.f32.mrf.mxu1  ;;  %v7189_v26 = vmax.f32 %v5500_v51, %v5502_v52  ;;  %v7190_v51 = vmax.f32 %v5520_v18, %v5522_v19  ;;  %v7191_v18 = vmax.f32 %v5540_v45, %v5542_v46 }
 0x1d1   :  { %vm2169_vm1 = vcmp.gt.f32.partialorder %v1918_v13, 0.0  ;;  %v2226_v4 = vmul.f32 0.01, %v1918_v13  ;;  %v3033_v9 = vmul.f32 0.01, %v2725_v44  ;;  %vm2976_vm6 = vcmp.gt.f32.partialorder %v2725_v44, 0.0 }
 0x1d2   :  { %v3146_v57 = vmax.f32 %v2339_v39, %v3089_v3  ;;  %v1922_v33 = vpop.f32.mrf.mxu0  ;;  %v2729_v53 = vpop.f32.mrf.mxu1  ;;  %v7192_v45 = vmax.f32 %v5560_v21, %v5562_v23  ;;  %v7193_v21 = vmax.f32 %v5580_v61, %v5582_v1  ;;  %v7194_v61 = vmax.f32 %v5600_v42, %v5602_v50 }
 0x1d3   :  { %v2283_v54 = vsel %vm2169_vm1, %v1918_v13, %v2226_v4  ;;  %v1923_v29 = vadd.f32 %v6352_v10, %v1922_v33  ;;  %v2730_v30 = vadd.f32 %v6352_v10, %v2729_v53  ;;  %v3090_v60 = vsel %vm2976_vm6, %v2725_v44, %v3033_v9 }
 0x1d4   :  { %3203 = vst.msk [vmem:[%s7039_s3 + $0x38] sm:$0xff] %vm82_vm0, %v3146_v57  ;;  %v2340_v31 = vmax.f32 %v7186_v28, %v2283_v54  ;;  %v4297_v25 = vpop.f32.mrf.mxu0  ;;  %v4476_v58 = vpop.f32.mrf.mxu1  ;;  %v7195_v42 = vmax.f32 %v5620_v41, %v5622_v14  ;;  %v7196_v14 = vmax.f32 %v5640_v36, %v5642_v62  ;;  %v7197_v62 = vmax.f32 %v5660_v32, %v5662_v63 }
 0x1d5   :  { %vm2170_vm7 = vcmp.gt.f32.partialorder %v1923_v29, 0.0  ;;  %v2227_v35 = vmul.f32 0.01, %v1923_v29  ;;  %v3034_v40 = vmul.f32 0.01, %v2730_v30  ;;  %vm2977_vm8 = vcmp.gt.f32.partialorder %v2730_v30, 0.0 }
 0x1d6   :  { %v3147_v22 = vmax.f32 %v2340_v31, %v3090_v60  ;;  %v1927_v49 = vpop.f32.mrf.mxu0  ;;  %v2734_v2 = vpop.f32.mrf.mxu1  ;;  %v7198_v63 = vmax.f32 %v5680_v38, %v5682_v15  ;;  %v7199_v15 = vmax.f32 %v5700_v56, %v5702_v37  ;;  %v7200_v37 = vld [vmem:[#allocation2_spill] sm:$0xff] }
 0x1d7   :  { %v2284_v55 = vsel %vm2170_vm7, %v1923_v29, %v2227_v35  ;;  %v1928_v24 = vadd.f32 %v6352_v10, %v1927_v49  ;;  %v2735_v16 = vadd.f32 %v6352_v10, %v2734_v2  ;;  %v3091_v5 = vsel %vm2977_vm8, %v2730_v30, %v3034_v40 }
 0x1d8   :  { %3204 = vst.msk [vmem:[%s7039_s3 + $0x40] sm:$0xff] %vm82_vm0, %v3147_v22  ;;  %v2341_v48 = vmax.f32 %v7187_v47, %v2284_v55  ;;  %v4300_v17 = vpop.f32.mrf.mxu0  ;;  %v4479_v34 = vpop.f32.mrf.mxu1  ;;  %v7201_v56 = vmax.f32 %v5720_v20, %v7200_v37  ;;  %v7202_v20 = vld [vmem:[#allocation3_spill] sm:$0xff] }
 0x1d9   :  { %vm2171_vm9 = vcmp.gt.f32.partialorder %v1928_v24, 0.0  ;;  %v2228_v11 = vmul.f32 0.01, %v1928_v24  ;;  %v3035_v43 = vmul.f32 0.01, %v2735_v16  ;;  %vm2978_vm10 = vcmp.gt.f32.partialorder %v2735_v16, 0.0 }
 0x1da   :  { %v3148_v12 = vmax.f32 %v2341_v48, %v3091_v5  ;;  %v1932_v13 = vpop.f32.mrf.mxu0  ;;  %v2739_v44 = vpop.f32.mrf.mxu1 }
 0x1db   :  { %v2285_v0 = vsel %vm2171_vm9, %v1928_v24, %v2228_v11  ;;  %v1933_v39 = vadd.f32 %v6352_v10, %v1932_v13  ;;  %v2740_v8 = vadd.f32 %v6352_v10, %v2739_v44  ;;  %v3092_v4 = vsel %vm2978_vm10, %v2735_v16, %v3035_v43 }
 0x1dc   :  { %3205 = vst.msk [vmem:[%s7039_s3 + $0x48] sm:$0xff] %vm82_vm0, %v3148_v12  ;;  %v2342_v7 = vmax.f32 %v7188_v6, %v2285_v0  ;;  %v4303_v59 = vpop.f32.mrf.mxu0  ;;  %v4482_v3 = vpop.f32.mrf.mxu1 }
 0x1dd   :  { %vm2172_vm11 = vcmp.gt.f32.partialorder %v1933_v39, 0.0  ;;  %v2229_v9 = vmul.f32 0.01, %v1933_v39  ;;  %v3036_v57 = vmul.f32 0.01, %v2740_v8  ;;  %vm2979_vm12 = vcmp.gt.f32.partialorder %v2740_v8, 0.0 }
 0x1de   :  { %v3149_v33 = vmax.f32 %v2342_v7, %v3092_v4  ;;  %v1937_v53 = vpop.f32.mrf.mxu0  ;;  %v2744_v54 = vpop.f32.mrf.mxu1 }
 0x1df   :  { %v2286_v29 = vsel %vm2172_vm11, %v1933_v39, %v2229_v9  ;;  %v1938_v30 = vadd.f32 %v6352_v10, %v1937_v53  ;;  %v2745_v28 = vadd.f32 %v6352_v10, %v2744_v54  ;;  %v3093_v58 = vsel %vm2979_vm12, %v2740_v8, %v3036_v57 }
 0x1e0   :  { %3206 = vst.msk [vmem:[%s7039_s3 + $0x50] sm:$0xff] %vm82_vm0, %v3149_v33  ;;  %v2343_v27 = vmax.f32 %v7189_v26, %v2286_v29  ;;  %v4306_v31 = vpop.f32.mrf.mxu0  ;;  %v4485_v25 = vpop.f32.mrf.mxu1 }
 0x1e1   :  { %vm2173_vm13 = vcmp.gt.f32.partialorder %v1938_v30, 0.0  ;;  %v2230_v60 = vmul.f32 0.01, %v1938_v30  ;;  %v3037_v35 = vmul.f32 0.01, %v2745_v28  ;;  %vm2980_vm14 = vcmp.gt.f32.partialorder %v2745_v28, 0.0 }
 0x1e2   :  { %v3150_v40 = vmax.f32 %v2343_v27, %v3093_v58  ;;  %v1942_v22 = vpop.f32.mrf.mxu0  ;;  %v2749_v49 = vpop.f32.mrf.mxu1 }
 0x1e3   :  { %v2287_v2 = vsel %vm2173_vm13, %v1938_v30, %v2230_v60  ;;  %v1943_v55 = vadd.f32 %v6352_v10, %v1942_v22  ;;  %v2750_v24 = vadd.f32 %v6352_v10, %v2749_v49  ;;  %v3094_v48 = vsel %vm2980_vm14, %v2745_v28, %v3037_v35 }
 0x1e4   :  { %3207 = vst.msk [vmem:[%s7039_s3 + $0x58] sm:$0xff] %vm82_vm0, %v3150_v40  ;;  %v2344_v52 = vmax.f32 %v7190_v51, %v2287_v2  ;;  %v4309_v16 = vpop.f32.mrf.mxu0  ;;  %v4488_v47 = vpop.f32.mrf.mxu1 }
 0x1e5   :  { %vm2174_vm15 = vcmp.gt.f32.partialorder %v1943_v55, 0.0  ;;  %v2231_v17 = vmul.f32 0.01, %v1943_v55  ;;  %v3038_v34 = vmul.f32 0.01, %v2750_v24  ;;  %vm2981_vm2 = vcmp.gt.f32.partialorder %v2750_v24, 0.0 }
 0x1e6   :  { %v3151_v5 = vmax.f32 %v2344_v52, %v3094_v48  ;;  %v1947_v11 = vpop.f32.mrf.mxu0  ;;  %v2754_v43 = vpop.f32.mrf.mxu1 }
 0x1e7   :  { %v2288_v12 = vsel %vm2174_vm15, %v1943_v55, %v2231_v17  ;;  %v1948_v13 = vadd.f32 %v6352_v10, %v1947_v11  ;;  %v2755_v44 = vadd.f32 %v6352_v10, %v2754_v43  ;;  %v3095_v8 = vsel %vm2981_vm2, %v2750_v24, %v3038_v34 }
 0x1e8   :  { %3208 = vst.msk [vmem:[%s7039_s3 + $0x60] sm:$0xff] %vm82_vm0, %v3151_v5  ;;  %v2345_v19 = vmax.f32 %v7191_v18, %v2288_v12  ;;  %v4312_v0 = vpop.f32.mrf.mxu0  ;;  %v4491_v39 = vpop.f32.mrf.mxu1 }
 0x1e9   :  { %vm2175_vm3 = vcmp.gt.f32.partialorder %v1948_v13, 0.0  ;;  %v2232_v6 = vmul.f32 0.01, %v1948_v13  ;;  %v3039_v7 = vmul.f32 0.01, %v2755_v44  ;;  %vm2982_vm4 = vcmp.gt.f32.partialorder %v2755_v44, 0.0 }
 0x1ea   :  { %v3152_v59 = vmax.f32 %v2345_v19, %v3095_v8  ;;  %v1952_v3 = vpop.f32.mrf.mxu0  ;;  %v2759_v4 = vpop.f32.mrf.mxu1 }
 0x1eb   :  { %v2289_v9 = vsel %vm2175_vm3, %v1948_v13, %v2232_v6  ;;  %v1953_v57 = vadd.f32 %v6352_v10, %v1952_v3  ;;  %v2760_v33 = vadd.f32 %v6352_v10, %v2759_v4  ;;  %v3096_v29 = vsel %vm2982_vm4, %v2755_v44, %v3039_v7 }
 0x1ec   :  { %3209 = vst.msk [vmem:[%s7039_s3 + $0x68] sm:$0xff] %vm82_vm0, %v3152_v59  ;;  %v2346_v46 = vmax.f32 %v7192_v45, %v2289_v9  ;;  %v4315_v53 = vpop.f32.mrf.mxu0  ;;  %v4494_v54 = vpop.f32.mrf.mxu1 }
 0x1ed   :  { %vm2176_vm5 = vcmp.gt.f32.partialorder %v1953_v57, 0.0  ;;  %v2233_v30 = vmul.f32 0.01, %v1953_v57  ;;  %v3040_v28 = vmul.f32 0.01, %v2760_v33  ;;  %vm2983_vm1 = vcmp.gt.f32.partialorder %v2760_v33, 0.0 }
 0x1ee   :  { %v3153_v26 = vmax.f32 %v2346_v46, %v3096_v29  ;;  %v1957_v27 = vpop.f32.mrf.mxu0  ;;  %v2764_v31 = vpop.f32.mrf.mxu1 }
 0x1ef   :  { %v2290_v25 = vsel %vm2176_vm5, %v1953_v57, %v2233_v30  ;;  %v1958_v58 = vadd.f32 %v6352_v10, %v1957_v27  ;;  %v2765_v60 = vadd.f32 %v6352_v10, %v2764_v31  ;;  %v3097_v22 = vsel %vm2983_vm1, %v2760_v33, %v3040_v28 }
 0x1f0   :  { %3210 = vst.msk [vmem:[%s7039_s3 + $0x70] sm:$0xff] %vm82_vm0, %v3153_v26  ;;  %v2347_v23 = vmax.f32 %v7193_v21, %v2290_v25  ;;  %v4318_v35 = vpop.f32.mrf.mxu0  ;;  %v4497_v40 = vpop.f32.mrf.mxu1 }
 0x1f1   :  { %vm2177_vm6 = vcmp.gt.f32.partialorder %v1958_v58, 0.0  ;;  %v2234_v49 = vmul.f32 0.01, %v1958_v58  ;;  %v3041_v2 = vmul.f32 0.01, %v2765_v60  ;;  %vm2984_vm7 = vcmp.gt.f32.partialorder %v2765_v60, 0.0 }
 0x1f2   :  { %v3154_v55 = vmax.f32 %v2347_v23, %v3097_v22  ;;  %v1962_v24 = vpop.f32.mrf.mxu0  ;;  %v2769_v51 = vpop.f32.mrf.mxu1 }
 0x1f3   :  { %v2291_v52 = vsel %vm2177_vm6, %v1958_v58, %v2234_v49  ;;  %v1963_v16 = vadd.f32 %v6352_v10, %v1962_v24  ;;  %v2770_v47 = vadd.f32 %v6352_v10, %v2769_v51  ;;  %v3098_v34 = vsel %vm2984_vm7, %v2765_v60, %v3041_v2 }
 0x1f4   :  { %3211 = vst.msk [vmem:[%s7039_s3 + $0x78] sm:$0xff] %vm82_vm0, %v3154_v55  ;;  %v2348_v1 = vmax.f32 %v7194_v61, %v2291_v52  ;;  %v4321_v48 = vpop.f32.mrf.mxu0  ;;  %v4500_v17 = vpop.f32.mrf.mxu1 }
 0x1f5   :  { %vm2178_vm8 = vcmp.gt.f32.partialorder %v1963_v16, 0.0  ;;  %v2235_v5 = vmul.f32 0.01, %v1963_v16  ;;  %v3042_v11 = vmul.f32 0.01, %v2770_v47  ;;  %vm2985_vm9 = vcmp.gt.f32.partialorder %v2770_v47, 0.0 }
 0x1f6   :  { %v3155_v43 = vmax.f32 %v2348_v1, %v3098_v34  ;;  %v1967_v12 = vpop.f32.mrf.mxu0  ;;  %v2774_v13 = vpop.f32.mrf.mxu1 }
 0x1f7   :  { %v2292_v44 = vsel %vm2178_vm8, %v1963_v16, %v2235_v5  ;;  %v1968_v18 = vadd.f32 %v6352_v10, %v1967_v12  ;;  %v2775_v19 = vadd.f32 %v6352_v10, %v2774_v13  ;;  %v3099_v8 = vsel %vm2985_vm9, %v2770_v47, %v3042_v11 }
 0x1f8   :  { %3212 = vst.msk [vmem:[%s7039_s3 + $0x80] sm:$0xff] %vm82_vm0, %v3155_v43  ;;  %v2349_v50 = vmax.f32 %v7195_v42, %v2292_v44  ;;  %v4324_v0 = vpop.f32.mrf.mxu0  ;;  %v4503_v39 = vpop.f32.mrf.mxu1 }
 0x1f9   :  { %vm2179_vm10 = vcmp.gt.f32.partialorder %v1968_v18, 0.0  ;;  %v2236_v6 = vmul.f32 0.01, %v1968_v18  ;;  %v3043_v7 = vmul.f32 0.01, %v2775_v19  ;;  %vm2986_vm11 = vcmp.gt.f32.partialorder %v2775_v19, 0.0 }
 0x1fa   :  { %v3156_v59 = vmax.f32 %v2349_v50, %v3099_v8  ;;  %v1972_v3 = vpop.f32.mrf.mxu0  ;;  %v2779_v4 = vpop.f32.mrf.mxu1 }
 0x1fb   :  { %v2293_v9 = vsel %vm2179_vm10, %v1968_v18, %v2236_v6  ;;  %v1973_v57 = vadd.f32 %v6352_v10, %v1972_v3  ;;  %v2780_v33 = vadd.f32 %v6352_v10, %v2779_v4  ;;  %v3100_v53 = vsel %vm2986_vm11, %v2775_v19, %v3043_v7 }
 0x1fc   :  { %3213 = vst.msk [vmem:[%s7039_s3 + $0x88] sm:$0xff] %vm82_vm0, %v3156_v59  ;;  %v2350_v41 = vmax.f32 %v7196_v14, %v2293_v9  ;;  %v4327_v45 = vpop.f32.mrf.mxu0  ;;  %v4506_v46 = vpop.f32.mrf.mxu1 }
 0x1fd   :  { %vm2180_vm12 = vcmp.gt.f32.partialorder %v1973_v57, 0.0  ;;  %v2237_v54 = vmul.f32 0.01, %v1973_v57  ;;  %v3044_v29 = vmul.f32 0.01, %v2780_v33  ;;  %vm2987_vm13 = vcmp.gt.f32.partialorder %v2780_v33, 0.0 }
 0x1fe   :  { %v3157_v30 = vmax.f32 %v2350_v41, %v3100_v53  ;;  %v1977_v28 = vpop.f32.mrf.mxu0  ;;  %v2784_v26 = vpop.f32.mrf.mxu1  ;;  %v7203_v53 = vld [vmem:[#allocation4_spill] sm:$0xff] }
 0x1ff   :  { %v2294_v27 = vsel %vm2180_vm12, %v1973_v57, %v2237_v54  ;;  %v1978_v31 = vadd.f32 %v6352_v10, %v1977_v28  ;;  %v2785_v25 = vadd.f32 %v6352_v10, %v2784_v26  ;;  %v3101_v21 = vsel %vm2987_vm13, %v2780_v33, %v3044_v29 }
 0x200   :  { %3214 = vst.msk [vmem:[%s7039_s3 + $0x90] sm:$0xff] %vm82_vm0, %v3157_v30  ;;  %v2351_v36 = vmax.f32 %v7197_v62, %v2294_v27  ;;  %v4330_v58 = vpop.f32.mrf.mxu0  ;;  %v4509_v60 = vpop.f32.mrf.mxu1  ;;  %v7204_v54 = vmax.f32 %v7202_v20, %v7203_v53 }
 0x201   :  { %vm2181_vm14 = vcmp.gt.f32.partialorder %v1978_v31, 0.0  ;;  %v2238_v23 = vmul.f32 0.01, %v1978_v31  ;;  %v3045_v35 = vmul.f32 0.01, %v2785_v25  ;;  %vm2988_vm15 = vcmp.gt.f32.partialorder %v2785_v25, 0.0 }
 0x202   :  { %v3158_v40 = vmax.f32 %v2351_v36, %v3101_v21  ;;  %v1982_v22 = vpop.f32.mrf.mxu0  ;;  %v2789_v49 = vpop.f32.mrf.mxu1 }
 0x203   :  { %v2295_v2 = vsel %vm2181_vm14, %v1978_v31, %v2238_v23  ;;  %v1983_v55 = vadd.f32 %v6352_v10, %v1982_v22  ;;  %v2790_v24 = vadd.f32 %v6352_v10, %v2789_v49  ;;  %v3102_v16 = vsel %vm2988_vm15, %v2785_v25, %v3045_v35  ;;  %v7205_v23 = vld [vmem:[#allocation5_spill] sm:$0xff]  ;;  %v7206_v35 = vld [vmem:[#allocation6_spill] sm:$0xff] }
 0x204   :  { %3215 = vst.msk [vmem:[%s7039_s3 + $0x98] sm:$0xff] %vm82_vm0, %v3158_v40  ;;  %v2352_v32 = vmax.f32 %v7198_v63, %v2295_v2  ;;  %v4333_v51 = vpop.f32.mrf.mxu0  ;;  %v4512_v52 = vpop.f32.mrf.mxu1  ;;  %v7207_v40 = vmax.f32 %v7205_v23, %v7206_v35 }
 0x205   :  { %vm2182_vm2 = vcmp.gt.f32.partialorder %v1983_v55, 0.0  ;;  %v2239_v47 = vmul.f32 0.01, %v1983_v55  ;;  %v3046_v61 = vmul.f32 0.01, %v2790_v24  ;;  %vm2989_vm3 = vcmp.gt.f32.partialorder %v2790_v24, 0.0 }
 0x206   :  { %v3159_v1 = vmax.f32 %v2352_v32, %v3102_v16  ;;  %v1987_v48 = vpop.f32.mrf.mxu0  ;;  %v2794_v17 = vpop.f32.mrf.mxu1 }
 0x207   :  { %v2296_v34 = vsel %vm2182_vm2, %v1983_v55, %v2239_v47  ;;  %v1988_v5 = vadd.f32 %v6352_v10, %v1987_v48  ;;  %v2795_v11 = vadd.f32 %v6352_v10, %v2794_v17  ;;  %v3103_v13 = vsel %vm2989_vm3, %v2790_v24, %v3046_v61  ;;  %v7209_v48 = vld [vmem:[#allocation8_spill] sm:$0xff] }
 0x208   :  { %3216 = vst.msk [vmem:[%s7039_s3 + $0xa0] sm:$0xff] %vm82_vm0, %v3159_v1  ;;  %v2353_v38 = vmax.f32 %v7199_v15, %v2296_v34  ;;  %v4336_v43 = vpop.f32.mrf.mxu0  ;;  %v4515_v12 = vpop.f32.mrf.mxu1  ;;  %v7208_v1 = vld [vmem:[#allocation7_spill] sm:$0xff] }
 0x209   :  { %vm2183_vm4 = vcmp.gt.f32.partialorder %v1988_v5, 0.0  ;;  %v2240_v44 = vmul.f32 0.01, %v1988_v5  ;;  %v3047_v18 = vmul.f32 0.01, %v2795_v11  ;;  %vm2990_vm5 = vcmp.gt.f32.partialorder %v2795_v11, 0.0 }
 0x20a   :  { %v3160_v19 = vmax.f32 %v2353_v38, %v3103_v13  ;;  %v1992_v42 = vpop.f32.mrf.mxu0  ;;  %v2799_v50 = vpop.f32.mrf.mxu1  ;;  %v7210_v17 = vmax.f32 %v7208_v1, %v7209_v48 }
 0x20b   :  { %v2297_v0 = vsel %vm2183_vm4, %v1988_v5, %v2240_v44  ;;  %v1993_v39 = vadd.f32 %v6352_v10, %v1992_v42  ;;  %v2800_v8 = vadd.f32 %v6352_v10, %v2799_v50  ;;  %v3104_v3 = vsel %vm2990_vm5, %v2795_v11, %v3047_v18  ;;  %v7211_v50 = vld [vmem:[#allocation9_spill] sm:$0xff] }
 0x20c   :  { %3217 = vst.msk [vmem:[%s7039_s3 + $0xa8] sm:$0xff] %vm82_vm0, %v3160_v19  ;;  %v2354_v6 = vmax.f32 %v7201_v56, %v2297_v0  ;;  %v4339_v7 = vpop.f32.mrf.mxu0  ;;  %v4518_v59 = vpop.f32.mrf.mxu1  ;;  %v7212_v0 = vld [vmem:[#allocation10_spill] sm:$0xff] }
 0x20d   :  { %vm2184_vm1 = vcmp.gt.f32.partialorder %v1993_v39, 0.0  ;;  %v2241_v4 = vmul.f32 0.01, %v1993_v39  ;;  %v3048_v9 = vmul.f32 0.01, %v2800_v8  ;;  %vm2991_vm6 = vcmp.gt.f32.partialorder %v2800_v8, 0.0 }
 0x20e   :  { %v3161_v57 = vmax.f32 %v2354_v6, %v3104_v3  ;;  %v1997_v33 = vpop.f32.mrf.mxu0  ;;  %v2804_v14 = vpop.f32.mrf.mxu1 }
 0x20f   :  { %v2298_v41 = vsel %vm2184_vm1, %v1993_v39, %v2241_v4  ;;  %v1998_v45 = vadd.f32 %v6352_v10, %v1997_v33  ;;  %v2805_v46 = vadd.f32 %v6352_v10, %v2804_v14  ;;  %v3105_v26 = vsel %vm2991_vm6, %v2800_v8, %v3048_v9 }
 0x210   :  { %3218 = vst.msk [vmem:[%s7039_s3 + $0xb0] sm:$0xff] %vm82_vm0, %v3161_v57  ;;  %v2355_v29 = vmax.f32 %v7204_v54, %v2298_v41  ;;  %v4342_v30 = vpop.f32.mrf.mxu0  ;;  %v4521_v28 = vpop.f32.mrf.mxu1  ;;  %v7213_v39 = vmax.f32 %v7211_v50, %v7212_v0  ;;  %v6763_v57 = vld [vmem:[%s7038_s2] ss:$0 sm:$0xff]  ;;  %v7214_v41 = vld [vmem:[#allocation11_spill] sm:$0xff] }
 0x211   :  { %vm2185_vm7 = vcmp.gt.f32.partialorder %v1998_v45, 0.0  ;;  %v2242_v27 = vmul.f32 0.01, %v1998_v45  ;;  %v3049_v31 = vmul.f32 0.01, %v2805_v46  ;;  %vm2992_vm8 = vcmp.gt.f32.partialorder %v2805_v46, 0.0 }
 0x212   :  { %v3162_v25 = vmax.f32 %v2355_v29, %v3105_v26  ;;  %v2002_v62 = vpop.f32.mrf.mxu0  ;;  %v2809_v36 = vpop.f32.mrf.mxu1 }
 0x213   :  { %v2299_v58 = vsel %vm2185_vm7, %v1998_v45, %v2242_v27  ;;  %v2003_v60 = vadd.f32 %v6352_v10, %v2002_v62  ;;  %v2810_v21 = vadd.f32 %v6352_v10, %v2809_v36  ;;  %v3106_v55 = vsel %vm2992_vm8, %v2805_v46, %v3049_v31  ;;  %v7215_v45 = vld [vmem:[#allocation12_spill] sm:$0xff] }
 0x214   :  { %3219 = vst.msk [vmem:[%s7039_s3 + $0xb8] sm:$0xff] %vm82_vm0, %v3162_v25  ;;  %v2356_v22 = vmax.f32 %v7207_v40, %v2299_v58  ;;  %v4345_v49 = vpop.f32.mrf.mxu0  ;;  %v4524_v2 = vpop.f32.mrf.mxu1  ;;  %v7216_v46 = vmax.f32 %v7214_v41, %v7215_v45  ;;  %v7217_v58 = vld [vmem:[#allocation13_spill] sm:$0xff] }
 0x215   :  { %vm2186_vm9 = vcmp.gt.f32.partialorder %v2003_v60, 0.0  ;;  %v2243_v24 = vmul.f32 0.01, %v2003_v60  ;;  %v3050_v63 = vmul.f32 0.01, %v2810_v21  ;;  %vm2993_vm10 = vcmp.gt.f32.partialorder %v2810_v21, 0.0 }
 0x216   :  { %v3163_v32 = vmax.f32 %v2356_v22, %v3106_v55  ;;  %v2007_v51 = vpop.f32.mrf.mxu0  ;;  %v2814_v52 = vpop.f32.mrf.mxu1 }
 0x217   :  { %v2300_v16 = vsel %vm2186_vm9, %v2003_v60, %v2243_v24  ;;  %v2008_v47 = vadd.f32 %v6352_v10, %v2007_v51  ;;  %v2815_v61 = vadd.f32 %v6352_v10, %v2814_v52  ;;  %v3107_v15 = vsel %vm2993_vm10, %v2810_v21, %v3050_v63  ;;  %v7218_v60 = vld [vmem:[#allocation14_spill] sm:$0xff] }
 0x218   :  { %3220 = vst.msk [vmem:[%s7039_s3 + $0xc0] sm:$0xff] %vm82_vm0, %v3163_v32  ;;  %v2357_v34 = vmax.f32 %v7210_v17, %v2300_v16  ;;  %v4348_v5 = vpop.f32.mrf.mxu0  ;;  %v4527_v11 = vpop.f32.mrf.mxu1  ;;  %v7219_v21 = vmax.f32 %v7217_v58, %v7218_v60  ;;  %v7220_v16 = vld [vmem:[#allocation15_spill] sm:$0xff] }
 0x219   :  { %vm2187_vm11 = vcmp.gt.f32.partialorder %v2008_v47, 0.0  ;;  %v2244_v38 = vmul.f32 0.01, %v2008_v47  ;;  %v3051_v43 = vmul.f32 0.01, %v2815_v61  ;;  %vm2994_vm12 = vcmp.gt.f32.partialorder %v2815_v61, 0.0 }
 0x21a   :  { %v3164_v12 = vmax.f32 %v2357_v34, %v3107_v15  ;;  %v2012_v13 = vpop.f32.mrf.mxu0  ;;  %v2819_v44 = vpop.f32.mrf.mxu1 }
 0x21b   :  { %v2301_v18 = vsel %vm2187_vm11, %v2008_v47, %v2244_v38  ;;  %v2013_v19 = vadd.f32 %v6352_v10, %v2012_v13  ;;  %v2820_v42 = vadd.f32 %v6352_v10, %v2819_v44  ;;  %v3108_v6 = vsel %vm2994_vm12, %v2815_v61, %v3051_v43  ;;  %v7221_v47 = vld [vmem:[#allocation16_spill] sm:$0xff] }
 0x21c   :  { %3221 = vst.msk [vmem:[%s7039_s3 + $0xc8] sm:$0xff] %vm82_vm0, %v3164_v12  ;;  %v2358_v8 = vmax.f32 %v7213_v39, %v2301_v18  ;;  %v4351_v37 = vpop.f32.mrf.mxu0  ;;  %v4530_v56 = vpop.f32.mrf.mxu1  ;;  %v7222_v61 = vmax.f32 %v7220_v16, %v7221_v47  ;;  %v7223_v18 = vld [vmem:[#allocation17_spill] sm:$0xff] }
 0x21d   :  { %vm2188_vm13 = vcmp.gt.f32.partialorder %v2013_v19, 0.0  ;;  %v2245_v7 = vmul.f32 0.01, %v2013_v19  ;;  %v3052_v59 = vmul.f32 0.01, %v2820_v42  ;;  %vm2995_vm14 = vcmp.gt.f32.partialorder %v2820_v42, 0.0 }
 0x21e   :  { %v3165_v3 = vmax.f32 %v2358_v8, %v3108_v6  ;;  %v2017_v4 = vpop.f32.mrf.mxu0  ;;  %v2824_v9 = vpop.f32.mrf.mxu1 }
 0x21f   :  { %v2302_v10 = vsel %vm2188_vm13, %v2013_v19, %v2245_v7  ;;  %v2018_v33 = vadd.f32 %v6763_v57, %v2017_v4  ;;  %v2825_v14 = vadd.f32 %v6763_v57, %v2824_v9  ;;  %v3109_v29 = vsel %vm2995_vm14, %v2820_v42, %v3052_v59  ;;  %v7224_v19 = vld [vmem:[#allocation18_spill] sm:$0xff] }
 0x220   :  { %3222 = vst.msk [vmem:[%s7039_s3 + $0xd0] sm:$0xff] %vm82_vm0, %v3165_v3  ;;  %v2359_v20 = vmax.f32 %v7216_v46, %v2302_v10  ;;  %v4354_v53 = vpop.f32.mrf.mxu0  ;;  %v4533_v54 = vpop.f32.mrf.mxu1  ;;  %v7225_v42 = vmax.f32 %v7223_v18, %v7224_v19  ;;  %v7226_v10 = vld [vmem:[#allocation19_spill] sm:$0xff] }
 0x221   :  { %vm2189_vm15 = vcmp.gt.f32.partialorder %v2018_v33, 0.0  ;;  %v2246_v30 = vmul.f32 0.01, %v2018_v33  ;;  %v3053_v28 = vmul.f32 0.01, %v2825_v14  ;;  %vm2996_vm2 = vcmp.gt.f32.partialorder %v2825_v14, 0.0 }
 0x222   :  { %v3166_v26 = vmax.f32 %v2359_v20, %v3109_v29  ;;  %v2022_v27 = vpop.f32.mrf.mxu0  ;;  %v2829_v31 = vpop.f32.mrf.mxu1 }
 0x223   :  { %v2303_v25 = vsel %vm2189_vm15, %v2018_v33, %v2246_v30  ;;  %v2023_v62 = vadd.f32 %v6763_v57, %v2022_v27  ;;  %v2830_v36 = vadd.f32 %v6763_v57, %v2829_v31  ;;  %v3110_v22 = vsel %vm2996_vm2, %v2825_v14, %v3053_v28  ;;  %v7227_v33 = vld [vmem:[#allocation20_spill] sm:$0xff] }
 0x224   :  { %3223 = vst.msk [vmem:[%s7039_s3 + $0xd8] sm:$0xff] %vm82_vm0, %v3166_v26  ;;  %v2360_v23 = vmax.f32 %v7219_v21, %v2303_v25  ;;  %v4357_v35 = vpop.f32.mrf.mxu0  ;;  %v4536_v40 = vpop.f32.mrf.mxu1  ;;  %v7228_v14 = vmax.f32 %v7226_v10, %v7227_v33  ;;  %v7229_v25 = vld [vmem:[#allocation21_spill] sm:$0xff] }
 0x225   :  { %vm2190_vm3 = vcmp.gt.f32.partialorder %v2023_v62, 0.0  ;;  %v2247_v49 = vmul.f32 0.01, %v2023_v62  ;;  %v3054_v2 = vmul.f32 0.01, %v2830_v36  ;;  %vm2997_vm4 = vcmp.gt.f32.partialorder %v2830_v36, 0.0 }
 0x226   :  { %v3167_v55 = vmax.f32 %v2360_v23, %v3110_v22  ;;  %v2027_v24 = vpop.f32.mrf.mxu0  ;;  %v2834_v63 = vpop.f32.mrf.mxu1 }
 0x227   :  { %v2304_v32 = vsel %vm2190_vm3, %v2023_v62, %v2247_v49  ;;  %v2028_v51 = vadd.f32 %v6763_v57, %v2027_v24  ;;  %v2835_v52 = vadd.f32 %v6763_v57, %v2834_v63  ;;  %v3111_v34 = vsel %vm2997_vm4, %v2830_v36, %v3054_v2  ;;  %v7230_v62 = vld [vmem:[#allocation22_spill] sm:$0xff] }
 0x228   :  { %3224 = vst.msk [vmem:[%s7039_s3 + $0xe0] sm:$0xff] %vm82_vm0, %v3167_v55  ;;  %v2361_v1 = vmax.f32 %v7222_v61, %v2304_v32  ;;  %v4360_v48 = vpop.f32.mrf.mxu0  ;;  %v4539_v17 = vpop.f32.mrf.mxu1  ;;  %v7231_v36 = vmax.f32 %v7229_v25, %v7230_v62  ;;  %v7232_v32 = vld [vmem:[#allocation23_spill] sm:$0xff] }
 0x229   :  { %vm2191_vm5 = vcmp.gt.f32.partialorder %v2028_v51, 0.0  ;;  %v2248_v5 = vmul.f32 0.01, %v2028_v51  ;;  %v3055_v11 = vmul.f32 0.01, %v2835_v52  ;;  %vm2998_vm1 = vcmp.gt.f32.partialorder %v2835_v52, 0.0 }
 0x22a   :  { %v3168_v15 = vmax.f32 %v2361_v1, %v3111_v34  ;;  %v2032_v38 = vpop.f32.mrf.mxu0  ;;  %v2839_v43 = vpop.f32.mrf.mxu1 }
 0x22b   :  { %v2305_v12 = vsel %vm2191_vm5, %v2028_v51, %v2248_v5  ;;  %v2033_v13 = vadd.f32 %v6763_v57, %v2032_v38  ;;  %v2840_v44 = vadd.f32 %v6763_v57, %v2839_v43  ;;  %v3112_v8 = vsel %vm2998_vm1, %v2835_v52, %v3055_v11  ;;  %v7233_v51 = vld [vmem:[#allocation24_spill] sm:$0xff] }
 0x22c   :  { %3225 = vst.msk [vmem:[%s7039_s3 + $0xe8] sm:$0xff] %vm82_vm0, %v3168_v15  ;;  %v2362_v50 = vmax.f32 %v7225_v42, %v2305_v12  ;;  %v4363_v0 = vpop.f32.mrf.mxu0  ;;  %v4542_v39 = vpop.f32.mrf.mxu1  ;;  %v7234_v52 = vmax.f32 %v7232_v32, %v7233_v51  ;;  %v7235_v12 = vld [vmem:[#allocation25_spill] sm:$0xff] }
 0x22d   :  { %vm2192_vm6 = vcmp.gt.f32.partialorder %v2033_v13, 0.0  ;;  %v2249_v37 = vmul.f32 0.01, %v2033_v13  ;;  %v3056_v56 = vmul.f32 0.01, %v2840_v44  ;;  %vm2999_vm7 = vcmp.gt.f32.partialorder %v2840_v44, 0.0 }
 0x22e   :  { %v3169_v6 = vmax.f32 %v2362_v50, %v3112_v8  ;;  %v2037_v7 = vpop.f32.mrf.mxu0  ;;  %v2844_v59 = vpop.f32.mrf.mxu1 }
 0x22f   :  { %v2306_v3 = vsel %vm2192_vm6, %v2033_v13, %v2249_v37  ;;  %v2038_v4 = vadd.f32 %v6763_v57, %v2037_v7  ;;  %v2845_v9 = vadd.f32 %v6763_v57, %v2844_v59  ;;  %v3113_v20 = vsel %vm2999_vm7, %v2840_v44, %v3056_v56  ;;  %v7236_v13 = vld [vmem:[#allocation26_spill] sm:$0xff] }
 0x230   :  { %3226 = vst.msk [vmem:[%s7039_s3 + $0xf0] sm:$0xff] %vm82_vm0, %v3169_v6  ;;  %v2363_v41 = vmax.f32 %v7228_v14, %v2306_v3  ;;  %v4366_v45 = vpop.f32.mrf.mxu0  ;;  %v4545_v46 = vpop.f32.mrf.mxu1  ;;  %v7237_v44 = vmax.f32 %v7235_v12, %v7236_v13  ;;  %v7238_v3 = vld [vmem:[#allocation27_spill] sm:$0xff] }
 0x231   :  { %vm2193_vm8 = vcmp.gt.f32.partialorder %v2038_v4, 0.0  ;;  %v2250_v53 = vmul.f32 0.01, %v2038_v4  ;;  %v3057_v54 = vmul.f32 0.01, %v2845_v9  ;;  %vm3000_vm9 = vcmp.gt.f32.partialorder %v2845_v9, 0.0 }
 0x232   :  { %v3170_v29 = vmax.f32 %v2363_v41, %v3113_v20  ;;  %v2042_v30 = vpop.f32.mrf.mxu0  ;;  %v2849_v28 = vpop.f32.mrf.mxu1 }
 0x233   :  { %v2307_v26 = vsel %vm2193_vm8, %v2038_v4, %v2250_v53  ;;  %v2043_v27 = vadd.f32 %v6763_v57, %v2042_v30  ;;  %v2850_v31 = vadd.f32 %v6763_v57, %v2849_v28  ;;  %v3114_v23 = vsel %vm3000_vm9, %v2845_v9, %v3057_v54  ;;  %v7239_v4 = vld [vmem:[#allocation28_spill] sm:$0xff] }
 0x234   :  { %3227 = vst.msk [vmem:[%s7039_s3 + $0xf8] sm:$0xff] %vm82_vm0, %v3170_v29  ;;  %v2364_v58 = vmax.f32 %v7231_v36, %v2307_v26  ;;  %v4369_v60 = vpop.f32.mrf.mxu0  ;;  %v4548_v21 = vpop.f32.mrf.mxu1  ;;  %v7240_v9 = vmax.f32 %v7238_v3, %v7239_v4  ;;  %v7241_v26 = vld [vmem:[#allocation29_spill] sm:$0xff] }
 0x235   :  { %vm2194_vm10 = vcmp.gt.f32.partialorder %v2043_v27, 0.0  ;;  %v2251_v35 = vmul.f32 0.01, %v2043_v27  ;;  %v3058_v40 = vmul.f32 0.01, %v2850_v31  ;;  %vm3001_vm11 = vcmp.gt.f32.partialorder %v2850_v31, 0.0 }
 0x236   :  { %v3171_v22 = vmax.f32 %v2364_v58, %v3114_v23  ;;  %v2047_v49 = vpop.f32.mrf.mxu0  ;;  %v2854_v2 = vpop.f32.mrf.mxu1 }
 0x237   :  { %v2308_v55 = vsel %vm2194_vm10, %v2043_v27, %v2251_v35  ;;  %v2048_v24 = vadd.f32 %v6763_v57, %v2047_v49  ;;  %v2855_v63 = vadd.f32 %v6763_v57, %v2854_v2  ;;  %v3115_v1 = vsel %vm3001_vm11, %v2850_v31, %v3058_v40  ;;  %v7242_v27 = vld [vmem:[#allocation30_spill] sm:$0xff] }
 0x238   :  { %3228 = vst.msk [vmem:[%s7039_s3 + $0x100] sm:$0xff] %vm82_vm0, %v3171_v22  ;;  %v2365_v16 = vmax.f32 %v7234_v52, %v2308_v55  ;;  %v4372_v47 = vpop.f32.mrf.mxu0  ;;  %v4551_v61 = vpop.f32.mrf.mxu1  ;;  %v7243_v31 = vmax.f32 %v7241_v26, %v7242_v27  ;;  %v7244_v55 = vld [vmem:[#allocation31_spill] sm:$0xff] }
 0x239   :  { %vm2195_vm12 = vcmp.gt.f32.partialorder %v2048_v24, 0.0  ;;  %v2252_v48 = vmul.f32 0.01, %v2048_v24  ;;  %v3059_v17 = vmul.f32 0.01, %v2855_v63  ;;  %vm3002_vm13 = vcmp.gt.f32.partialorder %v2855_v63, 0.0 }
 0x23a   :  { %v3172_v34 = vmax.f32 %v2365_v16, %v3115_v1  ;;  %v2052_v5 = vpop.f32.mrf.mxu0  ;;  %v2859_v11 = vpop.f32.mrf.mxu1 }
 0x23b   :  { %v2309_v15 = vsel %vm2195_vm12, %v2048_v24, %v2252_v48  ;;  %v2053_v38 = vadd.f32 %v6763_v57, %v2052_v5  ;;  %v2860_v43 = vadd.f32 %v6763_v57, %v2859_v11  ;;  %v3116_v50 = vsel %vm3002_vm13, %v2855_v63, %v3059_v17  ;;  %v7245_v24 = vld [vmem:[#allocation32_spill] sm:$0xff] }
 0x23c   :  { %3229 = vst.msk [vmem:[%s7039_s3 + $0x108] sm:$0xff] %vm82_vm0, %v3172_v34  ;;  %v2366_v18 = vmax.f32 %v7237_v44, %v2309_v15  ;;  %v4375_v19 = vpop.f32.mrf.mxu0  ;;  %v4554_v42 = vpop.f32.mrf.mxu1  ;;  %v7246_v63 = vmax.f32 %v7244_v55, %v7245_v24  ;;  %v7247_v15 = vld [vmem:[#allocation33_spill] sm:$0xff] }
 0x23d   :  { %vm2196_vm14 = vcmp.gt.f32.partialorder %v2053_v38, 0.0  ;;  %v2253_v0 = vmul.f32 0.01, %v2053_v38  ;;  %v3060_v39 = vmul.f32 0.01, %v2860_v43  ;;  %vm3003_vm15 = vcmp.gt.f32.partialorder %v2860_v43, 0.0 }
 0x23e   :  { %v3173_v8 = vmax.f32 %v2366_v18, %v3116_v50  ;;  %v2057_v37 = vpop.f32.mrf.mxu0  ;;  %v2864_v56 = vpop.f32.mrf.mxu1 }
 0x23f   :  { %v2310_v6 = vsel %vm2196_vm14, %v2053_v38, %v2253_v0  ;;  %v2058_v7 = vadd.f32 %v6763_v57, %v2057_v37  ;;  %v2865_v59 = vadd.f32 %v6763_v57, %v2864_v56  ;;  %v3117_v41 = vsel %vm3003_vm15, %v2860_v43, %v3060_v39  ;;  %v7248_v38 = vld [vmem:[#allocation34_spill] sm:$0xff] }
 0x240   :  { %3230 = vst.msk [vmem:[%s7039_s3 + $0x110] sm:$0xff] %vm82_vm0, %v3173_v8  ;;  %v2367_v10 = vmax.f32 %v7240_v9, %v2310_v6  ;;  %v4378_v33 = vpop.f32.mrf.mxu0  ;;  %v4557_v14 = vpop.f32.mrf.mxu1  ;;  %v7249_v43 = vmax.f32 %v7247_v15, %v7248_v38  ;;  %v7250_v6 = vld [vmem:[#allocation35_spill] sm:$0xff] }
 0x241   :  { %vm2197_vm2 = vcmp.gt.f32.partialorder %v2058_v7, 0.0  ;;  %v2254_v45 = vmul.f32 0.01, %v2058_v7  ;;  %v3061_v46 = vmul.f32 0.01, %v2865_v59  ;;  %vm3004_vm3 = vcmp.gt.f32.partialorder %v2865_v59, 0.0 }
 0x242   :  { %v3174_v20 = vmax.f32 %v2367_v10, %v3117_v41  ;;  %v2062_v53 = vpop.f32.mrf.mxu0  ;;  %v2869_v54 = vpop.f32.mrf.mxu1 }
 0x243   :  { %v2311_v29 = vsel %vm2197_vm2, %v2058_v7, %v2254_v45  ;;  %v2063_v30 = vadd.f32 %v6763_v57, %v2062_v53  ;;  %v2870_v28 = vadd.f32 %v6763_v57, %v2869_v54  ;;  %v3118_v58 = vsel %vm3004_vm3, %v2865_v59, %v3061_v46  ;;  %v7251_v7 = vld [vmem:[#allocation36_spill] sm:$0xff] }
 0x244   :  { %3231 = vst.msk [vmem:[%s7039_s3 + $0x118] sm:$0xff] %vm82_vm0, %v3174_v20  ;;  %v2368_v25 = vmax.f32 %v7243_v31, %v2311_v29  ;;  %v4381_v62 = vpop.f32.mrf.mxu0  ;;  %v4560_v36 = vpop.f32.mrf.mxu1  ;;  %v7252_v59 = vmax.f32 %v7250_v6, %v7251_v7  ;;  %v7253_v29 = vld [vmem:[#allocation37_spill] sm:$0xff] }
 0x245   :  { %vm2198_vm4 = vcmp.gt.f32.partialorder %v2063_v30, 0.0  ;;  %v2255_v60 = vmul.f32 0.01, %v2063_v30  ;;  %v3062_v21 = vmul.f32 0.01, %v2870_v28  ;;  %vm3005_vm5 = vcmp.gt.f32.partialorder %v2870_v28, 0.0 }
 0x246   :  { %v3175_v23 = vmax.f32 %v2368_v25, %v3118_v58  ;;  %v2067_v35 = vpop.f32.mrf.mxu0  ;;  %v2874_v40 = vpop.f32.mrf.mxu1 }
 0x247   :  { %v2312_v22 = vsel %vm2198_vm4, %v2063_v30, %v2255_v60  ;;  %v2068_v49 = vadd.f32 %v6763_v57, %v2067_v35  ;;  %v2875_v2 = vadd.f32 %v6763_v57, %v2874_v40  ;;  %v3119_v16 = vsel %vm3005_vm5, %v2870_v28, %v3062_v21  ;;  %v7254_v30 = vld [vmem:[#allocation38_spill] sm:$0xff] }
 0x248   :  { %3232 = vst.msk [vmem:[%s7039_s3 + $0x120] sm:$0xff] %vm82_vm0, %v3175_v23  ;;  %v2369_v32 = vmax.f32 %v7246_v63, %v2312_v22  ;;  %v4384_v51 = vpop.f32.mrf.mxu0  ;;  %v4563_v52 = vpop.f32.mrf.mxu1  ;;  %v7255_v28 = vmax.f32 %v7253_v29, %v7254_v30  ;;  %v7256_v22 = vld [vmem:[#allocation39_spill] sm:$0xff] }
 0x249   :  { %vm2199_vm1 = vcmp.gt.f32.partialorder %v2068_v49, 0.0  ;;  %v2256_v47 = vmul.f32 0.01, %v2068_v49  ;;  %v3063_v61 = vmul.f32 0.01, %v2875_v2  ;;  %vm3006_vm6 = vcmp.gt.f32.partialorder %v2875_v2, 0.0 }
 0x24a   :  { %v3176_v1 = vmax.f32 %v2369_v32, %v3119_v16  ;;  %v2072_v48 = vpop.f32.mrf.mxu0  ;;  %v2879_v17 = vpop.f32.mrf.mxu1 }
 0x24b   :  { %v2313_v34 = vsel %vm2199_vm1, %v2068_v49, %v2256_v47  ;;  %v2073_v5 = vadd.f32 %v6763_v57, %v2072_v48  ;;  %v2880_v11 = vadd.f32 %v6763_v57, %v2879_v17  ;;  %v3120_v18 = vsel %vm3006_vm6, %v2875_v2, %v3063_v61  ;;  %v7257_v49 = vld [vmem:[#allocation40_spill] sm:$0xff] }
 0x24c   :  { %3233 = vst.msk [vmem:[%s7039_s3 + $0x128] sm:$0xff] %vm82_vm0, %v3176_v1  ;;  %v2370_v12 = vmax.f32 %v7249_v43, %v2313_v34  ;;  %v4387_v13 = vpop.f32.mrf.mxu0  ;;  %v4566_v44 = vpop.f32.mrf.mxu1  ;;  %v7258_v2 = vmax.f32 %v7256_v22, %v7257_v49  ;;  %v7259_v34 = vld [vmem:[#allocation41_spill] sm:$0xff] }
 0x24d   :  { %vm2200_vm7 = vcmp.gt.f32.partialorder %v2073_v5, 0.0  ;;  %v2257_v19 = vmul.f32 0.01, %v2073_v5  ;;  %v3064_v42 = vmul.f32 0.01, %v2880_v11  ;;  %vm3007_vm8 = vcmp.gt.f32.partialorder %v2880_v11, 0.0 }
 0x24e   :  { %v3177_v50 = vmax.f32 %v2370_v12, %v3120_v18  ;;  %v2077_v0 = vpop.f32.mrf.mxu0  ;;  %v2884_v39 = vpop.f32.mrf.mxu1 }
 0x24f   :  { %v2314_v8 = vsel %vm2200_vm7, %v2073_v5, %v2257_v19  ;;  %v2078_v37 = vadd.f32 %v6763_v57, %v2077_v0  ;;  %v2885_v56 = vadd.f32 %v6763_v57, %v2884_v39  ;;  %v3121_v10 = vsel %vm3007_vm8, %v2880_v11, %v3064_v42  ;;  %v7260_v5 = vld [vmem:[#allocation42_spill] sm:$0xff] }
 0x250   :  { %3234 = vst.msk [vmem:[%s7039_s3 + $0x130] sm:$0xff] %vm82_vm0, %v3177_v50  ;;  %v2371_v3 = vmax.f32 %v7252_v59, %v2314_v8  ;;  %v4390_v4 = vpop.f32.mrf.mxu0  ;;  %v4569_v9 = vpop.f32.mrf.mxu1  ;;  %v7261_v11 = vmax.f32 %v7259_v34, %v7260_v5  ;;  %v7262_v8 = vld [vmem:[#allocation43_spill] sm:$0xff] }
 0x251   :  { %vm2201_vm9 = vcmp.gt.f32.partialorder %v2078_v37, 0.0  ;;  %v2258_v33 = vmul.f32 0.01, %v2078_v37  ;;  %v3065_v14 = vmul.f32 0.01, %v2885_v56  ;;  %vm3008_vm10 = vcmp.gt.f32.partialorder %v2885_v56, 0.0 }
 0x252   :  { %v3178_v41 = vmax.f32 %v2371_v3, %v3121_v10  ;;  %v2082_v45 = vpop.f32.mrf.mxu0  ;;  %v2889_v46 = vpop.f32.mrf.mxu1 }
 0x253   :  { %v2315_v20 = vsel %vm2201_vm9, %v2078_v37, %v2258_v33  ;;  %v2083_v53 = vadd.f32 %v6763_v57, %v2082_v45  ;;  %v2890_v54 = vadd.f32 %v6763_v57, %v2889_v46  ;;  %v3122_v25 = vsel %vm3008_vm10, %v2885_v56, %v3065_v14  ;;  %v7263_v37 = vld [vmem:[#allocation44_spill] sm:$0xff] }
 0x254   :  { %3235 = vst.msk [vmem:[%s7039_s3 + $0x138] sm:$0xff] %vm82_vm0, %v3178_v41  ;;  %v2372_v26 = vmax.f32 %v7255_v28, %v2315_v20  ;;  %v4393_v27 = vpop.f32.mrf.mxu0  ;;  %v4572_v31 = vpop.f32.mrf.mxu1  ;;  %v7264_v56 = vmax.f32 %v7262_v8, %v7263_v37  ;;  %v7265_v20 = vld [vmem:[#allocation45_spill] sm:$0xff] }
 0x255   :  { %vm2202_vm11 = vcmp.gt.f32.partialorder %v2083_v53, 0.0  ;;  %v2259_v62 = vmul.f32 0.01, %v2083_v53  ;;  %v3066_v36 = vmul.f32 0.01, %v2890_v54  ;;  %vm3009_vm12 = vcmp.gt.f32.partialorder %v2890_v54, 0.0 }
 0x256   :  { %v3179_v58 = vmax.f32 %v2372_v26, %v3122_v25  ;;  %v2087_v60 = vpop.f32.mrf.mxu0  ;;  %v2894_v21 = vpop.f32.mrf.mxu1 }
 0x257   :  { %v2316_v23 = vsel %vm2202_vm11, %v2083_v53, %v2259_v62  ;;  %v2088_v35 = vadd.f32 %v6763_v57, %v2087_v60  ;;  %v2895_v40 = vadd.f32 %v6763_v57, %v2894_v21  ;;  %v3123_v32 = vsel %vm3009_vm12, %v2890_v54, %v3066_v36  ;;  %v7266_v53 = vld [vmem:[#allocation46_spill] sm:$0xff] }
 0x258   :  { %3236 = vst.msk [vmem:[%s7039_s3 + $0x140] sm:$0xff] %vm82_vm0, %v3179_v58  ;;  %v2373_v55 = vmax.f32 %v7258_v2, %v2316_v23  ;;  %v4396_v24 = vpop.f32.mrf.mxu0  ;;  %v4575_v63 = vpop.f32.mrf.mxu1  ;;  %v7267_v54 = vmax.f32 %v7265_v20, %v7266_v53  ;;  %v7268_v23 = vld [vmem:[#allocation47_spill] sm:$0xff] }
 0x259   :  { %vm2203_vm13 = vcmp.gt.f32.partialorder %v2088_v35, 0.0  ;;  %v2260_v51 = vmul.f32 0.01, %v2088_v35  ;;  %v3067_v52 = vmul.f32 0.01, %v2895_v40  ;;  %vm3010_vm14 = vcmp.gt.f32.partialorder %v2895_v40, 0.0 }
 0x25a   :  { %v3180_v16 = vmax.f32 %v2373_v55, %v3123_v32  ;;  %v2092_v47 = vpop.f32.mrf.mxu0  ;;  %v2899_v61 = vpop.f32.mrf.mxu1 }
 0x25b   :  { %v2317_v1 = vsel %vm2203_vm13, %v2088_v35, %v2260_v51  ;;  %v2093_v48 = vadd.f32 %v6763_v57, %v2092_v47  ;;  %v2900_v17 = vadd.f32 %v6763_v57, %v2899_v61  ;;  %v3124_v12 = vsel %vm3010_vm14, %v2895_v40, %v3067_v52  ;;  %v7269_v35 = vld [vmem:[#allocation48_spill] sm:$0xff] }
 0x25c   :  { %3237 = vst.msk [vmem:[%s7039_s3 + $0x148] sm:$0xff] %vm82_vm0, %v3180_v16  ;;  %v2374_v15 = vmax.f32 %v7261_v11, %v2317_v1  ;;  %v4399_v38 = vpop.f32.mrf.mxu0  ;;  %v4578_v43 = vpop.f32.mrf.mxu1  ;;  %v7270_v40 = vmax.f32 %v7268_v23, %v7269_v35  ;;  %v7271_v1 = vld [vmem:[#allocation49_spill] sm:$0xff] }
 0x25d   :  { %vm2204_vm15 = vcmp.gt.f32.partialorder %v2093_v48, 0.0  ;;  %v2261_v13 = vmul.f32 0.01, %v2093_v48  ;;  %v3068_v44 = vmul.f32 0.01, %v2900_v17  ;;  %vm3011_vm2 = vcmp.gt.f32.partialorder %v2900_v17, 0.0 }
 0x25e   :  { %v3181_v18 = vmax.f32 %v2374_v15, %v3124_v12  ;;  %v2097_v19 = vpop.f32.mrf.mxu0  ;;  %v2904_v42 = vpop.f32.mrf.mxu1 }
 0x25f   :  { %v2318_v50 = vsel %vm2204_vm15, %v2093_v48, %v2261_v13  ;;  %v2098_v0 = vadd.f32 %v6763_v57, %v2097_v19  ;;  %v2905_v39 = vadd.f32 %v6763_v57, %v2904_v42  ;;  %v3125_v3 = vsel %vm3011_vm2, %v2900_v17, %v3068_v44  ;;  %v7272_v48 = vld [vmem:[#allocation50_spill] sm:$0xff] }
 0x260   :  { %3238 = vst.msk [vmem:[%s7039_s3 + $0x150] sm:$0xff] %vm82_vm0, %v3181_v18  ;;  %v2375_v6 = vmax.f32 %v7264_v56, %v2318_v50  ;;  %v4402_v7 = vpop.f32.mrf.mxu0  ;;  %v4581_v59 = vpop.f32.mrf.mxu1  ;;  %v7273_v17 = vmax.f32 %v7271_v1, %v7272_v48  ;;  %v7274_v50 = vld [vmem:[#allocation51_spill] sm:$0xff] }
 0x261   :  { %vm2205_vm3 = vcmp.gt.f32.partialorder %v2098_v0, 0.0  ;;  %v2262_v4 = vmul.f32 0.01, %v2098_v0  ;;  %v3069_v9 = vmul.f32 0.01, %v2905_v39  ;;  %vm3012_vm4 = vcmp.gt.f32.partialorder %v2905_v39, 0.0 }
 0x262   :  { %v3182_v10 = vmax.f32 %v2375_v6, %v3125_v3  ;;  %v2102_v33 = vpop.f32.mrf.mxu0  ;;  %v2909_v14 = vpop.f32.mrf.mxu1 }
 0x263   :  { %v2319_v41 = vsel %vm2205_vm3, %v2098_v0, %v2262_v4  ;;  %v2103_v45 = vadd.f32 %v6763_v57, %v2102_v33  ;;  %v2910_v46 = vadd.f32 %v6763_v57, %v2909_v14  ;;  %v3126_v26 = vsel %vm3012_vm4, %v2905_v39, %v3069_v9  ;;  %v7275_v0 = vld [vmem:[#allocation52_spill] sm:$0xff] }
 0x264   :  { %3239 = vst.msk [vmem:[%s7039_s3 + $0x158] sm:$0xff] %vm82_vm0, %v3182_v10  ;;  %v2376_v29 = vmax.f32 %v7267_v54, %v2319_v41  ;;  %v4405_v30 = vpop.f32.mrf.mxu0  ;;  %v4584_v28 = vpop.f32.mrf.mxu1  ;;  %v7276_v39 = vmax.f32 %v7274_v50, %v7275_v0  ;;  %v7277_v41 = vld [vmem:[#allocation53_spill] sm:$0xff] }
 0x265   :  { %vm2206_vm5 = vcmp.gt.f32.partialorder %v2103_v45, 0.0  ;;  %v2263_v27 = vmul.f32 0.01, %v2103_v45  ;;  %v3070_v31 = vmul.f32 0.01, %v2910_v46  ;;  %vm3013_vm1 = vcmp.gt.f32.partialorder %v2910_v46, 0.0 }
 0x266   :  { %v3183_v25 = vmax.f32 %v2376_v29, %v3126_v26  ;;  %v2107_v62 = vpop.f32.mrf.mxu0  ;;  %v2914_v36 = vpop.f32.mrf.mxu1 }
 0x267   :  { %v2320_v58 = vsel %vm2206_vm5, %v2103_v45, %v2263_v27  ;;  %v2108_v60 = vadd.f32 %v6763_v57, %v2107_v62  ;;  %v2915_v21 = vadd.f32 %v6763_v57, %v2914_v36  ;;  %v3127_v55 = vsel %vm3013_vm1, %v2910_v46, %v3070_v31  ;;  %v7278_v45 = vld [vmem:[#allocation54_spill] sm:$0xff] }
 0x268   :  { %3240 = vst.msk [vmem:[%s7039_s3 + $0x160] sm:$0xff] %vm82_vm0, %v3183_v25  ;;  %v2377_v22 = vmax.f32 %v7270_v40, %v2320_v58  ;;  %v4408_v49 = vpop.f32.mrf.mxu0  ;;  %v4587_v2 = vpop.f32.mrf.mxu1  ;;  %v7279_v46 = vmax.f32 %v7277_v41, %v7278_v45  ;;  %v7280_v58 = vld [vmem:[#allocation55_spill] sm:$0xff] }
 0x269   :  { %vm2207_vm6 = vcmp.gt.f32.partialorder %v2108_v60, 0.0  ;;  %v2264_v24 = vmul.f32 0.01, %v2108_v60  ;;  %v3071_v63 = vmul.f32 0.01, %v2915_v21  ;;  %vm3014_vm7 = vcmp.gt.f32.partialorder %v2915_v21, 0.0 }
 0x26a   :  { %v3184_v32 = vmax.f32 %v2377_v22, %v3127_v55  ;;  %v2112_v51 = vpop.f32.mrf.mxu0  ;;  %v2919_v52 = vpop.f32.mrf.mxu1 }
 0x26b   :  { %v2321_v16 = vsel %vm2207_vm6, %v2108_v60, %v2264_v24  ;;  %v2113_v47 = vadd.f32 %v6763_v57, %v2112_v51  ;;  %v2920_v61 = vadd.f32 %v6763_v57, %v2919_v52  ;;  %v3128_v15 = vsel %vm3014_vm7, %v2915_v21, %v3071_v63  ;;  %v7281_v60 = vld [vmem:[#allocation56_spill] sm:$0xff] }
 0x26c   :  { %3241 = vst.msk [vmem:[%s7039_s3 + $0x168] sm:$0xff] %vm82_vm0, %v3184_v32  ;;  %v2378_v34 = vmax.f32 %v7273_v17, %v2321_v16  ;;  %v4411_v5 = vpop.f32.mrf.mxu0  ;;  %v4590_v11 = vpop.f32.mrf.mxu1  ;;  %v7282_v21 = vmax.f32 %v7280_v58, %v7281_v60  ;;  %v7283_v16 = vld [vmem:[#allocation57_spill] sm:$0xff] }
 0x26d   :  { %vm2208_vm8 = vcmp.gt.f32.partialorder %v2113_v47, 0.0  ;;  %v2265_v38 = vmul.f32 0.01, %v2113_v47  ;;  %v3072_v43 = vmul.f32 0.01, %v2920_v61  ;;  %vm3015_vm9 = vcmp.gt.f32.partialorder %v2920_v61, 0.0 }
 0x26e   :  { %v3185_v12 = vmax.f32 %v2378_v34, %v3128_v15  ;;  %v2117_v13 = vpop.f32.mrf.mxu0  ;;  %v2924_v44 = vpop.f32.mrf.mxu1 }
 0x26f   :  { %v2322_v18 = vsel %vm2208_vm8, %v2113_v47, %v2265_v38  ;;  %v2118_v19 = vadd.f32 %v6763_v57, %v2117_v13  ;;  %v2925_v42 = vadd.f32 %v6763_v57, %v2924_v44  ;;  %v3129_v6 = vsel %vm3015_vm9, %v2920_v61, %v3072_v43  ;;  %v7284_v47 = vld [vmem:[#allocation58_spill] sm:$0xff] }
 0x270   :  { %3242 = vst.msk [vmem:[%s7039_s3 + $0x170] sm:$0xff] %vm82_vm0, %v3185_v12  ;;  %v2379_v8 = vmax.f32 %v7276_v39, %v2322_v18  ;;  %v4414_v37 = vpop.f32.mrf.mxu0  ;;  %v4593_v56 = vpop.f32.mrf.mxu1  ;;  %v7285_v61 = vmax.f32 %v7283_v16, %v7284_v47  ;;  %v7286_v18 = vld [vmem:[#allocation59_spill] sm:$0xff] }
 0x271   :  { %vm2209_vm10 = vcmp.gt.f32.partialorder %v2118_v19, 0.0  ;;  %v2266_v7 = vmul.f32 0.01, %v2118_v19  ;;  %v3073_v59 = vmul.f32 0.01, %v2925_v42  ;;  %vm3016_vm11 = vcmp.gt.f32.partialorder %v2925_v42, 0.0 }
 0x272   :  { %v3186_v3 = vmax.f32 %v2379_v8, %v3129_v6  ;;  %v2122_v4 = vpop.f32.mrf.mxu0  ;;  %v2929_v9 = vpop.f32.mrf.mxu1 }
 0x273   :  { %v2323_v10 = vsel %vm2209_vm10, %v2118_v19, %v2266_v7  ;;  %v2123_v33 = vadd.f32 %v6763_v57, %v2122_v4  ;;  %v2930_v14 = vadd.f32 %v6763_v57, %v2929_v9  ;;  %v3130_v29 = vsel %vm3016_vm11, %v2925_v42, %v3073_v59  ;;  %v7287_v19 = vld [vmem:[#allocation60_spill] sm:$0xff] }
 0x274   :  { %3243 = vst.msk [vmem:[%s7039_s3 + $0x178] sm:$0xff] %vm82_vm0, %v3186_v3  ;;  %v2380_v20 = vmax.f32 %v7279_v46, %v2323_v10  ;;  %v4417_v53 = vpop.f32.mrf.mxu0  ;;  %v4596_v54 = vpop.f32.mrf.mxu1  ;;  %v7288_v42 = vmax.f32 %v7286_v18, %v7287_v19  ;;  %v7289_v10 = vld [vmem:[#allocation61_spill] sm:$0xff] }
 0x275   :  { %vm2210_vm12 = vcmp.gt.f32.partialorder %v2123_v33, 0.0  ;;  %v2267_v30 = vmul.f32 0.01, %v2123_v33  ;;  %v3074_v28 = vmul.f32 0.01, %v2930_v14  ;;  %vm3017_vm13 = vcmp.gt.f32.partialorder %v2930_v14, 0.0 }
 0x276   :  { %v3187_v26 = vmax.f32 %v2380_v20, %v3130_v29  ;;  %v2127_v27 = vpop.f32.mrf.mxu0  ;;  %v2934_v31 = vpop.f32.mrf.mxu1 }
 0x277   :  { %v2324_v25 = vsel %vm2210_vm12, %v2123_v33, %v2267_v30  ;;  %v2128_v62 = vadd.f32 %v6763_v57, %v2127_v27  ;;  %v2935_v36 = vadd.f32 %v6763_v57, %v2934_v31  ;;  %v3131_v22 = vsel %vm3017_vm13, %v2930_v14, %v3074_v28  ;;  %v7290_v33 = vld [vmem:[#allocation62_spill] sm:$0xff] }
 0x278   :  { %3244 = vst.msk [vmem:[%s7039_s3 + $0x180] sm:$0xff] %vm82_vm0, %v3187_v26  ;;  %v2381_v23 = vmax.f32 %v7282_v21, %v2324_v25  ;;  %v4420_v35 = vpop.f32.mrf.mxu0  ;;  %v4599_v40 = vpop.f32.mrf.mxu1  ;;  %v7291_v14 = vmax.f32 %v7289_v10, %v7290_v33  ;;  %v7292_v25 = vld [vmem:[#allocation63_spill] sm:$0xff]  ;;  %vm3252_vm13 = vcmask 254976  }
 0x279   :  { %vm2211_vm14 = vcmp.gt.f32.partialorder %v2128_v62, 0.0  ;;  %v2268_v49 = vmul.f32 0.01, %v2128_v62  ;;  %v3075_v2 = vmul.f32 0.01, %v2935_v36  ;;  %vm3018_vm15 = vcmp.gt.f32.partialorder %v2935_v36, 0.0 }
 0x27a   :  { %v3188_v55 = vmax.f32 %v2381_v23, %v3131_v22  ;;  %v2132_v24 = vpop.f32.mrf.mxu0  ;;  %v2939_v63 = vpop.f32.mrf.mxu1 }
 0x27b   :  { %v2325_v32 = vsel %vm2211_vm14, %v2128_v62, %v2268_v49  ;;  %v2133_v51 = vadd.f32 %v6763_v57, %v2132_v24  ;;  %v2940_v52 = vadd.f32 %v6763_v57, %v2939_v63  ;;  %v3132_v34 = vsel %vm3018_vm15, %v2935_v36, %v3075_v2  ;;  %v7293_v62 = vld [vmem:[#allocation64_spill] sm:$0xff] }
 0x27c   :  { %3245 = vst.msk [vmem:[%s7039_s3 + $0x188] sm:$0xff] %vm82_vm0, %v3188_v55  ;;  %v2382_v1 = vmax.f32 %v7285_v61, %v2325_v32  ;;  %v4423_v48 = vpop.f32.mrf.mxu0  ;;  %v4602_v17 = vpop.f32.mrf.mxu1  ;;  %v7294_v36 = vmax.f32 %v7292_v25, %v7293_v62  ;;  %v7295_v32 = vld [vmem:[#allocation65_spill] sm:$0xff] }
 0x27d   :  { %vm2212_vm2 = vcmp.gt.f32.partialorder %v2133_v51, 0.0  ;;  %v2269_v5 = vmul.f32 0.01, %v2133_v51  ;;  %v3076_v11 = vmul.f32 0.01, %v2940_v52  ;;  %vm3019_vm3 = vcmp.gt.f32.partialorder %v2940_v52, 0.0 }
 0x27e   :  { %v3189_v15 = vmax.f32 %v2382_v1, %v3132_v34  ;;  %v2137_v38 = vpop.f32.mrf.mxu0  ;;  %v2944_v43 = vpop.f32.mrf.mxu1 }
 0x27f   :  { %v2326_v12 = vsel %vm2212_vm2, %v2133_v51, %v2269_v5  ;;  %v2138_v13 = vadd.f32 %v6763_v57, %v2137_v38  ;;  %v2945_v44 = vadd.f32 %v6763_v57, %v2944_v43  ;;  %v3133_v8 = vsel %vm3019_vm3, %v2940_v52, %v3076_v11  ;;  %v7296_v51 = vld [vmem:[#allocation66_spill] sm:$0xff] }
 0x280   :  { %3246 = vst.msk [vmem:[%s7039_s3 + $0x190] sm:$0xff] %vm82_vm0, %v3189_v15  ;;  %v2383_v50 = vmax.f32 %v7288_v42, %v2326_v12  ;;  %v4426_v0 = vpop.f32.mrf.mxu0  ;;  %v4605_v39 = vpop.f32.mrf.mxu1  ;;  %v7297_v52 = vmax.f32 %v7295_v32, %v7296_v51  ;;  %v7298_v12 = vld [vmem:[#allocation67_spill] sm:$0xff] }
 0x281   :  { %vm2213_vm4 = vcmp.gt.f32.partialorder %v2138_v13, 0.0  ;;  %v2270_v37 = vmul.f32 0.01, %v2138_v13  ;;  %v3077_v56 = vmul.f32 0.01, %v2945_v44  ;;  %vm3020_vm5 = vcmp.gt.f32.partialorder %v2945_v44, 0.0 }
 0x282   :  { %v3190_v6 = vmax.f32 %v2383_v50, %v3133_v8  ;;  %v2142_v7 = vpop.f32.mrf.mxu0  ;;  %v2949_v59 = vpop.f32.mrf.mxu1 }
 0x283   :  { %v2327_v3 = vsel %vm2213_vm4, %v2138_v13, %v2270_v37  ;;  %v2143_v4 = vadd.f32 %v6763_v57, %v2142_v7  ;;  %v2950_v9 = vadd.f32 %v6763_v57, %v2949_v59  ;;  %v3134_v20 = vsel %vm3020_vm5, %v2945_v44, %v3077_v56  ;;  %v7299_v13 = vld [vmem:[#allocation68_spill] sm:$0xff]  ;;  %v7302_v56 = vld [vmem:[#allocation70_spill] sm:$0xff] }
 0x284   :  { %3247 = vst.msk [vmem:[%s7039_s3 + $0x198] sm:$0xff] %vm82_vm0, %v3190_v6  ;;  %v2384_v41 = vmax.f32 %v7291_v14, %v2327_v3  ;;  %v4429_v45 = vpop.f32.mrf.mxu0  ;;  %v4608_v46 = vpop.f32.mrf.mxu1  ;;  %v7300_v44 = vmax.f32 %v7298_v12, %v7299_v13 }
 0x285   :  { %vm2214_vm1 = vcmp.gt.f32.partialorder %v2143_v4, 0.0  ;;  %v2271_v53 = vmul.f32 0.01, %v2143_v4  ;;  %v3078_v54 = vmul.f32 0.01, %v2950_v9  ;;  %vm3021_vm6 = vcmp.gt.f32.partialorder %v2950_v9, 0.0 }
 0x286   :  { %v3191_v29 = vmax.f32 %v2384_v41, %v3134_v20  ;;  %v2147_v30 = vpop.f32.mrf.mxu0  ;;  %v2954_v28 = vpop.f32.mrf.mxu1 }
 0x287   :  { %v2328_v26 = vsel %vm2214_vm1, %v2143_v4, %v2271_v53  ;;  %v2148_v27 = vadd.f32 %v6763_v57, %v2147_v30  ;;  %v2955_v31 = vadd.f32 %v6763_v57, %v2954_v28  ;;  %v3135_v23 = vsel %vm3021_vm6, %v2950_v9, %v3078_v54 }
 0x288   :  { %3248 = vst.msk [vmem:[%s7039_s3 + $0x1a0] sm:$0xff] %vm82_vm0, %v3191_v29  ;;  %v2385_v58 = vmax.f32 %v7294_v36, %v2328_v26  ;;  %v4432_v60 = vpop.f32.mrf.mxu0  ;;  %v4611_v21 = vpop.f32.mrf.mxu1 }
 0x289   :  { %vm2215_vm7 = vcmp.gt.f32.partialorder %v2148_v27, 0.0  ;;  %v2272_v35 = vmul.f32 0.01, %v2148_v27  ;;  %v3079_v40 = vmul.f32 0.01, %v2955_v31  ;;  %vm3022_vm8 = vcmp.gt.f32.partialorder %v2955_v31, 0.0 }
 0x28a   :  { %v3192_v22 = vmax.f32 %v2385_v58, %v3135_v23  ;;  %v2152_v49 = vpop.f32.mrf.mxu0  ;;  %v2959_v2 = vpop.f32.mrf.mxu1 }
 0x28b   :  { %v2329_v55 = vsel %vm2215_vm7, %v2148_v27, %v2272_v35  ;;  %v2153_v24 = vadd.f32 %v6763_v57, %v2152_v49  ;;  %v2960_v63 = vadd.f32 %v6763_v57, %v2959_v2  ;;  %v3136_v1 = vsel %vm3022_vm8, %v2955_v31, %v3079_v40 }
 0x28c   :  { %3249 = vst.msk [vmem:[%s7039_s3 + $0x1a8] sm:$0xff] %vm82_vm0, %v3192_v22  ;;  %v2386_v16 = vmax.f32 %v7297_v52, %v2329_v55  ;;  %v4435_v47 = vpop.f32.mrf.mxu0  ;;  %v4614_v61 = vpop.f32.mrf.mxu1 }
 0x28d   :  { %vm2216_vm9 = vcmp.gt.f32.partialorder %v2153_v24, 0.0  ;;  %v2273_v48 = vmul.f32 0.01, %v2153_v24  ;;  %v3080_v17 = vmul.f32 0.01, %v2960_v63  ;;  %vm3023_vm10 = vcmp.gt.f32.partialorder %v2960_v63, 0.0 }
 0x28e   :  { %v3193_v34 = vmax.f32 %v2386_v16, %v3136_v1  ;;  %v2157_v5 = vpop.f32.mrf.mxu0  ;;  %v2964_v11 = vpop.f32.mrf.mxu1 }
 0x28f   :  { %v2330_v15 = vsel %vm2216_vm9, %v2153_v24, %v2273_v48  ;;  %v2158_v38 = vadd.f32 %v6763_v57, %v2157_v5  ;;  %v2965_v43 = vadd.f32 %v6763_v57, %v2964_v11  ;;  %v3137_v50 = vsel %vm3023_vm10, %v2960_v63, %v3080_v17  ;;  %v7301_v57 = vld [vmem:[#allocation69_spill] sm:$0xff] }
 0x290   :  { %3250 = vst.msk [vmem:[%s7039_s3 + $0x1b0] sm:$0xff] %vm82_vm0, %v3193_v34  ;;  %v2387_v18 = vmax.f32 %v7300_v44, %v2330_v15  ;;  %v4438_v19 = vpop.f32.mrf.mxu0  ;;  %v4617_v42 = vpop.f32.mrf.mxu1  ;;  %v7303_v6 = vmax.f32 %v7301_v57, %v7302_v56 }
 0x291   :  { %vm2217_vm11 = vcmp.gt.f32.partialorder %v2158_v38, 0.0  ;;  %v2274_v0 = vmul.f32 0.01, %v2158_v38  ;;  %v3081_v39 = vmul.f32 0.01, %v2965_v43  ;;  %vm3024_vm12 = vcmp.gt.f32.partialorder %v2965_v43, 0.0 }
 0x292   :  { %v3194_v8 = vmax.f32 %v2387_v18, %v3137_v50 }
 0x293   :  { %v2331_v37 = vsel %vm2217_vm11, %v2158_v38, %v2274_v0  ;;  %v3138_v59 = vsel %vm3024_vm12, %v2965_v43, %v3081_v39 }
 0x294   :  { %3251 = vst.msk [vmem:[%s7039_s3 + $0x1b8] sm:$0xff] %vm82_vm0, %v3194_v8  ;;  %v2388_v7 = vmax.f32 %v7303_v6, %v2331_v37 }
 0x296   :  { %v3195_v3 = vmax.f32 %v2388_v7, %v3138_v59 }
 0x298   :  { %3253 = vst.msk [vmem:[%s7039_s3 + $0x1c0] sm:$0x3] %vm3252_vm13, %v3195_v3 }

// kernel: encoder_forward.7
= control target key start
LH: loop header
LB: loop body
LE: loop exit
PB: predicated region body
PF: predicated region fallthrough
CT: control target
= control target key end

     0   :  { %s3114_s1 = inlined_call_operand.vmem [shape: f32[512,128], index: 1, kind: input, shape index: {}]   ;;  %s3115_s0 = inlined_call_operand.vmem [shape: f32[4,72,512], index: 0, kind: input, shape index: {}]   ;;  %s3116_s2 = inlined_call_operand.vmem [shape: f32[1,128], index: 2, kind: input, shape index: {}]   ;;  %s3117_s3 = inlined_call_operand.vmem [shape: f32[72,128], index: 3, kind: output, shape index: {}]  }
   0x1   :  { %v1864_v0 = vld [vmem:[%s3114_s1 + $0xf8] sm:$0xff]  ;;  %v1881_v3 = vld [vmem:[%s3114_s1 + $0xf0] sm:$0xff]  ;;  %v1903_v7 = vld [vmem:[%s3114_s1 + $0xe8] sm:$0xff] }
   0x2   :  { %v1869_v1 = vld [vmem:[%s3114_s1 + $0x78] sm:$0xff]  ;;  %1369 = vmatprep.subr.mxu0 %v1864_v0  ;;  %v1891_v5 = vld [vmem:[%s3114_s1 + $0x70] sm:$0xff]  ;;  %v1915_v9 = vld [vmem:[%s3114_s1 + $0x68] sm:$0xff] }
   0x3   :  { %v1874_v2 = vld [vmem:[%s3114_s1 + $0x1f8] sm:$0xff]  ;;  %1370 = vmatpush3.msra.mxu0 %v1869_v1  ;;  %v1898_v6 = vld [vmem:[%s3114_s1 + $0x1f0] sm:$0xff]  ;;  %v1920_v10 = vld [vmem:[%s3114_s1 + $0x1e8] sm:$0xff] }
   0x4   :  { %1428 = vmatprep.subr.mxu1 %v1874_v2  ;;  %v1886_v4 = vld [vmem:[%s3114_s1 + $0x178] sm:$0xff]  ;;  %v1908_v8 = vld [vmem:[%s3114_s1 + $0x170] sm:$0xff]  ;;  %1371 = vmatprep.subr.mxu0 %v1881_v3  ;;  %v1927_v11 = vld [vmem:[%s3114_s1 + $0xe0] sm:$0xff] }
   0x5   :  { %1429 = vmatpush3.msra.mxu1 %v1886_v4  ;;  %1372 = vmatpush3.msra.mxu0 %v1891_v5  ;;  %v1932_v12 = vld [vmem:[%s3114_s1 + $0x168] sm:$0xff]  ;;  %v1937_v13 = vld [vmem:[%s3114_s1 + $0x1e0] sm:$0xff]  ;;  %v1956_v16 = vld [vmem:[%s3114_s1 + $0xd8] sm:$0xff] }
   0x6   :  { %1430 = vmatprep.subr.mxu1 %v1898_v6  ;;  %1373 = vmatprep.subr.mxu0 %v1903_v7  ;;  %v1944_v14 = vld [vmem:[%s3114_s1 + $0x60] sm:$0xff]  ;;  %v1961_v17 = vld [vmem:[%s3114_s1 + $0x1d8] sm:$0xff]  ;;  %v1980_v20 = vld [vmem:[%s3114_s1 + $0xd0] sm:$0xff] }
   0x7   :  { %1431 = vmatpush3.msra.mxu1 %v1908_v8  ;;  %v1949_v15 = vld [vmem:[%s3114_s1 + $0x160] sm:$0xff]  ;;  %1374 = vmatpush3.msra.mxu0 %v1915_v9  ;;  %v1968_v18 = vld [vmem:[%s3114_s1 + $0x58] sm:$0xff]  ;;  %v1985_v21 = vld [vmem:[%s3114_s1 + $0x1d0] sm:$0xff] }
   0x8   :  { %1432 = vmatprep.subr.mxu1 %v1920_v10  ;;  %1375 = vmatprep.subr.mxu0 %v1927_v11  ;;  %v1973_v19 = vld [vmem:[%s3114_s1 + $0x158] sm:$0xff]  ;;  %v1992_v22 = vld [vmem:[%s3114_s1 + $0x50] sm:$0xff]  ;;  %v2004_v24 = vld [vmem:[%s3114_s1 + $0xc8] sm:$0xff] }
   0x9   :  { %1433 = vmatpush3.msra.mxu1 %v1932_v12  ;;  %1376 = vmatpush3.msra.mxu0 %v1944_v14  ;;  %v1997_v23 = vld [vmem:[%s3114_s1 + $0x150] sm:$0xff]  ;;  %v2009_v25 = vld [vmem:[%s3114_s1 + $0x1c8] sm:$0xff]  ;;  %v2028_v28 = vld [vmem:[%s3114_s1 + $0xc0] sm:$0xff] }
   0xa   :  { %1434 = vmatprep.subr.mxu1 %v1937_v13  ;;  %1377 = vmatprep.subr.mxu0 %v1956_v16  ;;  %v2016_v26 = vld [vmem:[%s3114_s1 + $0x48] sm:$0xff]  ;;  %v2033_v29 = vld [vmem:[%s3114_s1 + $0x1c0] sm:$0xff]  ;;  %v2052_v32 = vld [vmem:[%s3114_s1 + $0xb8] sm:$0xff] }
   0xb   :  { %1435 = vmatpush3.msra.mxu1 %v1949_v15  ;;  %1378 = vmatpush3.msra.mxu0 %v1968_v18  ;;  %v2021_v27 = vld [vmem:[%s3114_s1 + $0x148] sm:$0xff]  ;;  %v2040_v30 = vld [vmem:[%s3114_s1 + $0x40] sm:$0xff]  ;;  %v2057_v33 = vld [vmem:[%s3114_s1 + $0x1b8] sm:$0xff] }
   0xc   :  { %1436 = vmatprep.subr.mxu1 %v1961_v17  ;;  %1379 = vmatprep.subr.mxu0 %v1980_v20  ;;  %v2045_v31 = vld [vmem:[%s3114_s1 + $0x140] sm:$0xff]  ;;  %v2064_v34 = vld [vmem:[%s3114_s1 + $0x38] sm:$0xff]  ;;  %v2076_v36 = vld [vmem:[%s3114_s1 + $0xb0] sm:$0xff] }
   0xd   :  { %1437 = vmatpush3.msra.mxu1 %v1973_v19  ;;  %1380 = vmatpush3.msra.mxu0 %v1992_v22  ;;  %v2069_v35 = vld [vmem:[%s3114_s1 + $0x138] sm:$0xff]  ;;  %v2081_v37 = vld [vmem:[%s3114_s1 + $0x1b0] sm:$0xff]  ;;  %v2100_v40 = vld [vmem:[%s3114_s1 + $0xa8] sm:$0xff] }
   0xe   :  { %1438 = vmatprep.subr.mxu1 %v1985_v21  ;;  %1381 = vmatprep.subr.mxu0 %v2004_v24  ;;  %v2088_v38 = vld [vmem:[%s3114_s1 + $0x30] sm:$0xff]  ;;  %v2105_v41 = vld [vmem:[%s3114_s1 + $0x1a8] sm:$0xff]  ;;  %v2124_v44 = vld [vmem:[%s3114_s1 + $0xa0] sm:$0xff] }
   0xf   :  { %1439 = vmatpush3.msra.mxu1 %v1997_v23  ;;  %1382 = vmatpush3.msra.mxu0 %v2016_v26  ;;  %v2093_v39 = vld [vmem:[%s3114_s1 + $0x130] sm:$0xff]  ;;  %v2112_v42 = vld [vmem:[%s3114_s1 + $0x28] sm:$0xff]  ;;  %v2129_v45 = vld [vmem:[%s3114_s1 + $0x1a0] sm:$0xff] }
  0x10   :  { %1440 = vmatprep.subr.mxu1 %v2009_v25  ;;  %1383 = vmatprep.subr.mxu0 %v2028_v28  ;;  %v2117_v43 = vld [vmem:[%s3114_s1 + $0x128] sm:$0xff]  ;;  %3140 = vst [vmem:[#allocation2_spill] sm:$0xff] %v2129_v45  ;;  %v2136_v46 = vld [vmem:[%s3114_s1 + $0x20] sm:$0xff]  ;;  %v2148_v48 = vld [vmem:[%s3114_s1 + $0x98] sm:$0xff] }
  0x11   :  { %1441 = vmatpush3.msra.mxu1 %v2021_v27  ;;  %1384 = vmatpush3.msra.mxu0 %v2040_v30  ;;  %v2141_v47 = vld [vmem:[%s3114_s1 + $0x120] sm:$0xff]  ;;  %v2153_v49 = vld [vmem:[%s3114_s1 + $0x198] sm:$0xff]  ;;  %v2172_v52 = vld [vmem:[%s3114_s1 + $0x90] sm:$0xff] }
  0x12   :  { %1442 = vmatprep.subr.mxu1 %v2033_v29  ;;  %1385 = vmatprep.subr.mxu0 %v2052_v32  ;;  %3141 = vst [vmem:[#allocation3_spill] sm:$0xff] %v2153_v49  ;;  %v2160_v50 = vld [vmem:[%s3114_s1 + $0x18] sm:$0xff]  ;;  %v2177_v53 = vld [vmem:[%s3114_s1 + $0x190] sm:$0xff]  ;;  %v2196_v56 = vld [vmem:[%s3114_s1 + $0x88] sm:$0xff] }
  0x13   :  { %1443 = vmatpush3.msra.mxu1 %v2045_v31  ;;  %1386 = vmatpush3.msra.mxu0 %v2064_v34  ;;  %3142 = vst [vmem:[#allocation4_spill] sm:$0xff] %v2160_v50  ;;  %v2165_v51 = vld [vmem:[%s3114_s1 + $0x118] sm:$0xff]  ;;  %3143 = vst [vmem:[#allocation5_spill] sm:$0xff] %v2177_v53  ;;  %v2184_v54 = vld [vmem:[%s3114_s1 + $0x10] sm:$0xff] }
  0x14   :  { %1444 = vmatprep.subr.mxu1 %v2057_v33  ;;  %1387 = vmatprep.subr.mxu0 %v2076_v36  ;;  %3144 = vst [vmem:[#allocation6_spill] sm:$0xff] %v2184_v54  ;;  %v2189_v55 = vld [vmem:[%s3114_s1 + $0x110] sm:$0xff]  ;;  %3146 = vst [vmem:[#allocation8_spill] sm:$0xff] %v2196_v56  ;;  %v2201_v57 = vld [vmem:[%s3114_s1 + $0x188] sm:$0xff] }
  0x15   :  { %1445 = vmatpush3.msra.mxu1 %v2069_v35  ;;  %1388 = vmatpush3.msra.mxu0 %v2088_v38  ;;  %3145 = vst [vmem:[#allocation7_spill] sm:$0xff] %v2189_v55  ;;  %3147 = vst [vmem:[#allocation9_spill] sm:$0xff] %v2201_v57  ;;  %v2208_v58 = vld [vmem:[%s3114_s1 + $0x8] sm:$0xff]  ;;  %v2220_v60 = vld [vmem:[%s3114_s1 + $0x80] sm:$0xff] }
  0x16   :  { %1446 = vmatprep.subr.mxu1 %v2081_v37  ;;  %1389 = vmatprep.subr.mxu0 %v2100_v40  ;;  %v2213_v59 = vld [vmem:[%s3114_s1 + $0x108] sm:$0xff]  ;;  %3149 = vst [vmem:[#allocation11_spill] sm:$0xff] %v2220_v60  ;;  %v2230_v62 = vld [vmem:[%s3114_s1] sm:$0xff] }
  0x17   :  { %1447 = vmatpush3.msra.mxu1 %v2093_v39  ;;  %1390 = vmatpush3.msra.mxu0 %v2112_v42  ;;  %3148 = vst [vmem:[#allocation10_spill] sm:$0xff] %v2213_v59  ;;  %v80_v61 = vld [vmem:[%s3115_s0 + $0x8] sm:$0xff]  ;;  %v2235_v63 = vld [vmem:[%s3114_s1 + $0x180] sm:$0xff] }
  0x18   :  { %1448 = vmatprep.subr.mxu1 %v2105_v41  ;;  %1391 = vmatprep.subr.mxu0 %v2124_v44 }
  0x19   :  { %1449 = vmatpush3.msra.mxu1 %v2117_v43  ;;  %1392 = vmatpush3.msra.mxu0 %v2136_v46 }
  0x1a   :  { %1450 = vmatprep.subr.mxu1 %v2129_v45  ;;  %1393 = vmatprep.subr.mxu0 %v2148_v48 }
  0x1b   :  { %1451 = vmatpush3.msra.mxu1 %v2141_v47  ;;  %1394 = vmatpush3.msra.mxu0 %v2160_v50 }
  0x1c   :  { %1452 = vmatprep.subr.mxu1 %v2153_v49  ;;  %1395 = vmatprep.subr.mxu0 %v2172_v52 }
  0x1d   :  { %1453 = vmatpush3.msra.mxu1 %v2165_v51  ;;  %1396 = vmatpush3.msra.mxu0 %v2184_v54 }
  0x1e   :  { %1454 = vmatprep.subr.mxu1 %v2177_v53  ;;  %1397 = vmatprep.subr.mxu0 %v2196_v56  ;;  %v82_v56 = vld [vmem:[%s3115_s0 + $0x18] sm:$0xff] }
  0x1f   :  { %1455 = vmatpush3.msra.mxu1 %v2189_v55  ;;  %1398 = vmatpush3.msra.mxu0 %v2208_v58  ;;  %v79_v55 = vld [vmem:[%s3115_s0] sm:$0xff] }
  0x20   :  { %1456 = vmatprep.subr.mxu1 %v2201_v57  ;;  %v2245_v57 = vld [vmem:[%s3114_s1 + $0x100] sm:$0xff]  ;;  %1399 = vmatprep.subr.mxu0 %v2220_v60  ;;  %v84_v60 = vld [vmem:[%s3115_s0 + $0x28] sm:$0xff] }
  0x21   :  { %1457 = vmatpush3.msra.mxu1 %v2213_v59  ;;  %185 = vmatprep.mubr.f32.mxu0 %v80_v61  ;;  %v81_v59 = vld [vmem:[%s3115_s0 + $0x10] sm:$0xff]  ;;  %v83_v61 = vld [vmem:[%s3115_s0 + $0x20] sm:$0xff] }
  0x22   :  { %1400 = vmatpush3.msra.mxu0 %v2230_v62  ;;  %1458 = vmatprep.subr.mxu1 %v2235_v63 }
  0x23   :  { %186 = vmatmul.mubr.f32.vlgmr.msra.gmra.mxu0 %v79_v55  ;;  %1459 = vmatpush3.msra.mxu1 %v2245_v57  ;;  %v86_v55 = vld [vmem:[%s3115_s0 + $0x38] sm:$0xff] }
  0x24   :  { %295 = vmatprep.mubr.f32.mxu1 %v82_v56  ;;  %1487 = vmatprep.subr.mxu0 %v1864_v0  ;;  %v85_v56 = vld [vmem:[%s3115_s0 + $0x30] sm:$0xff] }
  0x25   :  { %296 = vmatmul.mubr.f32.vlgmr.msra.gmra.mxu1 %v81_v59  ;;  %1488 = vmatpush3.msra.mxu0 %v1869_v1  ;;  %v88_v59 = vld [vmem:[%s3115_s0 + $0x48] sm:$0xff] }
  0x26   :  { %1546 = vmatprep.subr.mxu1 %v1874_v2  ;;  %190 = vmatprep.mubr.f32.mxu0 %v84_v60  ;;  %v87_v60 = vld [vmem:[%s3115_s0 + $0x40] sm:$0xff] }
  0x27   :  { %1489 = vmatprep.subr.mxu0 %v1881_v3  ;;  %1547 = vmatpush3.msra.mxu1 %v1886_v4 }
  0x28   :  { %191 = vmatmul.mubr.f32.gmra.mxu0 %v83_v61  ;;  %300 = vmatprep.mubr.f32.mxu1 %v86_v55  ;;  %v90_v61 = vld [vmem:[%s3115_s0 + $0x58] sm:$0xff]  ;;  %v89_v55 = vld [vmem:[%s3115_s0 + $0x50] sm:$0xff] }
  0x29   :  { %1490 = vmatpush3.msra.mxu0 %v1891_v5  ;;  %301 = vmatmul.mubr.f32.gmra.mxu1 %v85_v56  ;;  %v92_v56 = vld [vmem:[%s3115_s0 + $0x68] sm:$0xff] }
  0x2a   :  { %1491 = vmatprep.subr.mxu0 %v1903_v7  ;;  %1548 = vmatprep.subr.mxu1 %v1898_v6 }
  0x2b   :  { %1492 = vmatpush3.msra.mxu0 %v1915_v9  ;;  %1549 = vmatpush3.msra.mxu1 %v1908_v8 }
  0x2c   :  { %195 = vmatprep.mubr.f32.mxu0 %v88_v59  ;;  %1493 = vmatprep.subr.mxu0 %v1927_v11  ;;  %v91_v59 = vld [vmem:[%s3115_s0 + $0x60] sm:$0xff] }
  0x2d   :  { %1550 = vmatprep.subr.mxu1 %v1920_v10  ;;  %196 = vmatmul.mubr.f32.gmra.mxu0 %v87_v60  ;;  %v94_v60 = vld [vmem:[%s3115_s0 + $0x78] sm:$0xff] }
  0x2e   :  { %305 = vmatprep.mubr.f32.mxu1 %v90_v61  ;;  %1494 = vmatpush3.msra.mxu0 %v1944_v14  ;;  %v93_v61 = vld [vmem:[%s3115_s0 + $0x70] sm:$0xff] }
  0x2f   :  { %1551 = vmatpush3.msra.mxu1 %v1932_v12  ;;  %1495 = vmatprep.subr.mxu0 %v1956_v16 }
  0x30   :  { %306 = vmatmul.mubr.f32.gmra.mxu1 %v89_v55  ;;  %1552 = vmatprep.subr.mxu1 %v1937_v13  ;;  %v96_v55 = vld [vmem:[%s3115_s0 + $0x88] sm:$0xff] }
  0x31   :  { %1496 = vmatpush3.msra.mxu0 %v1968_v18  ;;  %1553 = vmatpush3.msra.mxu1 %v1949_v15 }
  0x32   :  { %200 = vmatprep.mubr.f32.mxu0 %v92_v56  ;;  %1554 = vmatprep.subr.mxu1 %v1961_v17  ;;  %v95_v56 = vld [vmem:[%s3115_s0 + $0x80] sm:$0xff] }
  0x33   :  { %201 = vmatmul.mubr.f32.gmra.mxu0 %v91_v59  ;;  %310 = vmatprep.mubr.f32.mxu1 %v94_v60  ;;  %v98_v59 = vld [vmem:[%s3115_s0 + $0x98] sm:$0xff]  ;;  %v97_v60 = vld [vmem:[%s3115_s0 + $0x90] sm:$0xff] }
  0x34   :  { %1497 = vmatprep.subr.mxu0 %v1980_v20  ;;  %1555 = vmatpush3.msra.mxu1 %v1973_v19 }
  0x35   :  { %311 = vmatmul.mubr.f32.gmra.mxu1 %v93_v61  ;;  %1498 = vmatpush3.msra.mxu0 %v1992_v22  ;;  %v100_v61 = vld [vmem:[%s3115_s0 + $0xa8] sm:$0xff] }
  0x36   :  { %1499 = vmatprep.subr.mxu0 %v2004_v24  ;;  %1556 = vmatprep.subr.mxu1 %v1985_v21 }
  0x37   :  { %205 = vmatprep.mubr.f32.mxu0 %v96_v55  ;;  %1500 = vmatpush3.msra.mxu0 %v2016_v26  ;;  %v99_v55 = vld [vmem:[%s3115_s0 + $0xa0] sm:$0xff] }
  0x38   :  { %1557 = vmatpush3.msra.mxu1 %v1997_v23  ;;  %206 = vmatmul.mubr.f32.gmra.mxu0 %v95_v56  ;;  %v102_v56 = vld [vmem:[%s3115_s0 + $0xb8] sm:$0xff] }
  0x39   :  { %315 = vmatprep.mubr.f32.mxu1 %v98_v59  ;;  %1501 = vmatprep.subr.mxu0 %v2028_v28  ;;  %v101_v59 = vld [vmem:[%s3115_s0 + $0xb0] sm:$0xff] }
  0x3a   :  { %1558 = vmatprep.subr.mxu1 %v2009_v25  ;;  %316 = vmatmul.mubr.f32.gmra.mxu1 %v97_v60  ;;  %v104_v60 = vld [vmem:[%s3115_s0 + $0xc8] sm:$0xff] }
  0x3b   :  { %1502 = vmatpush3.msra.mxu0 %v2040_v30  ;;  %1559 = vmatpush3.msra.mxu1 %v2021_v27 }
  0x3c   :  { %1503 = vmatprep.subr.mxu0 %v2052_v32  ;;  %1560 = vmatprep.subr.mxu1 %v2033_v29 }
  0x3d   :  { %210 = vmatprep.mubr.f32.mxu0 %v100_v61  ;;  %1504 = vmatpush3.msra.mxu0 %v2064_v34  ;;  %v103_v61 = vld [vmem:[%s3115_s0 + $0xc0] sm:$0xff] }
  0x3e   :  { %1561 = vmatpush3.msra.mxu1 %v2045_v31  ;;  %211 = vmatmul.mubr.f32.gmra.mxu0 %v99_v55  ;;  %v106_v55 = vld [vmem:[%s3115_s0 + $0xd8] sm:$0xff] }
  0x3f   :  { %320 = vmatprep.mubr.f32.mxu1 %v102_v56  ;;  %1562 = vmatprep.subr.mxu1 %v2057_v33  ;;  %v105_v56 = vld [vmem:[%s3115_s0 + $0xd0] sm:$0xff] }
  0x40   :  { %321 = vmatmul.mubr.f32.gmra.mxu1 %v101_v59  ;;  %1505 = vmatprep.subr.mxu0 %v2076_v36  ;;  %v108_v59 = vld [vmem:[%s3115_s0 + $0xe8] sm:$0xff] }
  0x41   :  { %1563 = vmatpush3.msra.mxu1 %v2069_v35  ;;  %1506 = vmatpush3.msra.mxu0 %v2088_v38 }
  0x42   :  { %215 = vmatprep.mubr.f32.mxu0 %v104_v60  ;;  %1507 = vmatprep.subr.mxu0 %v2100_v40  ;;  %v107_v60 = vld [vmem:[%s3115_s0 + $0xe0] sm:$0xff] }
  0x43   :  { %1564 = vmatprep.subr.mxu1 %v2081_v37  ;;  %216 = vmatmul.mubr.f32.gmra.mxu0 %v103_v61  ;;  %v110_v61 = vld [vmem:[%s3115_s0 + $0xf8] sm:$0xff] }
  0x44   :  { %325 = vmatprep.mubr.f32.mxu1 %v106_v55  ;;  %1508 = vmatpush3.msra.mxu0 %v2112_v42  ;;  %v109_v55 = vld [vmem:[%s3115_s0 + $0xf0] sm:$0xff] }
  0x45   :  { %1565 = vmatpush3.msra.mxu1 %v2093_v39  ;;  %1509 = vmatprep.subr.mxu0 %v2124_v44 }
  0x46   :  { %326 = vmatmul.mubr.f32.gmra.mxu1 %v105_v56  ;;  %1566 = vmatprep.subr.mxu1 %v2105_v41  ;;  %v112_v56 = vld [vmem:[%s3115_s0 + $0x108] sm:$0xff] }
  0x47   :  { %1510 = vmatpush3.msra.mxu0 %v2136_v46  ;;  %1567 = vmatpush3.msra.mxu1 %v2117_v43 }
  0x48   :  { %220 = vmatprep.mubr.f32.mxu0 %v108_v59  ;;  %1511 = vmatprep.subr.mxu0 %v2148_v48  ;;  %v111_v59 = vld [vmem:[%s3115_s0 + $0x100] sm:$0xff] }
  0x49   :  { %1568 = vmatprep.subr.mxu1 %v2129_v45  ;;  %221 = vmatmul.mubr.f32.gmra.mxu0 %v107_v60  ;;  %v114_v60 = vld [vmem:[%s3115_s0 + $0x118] sm:$0xff] }
  0x4a   :  { %330 = vmatprep.mubr.f32.mxu1 %v110_v61  ;;  %1512 = vmatpush3.msra.mxu0 %v2160_v50  ;;  %v113_v61 = vld [vmem:[%s3115_s0 + $0x110] sm:$0xff] }
  0x4b   :  { %1569 = vmatpush3.msra.mxu1 %v2141_v47  ;;  %1513 = vmatprep.subr.mxu0 %v2172_v52 }
  0x4c   :  { %331 = vmatmul.mubr.f32.gmra.mxu1 %v109_v55  ;;  %1570 = vmatprep.subr.mxu1 %v2153_v49  ;;  %v3150_v55 = vld [vmem:[#allocation8_spill] sm:$0xff]  ;;  %v3151_v49 = vld [vmem:[#allocation7_spill] sm:$0xff] }
  0x4d   :  { %1571 = vmatpush3.msra.mxu1 %v2165_v51  ;;  %225 = vmatprep.mubr.f32.mxu0 %v112_v56  ;;  %v1262_v56 = vld [vmem:[%s3115_s0 + $0x128] sm:$0xff] }
  0x4e   :  { %1514 = vmatpush3.msra.mxu0 %v2184_v54  ;;  %1572 = vmatprep.subr.mxu1 %v2177_v53  ;;  %v3152_v54 = vld [vmem:[#allocation9_spill] sm:$0xff]  ;;  %v3153_v53 = vld [vmem:[#allocation11_spill] sm:$0xff] }
  0x4f   :  { %226 = vmatmul.mubr.f32.gmra.mxu0 %v111_v59  ;;  %335 = vmatprep.mubr.f32.mxu1 %v114_v60  ;;  %v1261_v59 = vld [vmem:[%s3115_s0 + $0x120] sm:$0xff] }
  0x50   :  { %1515 = vmatprep.subr.mxu0 %v3150_v55  ;;  %1573 = vmatpush3.msra.mxu1 %v3151_v49  ;;  %v3154_v60 = vld [vmem:[#allocation10_spill] sm:$0xff] }
  0x51   :  { %336 = vmatmul.mubr.f32.gmra.mxu1 %v113_v61  ;;  %1516 = vmatpush3.msra.mxu0 %v2208_v58  ;;  %v1264_v61 = vld [vmem:[%s3115_s0 + $0x138] sm:$0xff] }
  0x52   :  { %1574 = vmatprep.subr.mxu1 %v3152_v54  ;;  %1517 = vmatprep.subr.mxu0 %v3153_v53  ;;  %v1263_v54 = vld [vmem:[%s3115_s0 + $0x130] sm:$0xff] }
  0x53   :  { %1575 = vmatpush3.msra.mxu1 %v3154_v60  ;;  %1518 = vmatpush3.msra.mxu0 %v2230_v62  ;;  %v1266_v60 = vld [vmem:[%s3115_s0 + $0x148] sm:$0xff] }
  0x54   :  { %469 = vmatprep.mubr.f32.mxu0 %v1262_v56  ;;  %1576 = vmatprep.subr.mxu1 %v2235_v63  ;;  %v1265_v56 = vld [vmem:[%s3115_s0 + $0x140] sm:$0xff] }
  0x55   :  { %470 = vmatmul.mubr.f32.vlgmr.msra.gmra.mxu0 %v1261_v59  ;;  %1577 = vmatpush3.msra.mxu1 %v2245_v57  ;;  %v1268_v59 = vld [vmem:[%s3115_s0 + $0x158] sm:$0xff] }
  0x56   :  { %579 = vmatprep.mubr.f32.mxu1 %v1264_v61  ;;  %1605 = vmatprep.subr.mxu0 %v1864_v0  ;;  %v1267_v61 = vld [vmem:[%s3115_s0 + $0x150] sm:$0xff] }
  0x57   :  { %580 = vmatmul.mubr.f32.vlgmr.msra.gmra.mxu1 %v1263_v54  ;;  %1606 = vmatpush3.msra.mxu0 %v1869_v1  ;;  %v1270_v54 = vld [vmem:[%s3115_s0 + $0x168] sm:$0xff] }
  0x58   :  { %1664 = vmatprep.subr.mxu1 %v1874_v2  ;;  %474 = vmatprep.mubr.f32.mxu0 %v1266_v60  ;;  %v1269_v60 = vld [vmem:[%s3115_s0 + $0x160] sm:$0xff] }
  0x59   :  { %1607 = vmatprep.subr.mxu0 %v1881_v3  ;;  %1665 = vmatpush3.msra.mxu1 %v1886_v4 }
  0x5a   :  { %475 = vmatmul.mubr.f32.gmra.mxu0 %v1265_v56  ;;  %584 = vmatprep.mubr.f32.mxu1 %v1268_v59  ;;  %v1272_v56 = vld [vmem:[%s3115_s0 + $0x178] sm:$0xff]  ;;  %v1271_v59 = vld [vmem:[%s3115_s0 + $0x170] sm:$0xff] }
  0x5b   :  { %1608 = vmatpush3.msra.mxu0 %v1891_v5  ;;  %585 = vmatmul.mubr.f32.gmra.mxu1 %v1267_v61  ;;  %v1274_v61 = vld [vmem:[%s3115_s0 + $0x188] sm:$0xff] }
  0x5c   :  { %1609 = vmatprep.subr.mxu0 %v1903_v7  ;;  %1666 = vmatprep.subr.mxu1 %v1898_v6 }
  0x5d   :  { %1610 = vmatpush3.msra.mxu0 %v1915_v9  ;;  %1667 = vmatpush3.msra.mxu1 %v1908_v8 }
  0x5e   :  { %479 = vmatprep.mubr.f32.mxu0 %v1270_v54  ;;  %1611 = vmatprep.subr.mxu0 %v1927_v11  ;;  %v1273_v54 = vld [vmem:[%s3115_s0 + $0x180] sm:$0xff] }
  0x5f   :  { %1668 = vmatprep.subr.mxu1 %v1920_v10  ;;  %480 = vmatmul.mubr.f32.gmra.mxu0 %v1269_v60  ;;  %v1276_v60 = vld [vmem:[%s3115_s0 + $0x198] sm:$0xff] }
  0x60   :  { %589 = vmatprep.mubr.f32.mxu1 %v1272_v56  ;;  %1612 = vmatpush3.msra.mxu0 %v1944_v14  ;;  %v1275_v56 = vld [vmem:[%s3115_s0 + $0x190] sm:$0xff] }
  0x61   :  { %1669 = vmatpush3.msra.mxu1 %v1932_v12  ;;  %1613 = vmatprep.subr.mxu0 %v1956_v16 }
  0x62   :  { %590 = vmatmul.mubr.f32.gmra.mxu1 %v1271_v59  ;;  %1670 = vmatprep.subr.mxu1 %v1937_v13  ;;  %v1278_v59 = vld [vmem:[%s3115_s0 + $0x1a8] sm:$0xff] }
  0x63   :  { %1614 = vmatpush3.msra.mxu0 %v1968_v18  ;;  %1671 = vmatpush3.msra.mxu1 %v1949_v15 }
  0x64   :  { %484 = vmatprep.mubr.f32.mxu0 %v1274_v61  ;;  %1672 = vmatprep.subr.mxu1 %v1961_v17  ;;  %v1277_v61 = vld [vmem:[%s3115_s0 + $0x1a0] sm:$0xff] }
  0x65   :  { %485 = vmatmul.mubr.f32.gmra.mxu0 %v1273_v54  ;;  %594 = vmatprep.mubr.f32.mxu1 %v1276_v60  ;;  %v1280_v54 = vld [vmem:[%s3115_s0 + $0x1b8] sm:$0xff]  ;;  %v1279_v60 = vld [vmem:[%s3115_s0 + $0x1b0] sm:$0xff] }
  0x66   :  { %1615 = vmatprep.subr.mxu0 %v1980_v20  ;;  %1673 = vmatpush3.msra.mxu1 %v1973_v19 }
  0x67   :  { %595 = vmatmul.mubr.f32.gmra.mxu1 %v1275_v56  ;;  %1616 = vmatpush3.msra.mxu0 %v1992_v22  ;;  %v1282_v56 = vld [vmem:[%s3115_s0 + $0x1c8] sm:$0xff] }
  0x68   :  { %1617 = vmatprep.subr.mxu0 %v2004_v24  ;;  %1674 = vmatprep.subr.mxu1 %v1985_v21 }
  0x69   :  { %489 = vmatprep.mubr.f32.mxu0 %v1278_v59  ;;  %1618 = vmatpush3.msra.mxu0 %v2016_v26  ;;  %v1281_v59 = vld [vmem:[%s3115_s0 + $0x1c0] sm:$0xff] }
  0x6a   :  { %1675 = vmatpush3.msra.mxu1 %v1997_v23  ;;  %490 = vmatmul.mubr.f32.gmra.mxu0 %v1277_v61  ;;  %v1284_v61 = vld [vmem:[%s3115_s0 + $0x1d8] sm:$0xff] }
  0x6b   :  { %599 = vmatprep.mubr.f32.mxu1 %v1280_v54  ;;  %1619 = vmatprep.subr.mxu0 %v2028_v28  ;;  %v1283_v54 = vld [vmem:[%s3115_s0 + $0x1d0] sm:$0xff] }
  0x6c   :  { %1676 = vmatprep.subr.mxu1 %v2009_v25  ;;  %600 = vmatmul.mubr.f32.gmra.mxu1 %v1279_v60  ;;  %v1286_v60 = vld [vmem:[%s3115_s0 + $0x1e8] sm:$0xff] }
  0x6d   :  { %1620 = vmatpush3.msra.mxu0 %v2040_v30  ;;  %1677 = vmatpush3.msra.mxu1 %v2021_v27 }
  0x6e   :  { %1621 = vmatprep.subr.mxu0 %v2052_v32  ;;  %1678 = vmatprep.subr.mxu1 %v2033_v29 }
  0x6f   :  { %494 = vmatprep.mubr.f32.mxu0 %v1282_v56  ;;  %1622 = vmatpush3.msra.mxu0 %v2064_v34  ;;  %v1285_v56 = vld [vmem:[%s3115_s0 + $0x1e0] sm:$0xff] }
  0x70   :  { %1679 = vmatpush3.msra.mxu1 %v2045_v31  ;;  %495 = vmatmul.mubr.f32.gmra.mxu0 %v1281_v59  ;;  %v1288_v59 = vld [vmem:[%s3115_s0 + $0x1f8] sm:$0xff] }
  0x71   :  { %604 = vmatprep.mubr.f32.mxu1 %v1284_v61  ;;  %1680 = vmatprep.subr.mxu1 %v2057_v33  ;;  %v1287_v61 = vld [vmem:[%s3115_s0 + $0x1f0] sm:$0xff] }
  0x72   :  { %605 = vmatmul.mubr.f32.gmra.mxu1 %v1283_v54  ;;  %1623 = vmatprep.subr.mxu0 %v2076_v36  ;;  %v1290_v54 = vld [vmem:[%s3115_s0 + $0x208] sm:$0xff] }
  0x73   :  { %1681 = vmatpush3.msra.mxu1 %v2069_v35  ;;  %1624 = vmatpush3.msra.mxu0 %v2088_v38 }
  0x74   :  { %499 = vmatprep.mubr.f32.mxu0 %v1286_v60  ;;  %1625 = vmatprep.subr.mxu0 %v2100_v40  ;;  %v1289_v60 = vld [vmem:[%s3115_s0 + $0x200] sm:$0xff] }
  0x75   :  { %1682 = vmatprep.subr.mxu1 %v2081_v37  ;;  %500 = vmatmul.mubr.f32.gmra.mxu0 %v1285_v56  ;;  %v1292_v56 = vld [vmem:[%s3115_s0 + $0x218] sm:$0xff] }
  0x76   :  { %609 = vmatprep.mubr.f32.mxu1 %v1288_v59  ;;  %1626 = vmatpush3.msra.mxu0 %v2112_v42  ;;  %v1291_v59 = vld [vmem:[%s3115_s0 + $0x210] sm:$0xff] }
  0x77   :  { %1683 = vmatpush3.msra.mxu1 %v2093_v39  ;;  %1627 = vmatprep.subr.mxu0 %v2124_v44 }
  0x78   :  { %610 = vmatmul.mubr.f32.gmra.mxu1 %v1287_v61  ;;  %1684 = vmatprep.subr.mxu1 %v2105_v41  ;;  %v1294_v61 = vld [vmem:[%s3115_s0 + $0x228] sm:$0xff] }
  0x79   :  { %1628 = vmatpush3.msra.mxu0 %v2136_v46  ;;  %1685 = vmatpush3.msra.mxu1 %v2117_v43 }
  0x7a   :  { %504 = vmatprep.mubr.f32.mxu0 %v1290_v54  ;;  %1629 = vmatprep.subr.mxu0 %v2148_v48  ;;  %v3155_v54 = vld [vmem:[#allocation3_spill] sm:$0xff] }
  0x7b   :  { %1686 = vmatprep.subr.mxu1 %v2129_v45  ;;  %505 = vmatmul.mubr.f32.gmra.mxu0 %v1289_v60  ;;  %v1293_v60 = vld [vmem:[%s3115_s0 + $0x220] sm:$0xff]  ;;  %v3157_v45 = vld [vmem:[#allocation5_spill] sm:$0xff] }
  0x7c   :  { %614 = vmatprep.mubr.f32.mxu1 %v1292_v56  ;;  %1630 = vmatpush3.msra.mxu0 %v2160_v50  ;;  %v1296_v56 = vld [vmem:[%s3115_s0 + $0x238] sm:$0xff]  ;;  %v3156_v50 = vld [vmem:[#allocation6_spill] sm:$0xff] }
  0x7d   :  { %1687 = vmatpush3.msra.mxu1 %v2141_v47  ;;  %1631 = vmatprep.subr.mxu0 %v2172_v52 }
  0x7e   :  { %615 = vmatmul.mubr.f32.gmra.mxu1 %v1291_v59  ;;  %1688 = vmatprep.subr.mxu1 %v3155_v54  ;;  %v1295_v59 = vld [vmem:[%s3115_s0 + $0x230] sm:$0xff] }
  0x7f   :  { %1689 = vmatpush3.msra.mxu1 %v2165_v51  ;;  %509 = vmatprep.mubr.f32.mxu0 %v1294_v61  ;;  %v1298_v61 = vld [vmem:[%s3115_s0 + $0x248] sm:$0xff] }
  0x80   :  { %1632 = vmatpush3.msra.mxu0 %v3156_v50  ;;  %1690 = vmatprep.subr.mxu1 %v3157_v45  ;;  %v3158_v50 = vld [vmem:[#allocation9_spill] sm:$0xff] }
  0x81   :  { %510 = vmatmul.mubr.f32.gmra.mxu0 %v1293_v60  ;;  %619 = vmatprep.mubr.f32.mxu1 %v1296_v56  ;;  %v1297_v60 = vld [vmem:[%s3115_s0 + $0x240] sm:$0xff] }
  0x82   :  { %1633 = vmatprep.subr.mxu0 %v3150_v55  ;;  %1691 = vmatpush3.msra.mxu1 %v3151_v49  ;;  %v3159_v56 = vld [vmem:[#allocation10_spill] sm:$0xff] }
  0x83   :  { %620 = vmatmul.mubr.f32.gmra.mxu1 %v1295_v59  ;;  %1634 = vmatpush3.msra.mxu0 %v2208_v58  ;;  %v1300_v59 = vld [vmem:[%s3115_s0 + $0x258] sm:$0xff] }
  0x84   :  { %1692 = vmatprep.subr.mxu1 %v3158_v50  ;;  %1635 = vmatprep.subr.mxu0 %v3153_v53  ;;  %v1299_v50 = vld [vmem:[%s3115_s0 + $0x250] sm:$0xff] }
  0x85   :  { %1693 = vmatpush3.msra.mxu1 %v3159_v56  ;;  %1636 = vmatpush3.msra.mxu0 %v2230_v62  ;;  %v1302_v56 = vld [vmem:[%s3115_s0 + $0x268] sm:$0xff] }
  0x86   :  { %762 = vmatprep.mubr.f32.mxu0 %v1298_v61  ;;  %1694 = vmatprep.subr.mxu1 %v2235_v63  ;;  %v1301_v61 = vld [vmem:[%s3115_s0 + $0x260] sm:$0xff] }
  0x87   :  { %763 = vmatmul.mubr.f32.vlgmr.msra.gmra.mxu0 %v1297_v60  ;;  %1695 = vmatpush3.msra.mxu1 %v2245_v57  ;;  %v1304_v60 = vld [vmem:[%s3115_s0 + $0x278] sm:$0xff] }
  0x88   :  { %872 = vmatprep.mubr.f32.mxu1 %v1300_v59  ;;  %1723 = vmatprep.subr.mxu0 %v1864_v0  ;;  %v1303_v59 = vld [vmem:[%s3115_s0 + $0x270] sm:$0xff]  ;;  %v1306_v0 = vld [vmem:[%s3115_s0 + $0x288] sm:$0xff] }
  0x89   :  { %873 = vmatmul.mubr.f32.vlgmr.msra.gmra.mxu1 %v1299_v50  ;;  %1724 = vmatpush3.msra.mxu0 %v1869_v1  ;;  %v1305_v1 = vld [vmem:[%s3115_s0 + $0x280] sm:$0xff]  ;;  %v1352_v50 = vld [vmem:[%s3115_s0 + $0x3f8] sm:$0xff] }
  0x8a   :  { %1782 = vmatprep.subr.mxu1 %v1874_v2  ;;  %767 = vmatprep.mubr.f32.mxu0 %v1302_v56  ;;  %v1308_v2 = vld [vmem:[%s3115_s0 + $0x298] sm:$0xff]  ;;  %v1362_v56 = vld [vmem:[%s3115_s0 + $0x448] sm:$0xff] }
  0x8b   :  { %1725 = vmatprep.subr.mxu0 %v1881_v3  ;;  %1783 = vmatpush3.msra.mxu1 %v1886_v4  ;;  %v1307_v3 = vld [vmem:[%s3115_s0 + $0x290] sm:$0xff]  ;;  %v1310_v4 = vld [vmem:[%s3115_s0 + $0x2a8] sm:$0xff] }
  0x8c   :  { %768 = vmatmul.mubr.f32.gmra.mxu0 %v1301_v61  ;;  %877 = vmatprep.mubr.f32.mxu1 %v1304_v60  ;;  %v1359_v61 = vld [vmem:[%s3115_s0 + $0x430] sm:$0xff]  ;;  %v1364_v60 = vld [vmem:[%s3115_s0 + $0x458] sm:$0xff] }
  0x8d   :  { %1726 = vmatpush3.msra.mxu0 %v1891_v5  ;;  %878 = vmatmul.mubr.f32.gmra.mxu1 %v1303_v59  ;;  %v1309_v5 = vld [vmem:[%s3115_s0 + $0x2a0] sm:$0xff] }
  0x8e   :  { %1727 = vmatprep.subr.mxu0 %v1903_v7  ;;  %1784 = vmatprep.subr.mxu1 %v1898_v6  ;;  %v1312_v6 = vld [vmem:[%s3115_s0 + $0x2b8] sm:$0xff]  ;;  %v1311_v7 = vld [vmem:[%s3115_s0 + $0x2b0] sm:$0xff]  ;;  %v1361_v59 = vld [vmem:[%s3115_s0 + $0x440] sm:$0xff] }
  0x8f   :  { %1728 = vmatpush3.msra.mxu0 %v1915_v9  ;;  %1785 = vmatpush3.msra.mxu1 %v1908_v8  ;;  %v1314_v8 = vld [vmem:[%s3115_s0 + $0x2c8] sm:$0xff]  ;;  %v1313_v9 = vld [vmem:[%s3115_s0 + $0x2c0] sm:$0xff] }
  0x90   :  { %772 = vmatprep.mubr.f32.mxu0 %v1306_v0  ;;  %1729 = vmatprep.subr.mxu0 %v1927_v11  ;;  %v1315_v11 = vld [vmem:[%s3115_s0 + $0x2d0] sm:$0xff]  ;;  %v1366_v0 = vld [vmem:[%s3115_s0 + $0x468] sm:$0xff] }
  0x91   :  { %1786 = vmatprep.subr.mxu1 %v1920_v10  ;;  %773 = vmatmul.mubr.f32.gmra.mxu0 %v1305_v1  ;;  %v1316_v10 = vld [vmem:[%s3115_s0 + $0x2d8] sm:$0xff]  ;;  %v1363_v1 = vld [vmem:[%s3115_s0 + $0x450] sm:$0xff] }
  0x92   :  { %882 = vmatprep.mubr.f32.mxu1 %v1308_v2  ;;  %1730 = vmatpush3.msra.mxu0 %v1944_v14  ;;  %v1320_v14 = vld [vmem:[%s3115_s0 + $0x2f8] sm:$0xff] }
  0x93   :  { %1787 = vmatpush3.msra.mxu1 %v1932_v12  ;;  %1731 = vmatprep.subr.mxu0 %v1956_v16  ;;  %v1318_v12 = vld [vmem:[%s3115_s0 + $0x2e8] sm:$0xff]  ;;  %v1368_v2 = vld [vmem:[%s3115_s0 + $0x478] sm:$0xff] }
  0x94   :  { %883 = vmatmul.mubr.f32.gmra.mxu1 %v1307_v3  ;;  %1788 = vmatprep.subr.mxu1 %v1937_v13  ;;  %v1317_v13 = vld [vmem:[%s3115_s0 + $0x2e0] sm:$0xff]  ;;  %v1322_v16 = vld [vmem:[%s3115_s0 + $0x308] sm:$0xff] }
  0x95   :  { %1732 = vmatpush3.msra.mxu0 %v1968_v18  ;;  %1789 = vmatpush3.msra.mxu1 %v1949_v15  ;;  %v1319_v15 = vld [vmem:[%s3115_s0 + $0x2f0] sm:$0xff]  ;;  %v1324_v18 = vld [vmem:[%s3115_s0 + $0x318] sm:$0xff]  ;;  %v1365_v3 = vld [vmem:[%s3115_s0 + $0x460] sm:$0xff] }
  0x96   :  { %777 = vmatprep.mubr.f32.mxu0 %v1310_v4  ;;  %1790 = vmatprep.subr.mxu1 %v1961_v17  ;;  %v1321_v17 = vld [vmem:[%s3115_s0 + $0x300] sm:$0xff]  ;;  %v1367_v4 = vld [vmem:[%s3115_s0 + $0x470] sm:$0xff] }
  0x97   :  { %778 = vmatmul.mubr.f32.gmra.mxu0 %v1309_v5  ;;  %887 = vmatprep.mubr.f32.mxu1 %v1312_v6 }
  0x98   :  { %1733 = vmatprep.subr.mxu0 %v1980_v20  ;;  %1791 = vmatpush3.msra.mxu1 %v1973_v19  ;;  %v1323_v19 = vld [vmem:[%s3115_s0 + $0x310] sm:$0xff]  ;;  %v1326_v20 = vld [vmem:[%s3115_s0 + $0x328] sm:$0xff] }
  0x99   :  { %888 = vmatmul.mubr.f32.gmra.mxu1 %v1311_v7  ;;  %1734 = vmatpush3.msra.mxu0 %v1992_v22  ;;  %v1328_v22 = vld [vmem:[%s3115_s0 + $0x338] sm:$0xff]  ;;  %v2872_v7 = vld [vmem:[%s3116_s2] ss:$0 sm:$0xff] }
  0x9a   :  { %1735 = vmatprep.subr.mxu0 %v2004_v24  ;;  %1792 = vmatprep.subr.mxu1 %v1985_v21  ;;  %v1325_v21 = vld [vmem:[%s3115_s0 + $0x320] sm:$0xff]  ;;  %v1327_v24 = vld [vmem:[%s3115_s0 + $0x330] sm:$0xff] }
  0x9b   :  { %782 = vmatprep.mubr.f32.mxu0 %v1314_v8  ;;  %1736 = vmatpush3.msra.mxu0 %v2016_v26  ;;  %v1330_v26 = vld [vmem:[%s3115_s0 + $0x348] sm:$0xff] }
  0x9c   :  { %1793 = vmatpush3.msra.mxu1 %v1997_v23  ;;  %783 = vmatmul.mubr.f32.gmra.mxu0 %v1313_v9  ;;  %v3160_v23 = vld [vmem:[#allocation2_spill] sm:$0xff] }
  0x9d   :  { %892 = vmatprep.mubr.f32.mxu1 %v1316_v10  ;;  %1737 = vmatprep.subr.mxu0 %v2028_v28  ;;  %v1332_v28 = vld [vmem:[%s3115_s0 + $0x358] sm:$0xff] }
  0x9e   :  { %1794 = vmatprep.subr.mxu1 %v2009_v25  ;;  %893 = vmatmul.mubr.f32.gmra.mxu1 %v1315_v11  ;;  %v3161_v25 = vld [vmem:[#allocation4_spill] sm:$0xff] }
  0x9f   :  { %1738 = vmatpush3.msra.mxu0 %v2040_v30  ;;  %1795 = vmatpush3.msra.mxu1 %v2021_v27  ;;  %v1329_v27 = vld [vmem:[%s3115_s0 + $0x340] sm:$0xff]  ;;  %v1331_v30 = vld [vmem:[%s3115_s0 + $0x350] sm:$0xff] }
  0xa0   :  { %1739 = vmatprep.subr.mxu0 %v2052_v32  ;;  %1796 = vmatprep.subr.mxu1 %v2033_v29  ;;  %v3162_v29 = vld [vmem:[#allocation6_spill] sm:$0xff]  ;;  %v3163_v32 = vld [vmem:[#allocation9_spill] sm:$0xff] }
  0xa1   :  { %787 = vmatprep.mubr.f32.mxu0 %v1318_v12  ;;  %1740 = vmatpush3.msra.mxu0 %v2064_v34  ;;  %v3164_v34 = vld [vmem:[#allocation10_spill] sm:$0xff] }
  0xa2   :  { %1797 = vmatpush3.msra.mxu1 %v2045_v31  ;;  %788 = vmatmul.mubr.f32.gmra.mxu0 %v1317_v13  ;;  %v1334_v31 = vld [vmem:[%s3115_s0 + $0x368] sm:$0xff] }
  0xa3   :  { %897 = vmatprep.mubr.f32.mxu1 %v1320_v14  ;;  %1798 = vmatprep.subr.mxu1 %v2057_v33  ;;  %v1333_v33 = vld [vmem:[%s3115_s0 + $0x360] sm:$0xff] }
  0xa4   :  { %898 = vmatmul.mubr.f32.gmra.mxu1 %v1319_v15  ;;  %1741 = vmatprep.subr.mxu0 %v2076_v36  ;;  %v1338_v36 = vld [vmem:[%s3115_s0 + $0x388] sm:$0xff] }
  0xa5   :  { %1799 = vmatpush3.msra.mxu1 %v2069_v35  ;;  %1742 = vmatpush3.msra.mxu0 %v2088_v38  ;;  %v1336_v35 = vld [vmem:[%s3115_s0 + $0x378] sm:$0xff] }
  0xa6   :  { %792 = vmatprep.mubr.f32.mxu0 %v1322_v16  ;;  %1743 = vmatprep.subr.mxu0 %v2100_v40  ;;  %v1340_v38 = vld [vmem:[%s3115_s0 + $0x398] sm:$0xff]  ;;  %v1342_v40 = vld [vmem:[%s3115_s0 + $0x3a8] sm:$0xff] }
  0xa7   :  { %1800 = vmatprep.subr.mxu1 %v2081_v37  ;;  %793 = vmatmul.mubr.f32.gmra.mxu0 %v1321_v17  ;;  %v1335_v37 = vld [vmem:[%s3115_s0 + $0x370] sm:$0xff] }
  0xa8   :  { %902 = vmatprep.mubr.f32.mxu1 %v1324_v18  ;;  %1744 = vmatpush3.msra.mxu0 %v2112_v42  ;;  %v1344_v42 = vld [vmem:[%s3115_s0 + $0x3b8] sm:$0xff] }
  0xa9   :  { %1801 = vmatpush3.msra.mxu1 %v2093_v39  ;;  %1745 = vmatprep.subr.mxu0 %v2124_v44  ;;  %v1337_v39 = vld [vmem:[%s3115_s0 + $0x380] sm:$0xff]  ;;  %v1346_v44 = vld [vmem:[%s3115_s0 + $0x3c8] sm:$0xff] }
  0xaa   :  { %903 = vmatmul.mubr.f32.gmra.mxu1 %v1323_v19  ;;  %1802 = vmatprep.subr.mxu1 %v2105_v41  ;;  %v1339_v41 = vld [vmem:[%s3115_s0 + $0x390] sm:$0xff] }
  0xab   :  { %1746 = vmatpush3.msra.mxu0 %v2136_v46  ;;  %1803 = vmatpush3.msra.mxu1 %v2117_v43  ;;  %v1341_v43 = vld [vmem:[%s3115_s0 + $0x3a0] sm:$0xff]  ;;  %v1348_v46 = vld [vmem:[%s3115_s0 + $0x3d8] sm:$0xff] }
  0xac   :  { %797 = vmatprep.mubr.f32.mxu0 %v1326_v20  ;;  %1747 = vmatprep.subr.mxu0 %v2148_v48  ;;  %v1350_v48 = vld [vmem:[%s3115_s0 + $0x3e8] sm:$0xff] }
  0xad   :  { %1804 = vmatprep.subr.mxu1 %v3160_v23  ;;  %798 = vmatmul.mubr.f32.gmra.mxu0 %v1325_v21 }
  0xae   :  { %907 = vmatprep.mubr.f32.mxu1 %v1328_v22  ;;  %1748 = vmatpush3.msra.mxu0 %v3161_v25 }
  0xaf   :  { %1805 = vmatpush3.msra.mxu1 %v2141_v47  ;;  %1749 = vmatprep.subr.mxu0 %v2172_v52  ;;  %v1345_v47 = vld [vmem:[%s3115_s0 + $0x3c0] sm:$0xff]  ;;  %v1354_v52 = vld [vmem:[%s3115_s0 + $0x408] sm:$0xff] }
  0xb0   :  { %908 = vmatmul.mubr.f32.gmra.mxu1 %v1327_v24  ;;  %1806 = vmatprep.subr.mxu1 %v3155_v54  ;;  %v1357_v54 = vld [vmem:[%s3115_s0 + $0x420] sm:$0xff] }
  0xb1   :  { %1807 = vmatpush3.msra.mxu1 %v2165_v51  ;;  %802 = vmatprep.mubr.f32.mxu0 %v1330_v26  ;;  %v1349_v51 = vld [vmem:[%s3115_s0 + $0x3e0] sm:$0xff] }
  0xb2   :  { %1750 = vmatpush3.msra.mxu0 %v3162_v29  ;;  %1808 = vmatprep.subr.mxu1 %v3157_v45  ;;  %v1343_v45 = vld [vmem:[%s3115_s0 + $0x3b0] sm:$0xff] }
  0xb3   :  { %803 = vmatmul.mubr.f32.gmra.mxu0 %v1329_v27  ;;  %912 = vmatprep.mubr.f32.mxu1 %v1332_v28 }
  0xb4   :  { %1751 = vmatprep.subr.mxu0 %v3150_v55  ;;  %1809 = vmatpush3.msra.mxu1 %v3151_v49  ;;  %v1347_v49 = vld [vmem:[%s3115_s0 + $0x3d0] sm:$0xff]  ;;  %v1360_v55 = vld [vmem:[%s3115_s0 + $0x438] sm:$0xff] }
  0xb5   :  { %913 = vmatmul.mubr.f32.gmra.mxu1 %v1331_v30  ;;  %1752 = vmatpush3.msra.mxu0 %v2208_v58  ;;  %v1353_v58 = vld [vmem:[%s3115_s0 + $0x400] sm:$0xff] }
  0xb6   :  { %1810 = vmatprep.subr.mxu1 %v3163_v32  ;;  %1753 = vmatprep.subr.mxu0 %v3153_v53  ;;  %v1351_v53 = vld [vmem:[%s3115_s0 + $0x3f0] sm:$0xff] }
  0xb7   :  { %1811 = vmatpush3.msra.mxu1 %v3164_v34  ;;  %1754 = vmatpush3.msra.mxu0 %v2230_v62  ;;  %v1358_v62 = vld [vmem:[%s3115_s0 + $0x428] sm:$0xff] }
  0xb8   :  { %1055 = vmatprep.mubr.f32.mxu0 %v1334_v31  ;;  %1812 = vmatprep.subr.mxu1 %v2235_v63  ;;  %v1355_v63 = vld [vmem:[%s3115_s0 + $0x410] sm:$0xff] }
  0xb9   :  { %1056 = vmatmul.mubr.f32.vlgmr.msra.gmra.mxu0 %v1333_v33  ;;  %1813 = vmatpush3.msra.mxu1 %v2245_v57  ;;  %v1356_v57 = vld [vmem:[%s3115_s0 + $0x418] sm:$0xff] }
  0xba   :  { %1165 = vmatprep.mubr.f32.mxu1 %v1336_v35  ;;  %1060 = vmatprep.mubr.f32.mxu0 %v1338_v36 }
  0xbb   :  { %1166 = vmatmul.mubr.f32.vlgmr.msra.gmra.mxu1 %v1335_v37 }
  0xbc   :  { %1170 = vmatprep.mubr.f32.mxu1 %v1340_v38 }
  0xbd   :  { %1061 = vmatmul.mubr.f32.gmra.mxu0 %v1337_v39 }
  0xbe   :  { %1065 = vmatprep.mubr.f32.mxu0 %v1342_v40 }
  0xbf   :  { %1171 = vmatmul.mubr.f32.gmra.mxu1 %v1339_v41 }
  0xc0   :  { %1175 = vmatprep.mubr.f32.mxu1 %v1344_v42 }
  0xc1   :  { %1066 = vmatmul.mubr.f32.gmra.mxu0 %v1341_v43 }
  0xc2   :  { %1070 = vmatprep.mubr.f32.mxu0 %v1346_v44 }
  0xc3   :  { %1176 = vmatmul.mubr.f32.gmra.mxu1 %v1343_v45 }
  0xc4   :  { %1180 = vmatprep.mubr.f32.mxu1 %v1348_v46 }
  0xc5   :  { %1071 = vmatmul.mubr.f32.gmra.mxu0 %v1345_v47 }
  0xc6   :  { %1075 = vmatprep.mubr.f32.mxu0 %v1350_v48 }
  0xc7   :  { %1181 = vmatmul.mubr.f32.gmra.mxu1 %v1347_v49 }
  0xc8   :  { %1185 = vmatprep.mubr.f32.mxu1 %v1352_v50 }
  0xc9   :  { %1076 = vmatmul.mubr.f32.gmra.mxu0 %v1349_v51 }
  0xca   :  { %1080 = vmatprep.mubr.f32.mxu0 %v1354_v52 }
  0xcb   :  { %1186 = vmatmul.mubr.f32.gmra.mxu1 %v1351_v53 }
  0xcc   :  { %1190 = vmatprep.mubr.f32.mxu1 %v1356_v57 }
  0xcd   :  { %1081 = vmatmul.mubr.f32.gmra.mxu0 %v1353_v58 }
  0xce   :  { %1085 = vmatprep.mubr.f32.mxu0 %v1358_v62 }
  0xcf   :  { %1191 = vmatmul.mubr.f32.gmra.mxu1 %v1355_v63 }
  0xd0   :  { %1195 = vmatprep.mubr.f32.mxu1 %v1360_v55 }
  0xd1   :  { %1086 = vmatmul.mubr.f32.gmra.mxu0 %v1357_v54 }
  0xd2   :  { %1090 = vmatprep.mubr.f32.mxu0 %v1362_v56 }
  0xd3   :  { %1196 = vmatmul.mubr.f32.gmra.mxu1 %v1359_v61 }
  0xd4   :  { %1200 = vmatprep.mubr.f32.mxu1 %v1364_v60 }
  0xd5   :  { %1091 = vmatmul.mubr.f32.gmra.mxu0 %v1361_v59 }
  0xd6   :  { %1095 = vmatprep.mubr.f32.mxu0 %v1366_v0 }
  0xd7   :  { %1201 = vmatmul.mubr.f32.gmra.mxu1 %v1363_v1 }
  0xd8   :  { %1205 = vmatprep.mubr.f32.mxu1 %v1368_v2 }
  0xd9   :  { %1096 = vmatmul.mubr.f32.gmra.mxu0 %v1365_v3 }
  0xdb   :  { %1206 = vmatmul.mubr.f32.gmra.mxu1 %v1367_v4 }
  0xe3   :  { %v1401_v5 = vpop.f32.mrf.mxu0 }
  0xe5   :  { %v1460_v6 = vpop.f32.mrf.mxu1  ;;  %v1402_v8 = vpop.f32.mrf.mxu0 }
  0xe6   :  { %v1403_v9 = vadd.f32 %v1402_v8, %v1401_v5 }
  0xe7   :  { %v1461_v10 = vpop.f32.mrf.mxu1 }
  0xe8   :  { %v188_v11 = vadd.f32 %v1403_v9, %v2872_v7  ;;  %v1462_v12 = vadd.f32 %v1461_v10, %v1460_v6  ;;  %v1404_v13 = vpop.f32.mrf.mxu0 }
  0xe9   :  { %v1463_v14 = vpop.f32.mrf.mxu1 }
  0xea   :  { %v2875_v15 = vadd.f32 %v1462_v12, %v188_v11  ;;  %v1405_v16 = vpop.f32.mrf.mxu0 }
  0xeb   :  { %v1406_v17 = vadd.f32 %v1405_v16, %v1404_v13  ;;  %v1464_v18 = vpop.f32.mrf.mxu1 }
  0xec   :  { %v1465_v19 = vadd.f32 %v1464_v18, %v1463_v14  ;;  %vm341_vm0 = vcmp.gt.f32.partialorder %v2875_v15, 0.0 }
  0xed   :  { %v193_v20 = vadd.f32 %v1406_v17, %v2872_v7  ;;  %v1407_v21 = vpop.f32.mrf.mxu0 }
  0xef   :  { %v2878_v22 = vadd.f32 %v1465_v19, %v193_v20  ;;  %v1408_v23 = vpop.f32.mrf.mxu0 }
  0xf0   :  { %v1466_v24 = vpop.f32.mrf.mxu1  ;;  %v1409_v25 = vadd.f32 %v1408_v23, %v1407_v21 }
  0xf1   :  { %vm342_vm2 = vcmp.gt.f32.partialorder %v2878_v22, 0.0 }
  0xf2   :  { %v198_v26 = vadd.f32 %v1409_v25, %v2872_v7  ;;  %v1467_v27 = vpop.f32.mrf.mxu1 }
  0xf3   :  { %v1468_v28 = vadd.f32 %v1467_v27, %v1466_v24  ;;  %v1410_v29 = vpop.f32.mrf.mxu0 }
  0xf5   :  { %v2881_v30 = vadd.f32 %v1468_v28, %v198_v26  ;;  %v1469_v31 = vpop.f32.mrf.mxu1  ;;  %v1411_v32 = vpop.f32.mrf.mxu0  ;;  %v350_v26 = vmul.f32 0.01, %v2875_v15 }
  0xf6   :  { %v1412_v33 = vadd.f32 %v1411_v32, %v1410_v29 }
  0xf7   :  { %v1470_v34 = vpop.f32.mrf.mxu1  ;;  %vm343_vm4 = vcmp.gt.f32.partialorder %v2881_v30, 0.0 }
  0xf8   :  { %v203_v35 = vadd.f32 %v1412_v33, %v2872_v7  ;;  %v1471_v36 = vadd.f32 %v1470_v34, %v1469_v31  ;;  %v1413_v37 = vpop.f32.mrf.mxu0 }
  0xfa   :  { %v2884_v38 = vadd.f32 %v1471_v36, %v203_v35  ;;  %v1472_v39 = vpop.f32.mrf.mxu1  ;;  %v1414_v40 = vpop.f32.mrf.mxu0  ;;  %v2906_v36 = vsel %vm341_vm0, %v2875_v15, %v350_v26 }
  0xfb   :  { %v1415_v41 = vadd.f32 %v1414_v40, %v1413_v37 }
  0xfc   :  { %v1473_v42 = vpop.f32.mrf.mxu1  ;;  %vm344_vm6 = vcmp.gt.f32.partialorder %v2884_v38, 0.0 }
  0xfd   :  { %v208_v43 = vadd.f32 %v1415_v41, %v2872_v7  ;;  %v1474_v44 = vadd.f32 %v1473_v42, %v1472_v39  ;;  %v351_v39 = vmul.f32 0.01, %v2878_v22 }
  0xfe   :  { %v1416_v45 = vpop.f32.mrf.mxu0 }
  0xff   :  { %v2887_v46 = vadd.f32 %v1474_v44, %v208_v43  ;;  %v2916_v15 = vsel %vm342_vm2, %v2878_v22, %v351_v39 }
 0x100   :  { %v1475_v47 = vpop.f32.mrf.mxu1  ;;  %v1417_v48 = vpop.f32.mrf.mxu0 }
 0x101   :  { %v1418_v49 = vadd.f32 %v1417_v48, %v1416_v45  ;;  %vm345_vm8 = vcmp.gt.f32.partialorder %v2887_v46, 0.0 }
 0x102   :  { %v1476_v50 = vpop.f32.mrf.mxu1 }
 0x103   :  { %v213_v51 = vadd.f32 %v1418_v49, %v2872_v7  ;;  %v1477_v52 = vadd.f32 %v1476_v50, %v1475_v47  ;;  %v1419_v53 = vpop.f32.mrf.mxu0 }
 0x105   :  { %v2890_v57 = vadd.f32 %v1477_v52, %v213_v51  ;;  %v1420_v58 = vpop.f32.mrf.mxu0 }
 0x106   :  { %v1478_v62 = vpop.f32.mrf.mxu1  ;;  %v1421_v63 = vadd.f32 %v1420_v58, %v1419_v53  ;;  %v352_v53 = vmul.f32 0.01, %v2881_v30 }
 0x107   :  { %vm346_vm10 = vcmp.gt.f32.partialorder %v2890_v57, 0.0 }
 0x108   :  { %v218_v55 = vadd.f32 %v1421_v63, %v2872_v7  ;;  %v1479_v54 = vpop.f32.mrf.mxu1 }
 0x109   :  { %v1480_v56 = vadd.f32 %v1479_v54, %v1478_v62  ;;  %v1422_v61 = vpop.f32.mrf.mxu0 }
 0x10b   :  { %v2893_v60 = vadd.f32 %v1480_v56, %v218_v55  ;;  %v1423_v59 = vpop.f32.mrf.mxu0 }
 0x10c   :  { %v1481_v0 = vpop.f32.mrf.mxu1  ;;  %v1424_v1 = vadd.f32 %v1423_v59, %v1422_v61 }
 0x10d   :  { %vm347_vm12 = vcmp.gt.f32.partialorder %v2893_v60, 0.0 }
 0x10e   :  { %v223_v2 = vadd.f32 %v1424_v1, %v2872_v7  ;;  %v1482_v3 = vpop.f32.mrf.mxu1 }
 0x10f   :  { %v1483_v4 = vadd.f32 %v1482_v3, %v1481_v0  ;;  %v1425_v5 = vpop.f32.mrf.mxu0  ;;  %v2926_v0 = vsel %vm343_vm4, %v2881_v30, %v352_v53 }
 0x111   :  { %v2896_v6 = vadd.f32 %v1483_v4, %v223_v2  ;;  %v1484_v8 = vpop.f32.mrf.mxu1  ;;  %v1426_v9 = vpop.f32.mrf.mxu0  ;;  %v353_v2 = vmul.f32 0.01, %v2884_v38 }
 0x112   :  { %v1427_v10 = vadd.f32 %v1426_v9, %v1425_v5 }
 0x113   :  { %v1485_v11 = vpop.f32.mrf.mxu1  ;;  %vm348_vm14 = vcmp.gt.f32.partialorder %v2896_v6, 0.0 }
 0x114   :  { %v228_v12 = vadd.f32 %v1427_v10, %v2872_v7  ;;  %v1486_v13 = vadd.f32 %v1485_v11, %v1484_v8 }
 0x115   :  { %v1519_v14 = vpop.f32.mrf.mxu0 }
 0x116   :  { %v2899_v16 = vadd.f32 %v1486_v13, %v228_v12  ;;  %v2936_v13 = vsel %vm344_vm6, %v2884_v38, %v353_v2 }
 0x117   :  { %v1578_v17 = vpop.f32.mrf.mxu1  ;;  %v1520_v18 = vpop.f32.mrf.mxu0 }
 0x118   :  { %v1521_v19 = vadd.f32 %v1520_v18, %v1519_v14  ;;  %v354_v18 = vmul.f32 0.01, %v2887_v46  ;;  %vm349_vm0 = vcmp.gt.f32.partialorder %v2899_v16, 0.0 }
 0x119   :  { %v1579_v20 = vpop.f32.mrf.mxu1 }
 0x11a   :  { %v472_v21 = vadd.f32 %v1521_v19, %v2872_v7  ;;  %v1580_v23 = vadd.f32 %v1579_v20, %v1578_v17  ;;  %v1522_v24 = vpop.f32.mrf.mxu0  ;;  %v2945_v38 = vsel %vm345_vm8, %v2887_v46, %v354_v18 }
 0x11b   :  { %v1581_v25 = vpop.f32.mrf.mxu1 }
 0x11c   :  { %v582_v27 = vadd.f32 %v1580_v23, %v472_v21  ;;  %v1523_v28 = vpop.f32.mrf.mxu0 }
 0x11d   :  { %v1524_v29 = vadd.f32 %v1523_v28, %v1522_v24  ;;  %v1582_v31 = vpop.f32.mrf.mxu1 }
 0x11e   :  { %vm625_vm1 = vcmp.gt.f32.partialorder %v582_v27, 0.0  ;;  %v634_v32 = vmul.f32 0.01, %v582_v27  ;;  %v1583_v33 = vadd.f32 %v1582_v31, %v1581_v25 }
 0x11f   :  { %v477_v34 = vadd.f32 %v1524_v29, %v2872_v7  ;;  %v1525_v35 = vpop.f32.mrf.mxu0 }
 0x120   :  { %v2908_v37 = vsel %vm625_vm1, %v582_v27, %v634_v32 }
 0x121   :  { %v587_v41 = vadd.f32 %v1583_v33, %v477_v34  ;;  %v1526_v42 = vpop.f32.mrf.mxu0  ;;  %v355_v33 = vmul.f32 0.01, %v2890_v57 }
 0x122   :  { %v1584_v43 = vpop.f32.mrf.mxu1  ;;  %v1527_v44 = vadd.f32 %v1526_v42, %v1525_v35 }
 0x123   :  { %vm626_vm3 = vcmp.gt.f32.partialorder %v587_v41, 0.0  ;;  %v635_v45 = vmul.f32 0.01, %v587_v41 }
 0x124   :  { %v482_v47 = vadd.f32 %v1527_v44, %v2872_v7  ;;  %v1585_v48 = vpop.f32.mrf.mxu1  ;;  %v2956_v44 = vsel %vm346_vm10, %v2890_v57, %v355_v33 }
 0x125   :  { %v2918_v49 = vsel %vm626_vm3, %v587_v41, %v635_v45  ;;  %v1586_v50 = vadd.f32 %v1585_v48, %v1584_v43  ;;  %v1528_v51 = vpop.f32.mrf.mxu0 }
 0x127   :  { %v592_v58 = vadd.f32 %v1586_v50, %v482_v47  ;;  %v1587_v62 = vpop.f32.mrf.mxu1  ;;  %v1529_v63 = vpop.f32.mrf.mxu0 }
 0x128   :  { %v1530_v55 = vadd.f32 %v1529_v63, %v1528_v51  ;;  %v356_v51 = vmul.f32 0.01, %v2893_v60 }
 0x129   :  { %vm627_vm5 = vcmp.gt.f32.partialorder %v592_v58, 0.0  ;;  %v636_v54 = vmul.f32 0.01, %v592_v58  ;;  %v1588_v56 = vpop.f32.mrf.mxu1 }
 0x12a   :  { %v487_v22 = vadd.f32 %v1530_v55, %v2872_v7  ;;  %v1589_v61 = vadd.f32 %v1588_v56, %v1587_v62  ;;  %v1531_v59 = vpop.f32.mrf.mxu0  ;;  %v2966_v56 = vsel %vm347_vm12, %v2893_v60, %v356_v51 }
 0x12b   :  { %v2928_v1 = vsel %vm627_vm5, %v592_v58, %v636_v54 }
 0x12c   :  { %v597_v4 = vadd.f32 %v1589_v61, %v487_v22  ;;  %v1590_v5 = vpop.f32.mrf.mxu1  ;;  %v1532_v8 = vpop.f32.mrf.mxu0 }
 0x12d   :  { %v1533_v9 = vadd.f32 %v1532_v8, %v1531_v59 }
 0x12e   :  { %vm628_vm7 = vcmp.gt.f32.partialorder %v597_v4, 0.0  ;;  %v637_v10 = vmul.f32 0.01, %v597_v4  ;;  %v1591_v11 = vpop.f32.mrf.mxu1 }
 0x12f   :  { %v492_v12 = vadd.f32 %v1533_v9, %v2872_v7  ;;  %v1592_v30 = vadd.f32 %v1591_v11, %v1590_v5 }
 0x130   :  { %v2938_v14 = vsel %vm628_vm7, %v597_v4, %v637_v10  ;;  %v1534_v17 = vpop.f32.mrf.mxu0  ;;  %v357_v4 = vmul.f32 0.01, %v2896_v6 }
 0x131   :  { %v602_v20 = vadd.f32 %v1592_v30, %v492_v12 }
 0x132   :  { %v1593_v21 = vpop.f32.mrf.mxu1  ;;  %v1535_v23 = vpop.f32.mrf.mxu0 }
 0x133   :  { %vm629_vm9 = vcmp.gt.f32.partialorder %v602_v20, 0.0  ;;  %v638_v24 = vmul.f32 0.01, %v602_v20  ;;  %v1536_v25 = vadd.f32 %v1535_v23, %v1534_v17  ;;  %v2976_v17 = vsel %vm348_vm14, %v2896_v6, %v357_v4 }
 0x134   :  { %v1594_v26 = vpop.f32.mrf.mxu1  ;;  %3165 = vst [vmem:[#allocation8_spill] sm:$0xff] %v2976_v17 }
 0x135   :  { %v2947_v27 = vsel %vm629_vm9, %v602_v20, %v638_v24  ;;  %v497_v28 = vadd.f32 %v1536_v25, %v2872_v7  ;;  %v1595_v29 = vadd.f32 %v1594_v26, %v1593_v21  ;;  %v1537_v31 = vpop.f32.mrf.mxu0  ;;  %v358_v21 = vmul.f32 0.01, %v2899_v16 }
 0x137   :  { %v607_v34 = vadd.f32 %v1595_v29, %v497_v28  ;;  %v1538_v35 = vpop.f32.mrf.mxu0 }
 0x138   :  { %v1596_v39 = vpop.f32.mrf.mxu1  ;;  %v1539_v41 = vadd.f32 %v1538_v35, %v1537_v31  ;;  %v2985_v31 = vsel %vm349_vm0, %v2899_v16, %v358_v21 }
 0x139   :  { %vm630_vm11 = vcmp.gt.f32.partialorder %v607_v34, 0.0  ;;  %v639_v46 = vmul.f32 0.01, %v607_v34  ;;  %3167 = vst [vmem:[#allocation11_spill] sm:$0xff] %v2985_v31 }
 0x13a   :  { %v502_v42 = vadd.f32 %v1539_v41, %v2872_v7  ;;  %v1597_v43 = vpop.f32.mrf.mxu1 }
 0x13b   :  { %v2958_v45 = vsel %vm630_vm11, %v607_v34, %v639_v46  ;;  %v1598_v47 = vadd.f32 %v1597_v43, %v1596_v39  ;;  %v1540_v48 = vpop.f32.mrf.mxu0 }
 0x13d   :  { %v612_v53 = vadd.f32 %v1598_v47, %v502_v42  ;;  %v1541_v58 = vpop.f32.mrf.mxu0 }
 0x13e   :  { %v1599_v62 = vpop.f32.mrf.mxu1  ;;  %v1542_v63 = vadd.f32 %v1541_v58, %v1540_v48 }
 0x13f   :  { %vm631_vm13 = vcmp.gt.f32.partialorder %v612_v53, 0.0  ;;  %v640_v55 = vmul.f32 0.01, %v612_v53 }
 0x140   :  { %v507_v57 = vadd.f32 %v1542_v63, %v2872_v7  ;;  %v1600_v54 = vpop.f32.mrf.mxu1 }
 0x141   :  { %v2968_v22 = vsel %vm631_vm13, %v612_v53, %v640_v55  ;;  %v1601_v61 = vadd.f32 %v1600_v54, %v1599_v62  ;;  %v1543_v59 = vpop.f32.mrf.mxu0 }
 0x143   :  { %v617_v5 = vadd.f32 %v1601_v61, %v507_v57  ;;  %v1602_v8 = vpop.f32.mrf.mxu1  ;;  %v1544_v9 = vpop.f32.mrf.mxu0 }
 0x144   :  { %v1545_v10 = vadd.f32 %v1544_v9, %v1543_v59 }
 0x145   :  { %vm632_vm15 = vcmp.gt.f32.partialorder %v617_v5, 0.0  ;;  %v641_v11 = vmul.f32 0.01, %v617_v5  ;;  %v1603_v12 = vpop.f32.mrf.mxu1 }
 0x146   :  { %v512_v60 = vadd.f32 %v1545_v10, %v2872_v7  ;;  %v1604_v30 = vadd.f32 %v1603_v12, %v1602_v8 }
 0x147   :  { %v2978_v18 = vsel %vm632_vm15, %v617_v5, %v641_v11  ;;  %v1637_v20 = vpop.f32.mrf.mxu0 }
 0x148   :  { %3166 = vst [vmem:[#allocation7_spill] sm:$0xff] %v2978_v18  ;;  %v622_v24 = vadd.f32 %v1604_v30, %v512_v60 }
 0x149   :  { %v1696_v25 = vpop.f32.mrf.mxu1  ;;  %v1638_v26 = vpop.f32.mrf.mxu0 }
 0x14a   :  { %vm633_vm1 = vcmp.gt.f32.partialorder %v622_v24, 0.0  ;;  %v642_v28 = vmul.f32 0.01, %v622_v24  ;;  %v1639_v10 = vadd.f32 %v1638_v26, %v1637_v20 }
 0x14b   :  { %v1697_v29 = vpop.f32.mrf.mxu1 }
 0x14c   :  { %v2987_v6 = vsel %vm633_vm1, %v622_v24, %v642_v28  ;;  %v1640_v33 = vpop.f32.mrf.mxu0  ;;  %v765_v30 = vadd.f32 %v1639_v10, %v2872_v7  ;;  %v1698_v28 = vadd.f32 %v1697_v29, %v1696_v25 }
 0x14d   :  { %3168 = vst [vmem:[#allocation3_spill] sm:$0xff] %v2987_v6  ;;  %v1699_v35 = vpop.f32.mrf.mxu1 }
 0x14e   :  { %v1641_v39 = vpop.f32.mrf.mxu0  ;;  %v875_v23 = vadd.f32 %v1698_v28, %v765_v30 }
 0x14f   :  { %v1700_v41 = vpop.f32.mrf.mxu1  ;;  %v1642_v21 = vadd.f32 %v1641_v39, %v1640_v33 }
 0x150   :  { %v1701_v26 = vadd.f32 %v1700_v41, %v1699_v35  ;;  %v927_v52 = vmul.f32 0.01, %v875_v23  ;;  %vm918_vm2 = vcmp.gt.f32.partialorder %v875_v23, 0.0 }
 0x151   :  { %v1643_v46 = vpop.f32.mrf.mxu0  ;;  %v770_v2 = vadd.f32 %v1642_v21, %v2872_v7 }
 0x152   :  { %v936_v28 = vsel %vm918_vm2, %v875_v23, %v927_v52 }
 0x153   :  { %v1644_v42 = vpop.f32.mrf.mxu0  ;;  %v880_v10 = vadd.f32 %v1701_v26, %v770_v2 }
 0x154   :  { %v1702_v43 = vpop.f32.mrf.mxu1  ;;  %v1645_v32 = vadd.f32 %v1644_v42, %v1643_v46 }
 0x155   :  { %v928_v40 = vmul.f32 0.01, %v880_v10  ;;  %vm919_vm3 = vcmp.gt.f32.partialorder %v880_v10, 0.0 }
 0x156   :  { %v1703_v47 = vpop.f32.mrf.mxu1  ;;  %v775_v25 = vadd.f32 %v1645_v32, %v2872_v7 }
 0x157   :  { %v1646_v48 = vpop.f32.mrf.mxu0  ;;  %v1704_v6 = vadd.f32 %v1703_v47, %v1702_v43  ;;  %v937_v23 = vsel %vm919_vm3, %v880_v10, %v928_v40 }
 0x159   :  { %v1705_v51 = vpop.f32.mrf.mxu1  ;;  %v1647_v53 = vpop.f32.mrf.mxu0 }
 0x15a   :  { %v1648_v3 = vadd.f32 %v1647_v53, %v1646_v48  ;;  %v885_v48 = vadd.f32 %v1704_v6, %v775_v25 }
 0x15b   :  { %v1706_v58 = vpop.f32.mrf.mxu1 }
 0x15c   :  { %v1649_v62 = vpop.f32.mrf.mxu0  ;;  %v780_v30 = vadd.f32 %v1648_v3, %v2872_v7  ;;  %v1707_v46 = vadd.f32 %v1706_v58, %v1705_v51  ;;  %v3169_v3 = vmax.f32 %v2906_v36, %v2908_v37  ;;  %vm920_vm5 = vcmp.gt.f32.partialorder %v885_v48, 0.0 }
 0x15d   :  { %v929_v6 = vmul.f32 0.01, %v885_v48 }
 0x15e   :  { %v2991_v16 = vpop.f32.mrf.mxu1  ;;  %v1650_v63 = vpop.f32.mrf.mxu0  ;;  %v890_v32 = vadd.f32 %v1707_v46, %v780_v30  ;;  %v945_v52 = vmax.f32 %v3169_v3, %v936_v28 }
 0x15f   :  { %v1651_v31 = vadd.f32 %v1650_v63, %v1649_v62 }
 0x160   :  { %v1709_v55 = vpop.f32.mrf.mxu1  ;;  %v930_v30 = vmul.f32 0.01, %v890_v32  ;;  %vm921_vm6 = vcmp.gt.f32.partialorder %v890_v32, 0.0 }
 0x161   :  { %v785_v43 = vadd.f32 %v1651_v31, %v2872_v7 }
 0x162   :  { %v1652_v57 = vpop.f32.mrf.mxu0 }
 0x164   :  { %v2993_v54 = vpop.f32.mrf.mxu1  ;;  %v1653_v61 = vpop.f32.mrf.mxu0 }
 0x165   :  { %v1654_v25 = vadd.f32 %v1653_v61, %v1652_v57  ;;  %v938_v57 = vsel %vm920_vm5, %v885_v48, %v929_v6 }
 0x166   :  { %v2995_v59 = vpop.f32.mrf.mxu1 }
 0x167   :  { %v2997_v4 = vpop.f32.mrf.mxu0 }
 0x169   :  { %v2999_v5 = vpop.f32.mrf.mxu0 }
 0x16a   :  { %v3001_v8 = vpop.f32.mrf.mxu1  ;;  %v1657_v61 = vadd.f32 %v2999_v5, %v2997_v4 }
 0x16c   :  { %v3003_v9 = vpop.f32.mrf.mxu1 }
 0x16d   :  { %v3005_v11 = vpop.f32.mrf.mxu0 }
 0x16f   :  { %v3007_v12 = vpop.f32.mrf.mxu0 }
 0x170   :  { %v3009_v60 = vpop.f32.mrf.mxu1 }
 0x172   :  { %v3012_v24 = vpop.f32.mrf.mxu1 }
 0x173   :  { %v3014_v34 = vpop.f32.mrf.mxu0 }
 0x175   :  { %v3017_v50 = vpop.f32.mrf.mxu1  ;;  %v3019_v20 = vpop.f32.mrf.mxu0 }
 0x177   :  { %v3021_v19 = vpop.f32.mrf.mxu1 }
 0x179   :  { %v1755_v33 = vpop.f32.mrf.mxu0 }
 0x17b   :  { %v1814_v29 = vpop.f32.mrf.mxu1  ;;  %v1756_v39 = vpop.f32.mrf.mxu0 }
 0x17c   :  { %v1757_v21 = vadd.f32 %v1756_v39, %v1755_v33  ;;  %v1710_v33 = vadd.f32 %v1709_v55, %v2991_v16  ;;  %v3170_v16 = vmax.f32 %v2916_v15, %v2918_v49  ;;  %v1713_v49 = vadd.f32 %v2995_v59, %v2993_v54 }
 0x17d   :  { %v1815_v35 = vpop.f32.mrf.mxu1  ;;  %v1758_v41 = vpop.f32.mrf.mxu0 }
 0x17e   :  { %v1058_v42 = vadd.f32 %v1757_v21, %v2872_v7  ;;  %v1816_v2 = vadd.f32 %v1815_v35, %v1814_v29  ;;  %v895_v31 = vadd.f32 %v1710_v33, %v785_v43  ;;  %v946_v55 = vmax.f32 %v3170_v16, %v937_v23 }
 0x17f   :  { %v1817_v53 = vpop.f32.mrf.mxu1  ;;  %v1759_v26 = vpop.f32.mrf.mxu0 }
 0x180   :  { %v1168_v18 = vadd.f32 %v1816_v2, %v1058_v42  ;;  %v1760_v17 = vadd.f32 %v1759_v26, %v1758_v41  ;;  %v939_v2 = vsel %vm921_vm6, %v890_v32, %v930_v30  ;;  %vm922_vm8 = vcmp.gt.f32.partialorder %v895_v31, 0.0 }
 0x181   :  { %v1818_v47 = vpop.f32.mrf.mxu1  ;;  %v1761_v62 = vpop.f32.mrf.mxu0  ;;  %v931_v15 = vmul.f32 0.01, %v895_v31 }
 0x182   :  { %vm1211_vm4 = vcmp.gt.f32.partialorder %v1168_v18, 0.0  ;;  %v1220_v51 = vmul.f32 0.01, %v1168_v18  ;;  %v1063_v58 = vadd.f32 %v1760_v17, %v2872_v7  ;;  %v1819_v63 = vadd.f32 %v1818_v47, %v1817_v53 }
 0x183   :  { %v1820_v29 = vpop.f32.mrf.mxu1  ;;  %v1762_v39 = vpop.f32.mrf.mxu0  ;;  %v3171_v47 = vmax.f32 %v2926_v0, %v2928_v1  ;;  %v940_v1 = vsel %vm922_vm8, %v895_v31, %v931_v15 }
 0x184   :  { %v1229_v36 = vsel %vm1211_vm4, %v1168_v18, %v1220_v51  ;;  %v1173_v37 = vadd.f32 %v1819_v63, %v1063_v58  ;;  %v1763_v40 = vadd.f32 %v1762_v39, %v1761_v62  ;;  %v790_v18 = vadd.f32 %v1654_v25, %v2872_v7 }
 0x185   :  { %v1238_v10 = vmax.f32 %v945_v52, %v1229_v36  ;;  %v1821_v21 = vpop.f32.mrf.mxu1  ;;  %v1764_v28 = vpop.f32.mrf.mxu0  ;;  %v947_v32 = vmax.f32 %v3171_v47, %v938_v57  ;;  %v795_v51 = vadd.f32 %v1657_v61, %v2872_v7  ;;  %v1660_v58 = vadd.f32 %v3007_v12, %v3005_v11 }
 0x186   :  { %vm1212_vm7 = vcmp.gt.f32.partialorder %v1173_v37, 0.0  ;;  %v1221_v35 = vmul.f32 0.01, %v1173_v37  ;;  %v1068_v17 = vadd.f32 %v1763_v40, %v2872_v7  ;;  %v1822_v41 = vadd.f32 %v1821_v21, %v1820_v29 }
 0x187   :  { %1247 = vst [vmem:[%s3117_s3] sm:$0xff] %v1238_v10  ;;  %v1823_v46 = vpop.f32.mrf.mxu1  ;;  %v1765_v42 = vpop.f32.mrf.mxu0  ;;  %v900_v62 = vadd.f32 %v1713_v49, %v790_v18  ;;  %v3172_v25 = vmax.f32 %v2936_v13, %v2938_v14  ;;  %v1716_v29 = vadd.f32 %v3003_v9, %v3001_v8  ;;  %v800_v21 = vadd.f32 %v1660_v58, %v2872_v7 }
 0x188   :  { %v1230_v53 = vsel %vm1212_vm7, %v1173_v37, %v1221_v35  ;;  %v1178_v26 = vadd.f32 %v1822_v41, %v1068_v17  ;;  %v1766_v3 = vadd.f32 %v1765_v42, %v1764_v28  ;;  %v1663_v8 = vadd.f32 %v3019_v20, %v3014_v34 }
 0x189   :  { %v1239_v48 = vmax.f32 %v946_v55, %v1230_v53  ;;  %v1824_v52 = vpop.f32.mrf.mxu1  ;;  %v1767_v23 = vpop.f32.mrf.mxu0  ;;  %v948_v0 = vmax.f32 %v3172_v25, %v939_v2  ;;  %vm923_vm11 = vcmp.gt.f32.partialorder %v900_v62, 0.0  ;;  %v932_v40 = vmul.f32 0.01, %v900_v62 }
 0x18a   :  { %vm1213_vm9 = vcmp.gt.f32.partialorder %v1178_v26, 0.0  ;;  %v1222_v4 = vmul.f32 0.01, %v1178_v26  ;;  %v1073_v5 = vadd.f32 %v1766_v3, %v2872_v7  ;;  %v1825_v43 = vadd.f32 %v1824_v52, %v1823_v46 }
 0x18b   :  { %1248 = vst [vmem:[%s3117_s3 + $0x8] sm:$0xff] %v1239_v48  ;;  %v1826_v54 = vpop.f32.mrf.mxu1  ;;  %v1768_v59 = vpop.f32.mrf.mxu0  ;;  %v905_v10 = vadd.f32 %v1716_v29, %v795_v51  ;;  %v3173_v35 = vmax.f32 %v2945_v38, %v2947_v27  ;;  %v1719_v41 = vadd.f32 %v3012_v24, %v3009_v60  ;;  %v941_v34 = vsel %vm923_vm11, %v900_v62, %v932_v40 }
 0x18c   :  { %v1231_v63 = vsel %vm1213_vm9, %v1178_v26, %v1222_v4  ;;  %v1183_v6 = vadd.f32 %v1825_v43, %v1073_v5  ;;  %v1769_v33 = vadd.f32 %v1768_v59, %v1767_v23  ;;  %v805_v60 = vadd.f32 %v1663_v8, %v2872_v7 }
 0x18d   :  { %v1240_v39 = vmax.f32 %v947_v32, %v1231_v63  ;;  %v1827_v11 = vpop.f32.mrf.mxu1  ;;  %v1770_v12 = vpop.f32.mrf.mxu0  ;;  %v949_v17 = vmax.f32 %v3173_v35, %v940_v1  ;;  %vm924_vm13 = vcmp.gt.f32.partialorder %v905_v10, 0.0  ;;  %v933_v20 = vmul.f32 0.01, %v905_v10 }
 0x18e   :  { %vm1214_vm10 = vcmp.gt.f32.partialorder %v1183_v6, 0.0  ;;  %v1223_v30 = vmul.f32 0.01, %v1183_v6  ;;  %v1078_v36 = vadd.f32 %v1769_v33, %v2872_v7  ;;  %v1828_v37 = vadd.f32 %v1827_v11, %v1826_v54 }
 0x18f   :  { %1249 = vst [vmem:[%s3117_s3 + $0x10] sm:$0xff] %v1240_v39  ;;  %v1829_v13 = vpop.f32.mrf.mxu1  ;;  %v1771_v14 = vpop.f32.mrf.mxu0  ;;  %v910_v42 = vadd.f32 %v1719_v41, %v800_v21  ;;  %v1722_v26 = vadd.f32 %v3021_v19, %v3017_v50  ;;  %v3174_v4 = vmax.f32 %v2956_v44, %v2958_v45  ;;  %v942_v43 = vsel %vm924_vm13, %v905_v10, %v933_v20  ;;  %v3176_v10 = vld [vmem:[#allocation8_spill] sm:$0xff]  ;;  %v3177_v21 = vld [vmem:[#allocation7_spill] sm:$0xff] }
 0x190   :  { %v1232_v9 = vsel %vm1214_vm10, %v1183_v6, %v1223_v30  ;;  %v1188_v31 = vadd.f32 %v1828_v37, %v1078_v36  ;;  %v1772_v28 = vadd.f32 %v1771_v14, %v1770_v12  ;;  %v3175_v33 = vmax.f32 %v2966_v56, %v2968_v22  ;;  %v3180_v41 = vld [vmem:[#allocation3_spill] sm:$0xff] }
 0x191   :  { %v1241_v16 = vmax.f32 %v948_v0, %v1232_v9  ;;  %v1830_v55 = vpop.f32.mrf.mxu1  ;;  %v1773_v57 = vpop.f32.mrf.mxu0  ;;  %v950_v5 = vmax.f32 %v3174_v4, %v941_v34  ;;  %vm925_vm15 = vcmp.gt.f32.partialorder %v910_v42, 0.0  ;;  %v934_v47 = vmul.f32 0.01, %v910_v42 }
 0x192   :  { %vm1215_vm12 = vcmp.gt.f32.partialorder %v1188_v31, 0.0  ;;  %v1224_v18 = vmul.f32 0.01, %v1188_v31  ;;  %v1083_v61 = vadd.f32 %v1772_v28, %v2872_v7  ;;  %v1831_v46 = vadd.f32 %v1830_v55, %v1829_v13 }
 0x193   :  { %1250 = vst [vmem:[%s3117_s3 + $0x18] sm:$0xff] %v1241_v16  ;;  %v1832_v38 = vpop.f32.mrf.mxu1  ;;  %v1774_v27 = vpop.f32.mrf.mxu0  ;;  %v915_v32 = vadd.f32 %v1722_v26, %v805_v60  ;;  %v951_v25 = vmax.f32 %v3175_v33, %v942_v43  ;;  %v943_v0 = vsel %vm925_vm15, %v910_v42, %v934_v47  ;;  %v3178_v13 = vmax.f32 %v3176_v10, %v3177_v21 }
 0x194   :  { %v1233_v24 = vsel %vm1215_vm12, %v1188_v31, %v1224_v18  ;;  %v1193_v2 = vadd.f32 %v1831_v46, %v1083_v61  ;;  %v1775_v53 = vadd.f32 %v1774_v27, %v1773_v57 }
 0x195   :  { %v1242_v3 = vmax.f32 %v949_v17, %v1233_v24  ;;  %v1833_v15 = vpop.f32.mrf.mxu1  ;;  %v1776_v49 = vpop.f32.mrf.mxu0  ;;  %v935_v39 = vmul.f32 0.01, %v915_v32  ;;  %vm926_vm1 = vcmp.gt.f32.partialorder %v915_v32, 0.0  ;;  %v952_v14 = vmax.f32 %v3178_v13, %v943_v0  ;;  %v3179_v17 = vld [vmem:[#allocation11_spill] sm:$0xff] }
 0x196   :  { %vm1216_vm14 = vcmp.gt.f32.partialorder %v1193_v2, 0.0  ;;  %v1225_v48 = vmul.f32 0.01, %v1193_v2  ;;  %v1088_v52 = vadd.f32 %v1775_v53, %v2872_v7  ;;  %v1834_v23 = vadd.f32 %v1833_v15, %v1832_v38 }
 0x197   :  { %1251 = vst [vmem:[%s3117_s3 + $0x20] sm:$0xff] %v1242_v3  ;;  %v1835_v19 = vpop.f32.mrf.mxu1  ;;  %v1777_v50 = vpop.f32.mrf.mxu0  ;;  %v944_v8 = vsel %vm926_vm1, %v915_v32, %v935_v39  ;;  %v3181_v16 = vmax.f32 %v3179_v17, %v3180_v41 }
 0x198   :  { %v1234_v62 = vsel %vm1216_vm14, %v1193_v2, %v1225_v48  ;;  %v1198_v51 = vadd.f32 %v1834_v23, %v1088_v52  ;;  %v1778_v58 = vadd.f32 %v1777_v50, %v1776_v49 }
 0x199   :  { %v1243_v54 = vmax.f32 %v950_v5, %v1234_v62  ;;  %v1836_v59 = vpop.f32.mrf.mxu1  ;;  %v1779_v63 = vpop.f32.mrf.mxu0  ;;  %v953_v55 = vmax.f32 %v3181_v16, %v944_v8 }
 0x19a   :  { %vm1217_vm0 = vcmp.gt.f32.partialorder %v1198_v51, 0.0  ;;  %v1226_v44 = vmul.f32 0.01, %v1198_v51  ;;  %v1093_v45 = vadd.f32 %v1778_v58, %v2872_v7  ;;  %v1837_v6 = vadd.f32 %v1836_v59, %v1835_v19 }
 0x19b   :  { %1252 = vst [vmem:[%s3117_s3 + $0x28] sm:$0xff] %v1243_v54  ;;  %v1838_v1 = vpop.f32.mrf.mxu1  ;;  %v1780_v29 = vpop.f32.mrf.mxu0 }
 0x19c   :  { %v1235_v11 = vsel %vm1217_vm0, %v1198_v51, %v1226_v44  ;;  %v1203_v12 = vadd.f32 %v1837_v6, %v1093_v45  ;;  %v1781_v30 = vadd.f32 %v1780_v29, %v1779_v63 }
 0x19d   :  { %v1244_v36 = vmax.f32 %v951_v25, %v1235_v11  ;;  %v1839_v37 = vpop.f32.mrf.mxu1 }
 0x19e   :  { %vm1218_vm2 = vcmp.gt.f32.partialorder %v1203_v12, 0.0  ;;  %v1227_v40 = vmul.f32 0.01, %v1203_v12  ;;  %v1098_v56 = vadd.f32 %v1781_v30, %v2872_v7  ;;  %v1840_v22 = vadd.f32 %v1839_v37, %v1838_v1 }
 0x19f   :  { %1253 = vst [vmem:[%s3117_s3 + $0x30] sm:$0xff] %v1244_v36 }
 0x1a0   :  { %v1236_v9 = vsel %vm1218_vm2, %v1203_v12, %v1227_v40  ;;  %v1208_v31 = vadd.f32 %v1840_v22, %v1098_v56 }
 0x1a1   :  { %v1245_v28 = vmax.f32 %v952_v14, %v1236_v9 }
 0x1a2   :  { %vm1219_vm3 = vcmp.gt.f32.partialorder %v1208_v31, 0.0  ;;  %v1228_v35 = vmul.f32 0.01, %v1208_v31 }
 0x1a3   :  { %1254 = vst [vmem:[%s3117_s3 + $0x38] sm:$0xff] %v1245_v28 }
 0x1a4   :  { %v1237_v7 = vsel %vm1219_vm3, %v1208_v31, %v1228_v35 }
 0x1a5   :  { %v1246_v57 = vmax.f32 %v953_v55, %v1237_v7 }
 0x1a7   :  { %1255 = vst [vmem:[%s3117_s3 + $0x40] sm:$0xff] %v1246_v57 }

// kernel: encoder_forward.8
= control target key start
LH: loop header
LB: loop body
LE: loop exit
PB: predicated region body
PF: predicated region fallthrough
CT: control target
= control target key end

     0   :  { %s1727_s15 = smov 0   ;;  %s1729_s16 = smov 0   ;;  %s2654_s0 = inlined_call_operand.vmem [shape: f32[2,4608], index: 0, kind: input, shape index: {}]   ;;  %s2655_s1 = inlined_call_operand.vmem [shape: f32[4608,1024], index: 1, kind: input, shape index: {}]   ;;  %s2656_s2 = inlined_call_operand.vmem [shape: f32[1,1024], index: 2, kind: input, shape index: {}]   ;;  %s2657_s3 = inlined_call_operand.vmem [shape: f32[2,1024], index: 3, kind: input, shape index: {}]   ;;  %s2658_s4 = inlined_call_operand.vmem [shape: f32[2,1024], index: 4, kind: output, shape index: {}]  }
   0x1   :  { %s1731_s17 = smov 0   ;;  %s1733_s18 = smov 0  }
   0x2   :  { %s1735_s19 = smov 0   ;;  %s1737_s20 = smov 0  }
   0x3   :  { %s1739_s21 = smov 0  }
   0x4 LB: > { %s23_s22 = sadd.s32 1, %s1690_s19  ;;  %s26_s23 = sadd.s32 1, %s1694_s20  ;;  %s1698_s21 = sphi %s1739_s21, %s14_s21   ;;  %s1694_s20 = sphi %s1737_s20, %s2664_s20   ;;  %s1690_s19 = sphi %s1735_s19, %s2663_s19   ;;  %s1686_s18 = sphi %s1733_s18, %s2662_s18   ;;  %s1682_s17 = sphi %s1731_s17, %s2661_s17   ;;  %s1678_s16 = sphi %s1729_s16, %s2660_s16   ;;  %s1674_s15 = sphi %s1727_s15, %s2659_s15  }
   0x5   : > { %p24_p0 = scmp.ge.s32.totalorder %s23_s22, 9  ;;  %p68_p1 = scmp.ne.s32.totalorder %s1678_s16, %s1674_s15 }
   0x6   : > { %p69_p2 = scmp.eq.s32.totalorder %s1698_s21, 0  ;;  %s61_s27 = sadd.s32 1, %s1678_s16 }
   0x7   : > { %s2666_s22 = smov (%p24_p0, %s23_s22), 0  ;;  %s2668_s23 = smov (!%p24_p0, %s26_s23), %s1694_s20 }
   0x8   : > { %p70_p3 = por %p69_p2, %p68_p1  ;;  %p28_p4 = scmp.ge.s32.totalorder %s2668_s23, 2 }
   0x9   : > { %s56_s24 = ssub.s32 %s1690_s19, %s2666_s22  ;;  %p1565_p6 = scmp.ge.s32.totalorder %s1698_s21, 18 }
   0xa   : > { %s2670_s23 = smov (%p28_p4, %s2668_s23), 0 }
   0xb   : > { %s57_s25 = ssub.s32 %s1694_s20, %s2670_s23  ;;  %172 = sbr.rel (%p1565_p6) target bundleno = 151 (0x97), region = 16 }
   0xc   : > { %s58_s26 = sor.u32 %s57_s25, %s56_s24 }
   0xd   : > { %p59_p5 = scmp.eq.s32.totalorder %s58_s26, 0 }
   0xf   : > { %s1778_s28 = scalar_select %p59_p5, %s1678_s16, %s61_s27  }
  0x10   : > { %184 = sbr.rel (!%p70_p3) target bundleno = 151 (0x97), region = 24  ;;  %s186_s29 = sand.u32 (%p70_p3), 1, %s1678_s16  }
  0x11   : > { %s1568_s30 = sshll.u32 (%p70_p3), %s1694_s20, 2  ;;  %s1566_s5 = sshll.u32 (%p70_p3), %s186_s29, 11 }
  0x12   : > { %s1584_s6 = sshll.u32 (%p70_p3), %s1690_s19, 9  ;;  %s1792_s12 = scalar_lea.vmem (%p70_p3), [#allocation3], %s1566_s5 }
  0x13   : > { %s192_s7 = sadd.s32 (%p70_p3), %s1584_s6, %s1568_s30 }
  0x14   : > { %s1570_s8 = sshll.u32 (%p70_p3), %s192_s7, 3 }
  0x15   : > { %s1787_s11 = scalar_lea.vmem %s2655_s1, %s1570_s8 }
  0x16   : > { %v207_v0 = vld [vmem:[%s1787_s11] sm:$0xff]  ;;  %v209_v1 = vld [vmem:[%s1787_s11 + $0x8] sm:$0xff]  ;;  %v211_v2 = vld [vmem:[%s1787_s11 + $0x10] sm:$0xff] }
  0x17   : > { %208 = vst [vmem:[%s1792_s12] sm:$0xff] %v207_v0  ;;  %210 = vst [vmem:[%s1792_s12 + $0x8] sm:$0xff] %v209_v1  ;;  %v213_v3 = vld [vmem:[%s1787_s11 + $0x18] sm:$0xff]  ;;  %v215_v4 = vld [vmem:[%s1787_s11 + $0x40] sm:$0xff] }
  0x18   : > { %212 = vst [vmem:[%s1792_s12 + $0x10] sm:$0xff] %v211_v2  ;;  %v217_v5 = vld [vmem:[%s1787_s11 + $0x48] sm:$0xff]  ;;  %214 = vst [vmem:[%s1792_s12 + $0x18] sm:$0xff] %v213_v3  ;;  %v219_v6 = vld [vmem:[%s1787_s11 + $0x50] sm:$0xff] }
  0x19   : > { %216 = vst [vmem:[%s1792_s12 + $0x20] sm:$0xff] %v215_v4  ;;  %218 = vst [vmem:[%s1792_s12 + $0x28] sm:$0xff] %v217_v5  ;;  %v221_v7 = vld [vmem:[%s1787_s11 + $0x58] sm:$0xff]  ;;  %v223_v8 = vld [vmem:[%s1787_s11 + $0x80] sm:$0xff] }
  0x1a   : > { %220 = vst [vmem:[%s1792_s12 + $0x30] sm:$0xff] %v219_v6  ;;  %222 = vst [vmem:[%s1792_s12 + $0x38] sm:$0xff] %v221_v7  ;;  %v225_v9 = vld [vmem:[%s1787_s11 + $0x88] sm:$0xff]  ;;  %v227_v10 = vld [vmem:[%s1787_s11 + $0x90] sm:$0xff] }
  0x1b   : > { %224 = vst [vmem:[%s1792_s12 + $0x40] sm:$0xff] %v223_v8  ;;  %v229_v11 = vld [vmem:[%s1787_s11 + $0x98] sm:$0xff]  ;;  %226 = vst [vmem:[%s1792_s12 + $0x48] sm:$0xff] %v225_v9  ;;  %v231_v12 = vld [vmem:[%s1787_s11 + $0xc0] sm:$0xff] }
  0x1c   : > { %228 = vst [vmem:[%s1792_s12 + $0x50] sm:$0xff] %v227_v10  ;;  %230 = vst [vmem:[%s1792_s12 + $0x58] sm:$0xff] %v229_v11  ;;  %v233_v13 = vld [vmem:[%s1787_s11 + $0xc8] sm:$0xff]  ;;  %v235_v14 = vld [vmem:[%s1787_s11 + $0xd0] sm:$0xff] }
  0x1d   : > { %232 = vst [vmem:[%s1792_s12 + $0x60] sm:$0xff] %v231_v12  ;;  %234 = vst [vmem:[%s1792_s12 + $0x68] sm:$0xff] %v233_v13  ;;  %v237_v15 = vld [vmem:[%s1787_s11 + $0xd8] sm:$0xff]  ;;  %v239_v16 = vld [vmem:[%s1787_s11 + $0x100] sm:$0xff] }
  0x1e   : > { %236 = vst [vmem:[%s1792_s12 + $0x70] sm:$0xff] %v235_v14  ;;  %v241_v17 = vld [vmem:[%s1787_s11 + $0x108] sm:$0xff]  ;;  %238 = vst [vmem:[%s1792_s12 + $0x78] sm:$0xff] %v237_v15  ;;  %v243_v18 = vld [vmem:[%s1787_s11 + $0x110] sm:$0xff] }
  0x1f   : > { %240 = vst [vmem:[%s1792_s12 + $0x80] sm:$0xff] %v239_v16  ;;  %242 = vst [vmem:[%s1792_s12 + $0x88] sm:$0xff] %v241_v17  ;;  %v245_v19 = vld [vmem:[%s1787_s11 + $0x118] sm:$0xff]  ;;  %v247_v20 = vld [vmem:[%s1787_s11 + $0x140] sm:$0xff] }
  0x20   : > { %244 = vst [vmem:[%s1792_s12 + $0x90] sm:$0xff] %v243_v18  ;;  %246 = vst [vmem:[%s1792_s12 + $0x98] sm:$0xff] %v245_v19  ;;  %v249_v21 = vld [vmem:[%s1787_s11 + $0x148] sm:$0xff]  ;;  %v251_v22 = vld [vmem:[%s1787_s11 + $0x150] sm:$0xff] }
  0x21   : > { %248 = vst [vmem:[%s1792_s12 + $0xa0] sm:$0xff] %v247_v20  ;;  %v253_v23 = vld [vmem:[%s1787_s11 + $0x158] sm:$0xff]  ;;  %250 = vst [vmem:[%s1792_s12 + $0xa8] sm:$0xff] %v249_v21  ;;  %v255_v24 = vld [vmem:[%s1787_s11 + $0x180] sm:$0xff] }
  0x22   : > { %252 = vst [vmem:[%s1792_s12 + $0xb0] sm:$0xff] %v251_v22  ;;  %254 = vst [vmem:[%s1792_s12 + $0xb8] sm:$0xff] %v253_v23  ;;  %v257_v25 = vld [vmem:[%s1787_s11 + $0x188] sm:$0xff]  ;;  %v259_v26 = vld [vmem:[%s1787_s11 + $0x190] sm:$0xff] }
  0x23   : > { %256 = vst [vmem:[%s1792_s12 + $0xc0] sm:$0xff] %v255_v24  ;;  %258 = vst [vmem:[%s1792_s12 + $0xc8] sm:$0xff] %v257_v25  ;;  %v261_v27 = vld [vmem:[%s1787_s11 + $0x198] sm:$0xff]  ;;  %v263_v28 = vld [vmem:[%s1787_s11 + $0x1c0] sm:$0xff] }
  0x24   : > { %260 = vst [vmem:[%s1792_s12 + $0xd0] sm:$0xff] %v259_v26  ;;  %v265_v29 = vld [vmem:[%s1787_s11 + $0x1c8] sm:$0xff]  ;;  %262 = vst [vmem:[%s1792_s12 + $0xd8] sm:$0xff] %v261_v27  ;;  %v267_v30 = vld [vmem:[%s1787_s11 + $0x1d0] sm:$0xff] }
  0x25   : > { %264 = vst [vmem:[%s1792_s12 + $0xe0] sm:$0xff] %v263_v28  ;;  %266 = vst [vmem:[%s1792_s12 + $0xe8] sm:$0xff] %v265_v29  ;;  %v269_v31 = vld [vmem:[%s1787_s11 + $0x1d8] sm:$0xff]  ;;  %v271_v32 = vld [vmem:[%s1787_s11 + $0x200] sm:$0xff] }
  0x26   : > { %268 = vst [vmem:[%s1792_s12 + $0xf0] sm:$0xff] %v267_v30  ;;  %270 = vst [vmem:[%s1792_s12 + $0xf8] sm:$0xff] %v269_v31  ;;  %v273_v33 = vld [vmem:[%s1787_s11 + $0x208] sm:$0xff]  ;;  %v275_v34 = vld [vmem:[%s1787_s11 + $0x210] sm:$0xff] }
  0x27   : > { %272 = vst [vmem:[%s1792_s12 + $0x100] sm:$0xff] %v271_v32  ;;  %v277_v35 = vld [vmem:[%s1787_s11 + $0x218] sm:$0xff]  ;;  %274 = vst [vmem:[%s1792_s12 + $0x108] sm:$0xff] %v273_v33  ;;  %v279_v36 = vld [vmem:[%s1787_s11 + $0x240] sm:$0xff] }
  0x28   : > { %276 = vst [vmem:[%s1792_s12 + $0x110] sm:$0xff] %v275_v34  ;;  %278 = vst [vmem:[%s1792_s12 + $0x118] sm:$0xff] %v277_v35  ;;  %v281_v37 = vld [vmem:[%s1787_s11 + $0x248] sm:$0xff]  ;;  %v283_v38 = vld [vmem:[%s1787_s11 + $0x250] sm:$0xff] }
  0x29   : > { %280 = vst [vmem:[%s1792_s12 + $0x120] sm:$0xff] %v279_v36  ;;  %282 = vst [vmem:[%s1792_s12 + $0x128] sm:$0xff] %v281_v37  ;;  %v285_v39 = vld [vmem:[%s1787_s11 + $0x258] sm:$0xff]  ;;  %v287_v40 = vld [vmem:[%s1787_s11 + $0x280] sm:$0xff] }
  0x2a   : > { %284 = vst [vmem:[%s1792_s12 + $0x130] sm:$0xff] %v283_v38  ;;  %v289_v41 = vld [vmem:[%s1787_s11 + $0x288] sm:$0xff]  ;;  %286 = vst [vmem:[%s1792_s12 + $0x138] sm:$0xff] %v285_v39  ;;  %v291_v42 = vld [vmem:[%s1787_s11 + $0x290] sm:$0xff] }
  0x2b   : > { %288 = vst [vmem:[%s1792_s12 + $0x140] sm:$0xff] %v287_v40  ;;  %290 = vst [vmem:[%s1792_s12 + $0x148] sm:$0xff] %v289_v41  ;;  %v293_v43 = vld [vmem:[%s1787_s11 + $0x298] sm:$0xff]  ;;  %v295_v44 = vld [vmem:[%s1787_s11 + $0x2c0] sm:$0xff] }
  0x2c   : > { %292 = vst [vmem:[%s1792_s12 + $0x150] sm:$0xff] %v291_v42  ;;  %294 = vst [vmem:[%s1792_s12 + $0x158] sm:$0xff] %v293_v43  ;;  %v297_v45 = vld [vmem:[%s1787_s11 + $0x2c8] sm:$0xff]  ;;  %v299_v46 = vld [vmem:[%s1787_s11 + $0x2d0] sm:$0xff] }
  0x2d   : > { %296 = vst [vmem:[%s1792_s12 + $0x160] sm:$0xff] %v295_v44  ;;  %v301_v47 = vld [vmem:[%s1787_s11 + $0x2d8] sm:$0xff]  ;;  %298 = vst [vmem:[%s1792_s12 + $0x168] sm:$0xff] %v297_v45  ;;  %v303_v48 = vld [vmem:[%s1787_s11 + $0x300] sm:$0xff] }
  0x2e   : > { %300 = vst [vmem:[%s1792_s12 + $0x170] sm:$0xff] %v299_v46  ;;  %302 = vst [vmem:[%s1792_s12 + $0x178] sm:$0xff] %v301_v47  ;;  %v305_v49 = vld [vmem:[%s1787_s11 + $0x308] sm:$0xff]  ;;  %v307_v50 = vld [vmem:[%s1787_s11 + $0x310] sm:$0xff] }
  0x2f   : > { %304 = vst [vmem:[%s1792_s12 + $0x180] sm:$0xff] %v303_v48  ;;  %306 = vst [vmem:[%s1792_s12 + $0x188] sm:$0xff] %v305_v49  ;;  %v309_v51 = vld [vmem:[%s1787_s11 + $0x318] sm:$0xff]  ;;  %v311_v52 = vld [vmem:[%s1787_s11 + $0x340] sm:$0xff] }
  0x30   : > { %308 = vst [vmem:[%s1792_s12 + $0x190] sm:$0xff] %v307_v50  ;;  %v313_v53 = vld [vmem:[%s1787_s11 + $0x348] sm:$0xff]  ;;  %310 = vst [vmem:[%s1792_s12 + $0x198] sm:$0xff] %v309_v51  ;;  %v315_v54 = vld [vmem:[%s1787_s11 + $0x350] sm:$0xff] }
  0x31   : > { %312 = vst [vmem:[%s1792_s12 + $0x1a0] sm:$0xff] %v311_v52  ;;  %314 = vst [vmem:[%s1792_s12 + $0x1a8] sm:$0xff] %v313_v53  ;;  %v317_v55 = vld [vmem:[%s1787_s11 + $0x358] sm:$0xff]  ;;  %v319_v56 = vld [vmem:[%s1787_s11 + $0x380] sm:$0xff] }
  0x32   : > { %316 = vst [vmem:[%s1792_s12 + $0x1b0] sm:$0xff] %v315_v54  ;;  %318 = vst [vmem:[%s1792_s12 + $0x1b8] sm:$0xff] %v317_v55  ;;  %v321_v57 = vld [vmem:[%s1787_s11 + $0x388] sm:$0xff]  ;;  %v323_v58 = vld [vmem:[%s1787_s11 + $0x390] sm:$0xff] }
  0x33   : > { %320 = vst [vmem:[%s1792_s12 + $0x1c0] sm:$0xff] %v319_v56  ;;  %v325_v59 = vld [vmem:[%s1787_s11 + $0x398] sm:$0xff]  ;;  %322 = vst [vmem:[%s1792_s12 + $0x1c8] sm:$0xff] %v321_v57  ;;  %v327_v60 = vld [vmem:[%s1787_s11 + $0x3c0] sm:$0xff] }
  0x34   : > { %324 = vst [vmem:[%s1792_s12 + $0x1d0] sm:$0xff] %v323_v58  ;;  %326 = vst [vmem:[%s1792_s12 + $0x1d8] sm:$0xff] %v325_v59  ;;  %v329_v61 = vld [vmem:[%s1787_s11 + $0x3c8] sm:$0xff]  ;;  %v331_v62 = vld [vmem:[%s1787_s11 + $0x3d0] sm:$0xff] }
  0x35   : > { %328 = vst [vmem:[%s1792_s12 + $0x1e0] sm:$0xff] %v327_v60  ;;  %330 = vst [vmem:[%s1792_s12 + $0x1e8] sm:$0xff] %v329_v61  ;;  %v333_v63 = vld [vmem:[%s1787_s11 + $0x3d8] sm:$0xff]  ;;  %v335_v0 = vld [vmem:[%s1787_s11 + $0x400] sm:$0xff] }
  0x36   : > { %332 = vst [vmem:[%s1792_s12 + $0x1f0] sm:$0xff] %v331_v62  ;;  %v337_v1 = vld [vmem:[%s1787_s11 + $0x408] sm:$0xff]  ;;  %334 = vst [vmem:[%s1792_s12 + $0x1f8] sm:$0xff] %v333_v63  ;;  %v339_v2 = vld [vmem:[%s1787_s11 + $0x410] sm:$0xff] }
  0x37   : > { %336 = vst [vmem:[%s1792_s12 + $0x200] sm:$0xff] %v335_v0  ;;  %338 = vst [vmem:[%s1792_s12 + $0x208] sm:$0xff] %v337_v1  ;;  %v341_v3 = vld [vmem:[%s1787_s11 + $0x418] sm:$0xff]  ;;  %v343_v4 = vld [vmem:[%s1787_s11 + $0x440] sm:$0xff] }
  0x38   : > { %340 = vst [vmem:[%s1792_s12 + $0x210] sm:$0xff] %v339_v2  ;;  %342 = vst [vmem:[%s1792_s12 + $0x218] sm:$0xff] %v341_v3  ;;  %v345_v5 = vld [vmem:[%s1787_s11 + $0x448] sm:$0xff]  ;;  %v347_v6 = vld [vmem:[%s1787_s11 + $0x450] sm:$0xff] }
  0x39   : > { %344 = vst [vmem:[%s1792_s12 + $0x220] sm:$0xff] %v343_v4  ;;  %v349_v7 = vld [vmem:[%s1787_s11 + $0x458] sm:$0xff]  ;;  %346 = vst [vmem:[%s1792_s12 + $0x228] sm:$0xff] %v345_v5  ;;  %v351_v8 = vld [vmem:[%s1787_s11 + $0x480] sm:$0xff] }
  0x3a   : > { %348 = vst [vmem:[%s1792_s12 + $0x230] sm:$0xff] %v347_v6  ;;  %350 = vst [vmem:[%s1792_s12 + $0x238] sm:$0xff] %v349_v7  ;;  %v353_v9 = vld [vmem:[%s1787_s11 + $0x488] sm:$0xff]  ;;  %v355_v10 = vld [vmem:[%s1787_s11 + $0x490] sm:$0xff] }
  0x3b   : > { %352 = vst [vmem:[%s1792_s12 + $0x240] sm:$0xff] %v351_v8  ;;  %354 = vst [vmem:[%s1792_s12 + $0x248] sm:$0xff] %v353_v9  ;;  %v357_v11 = vld [vmem:[%s1787_s11 + $0x498] sm:$0xff]  ;;  %v359_v12 = vld [vmem:[%s1787_s11 + $0x4c0] sm:$0xff] }
  0x3c   : > { %356 = vst [vmem:[%s1792_s12 + $0x250] sm:$0xff] %v355_v10  ;;  %v361_v13 = vld [vmem:[%s1787_s11 + $0x4c8] sm:$0xff]  ;;  %358 = vst [vmem:[%s1792_s12 + $0x258] sm:$0xff] %v357_v11  ;;  %v363_v14 = vld [vmem:[%s1787_s11 + $0x4d0] sm:$0xff] }
  0x3d   : > { %360 = vst [vmem:[%s1792_s12 + $0x260] sm:$0xff] %v359_v12  ;;  %362 = vst [vmem:[%s1792_s12 + $0x268] sm:$0xff] %v361_v13  ;;  %v365_v15 = vld [vmem:[%s1787_s11 + $0x4d8] sm:$0xff]  ;;  %v367_v16 = vld [vmem:[%s1787_s11 + $0x500] sm:$0xff] }
  0x3e   : > { %364 = vst [vmem:[%s1792_s12 + $0x270] sm:$0xff] %v363_v14  ;;  %366 = vst [vmem:[%s1792_s12 + $0x278] sm:$0xff] %v365_v15  ;;  %v369_v17 = vld [vmem:[%s1787_s11 + $0x508] sm:$0xff]  ;;  %v371_v18 = vld [vmem:[%s1787_s11 + $0x510] sm:$0xff] }
  0x3f   : > { %368 = vst [vmem:[%s1792_s12 + $0x280] sm:$0xff] %v367_v16  ;;  %v373_v19 = vld [vmem:[%s1787_s11 + $0x518] sm:$0xff]  ;;  %370 = vst [vmem:[%s1792_s12 + $0x288] sm:$0xff] %v369_v17  ;;  %v375_v20 = vld [vmem:[%s1787_s11 + $0x540] sm:$0xff] }
  0x40   : > { %372 = vst [vmem:[%s1792_s12 + $0x290] sm:$0xff] %v371_v18  ;;  %374 = vst [vmem:[%s1792_s12 + $0x298] sm:$0xff] %v373_v19  ;;  %v377_v21 = vld [vmem:[%s1787_s11 + $0x548] sm:$0xff]  ;;  %v379_v22 = vld [vmem:[%s1787_s11 + $0x550] sm:$0xff] }
  0x41   : > { %376 = vst [vmem:[%s1792_s12 + $0x2a0] sm:$0xff] %v375_v20  ;;  %378 = vst [vmem:[%s1792_s12 + $0x2a8] sm:$0xff] %v377_v21  ;;  %v381_v23 = vld [vmem:[%s1787_s11 + $0x558] sm:$0xff]  ;;  %v383_v24 = vld [vmem:[%s1787_s11 + $0x580] sm:$0xff] }
  0x42   : > { %380 = vst [vmem:[%s1792_s12 + $0x2b0] sm:$0xff] %v379_v22  ;;  %v385_v25 = vld [vmem:[%s1787_s11 + $0x588] sm:$0xff]  ;;  %382 = vst [vmem:[%s1792_s12 + $0x2b8] sm:$0xff] %v381_v23  ;;  %v387_v26 = vld [vmem:[%s1787_s11 + $0x590] sm:$0xff] }
  0x43   : > { %384 = vst [vmem:[%s1792_s12 + $0x2c0] sm:$0xff] %v383_v24  ;;  %386 = vst [vmem:[%s1792_s12 + $0x2c8] sm:$0xff] %v385_v25  ;;  %v389_v27 = vld [vmem:[%s1787_s11 + $0x598] sm:$0xff]  ;;  %v391_v28 = vld [vmem:[%s1787_s11 + $0x5c0] sm:$0xff] }
  0x44   : > { %388 = vst [vmem:[%s1792_s12 + $0x2d0] sm:$0xff] %v387_v26  ;;  %390 = vst [vmem:[%s1792_s12 + $0x2d8] sm:$0xff] %v389_v27  ;;  %v393_v29 = vld [vmem:[%s1787_s11 + $0x5c8] sm:$0xff]  ;;  %v395_v30 = vld [vmem:[%s1787_s11 + $0x5d0] sm:$0xff] }
  0x45   : > { %392 = vst [vmem:[%s1792_s12 + $0x2e0] sm:$0xff] %v391_v28  ;;  %v397_v31 = vld [vmem:[%s1787_s11 + $0x5d8] sm:$0xff]  ;;  %394 = vst [vmem:[%s1792_s12 + $0x2e8] sm:$0xff] %v393_v29  ;;  %v399_v32 = vld [vmem:[%s1787_s11 + $0x600] sm:$0xff] }
  0x46   : > { %396 = vst [vmem:[%s1792_s12 + $0x2f0] sm:$0xff] %v395_v30  ;;  %398 = vst [vmem:[%s1792_s12 + $0x2f8] sm:$0xff] %v397_v31  ;;  %v401_v33 = vld [vmem:[%s1787_s11 + $0x608] sm:$0xff]  ;;  %v403_v34 = vld [vmem:[%s1787_s11 + $0x610] sm:$0xff] }
  0x47   : > { %400 = vst [vmem:[%s1792_s12 + $0x300] sm:$0xff] %v399_v32  ;;  %402 = vst [vmem:[%s1792_s12 + $0x308] sm:$0xff] %v401_v33  ;;  %v405_v35 = vld [vmem:[%s1787_s11 + $0x618] sm:$0xff]  ;;  %v407_v36 = vld [vmem:[%s1787_s11 + $0x640] sm:$0xff] }
  0x48   : > { %404 = vst [vmem:[%s1792_s12 + $0x310] sm:$0xff] %v403_v34  ;;  %v409_v37 = vld [vmem:[%s1787_s11 + $0x648] sm:$0xff]  ;;  %406 = vst [vmem:[%s1792_s12 + $0x318] sm:$0xff] %v405_v35  ;;  %v411_v38 = vld [vmem:[%s1787_s11 + $0x650] sm:$0xff] }
  0x49   : > { %408 = vst [vmem:[%s1792_s12 + $0x320] sm:$0xff] %v407_v36  ;;  %410 = vst [vmem:[%s1792_s12 + $0x328] sm:$0xff] %v409_v37  ;;  %v413_v39 = vld [vmem:[%s1787_s11 + $0x658] sm:$0xff]  ;;  %v415_v40 = vld [vmem:[%s1787_s11 + $0x680] sm:$0xff] }
  0x4a   : > { %412 = vst [vmem:[%s1792_s12 + $0x330] sm:$0xff] %v411_v38  ;;  %414 = vst [vmem:[%s1792_s12 + $0x338] sm:$0xff] %v413_v39  ;;  %v417_v41 = vld [vmem:[%s1787_s11 + $0x688] sm:$0xff]  ;;  %v419_v42 = vld [vmem:[%s1787_s11 + $0x690] sm:$0xff] }
  0x4b   : > { %416 = vst [vmem:[%s1792_s12 + $0x340] sm:$0xff] %v415_v40  ;;  %v421_v43 = vld [vmem:[%s1787_s11 + $0x698] sm:$0xff]  ;;  %418 = vst [vmem:[%s1792_s12 + $0x348] sm:$0xff] %v417_v41  ;;  %v423_v44 = vld [vmem:[%s1787_s11 + $0x6c0] sm:$0xff] }
  0x4c   : > { %420 = vst [vmem:[%s1792_s12 + $0x350] sm:$0xff] %v419_v42  ;;  %422 = vst [vmem:[%s1792_s12 + $0x358] sm:$0xff] %v421_v43  ;;  %v425_v45 = vld [vmem:[%s1787_s11 + $0x6c8] sm:$0xff]  ;;  %v427_v46 = vld [vmem:[%s1787_s11 + $0x6d0] sm:$0xff] }
  0x4d   : > { %424 = vst [vmem:[%s1792_s12 + $0x360] sm:$0xff] %v423_v44  ;;  %426 = vst [vmem:[%s1792_s12 + $0x368] sm:$0xff] %v425_v45  ;;  %v429_v47 = vld [vmem:[%s1787_s11 + $0x6d8] sm:$0xff]  ;;  %v431_v48 = vld [vmem:[%s1787_s11 + $0x700] sm:$0xff] }
  0x4e   : > { %428 = vst [vmem:[%s1792_s12 + $0x370] sm:$0xff] %v427_v46  ;;  %v433_v49 = vld [vmem:[%s1787_s11 + $0x708] sm:$0xff]  ;;  %430 = vst [vmem:[%s1792_s12 + $0x378] sm:$0xff] %v429_v47  ;;  %v435_v50 = vld [vmem:[%s1787_s11 + $0x710] sm:$0xff] }
  0x4f   : > { %432 = vst [vmem:[%s1792_s12 + $0x380] sm:$0xff] %v431_v48  ;;  %434 = vst [vmem:[%s1792_s12 + $0x388] sm:$0xff] %v433_v49  ;;  %v437_v51 = vld [vmem:[%s1787_s11 + $0x718] sm:$0xff]  ;;  %v439_v52 = vld [vmem:[%s1787_s11 + $0x740] sm:$0xff] }
  0x50   : > { %436 = vst [vmem:[%s1792_s12 + $0x390] sm:$0xff] %v435_v50  ;;  %438 = vst [vmem:[%s1792_s12 + $0x398] sm:$0xff] %v437_v51  ;;  %v441_v53 = vld [vmem:[%s1787_s11 + $0x748] sm:$0xff]  ;;  %v443_v54 = vld [vmem:[%s1787_s11 + $0x750] sm:$0xff] }
  0x51   : > { %440 = vst [vmem:[%s1792_s12 + $0x3a0] sm:$0xff] %v439_v52  ;;  %v445_v55 = vld [vmem:[%s1787_s11 + $0x758] sm:$0xff]  ;;  %442 = vst [vmem:[%s1792_s12 + $0x3a8] sm:$0xff] %v441_v53  ;;  %v447_v56 = vld [vmem:[%s1787_s11 + $0x780] sm:$0xff] }
  0x52   : > { %444 = vst [vmem:[%s1792_s12 + $0x3b0] sm:$0xff] %v443_v54  ;;  %446 = vst [vmem:[%s1792_s12 + $0x3b8] sm:$0xff] %v445_v55  ;;  %v449_v57 = vld [vmem:[%s1787_s11 + $0x788] sm:$0xff]  ;;  %v451_v58 = vld [vmem:[%s1787_s11 + $0x790] sm:$0xff] }
  0x53   : > { %448 = vst [vmem:[%s1792_s12 + $0x3c0] sm:$0xff] %v447_v56  ;;  %450 = vst [vmem:[%s1792_s12 + $0x3c8] sm:$0xff] %v449_v57  ;;  %v453_v59 = vld [vmem:[%s1787_s11 + $0x798] sm:$0xff]  ;;  %v455_v60 = vld [vmem:[%s1787_s11 + $0x7c0] sm:$0xff] }
  0x54   : > { %452 = vst [vmem:[%s1792_s12 + $0x3d0] sm:$0xff] %v451_v58  ;;  %v457_v61 = vld [vmem:[%s1787_s11 + $0x7c8] sm:$0xff]  ;;  %454 = vst [vmem:[%s1792_s12 + $0x3d8] sm:$0xff] %v453_v59  ;;  %v459_v62 = vld [vmem:[%s1787_s11 + $0x7d0] sm:$0xff] }
  0x55   : > { %456 = vst [vmem:[%s1792_s12 + $0x3e0] sm:$0xff] %v455_v60  ;;  %458 = vst [vmem:[%s1792_s12 + $0x3e8] sm:$0xff] %v457_v61  ;;  %v461_v63 = vld [vmem:[%s1787_s11 + $0x7d8] sm:$0xff]  ;;  %v463_v0 = vld [vmem:[%s1787_s11 + $0x800] sm:$0xff] }
  0x56   : > { %460 = vst [vmem:[%s1792_s12 + $0x3f0] sm:$0xff] %v459_v62  ;;  %462 = vst [vmem:[%s1792_s12 + $0x3f8] sm:$0xff] %v461_v63  ;;  %v465_v1 = vld [vmem:[%s1787_s11 + $0x808] sm:$0xff]  ;;  %v467_v2 = vld [vmem:[%s1787_s11 + $0x810] sm:$0xff] }
  0x57   : > { %464 = vst [vmem:[%s1792_s12 + $0x400] sm:$0xff] %v463_v0  ;;  %v469_v3 = vld [vmem:[%s1787_s11 + $0x818] sm:$0xff]  ;;  %466 = vst [vmem:[%s1792_s12 + $0x408] sm:$0xff] %v465_v1  ;;  %v471_v4 = vld [vmem:[%s1787_s11 + $0x840] sm:$0xff] }
  0x58   : > { %468 = vst [vmem:[%s1792_s12 + $0x410] sm:$0xff] %v467_v2  ;;  %470 = vst [vmem:[%s1792_s12 + $0x418] sm:$0xff] %v469_v3  ;;  %v473_v5 = vld [vmem:[%s1787_s11 + $0x848] sm:$0xff]  ;;  %v475_v6 = vld [vmem:[%s1787_s11 + $0x850] sm:$0xff] }
  0x59   : > { %472 = vst [vmem:[%s1792_s12 + $0x420] sm:$0xff] %v471_v4  ;;  %474 = vst [vmem:[%s1792_s12 + $0x428] sm:$0xff] %v473_v5  ;;  %v477_v7 = vld [vmem:[%s1787_s11 + $0x858] sm:$0xff]  ;;  %v479_v8 = vld [vmem:[%s1787_s11 + $0x880] sm:$0xff] }
  0x5a   : > { %476 = vst [vmem:[%s1792_s12 + $0x430] sm:$0xff] %v475_v6  ;;  %v481_v9 = vld [vmem:[%s1787_s11 + $0x888] sm:$0xff]  ;;  %478 = vst [vmem:[%s1792_s12 + $0x438] sm:$0xff] %v477_v7  ;;  %v483_v10 = vld [vmem:[%s1787_s11 + $0x890] sm:$0xff] }
  0x5b   : > { %480 = vst [vmem:[%s1792_s12 + $0x440] sm:$0xff] %v479_v8  ;;  %482 = vst [vmem:[%s1792_s12 + $0x448] sm:$0xff] %v481_v9  ;;  %v485_v11 = vld [vmem:[%s1787_s11 + $0x898] sm:$0xff]  ;;  %v487_v12 = vld [vmem:[%s1787_s11 + $0x8c0] sm:$0xff] }
  0x5c   : > { %484 = vst [vmem:[%s1792_s12 + $0x450] sm:$0xff] %v483_v10  ;;  %486 = vst [vmem:[%s1792_s12 + $0x458] sm:$0xff] %v485_v11  ;;  %v489_v13 = vld [vmem:[%s1787_s11 + $0x8c8] sm:$0xff]  ;;  %v491_v14 = vld [vmem:[%s1787_s11 + $0x8d0] sm:$0xff] }
  0x5d   : > { %488 = vst [vmem:[%s1792_s12 + $0x460] sm:$0xff] %v487_v12  ;;  %v493_v15 = vld [vmem:[%s1787_s11 + $0x8d8] sm:$0xff]  ;;  %490 = vst [vmem:[%s1792_s12 + $0x468] sm:$0xff] %v489_v13  ;;  %v495_v16 = vld [vmem:[%s1787_s11 + $0x900] sm:$0xff] }
  0x5e   : > { %492 = vst [vmem:[%s1792_s12 + $0x470] sm:$0xff] %v491_v14  ;;  %494 = vst [vmem:[%s1792_s12 + $0x478] sm:$0xff] %v493_v15  ;;  %v497_v17 = vld [vmem:[%s1787_s11 + $0x908] sm:$0xff]  ;;  %v499_v18 = vld [vmem:[%s1787_s11 + $0x910] sm:$0xff] }
  0x5f   : > { %496 = vst [vmem:[%s1792_s12 + $0x480] sm:$0xff] %v495_v16  ;;  %498 = vst [vmem:[%s1792_s12 + $0x488] sm:$0xff] %v497_v17  ;;  %v501_v19 = vld [vmem:[%s1787_s11 + $0x918] sm:$0xff]  ;;  %v503_v20 = vld [vmem:[%s1787_s11 + $0x940] sm:$0xff] }
  0x60   : > { %500 = vst [vmem:[%s1792_s12 + $0x490] sm:$0xff] %v499_v18  ;;  %v505_v21 = vld [vmem:[%s1787_s11 + $0x948] sm:$0xff]  ;;  %502 = vst [vmem:[%s1792_s12 + $0x498] sm:$0xff] %v501_v19  ;;  %v507_v22 = vld [vmem:[%s1787_s11 + $0x950] sm:$0xff] }
  0x61   : > { %504 = vst [vmem:[%s1792_s12 + $0x4a0] sm:$0xff] %v503_v20  ;;  %506 = vst [vmem:[%s1792_s12 + $0x4a8] sm:$0xff] %v505_v21  ;;  %v509_v23 = vld [vmem:[%s1787_s11 + $0x958] sm:$0xff]  ;;  %v511_v24 = vld [vmem:[%s1787_s11 + $0x980] sm:$0xff] }
  0x62   : > { %508 = vst [vmem:[%s1792_s12 + $0x4b0] sm:$0xff] %v507_v22  ;;  %510 = vst [vmem:[%s1792_s12 + $0x4b8] sm:$0xff] %v509_v23  ;;  %v513_v25 = vld [vmem:[%s1787_s11 + $0x988] sm:$0xff]  ;;  %v515_v26 = vld [vmem:[%s1787_s11 + $0x990] sm:$0xff] }
  0x63   : > { %512 = vst [vmem:[%s1792_s12 + $0x4c0] sm:$0xff] %v511_v24  ;;  %v517_v27 = vld [vmem:[%s1787_s11 + $0x998] sm:$0xff]  ;;  %514 = vst [vmem:[%s1792_s12 + $0x4c8] sm:$0xff] %v513_v25  ;;  %v519_v28 = vld [vmem:[%s1787_s11 + $0x9c0] sm:$0xff] }
  0x64   : > { %516 = vst [vmem:[%s1792_s12 + $0x4d0] sm:$0xff] %v515_v26  ;;  %518 = vst [vmem:[%s1792_s12 + $0x4d8] sm:$0xff] %v517_v27  ;;  %v521_v29 = vld [vmem:[%s1787_s11 + $0x9c8] sm:$0xff]  ;;  %v523_v30 = vld [vmem:[%s1787_s11 + $0x9d0] sm:$0xff] }
  0x65   : > { %520 = vst [vmem:[%s1792_s12 + $0x4e0] sm:$0xff] %v519_v28  ;;  %522 = vst [vmem:[%s1792_s12 + $0x4e8] sm:$0xff] %v521_v29  ;;  %v525_v31 = vld [vmem:[%s1787_s11 + $0x9d8] sm:$0xff]  ;;  %v527_v32 = vld [vmem:[%s1787_s11 + $0xa00] sm:$0xff] }
  0x66   : > { %524 = vst [vmem:[%s1792_s12 + $0x4f0] sm:$0xff] %v523_v30  ;;  %v529_v33 = vld [vmem:[%s1787_s11 + $0xa08] sm:$0xff]  ;;  %526 = vst [vmem:[%s1792_s12 + $0x4f8] sm:$0xff] %v525_v31  ;;  %v531_v34 = vld [vmem:[%s1787_s11 + $0xa10] sm:$0xff] }
  0x67   : > { %528 = vst [vmem:[%s1792_s12 + $0x500] sm:$0xff] %v527_v32  ;;  %530 = vst [vmem:[%s1792_s12 + $0x508] sm:$0xff] %v529_v33  ;;  %v533_v35 = vld [vmem:[%s1787_s11 + $0xa18] sm:$0xff]  ;;  %v535_v36 = vld [vmem:[%s1787_s11 + $0xa40] sm:$0xff] }
  0x68   : > { %532 = vst [vmem:[%s1792_s12 + $0x510] sm:$0xff] %v531_v34  ;;  %534 = vst [vmem:[%s1792_s12 + $0x518] sm:$0xff] %v533_v35  ;;  %v537_v37 = vld [vmem:[%s1787_s11 + $0xa48] sm:$0xff]  ;;  %v539_v38 = vld [vmem:[%s1787_s11 + $0xa50] sm:$0xff] }
  0x69   : > { %536 = vst [vmem:[%s1792_s12 + $0x520] sm:$0xff] %v535_v36  ;;  %v541_v39 = vld [vmem:[%s1787_s11 + $0xa58] sm:$0xff]  ;;  %538 = vst [vmem:[%s1792_s12 + $0x528] sm:$0xff] %v537_v37  ;;  %v543_v40 = vld [vmem:[%s1787_s11 + $0xa80] sm:$0xff] }
  0x6a   : > { %540 = vst [vmem:[%s1792_s12 + $0x530] sm:$0xff] %v539_v38  ;;  %542 = vst [vmem:[%s1792_s12 + $0x538] sm:$0xff] %v541_v39  ;;  %v545_v41 = vld [vmem:[%s1787_s11 + $0xa88] sm:$0xff]  ;;  %v547_v42 = vld [vmem:[%s1787_s11 + $0xa90] sm:$0xff] }
  0x6b   : > { %544 = vst [vmem:[%s1792_s12 + $0x540] sm:$0xff] %v543_v40  ;;  %546 = vst [vmem:[%s1792_s12 + $0x548] sm:$0xff] %v545_v41  ;;  %v549_v43 = vld [vmem:[%s1787_s11 + $0xa98] sm:$0xff]  ;;  %v551_v44 = vld [vmem:[%s1787_s11 + $0xac0] sm:$0xff] }
  0x6c   : > { %548 = vst [vmem:[%s1792_s12 + $0x550] sm:$0xff] %v547_v42  ;;  %v553_v45 = vld [vmem:[%s1787_s11 + $0xac8] sm:$0xff]  ;;  %550 = vst [vmem:[%s1792_s12 + $0x558] sm:$0xff] %v549_v43  ;;  %v555_v46 = vld [vmem:[%s1787_s11 + $0xad0] sm:$0xff] }
  0x6d   : > { %552 = vst [vmem:[%s1792_s12 + $0x560] sm:$0xff] %v551_v44  ;;  %554 = vst [vmem:[%s1792_s12 + $0x568] sm:$0xff] %v553_v45  ;;  %v557_v47 = vld [vmem:[%s1787_s11 + $0xad8] sm:$0xff]  ;;  %v559_v48 = vld [vmem:[%s1787_s11 + $0xb00] sm:$0xff] }
  0x6e   : > { %556 = vst [vmem:[%s1792_s12 + $0x570] sm:$0xff] %v555_v46  ;;  %558 = vst [vmem:[%s1792_s12 + $0x578] sm:$0xff] %v557_v47  ;;  %v561_v49 = vld [vmem:[%s1787_s11 + $0xb08] sm:$0xff]  ;;  %v563_v50 = vld [vmem:[%s1787_s11 + $0xb10] sm:$0xff] }
  0x6f   : > { %560 = vst [vmem:[%s1792_s12 + $0x580] sm:$0xff] %v559_v48  ;;  %v565_v51 = vld [vmem:[%s1787_s11 + $0xb18] sm:$0xff]  ;;  %562 = vst [vmem:[%s1792_s12 + $0x588] sm:$0xff] %v561_v49  ;;  %v567_v52 = vld [vmem:[%s1787_s11 + $0xb40] sm:$0xff] }
  0x70   : > { %564 = vst [vmem:[%s1792_s12 + $0x590] sm:$0xff] %v563_v50  ;;  %566 = vst [vmem:[%s1792_s12 + $0x598] sm:$0xff] %v565_v51  ;;  %v569_v53 = vld [vmem:[%s1787_s11 + $0xb48] sm:$0xff]  ;;  %v571_v54 = vld [vmem:[%s1787_s11 + $0xb50] sm:$0xff] }
  0x71   : > { %568 = vst [vmem:[%s1792_s12 + $0x5a0] sm:$0xff] %v567_v52  ;;  %570 = vst [vmem:[%s1792_s12 + $0x5a8] sm:$0xff] %v569_v53  ;;  %v573_v55 = vld [vmem:[%s1787_s11 + $0xb58] sm:$0xff]  ;;  %v575_v56 = vld [vmem:[%s1787_s11 + $0xb80] sm:$0xff] }
  0x72   : > { %572 = vst [vmem:[%s1792_s12 + $0x5b0] sm:$0xff] %v571_v54  ;;  %v577_v57 = vld [vmem:[%s1787_s11 + $0xb88] sm:$0xff]  ;;  %574 = vst [vmem:[%s1792_s12 + $0x5b8] sm:$0xff] %v573_v55  ;;  %v579_v58 = vld [vmem:[%s1787_s11 + $0xb90] sm:$0xff] }
  0x73   : > { %576 = vst [vmem:[%s1792_s12 + $0x5c0] sm:$0xff] %v575_v56  ;;  %578 = vst [vmem:[%s1792_s12 + $0x5c8] sm:$0xff] %v577_v57  ;;  %v581_v59 = vld [vmem:[%s1787_s11 + $0xb98] sm:$0xff]  ;;  %v583_v60 = vld [vmem:[%s1787_s11 + $0xbc0] sm:$0xff] }
  0x74   : > { %580 = vst [vmem:[%s1792_s12 + $0x5d0] sm:$0xff] %v579_v58  ;;  %582 = vst [vmem:[%s1792_s12 + $0x5d8] sm:$0xff] %v581_v59  ;;  %v585_v61 = vld [vmem:[%s1787_s11 + $0xbc8] sm:$0xff]  ;;  %v587_v62 = vld [vmem:[%s1787_s11 + $0xbd0] sm:$0xff] }
  0x75   : > { %584 = vst [vmem:[%s1792_s12 + $0x5e0] sm:$0xff] %v583_v60  ;;  %v589_v63 = vld [vmem:[%s1787_s11 + $0xbd8] sm:$0xff]  ;;  %586 = vst [vmem:[%s1792_s12 + $0x5e8] sm:$0xff] %v585_v61  ;;  %v591_v0 = vld [vmem:[%s1787_s11 + $0xc00] sm:$0xff] }
  0x76   : > { %588 = vst [vmem:[%s1792_s12 + $0x5f0] sm:$0xff] %v587_v62  ;;  %590 = vst [vmem:[%s1792_s12 + $0x5f8] sm:$0xff] %v589_v63  ;;  %v593_v1 = vld [vmem:[%s1787_s11 + $0xc08] sm:$0xff]  ;;  %v595_v2 = vld [vmem:[%s1787_s11 + $0xc10] sm:$0xff] }
  0x77   : > { %592 = vst [vmem:[%s1792_s12 + $0x600] sm:$0xff] %v591_v0  ;;  %594 = vst [vmem:[%s1792_s12 + $0x608] sm:$0xff] %v593_v1  ;;  %v597_v3 = vld [vmem:[%s1787_s11 + $0xc18] sm:$0xff]  ;;  %v599_v4 = vld [vmem:[%s1787_s11 + $0xc40] sm:$0xff] }
  0x78   : > { %596 = vst [vmem:[%s1792_s12 + $0x610] sm:$0xff] %v595_v2  ;;  %v601_v5 = vld [vmem:[%s1787_s11 + $0xc48] sm:$0xff]  ;;  %598 = vst [vmem:[%s1792_s12 + $0x618] sm:$0xff] %v597_v3  ;;  %v603_v6 = vld [vmem:[%s1787_s11 + $0xc50] sm:$0xff] }
  0x79   : > { %600 = vst [vmem:[%s1792_s12 + $0x620] sm:$0xff] %v599_v4  ;;  %602 = vst [vmem:[%s1792_s12 + $0x628] sm:$0xff] %v601_v5  ;;  %v605_v7 = vld [vmem:[%s1787_s11 + $0xc58] sm:$0xff]  ;;  %v607_v8 = vld [vmem:[%s1787_s11 + $0xc80] sm:$0xff] }
  0x7a   : > { %604 = vst [vmem:[%s1792_s12 + $0x630] sm:$0xff] %v603_v6  ;;  %606 = vst [vmem:[%s1792_s12 + $0x638] sm:$0xff] %v605_v7  ;;  %v609_v9 = vld [vmem:[%s1787_s11 + $0xc88] sm:$0xff]  ;;  %v611_v10 = vld [vmem:[%s1787_s11 + $0xc90] sm:$0xff] }
  0x7b   : > { %608 = vst [vmem:[%s1792_s12 + $0x640] sm:$0xff] %v607_v8  ;;  %v613_v11 = vld [vmem:[%s1787_s11 + $0xc98] sm:$0xff]  ;;  %610 = vst [vmem:[%s1792_s12 + $0x648] sm:$0xff] %v609_v9  ;;  %v615_v12 = vld [vmem:[%s1787_s11 + $0xcc0] sm:$0xff] }
  0x7c   : > { %612 = vst [vmem:[%s1792_s12 + $0x650] sm:$0xff] %v611_v10  ;;  %614 = vst [vmem:[%s1792_s12 + $0x658] sm:$0xff] %v613_v11  ;;  %v617_v13 = vld [vmem:[%s1787_s11 + $0xcc8] sm:$0xff]  ;;  %v619_v14 = vld [vmem:[%s1787_s11 + $0xcd0] sm:$0xff] }
  0x7d   : > { %616 = vst [vmem:[%s1792_s12 + $0x660] sm:$0xff] %v615_v12  ;;  %618 = vst [vmem:[%s1792_s12 + $0x668] sm:$0xff] %v617_v13  ;;  %v621_v15 = vld [vmem:[%s1787_s11 + $0xcd8] sm:$0xff]  ;;  %v623_v16 = vld [vmem:[%s1787_s11 + $0xd00] sm:$0xff] }
  0x7e   : > { %620 = vst [vmem:[%s1792_s12 + $0x670] sm:$0xff] %v619_v14  ;;  %v625_v17 = vld [vmem:[%s1787_s11 + $0xd08] sm:$0xff]  ;;  %622 = vst [vmem:[%s1792_s12 + $0x678] sm:$0xff] %v621_v15  ;;  %v627_v18 = vld [vmem:[%s1787_s11 + $0xd10] sm:$0xff] }
  0x7f   : > { %624 = vst [vmem:[%s1792_s12 + $0x680] sm:$0xff] %v623_v16  ;;  %626 = vst [vmem:[%s1792_s12 + $0x688] sm:$0xff] %v625_v17  ;;  %v629_v19 = vld [vmem:[%s1787_s11 + $0xd18] sm:$0xff]  ;;  %v631_v20 = vld [vmem:[%s1787_s11 + $0xd40] sm:$0xff] }
  0x80   : > { %628 = vst [vmem:[%s1792_s12 + $0x690] sm:$0xff] %v627_v18  ;;  %630 = vst [vmem:[%s1792_s12 + $0x698] sm:$0xff] %v629_v19  ;;  %v633_v21 = vld [vmem:[%s1787_s11 + $0xd48] sm:$0xff]  ;;  %v635_v22 = vld [vmem:[%s1787_s11 + $0xd50] sm:$0xff] }
  0x81   : > { %632 = vst [vmem:[%s1792_s12 + $0x6a0] sm:$0xff] %v631_v20  ;;  %v637_v23 = vld [vmem:[%s1787_s11 + $0xd58] sm:$0xff]  ;;  %634 = vst [vmem:[%s1792_s12 + $0x6a8] sm:$0xff] %v633_v21  ;;  %v639_v24 = vld [vmem:[%s1787_s11 + $0xd80] sm:$0xff] }
  0x82   : > { %636 = vst [vmem:[%s1792_s12 + $0x6b0] sm:$0xff] %v635_v22  ;;  %638 = vst [vmem:[%s1792_s12 + $0x6b8] sm:$0xff] %v637_v23  ;;  %v641_v25 = vld [vmem:[%s1787_s11 + $0xd88] sm:$0xff]  ;;  %v643_v26 = vld [vmem:[%s1787_s11 + $0xd90] sm:$0xff] }
  0x83   : > { %640 = vst [vmem:[%s1792_s12 + $0x6c0] sm:$0xff] %v639_v24  ;;  %642 = vst [vmem:[%s1792_s12 + $0x6c8] sm:$0xff] %v641_v25  ;;  %v645_v27 = vld [vmem:[%s1787_s11 + $0xd98] sm:$0xff]  ;;  %v647_v28 = vld [vmem:[%s1787_s11 + $0xdc0] sm:$0xff] }
  0x84   : > { %644 = vst [vmem:[%s1792_s12 + $0x6d0] sm:$0xff] %v643_v26  ;;  %v649_v29 = vld [vmem:[%s1787_s11 + $0xdc8] sm:$0xff]  ;;  %646 = vst [vmem:[%s1792_s12 + $0x6d8] sm:$0xff] %v645_v27  ;;  %v651_v30 = vld [vmem:[%s1787_s11 + $0xdd0] sm:$0xff] }
  0x85   : > { %648 = vst [vmem:[%s1792_s12 + $0x6e0] sm:$0xff] %v647_v28  ;;  %650 = vst [vmem:[%s1792_s12 + $0x6e8] sm:$0xff] %v649_v29  ;;  %v653_v31 = vld [vmem:[%s1787_s11 + $0xdd8] sm:$0xff]  ;;  %v655_v32 = vld [vmem:[%s1787_s11 + $0xe00] sm:$0xff] }
  0x86   : > { %652 = vst [vmem:[%s1792_s12 + $0x6f0] sm:$0xff] %v651_v30  ;;  %654 = vst [vmem:[%s1792_s12 + $0x6f8] sm:$0xff] %v653_v31  ;;  %v657_v33 = vld [vmem:[%s1787_s11 + $0xe08] sm:$0xff]  ;;  %v659_v34 = vld [vmem:[%s1787_s11 + $0xe10] sm:$0xff] }
  0x87   : > { %656 = vst [vmem:[%s1792_s12 + $0x700] sm:$0xff] %v655_v32  ;;  %v661_v35 = vld [vmem:[%s1787_s11 + $0xe18] sm:$0xff]  ;;  %658 = vst [vmem:[%s1792_s12 + $0x708] sm:$0xff] %v657_v33  ;;  %v663_v36 = vld [vmem:[%s1787_s11 + $0xe40] sm:$0xff] }
  0x88   : > { %660 = vst [vmem:[%s1792_s12 + $0x710] sm:$0xff] %v659_v34  ;;  %662 = vst [vmem:[%s1792_s12 + $0x718] sm:$0xff] %v661_v35  ;;  %v665_v37 = vld [vmem:[%s1787_s11 + $0xe48] sm:$0xff]  ;;  %v667_v38 = vld [vmem:[%s1787_s11 + $0xe50] sm:$0xff] }
  0x89   : > { %664 = vst [vmem:[%s1792_s12 + $0x720] sm:$0xff] %v663_v36  ;;  %666 = vst [vmem:[%s1792_s12 + $0x728] sm:$0xff] %v665_v37  ;;  %v669_v39 = vld [vmem:[%s1787_s11 + $0xe58] sm:$0xff]  ;;  %v671_v40 = vld [vmem:[%s1787_s11 + $0xe80] sm:$0xff] }
  0x8a   : > { %668 = vst [vmem:[%s1792_s12 + $0x730] sm:$0xff] %v667_v38  ;;  %v673_v41 = vld [vmem:[%s1787_s11 + $0xe88] sm:$0xff]  ;;  %670 = vst [vmem:[%s1792_s12 + $0x738] sm:$0xff] %v669_v39  ;;  %v675_v42 = vld [vmem:[%s1787_s11 + $0xe90] sm:$0xff] }
  0x8b   : > { %672 = vst [vmem:[%s1792_s12 + $0x740] sm:$0xff] %v671_v40  ;;  %674 = vst [vmem:[%s1792_s12 + $0x748] sm:$0xff] %v673_v41  ;;  %v677_v43 = vld [vmem:[%s1787_s11 + $0xe98] sm:$0xff]  ;;  %v679_v44 = vld [vmem:[%s1787_s11 + $0xec0] sm:$0xff] }
  0x8c   : > { %676 = vst [vmem:[%s1792_s12 + $0x750] sm:$0xff] %v675_v42  ;;  %678 = vst [vmem:[%s1792_s12 + $0x758] sm:$0xff] %v677_v43  ;;  %v681_v45 = vld [vmem:[%s1787_s11 + $0xec8] sm:$0xff]  ;;  %v683_v46 = vld [vmem:[%s1787_s11 + $0xed0] sm:$0xff] }
  0x8d   : > { %680 = vst [vmem:[%s1792_s12 + $0x760] sm:$0xff] %v679_v44  ;;  %v685_v47 = vld [vmem:[%s1787_s11 + $0xed8] sm:$0xff]  ;;  %682 = vst [vmem:[%s1792_s12 + $0x768] sm:$0xff] %v681_v45  ;;  %v687_v48 = vld [vmem:[%s1787_s11 + $0xf00] sm:$0xff] }
  0x8e   : > { %684 = vst [vmem:[%s1792_s12 + $0x770] sm:$0xff] %v683_v46  ;;  %686 = vst [vmem:[%s1792_s12 + $0x778] sm:$0xff] %v685_v47  ;;  %v689_v49 = vld [vmem:[%s1787_s11 + $0xf08] sm:$0xff]  ;;  %v691_v50 = vld [vmem:[%s1787_s11 + $0xf10] sm:$0xff] }
  0x8f   : > { %688 = vst [vmem:[%s1792_s12 + $0x780] sm:$0xff] %v687_v48  ;;  %690 = vst [vmem:[%s1792_s12 + $0x788] sm:$0xff] %v689_v49  ;;  %v693_v51 = vld [vmem:[%s1787_s11 + $0xf18] sm:$0xff]  ;;  %v695_v52 = vld [vmem:[%s1787_s11 + $0xf40] sm:$0xff] }
  0x90   : > { %692 = vst [vmem:[%s1792_s12 + $0x790] sm:$0xff] %v691_v50  ;;  %v697_v53 = vld [vmem:[%s1787_s11 + $0xf48] sm:$0xff]  ;;  %694 = vst [vmem:[%s1792_s12 + $0x798] sm:$0xff] %v693_v51  ;;  %v699_v54 = vld [vmem:[%s1787_s11 + $0xf50] sm:$0xff] }
  0x91   : > { %696 = vst [vmem:[%s1792_s12 + $0x7a0] sm:$0xff] %v695_v52  ;;  %698 = vst [vmem:[%s1792_s12 + $0x7a8] sm:$0xff] %v697_v53  ;;  %v701_v55 = vld [vmem:[%s1787_s11 + $0xf58] sm:$0xff]  ;;  %v703_v56 = vld [vmem:[%s1787_s11 + $0xf80] sm:$0xff] }
  0x92   : > { %700 = vst [vmem:[%s1792_s12 + $0x7b0] sm:$0xff] %v699_v54  ;;  %702 = vst [vmem:[%s1792_s12 + $0x7b8] sm:$0xff] %v701_v55  ;;  %v705_v57 = vld [vmem:[%s1787_s11 + $0xf88] sm:$0xff]  ;;  %v707_v58 = vld [vmem:[%s1787_s11 + $0xf90] sm:$0xff] }
  0x93   : > { %704 = vst [vmem:[%s1792_s12 + $0x7c0] sm:$0xff] %v703_v56  ;;  %v709_v59 = vld [vmem:[%s1787_s11 + $0xf98] sm:$0xff]  ;;  %706 = vst [vmem:[%s1792_s12 + $0x7c8] sm:$0xff] %v705_v57  ;;  %v711_v60 = vld [vmem:[%s1787_s11 + $0xfc0] sm:$0xff] }
  0x94   : > { %708 = vst [vmem:[%s1792_s12 + $0x7d0] sm:$0xff] %v707_v58  ;;  %710 = vst [vmem:[%s1792_s12 + $0x7d8] sm:$0xff] %v709_v59  ;;  %v713_v61 = vld [vmem:[%s1787_s11 + $0xfc8] sm:$0xff]  ;;  %v715_v62 = vld [vmem:[%s1787_s11 + $0xfd0] sm:$0xff] }
  0x95   : > { %712 = vst [vmem:[%s1792_s12 + $0x7e0] sm:$0xff] %v711_v60  ;;  %714 = vst [vmem:[%s1792_s12 + $0x7e8] sm:$0xff] %v713_v61  ;;  %v717_v63 = vld [vmem:[%s1787_s11 + $0xfd8] sm:$0xff] }
  0x96   : > { %716 = vst [vmem:[%s1792_s12 + $0x7f0] sm:$0xff] %v715_v62  ;;  %718 = vst [vmem:[%s1792_s12 + $0x7f8] sm:$0xff] %v717_v63 }
  0x97 PF: > { %p1571_p7 = scmp.ge.s32.totalorder %s1698_s21, 1  ;;  %p740_p8 = scmp.lt.s32.totalorder %s1698_s21, 19 }
  0x99   : > { %p741_p9 = pnand %p1571_p7, %p740_p8 }
  0x9a   : > { %s747_s13 = sand.u32 (!%p741_p9), 1, %s1674_s15   ;;  %s1573_s14 = sshll.u32 (!%p741_p9), %s1682_s17, 2 }
  0x9b   : > { %744 = sbr.rel (%p741_p9) target bundleno = 528 (0x210), region = 55  ;;  %s1572_s24 = sshll.u32 (!%p741_p9), %s747_s13, 11 }
  0x9c   : > { %p787_p10 = scmp.lt.s32.totalorder (!%p741_p9), %s1573_s14, 35  ;;  %s1575_s25 = sshll.u32 (!%p741_p9), %s1686_s18, 2 }
  0x9d   : > { %p795_p11 = scmp.lt.s32.totalorder (!%p741_p9), %s1575_s25, 7  ;;  %s2330_s13 = scalar_lea.vmem (!%p741_p9), [#allocation3], %s1572_s24 }
  0x9e   : > { %p1580_p12 = scmp.ne.s32.totalorder (!%p741_p9), %s1682_s17, 0 }
  0xa0   : > { %s2672_s14 = smov (!%p787_p10, %s1573_s14), 35  ;;  %s2674_s25 = smov (!%p795_p11, %s1575_s25), 7 }
  0xa1   : > { %s1574_s26 = sshll.u32 %s2672_s14, 1  ;;  %s797_s15 = scalar_lea.vmem %s2656_s2, %s2674_s25 }
  0xa2   : > { %s2311_s30 = scalar_lea.vmem %s2654_s0, %s1574_s26  ;;  %s1577_s7 = sshll.u32 %s2674_s25, 1 }
  0xa3   : > { %s2323_s18 = scalar_lea.vmem %s2657_s3, %s1577_s7  ;;  %s2328_s12 = scalar_lea.vmem %s2658_s4, %s1577_s7 }
  0xa4   : > { %814 = sbr.rel (%p1580_p12) target bundleno = 171 (0xab), region = 63 }
  0xa9   : > { %v1700_v0 = vmov 0.0  }
  0xaa   : > { %815 = vst [vmem:[#allocation2] sm:$0xff] %v1700_v0 }
  0xab PF: > { %v879_v1 = vld [vmem:[%s2330_s13 + $0x1e8] sm:$0xff]  ;;  %v878_v3 = vld [vmem:[%s2330_s13 + $0x1e0] sm:$0xff]  ;;  %p1581_p13 = scmp.ne.s32.totalorder %s1682_s17, 8 }
  0xac   : > { %v1007_v2 = vld [vmem:[%s2330_s13 + $0x5e8] sm:$0xff]  ;;  %1096 = vmatprep.subr.mxu0 %v879_v1  ;;  %v1006_v4 = vld [vmem:[%s2330_s13 + $0x5e0] sm:$0xff] }
  0xad   : > { %1167 = vmatprep.subr.mxu1 %v1007_v2  ;;  %v875_v5 = vld [vmem:[%s2330_s13 + $0x1c8] sm:$0xff]  ;;  %1097 = vmatpush1.msra.mxu0 %v878_v3  ;;  %v874_v7 = vld [vmem:[%s2330_s13 + $0x1c0] sm:$0xff] }
  0xae   : > { %v1003_v6 = vld [vmem:[%s2330_s13 + $0x5c8] sm:$0xff]  ;;  %1168 = vmatpush1.msra.mxu1 %v1006_v4  ;;  %v1002_v8 = vld [vmem:[%s2330_s13 + $0x5c0] sm:$0xff]  ;;  %1098 = vmatprep.subr.mxu0 %v875_v5 }
  0xaf   : > { %v871_v9 = vld [vmem:[%s2330_s13 + $0x1a8] sm:$0xff]  ;;  %1169 = vmatprep.subr.mxu1 %v1003_v6  ;;  %v870_v11 = vld [vmem:[%s2330_s13 + $0x1a0] sm:$0xff]  ;;  %1099 = vmatpush1.msra.mxu0 %v874_v7 }
  0xb0   : > { %v999_v10 = vld [vmem:[%s2330_s13 + $0x5a8] sm:$0xff]  ;;  %v998_v12 = vld [vmem:[%s2330_s13 + $0x5a0] sm:$0xff]  ;;  %1170 = vmatpush1.msra.mxu1 %v1002_v8  ;;  %1100 = vmatprep.subr.mxu0 %v871_v9 }
  0xb1   : > { %v867_v13 = vld [vmem:[%s2330_s13 + $0x188] sm:$0xff]  ;;  %1171 = vmatprep.subr.mxu1 %v999_v10  ;;  %v866_v15 = vld [vmem:[%s2330_s13 + $0x180] sm:$0xff]  ;;  %1101 = vmatpush1.msra.mxu0 %v870_v11 }
  0xb2   : > { %v995_v14 = vld [vmem:[%s2330_s13 + $0x588] sm:$0xff]  ;;  %v994_v16 = vld [vmem:[%s2330_s13 + $0x580] sm:$0xff]  ;;  %1172 = vmatpush1.msra.mxu1 %v998_v12  ;;  %1102 = vmatprep.subr.mxu0 %v867_v13 }
  0xb3   : > { %v863_v17 = vld [vmem:[%s2330_s13 + $0x168] sm:$0xff]  ;;  %1173 = vmatprep.subr.mxu1 %v995_v14  ;;  %v862_v19 = vld [vmem:[%s2330_s13 + $0x160] sm:$0xff]  ;;  %1103 = vmatpush1.msra.mxu0 %v866_v15 }
  0xb4   : > { %v991_v18 = vld [vmem:[%s2330_s13 + $0x568] sm:$0xff]  ;;  %v990_v20 = vld [vmem:[%s2330_s13 + $0x560] sm:$0xff]  ;;  %1174 = vmatpush1.msra.mxu1 %v994_v16  ;;  %1104 = vmatprep.subr.mxu0 %v863_v17 }
  0xb5   : > { %v859_v21 = vld [vmem:[%s2330_s13 + $0x148] sm:$0xff]  ;;  %1175 = vmatprep.subr.mxu1 %v991_v18  ;;  %v858_v23 = vld [vmem:[%s2330_s13 + $0x140] sm:$0xff]  ;;  %1105 = vmatpush1.msra.mxu0 %v862_v19 }
  0xb6   : > { %v987_v22 = vld [vmem:[%s2330_s13 + $0x548] sm:$0xff]  ;;  %v986_v24 = vld [vmem:[%s2330_s13 + $0x540] sm:$0xff]  ;;  %1176 = vmatpush1.msra.mxu1 %v990_v20  ;;  %1106 = vmatprep.subr.mxu0 %v859_v21 }
  0xb7   : > { %v855_v25 = vld [vmem:[%s2330_s13 + $0x128] sm:$0xff]  ;;  %1177 = vmatprep.subr.mxu1 %v987_v22  ;;  %v854_v27 = vld [vmem:[%s2330_s13 + $0x120] sm:$0xff]  ;;  %1107 = vmatpush1.msra.mxu0 %v858_v23 }
  0xb8   : > { %v983_v26 = vld [vmem:[%s2330_s13 + $0x528] sm:$0xff]  ;;  %v982_v28 = vld [vmem:[%s2330_s13 + $0x520] sm:$0xff]  ;;  %1178 = vmatpush1.msra.mxu1 %v986_v24  ;;  %1108 = vmatprep.subr.mxu0 %v855_v25 }
  0xb9   : > { %v851_v29 = vld [vmem:[%s2330_s13 + $0x108] sm:$0xff]  ;;  %1179 = vmatprep.subr.mxu1 %v983_v26  ;;  %v850_v31 = vld [vmem:[%s2330_s13 + $0x100] sm:$0xff]  ;;  %1109 = vmatpush1.msra.mxu0 %v854_v27 }
  0xba   : > { %v979_v30 = vld [vmem:[%s2330_s13 + $0x508] sm:$0xff]  ;;  %v978_v32 = vld [vmem:[%s2330_s13 + $0x500] sm:$0xff]  ;;  %1180 = vmatpush1.msra.mxu1 %v982_v28  ;;  %1110 = vmatprep.subr.mxu0 %v851_v29 }
  0xbb   : > { %v847_v33 = vld [vmem:[%s2330_s13 + $0xe8] sm:$0xff]  ;;  %1181 = vmatprep.subr.mxu1 %v979_v30  ;;  %v846_v35 = vld [vmem:[%s2330_s13 + $0xe0] sm:$0xff]  ;;  %1111 = vmatpush1.msra.mxu0 %v850_v31  ;;  %v1701_v31 = vmov 1983009808  }
  0xbc   : > { %v975_v34 = vld [vmem:[%s2330_s13 + $0x4e8] sm:$0xff]  ;;  %v974_v36 = vld [vmem:[%s2330_s13 + $0x4e0] sm:$0xff]  ;;  %1182 = vmatpush1.msra.mxu1 %v978_v32  ;;  %1112 = vmatprep.subr.mxu0 %v847_v33  ;;  %v1077_v32 = vunpack.c.l.s4 %v1701_v31  ;;  %v1079_v33 = vlaneseq  ;;  %v864_v31 = vld [vmem:[%s2330_s13 + $0x170] sm:$0xff] }
  0xbd   : > { %v843_v37 = vld [vmem:[%s2330_s13 + $0xc8] sm:$0xff]  ;;  %1183 = vmatprep.subr.mxu1 %v975_v34  ;;  %v842_v39 = vld [vmem:[%s2330_s13 + $0xc0] sm:$0xff]  ;;  %1113 = vmatpush1.msra.mxu0 %v846_v35 }
  0xbe   : > { %v971_v38 = vld [vmem:[%s2330_s13 + $0x4c8] sm:$0xff]  ;;  %v970_v40 = vld [vmem:[%s2330_s13 + $0x4c0] sm:$0xff]  ;;  %1184 = vmatpush1.msra.mxu1 %v974_v36  ;;  %1114 = vmatprep.subr.mxu0 %v843_v37 }
  0xbf   : > { %v839_v41 = vld [vmem:[%s2330_s13 + $0xa8] sm:$0xff]  ;;  %1185 = vmatprep.subr.mxu1 %v971_v38  ;;  %v838_v43 = vld [vmem:[%s2330_s13 + $0xa0] sm:$0xff]  ;;  %1115 = vmatpush1.msra.mxu0 %v842_v39 }
  0xc0   : > { %v967_v42 = vld [vmem:[%s2330_s13 + $0x4a8] sm:$0xff]  ;;  %v966_v44 = vld [vmem:[%s2330_s13 + $0x4a0] sm:$0xff]  ;;  %1186 = vmatpush1.msra.mxu1 %v970_v40  ;;  %1116 = vmatprep.subr.mxu0 %v839_v41 }
  0xc1   : > { %v835_v45 = vld [vmem:[%s2330_s13 + $0x88] sm:$0xff]  ;;  %1187 = vmatprep.subr.mxu1 %v967_v42  ;;  %v834_v47 = vld [vmem:[%s2330_s13 + $0x80] sm:$0xff]  ;;  %1117 = vmatpush1.msra.mxu0 %v838_v43  ;;  %v1078_v42 = vunpack.c.0.s8 %v1077_v32  ;;  %v2435_v43 = vshrl.u32 %v1079_v33, 7  ;;  %v992_v32 = vld [vmem:[%s2330_s13 + $0x570] sm:$0xff] }
  0xc2   : > { %v963_v46 = vld [vmem:[%s2330_s13 + $0x488] sm:$0xff]  ;;  %v962_v48 = vld [vmem:[%s2330_s13 + $0x480] sm:$0xff]  ;;  %1188 = vmatpush1.msra.mxu1 %v966_v44  ;;  %1118 = vmatprep.subr.mxu0 %v835_v45  ;;  %v861_v33 = vld [vmem:[%s2330_s13 + $0x158] sm:$0xff] }
  0xc3   : > { %v831_v49 = vld [vmem:[%s2330_s13 + $0x68] sm:$0xff]  ;;  %1189 = vmatprep.subr.mxu1 %v963_v46  ;;  %v830_v51 = vld [vmem:[%s2330_s13 + $0x60] sm:$0xff]  ;;  %1119 = vmatpush1.msra.mxu0 %v834_v47 }
  0xc4   : > { %v959_v50 = vld [vmem:[%s2330_s13 + $0x468] sm:$0xff]  ;;  %v958_v52 = vld [vmem:[%s2330_s13 + $0x460] sm:$0xff]  ;;  %1190 = vmatpush1.msra.mxu1 %v962_v48  ;;  %1120 = vmatprep.subr.mxu0 %v831_v49  ;;  %v817_v48 = vld [vmem:[%s2311_s30] sm:$0xff] }
  0xc5   : > { %v827_v53 = vld [vmem:[%s2330_s13 + $0x48] sm:$0xff]  ;;  %1191 = vmatprep.subr.mxu1 %v959_v50  ;;  %v826_v55 = vld [vmem:[%s2330_s13 + $0x40] sm:$0xff]  ;;  %1121 = vmatpush1.msra.mxu0 %v830_v51 }
  0xc6   : > { %v955_v54 = vld [vmem:[%s2330_s13 + $0x448] sm:$0xff]  ;;  %v954_v56 = vld [vmem:[%s2330_s13 + $0x440] sm:$0xff]  ;;  %1192 = vmatpush1.msra.mxu1 %v958_v52  ;;  %1122 = vmatprep.subr.mxu0 %v827_v53  ;;  %v2447_v53 = vsub.s32 %v1078_v42, %v2435_v43  ;;  %v981_v42 = vld [vmem:[%s2330_s13 + $0x518] sm:$0xff] }
  0xc7   : > { %v823_v57 = vld [vmem:[%s2330_s13 + $0x28] sm:$0xff]  ;;  %1193 = vmatprep.subr.mxu1 %v955_v54  ;;  %v822_v59 = vld [vmem:[%s2330_s13 + $0x20] sm:$0xff]  ;;  %1123 = vmatpush1.msra.mxu0 %v826_v55 }
  0xc8   : > { %v951_v58 = vld [vmem:[%s2330_s13 + $0x428] sm:$0xff]  ;;  %v950_v60 = vld [vmem:[%s2330_s13 + $0x420] sm:$0xff]  ;;  %1194 = vmatpush1.msra.mxu1 %v954_v56  ;;  %1124 = vmatprep.subr.mxu0 %v823_v57  ;;  %v1075_v56 = vcombine.high %v817_v48, %v817_v48 }
  0xc9   : > { %v819_v61 = vld [vmem:[%s2330_s13 + $0x8] sm:$0xff]  ;;  %1195 = vmatprep.subr.mxu1 %v951_v58  ;;  %v818_v63 = vld [vmem:[%s2330_s13] sm:$0xff]  ;;  %1125 = vmatpush1.msra.mxu0 %v822_v59 }
  0xca   : > { %v947_v62 = vld [vmem:[%s2330_s13 + $0x408] sm:$0xff]  ;;  %v946_v0 = vld [vmem:[%s2330_s13 + $0x400] sm:$0xff]  ;;  %1196 = vmatpush1.msra.mxu1 %v950_v60  ;;  %1126 = vmatprep.subr.mxu0 %v819_v61 }
  0xcb   : > { %v943_v1 = vld [vmem:[%s2330_s13 + $0x3e8] sm:$0xff]  ;;  %1197 = vmatprep.subr.mxu1 %v947_v62  ;;  %v942_v3 = vld [vmem:[%s2330_s13 + $0x3e0] sm:$0xff]  ;;  %1127 = vmatpush1.msra.mxu0 %v818_v63  ;;  %v2458_v63 = vrot.slane %v817_v48, %v2447_v53  ;;  %v848_v48 = vld [vmem:[%s2330_s13 + $0xf0] sm:$0xff] }
  0xcc   : > { %v1071_v2 = vld [vmem:[%s2330_s13 + $0x7e8] sm:$0xff]  ;;  %v1070_v4 = vld [vmem:[%s2330_s13 + $0x7e0] sm:$0xff]  ;;  %1198 = vmatpush1.msra.mxu1 %v946_v0  ;;  %1128 = vmatprep.subr.mxu0 %v943_v1 }
  0xcd   : > { %v939_v5 = vld [vmem:[%s2330_s13 + $0x3c8] sm:$0xff]  ;;  %1199 = vmatprep.subr.mxu1 %v1071_v2  ;;  %v938_v7 = vld [vmem:[%s2330_s13 + $0x3c0] sm:$0xff]  ;;  %1129 = vmatpush2.msra.mxu0 %v942_v3  ;;  %v2463_v2 = vrot.slane %v1075_v56, %v2447_v53  ;;  %v969_v56 = vld [vmem:[%s2330_s13 + $0x4b8] sm:$0xff] }
  0xce   : > { %v1067_v6 = vld [vmem:[%s2330_s13 + $0x7c8] sm:$0xff]  ;;  %v1066_v8 = vld [vmem:[%s2330_s13 + $0x7c0] sm:$0xff]  ;;  %1200 = vmatpush2.msra.mxu1 %v1070_v4  ;;  %1130 = vmatprep.subr.mxu0 %v939_v5 }
  0xcf   : > { %v935_v9 = vld [vmem:[%s2330_s13 + $0x3a8] sm:$0xff]  ;;  %1201 = vmatprep.subr.mxu1 %v1067_v6  ;;  %v934_v11 = vld [vmem:[%s2330_s13 + $0x3a0] sm:$0xff]  ;;  %1131 = vmatpush2.msra.mxu0 %v938_v7 }
  0xd0   : > { %v1063_v10 = vld [vmem:[%s2330_s13 + $0x7a8] sm:$0xff]  ;;  %v1062_v12 = vld [vmem:[%s2330_s13 + $0x7a0] sm:$0xff]  ;;  %1202 = vmatpush2.msra.mxu1 %v1066_v8  ;;  %1132 = vmatprep.subr.mxu0 %v935_v9  ;;  %v2473_v9 = vcombine.high %v2458_v63, %v2458_v63 }
  0xd1   : > { %v931_v13 = vld [vmem:[%s2330_s13 + $0x388] sm:$0xff]  ;;  %1203 = vmatprep.subr.mxu1 %v1063_v10  ;;  %v930_v15 = vld [vmem:[%s2330_s13 + $0x380] sm:$0xff]  ;;  %1133 = vmatpush2.msra.mxu0 %v934_v11  ;;  %v2478_v11 = vcombine.high %v2463_v2, %v2463_v2 }
  0xd2   : > { %v1059_v14 = vld [vmem:[%s2330_s13 + $0x788] sm:$0xff]  ;;  %v1058_v16 = vld [vmem:[%s2330_s13 + $0x780] sm:$0xff]  ;;  %1204 = vmatpush2.msra.mxu1 %v1062_v12  ;;  %1134 = vmatprep.subr.mxu0 %v931_v13  ;;  %v881_v13 = vld [vmem:[%s2330_s13 + $0x1f8] sm:$0xff] }
  0xd3   : > { %v927_v17 = vld [vmem:[%s2330_s13 + $0x368] sm:$0xff]  ;;  %1205 = vmatprep.subr.mxu1 %v1059_v14  ;;  %v926_v19 = vld [vmem:[%s2330_s13 + $0x360] sm:$0xff]  ;;  %1135 = vmatpush2.msra.mxu0 %v930_v15  ;;  %v1009_v14 = vld [vmem:[%s2330_s13 + $0x5f8] sm:$0xff] }
  0xd4   : > { %v1055_v18 = vld [vmem:[%s2330_s13 + $0x768] sm:$0xff]  ;;  %v1054_v20 = vld [vmem:[%s2330_s13 + $0x760] sm:$0xff]  ;;  %1206 = vmatpush2.msra.mxu1 %v1058_v16  ;;  %1136 = vmatprep.subr.mxu0 %v927_v17  ;;  %v880_v15 = vld [vmem:[%s2330_s13 + $0x1f0] sm:$0xff] }
  0xd5   : > { %v923_v21 = vld [vmem:[%s2330_s13 + $0x348] sm:$0xff]  ;;  %1207 = vmatprep.subr.mxu1 %v1055_v18  ;;  %v922_v23 = vld [vmem:[%s2330_s13 + $0x340] sm:$0xff]  ;;  %1137 = vmatpush2.msra.mxu0 %v926_v19  ;;  %v1008_v16 = vld [vmem:[%s2330_s13 + $0x5f0] sm:$0xff] }
  0xd6   : > { %v1051_v22 = vld [vmem:[%s2330_s13 + $0x748] sm:$0xff]  ;;  %v1050_v24 = vld [vmem:[%s2330_s13 + $0x740] sm:$0xff]  ;;  %1208 = vmatpush2.msra.mxu1 %v1054_v20  ;;  %1138 = vmatprep.subr.mxu0 %v923_v21  ;;  %v877_v17 = vld [vmem:[%s2330_s13 + $0x1d8] sm:$0xff] }
  0xd7   : > { %v919_v25 = vld [vmem:[%s2330_s13 + $0x328] sm:$0xff]  ;;  %1209 = vmatprep.subr.mxu1 %v1051_v22  ;;  %v918_v27 = vld [vmem:[%s2330_s13 + $0x320] sm:$0xff]  ;;  %1139 = vmatpush2.msra.mxu0 %v922_v23  ;;  %v1005_v18 = vld [vmem:[%s2330_s13 + $0x5d8] sm:$0xff] }
  0xd8   : > { %v1047_v26 = vld [vmem:[%s2330_s13 + $0x728] sm:$0xff]  ;;  %v1046_v28 = vld [vmem:[%s2330_s13 + $0x720] sm:$0xff]  ;;  %1210 = vmatpush2.msra.mxu1 %v1050_v24  ;;  %1140 = vmatprep.subr.mxu0 %v919_v25  ;;  %v876_v19 = vld [vmem:[%s2330_s13 + $0x1d0] sm:$0xff] }
  0xd9   : > { %v915_v29 = vld [vmem:[%s2330_s13 + $0x308] sm:$0xff]  ;;  %1211 = vmatprep.subr.mxu1 %v1047_v26  ;;  %v914_v34 = vld [vmem:[%s2330_s13 + $0x300] sm:$0xff]  ;;  %1141 = vmatpush2.msra.mxu0 %v918_v27  ;;  %v1004_v20 = vld [vmem:[%s2330_s13 + $0x5d0] sm:$0xff] }
  0xda   : > { %v1043_v30 = vld [vmem:[%s2330_s13 + $0x708] sm:$0xff]  ;;  %v1042_v35 = vld [vmem:[%s2330_s13 + $0x700] sm:$0xff]  ;;  %1212 = vmatpush2.msra.mxu1 %v1046_v28  ;;  %1142 = vmatprep.subr.mxu0 %v915_v29  ;;  %v873_v21 = vld [vmem:[%s2330_s13 + $0x1b8] sm:$0xff] }
  0xdb   : > { %v911_v36 = vld [vmem:[%s2330_s13 + $0x2e8] sm:$0xff]  ;;  %1213 = vmatprep.subr.mxu1 %v1043_v30  ;;  %v910_v38 = vld [vmem:[%s2330_s13 + $0x2e0] sm:$0xff]  ;;  %1143 = vmatpush2.msra.mxu0 %v914_v34  ;;  %v1001_v22 = vld [vmem:[%s2330_s13 + $0x5b8] sm:$0xff] }
  0xdc   : > { %v1039_v37 = vld [vmem:[%s2330_s13 + $0x6e8] sm:$0xff]  ;;  %v1038_v39 = vld [vmem:[%s2330_s13 + $0x6e0] sm:$0xff]  ;;  %1214 = vmatpush2.msra.mxu1 %v1042_v35  ;;  %1144 = vmatprep.subr.mxu0 %v911_v36  ;;  %v872_v23 = vld [vmem:[%s2330_s13 + $0x1b0] sm:$0xff] }
  0xdd   : > { %v907_v40 = vld [vmem:[%s2330_s13 + $0x2c8] sm:$0xff]  ;;  %1215 = vmatprep.subr.mxu1 %v1039_v37  ;;  %v906_v44 = vld [vmem:[%s2330_s13 + $0x2c0] sm:$0xff]  ;;  %1145 = vmatpush2.msra.mxu0 %v910_v38  ;;  %v1000_v24 = vld [vmem:[%s2330_s13 + $0x5b0] sm:$0xff] }
  0xde   : > { %v1035_v41 = vld [vmem:[%s2330_s13 + $0x6c8] sm:$0xff]  ;;  %v1034_v45 = vld [vmem:[%s2330_s13 + $0x6c0] sm:$0xff]  ;;  %1216 = vmatpush2.msra.mxu1 %v1038_v39  ;;  %1146 = vmatprep.subr.mxu0 %v907_v40  ;;  %v869_v25 = vld [vmem:[%s2330_s13 + $0x198] sm:$0xff] }
  0xdf   : > { %v903_v46 = vld [vmem:[%s2330_s13 + $0x2a8] sm:$0xff]  ;;  %1217 = vmatprep.subr.mxu1 %v1035_v41  ;;  %v902_v49 = vld [vmem:[%s2330_s13 + $0x2a0] sm:$0xff]  ;;  %1147 = vmatpush2.msra.mxu0 %v906_v44  ;;  %v997_v26 = vld [vmem:[%s2330_s13 + $0x598] sm:$0xff] }
  0xe0   : > { %v1031_v47 = vld [vmem:[%s2330_s13 + $0x6a8] sm:$0xff]  ;;  %v1030_v50 = vld [vmem:[%s2330_s13 + $0x6a0] sm:$0xff]  ;;  %1218 = vmatpush2.msra.mxu1 %v1034_v45  ;;  %1148 = vmatprep.subr.mxu0 %v903_v46  ;;  %v868_v27 = vld [vmem:[%s2330_s13 + $0x190] sm:$0xff] }
  0xe1   : > { %v899_v51 = vld [vmem:[%s2330_s13 + $0x288] sm:$0xff]  ;;  %1219 = vmatprep.subr.mxu1 %v1031_v47  ;;  %v898_v54 = vld [vmem:[%s2330_s13 + $0x280] sm:$0xff]  ;;  %1149 = vmatpush2.msra.mxu0 %v902_v49  ;;  %v996_v28 = vld [vmem:[%s2330_s13 + $0x590] sm:$0xff] }
  0xe2   : > { %v1027_v52 = vld [vmem:[%s2330_s13 + $0x688] sm:$0xff]  ;;  %v1026_v55 = vld [vmem:[%s2330_s13 + $0x680] sm:$0xff]  ;;  %1220 = vmatpush2.msra.mxu1 %v1030_v50  ;;  %1150 = vmatprep.subr.mxu0 %v899_v51  ;;  %v865_v29 = vld [vmem:[%s2330_s13 + $0x178] sm:$0xff] }
  0xe3   : > { %v895_v57 = vld [vmem:[%s2330_s13 + $0x268] sm:$0xff]  ;;  %1221 = vmatprep.subr.mxu1 %v1027_v52  ;;  %v894_v59 = vld [vmem:[%s2330_s13 + $0x260] sm:$0xff]  ;;  %1151 = vmatpush2.msra.mxu0 %v898_v54  ;;  %v993_v30 = vld [vmem:[%s2330_s13 + $0x578] sm:$0xff] }
  0xe4   : > { %v1023_v58 = vld [vmem:[%s2330_s13 + $0x668] sm:$0xff]  ;;  %v1022_v60 = vld [vmem:[%s2330_s13 + $0x660] sm:$0xff]  ;;  %1222 = vmatpush2.msra.mxu1 %v1026_v55  ;;  %1152 = vmatprep.subr.mxu0 %v895_v57  ;;  %v989_v34 = vld [vmem:[%s2330_s13 + $0x558] sm:$0xff] }
  0xe5   : > { %v891_v61 = vld [vmem:[%s2330_s13 + $0x248] sm:$0xff]  ;;  %1223 = vmatprep.subr.mxu1 %v1023_v58  ;;  %v890_v0 = vld [vmem:[%s2330_s13 + $0x240] sm:$0xff]  ;;  %1153 = vmatpush2.msra.mxu0 %v894_v59  ;;  %v860_v35 = vld [vmem:[%s2330_s13 + $0x150] sm:$0xff] }
  0xe6   : > { %v1019_v62 = vld [vmem:[%s2330_s13 + $0x648] sm:$0xff]  ;;  %v1018_v1 = vld [vmem:[%s2330_s13 + $0x640] sm:$0xff]  ;;  %1224 = vmatpush2.msra.mxu1 %v1022_v60  ;;  %1154 = vmatprep.subr.mxu0 %v891_v61  ;;  %v988_v36 = vld [vmem:[%s2330_s13 + $0x550] sm:$0xff] }
  0xe7   : > { %v887_v3 = vld [vmem:[%s2330_s13 + $0x228] sm:$0xff]  ;;  %1225 = vmatprep.subr.mxu1 %v1019_v62  ;;  %v886_v5 = vld [vmem:[%s2330_s13 + $0x220] sm:$0xff]  ;;  %1155 = vmatpush2.msra.mxu0 %v890_v0  ;;  %v857_v37 = vld [vmem:[%s2330_s13 + $0x138] sm:$0xff] }
  0xe8   : > { %v1015_v4 = vld [vmem:[%s2330_s13 + $0x628] sm:$0xff]  ;;  %v1014_v6 = vld [vmem:[%s2330_s13 + $0x620] sm:$0xff]  ;;  %1226 = vmatpush2.msra.mxu1 %v1018_v1  ;;  %1156 = vmatprep.subr.mxu0 %v887_v3  ;;  %v985_v38 = vld [vmem:[%s2330_s13 + $0x538] sm:$0xff] }
  0xe9   : > { %v883_v7 = vld [vmem:[%s2330_s13 + $0x208] sm:$0xff]  ;;  %1227 = vmatprep.subr.mxu1 %v1015_v4  ;;  %v882_v10 = vld [vmem:[%s2330_s13 + $0x200] sm:$0xff]  ;;  %1157 = vmatpush2.msra.mxu0 %v886_v5  ;;  %v856_v39 = vld [vmem:[%s2330_s13 + $0x130] sm:$0xff] }
  0xea   : > { %v1011_v8 = vld [vmem:[%s2330_s13 + $0x608] sm:$0xff]  ;;  %1228 = vmatpush2.msra.mxu1 %v1014_v6  ;;  %v1010_v12 = vld [vmem:[%s2330_s13 + $0x600] sm:$0xff]  ;;  %1158 = vmatprep.subr.mxu0 %v883_v7  ;;  %v984_v40 = vld [vmem:[%s2330_s13 + $0x530] sm:$0xff] }
  0xeb   : > { %1229 = vmatprep.subr.mxu1 %v1011_v8  ;;  %1159 = vmatpush2.msra.mxu0 %v882_v10  ;;  %v853_v41 = vld [vmem:[%s2330_s13 + $0x118] sm:$0xff]  ;;  %v852_v44 = vld [vmem:[%s2330_s13 + $0x110] sm:$0xff] }
  0xec   : > { %1160 = vmatprep.mubr.f32.mxu0 %v2473_v9  ;;  %1230 = vmatpush2.msra.mxu1 %v1010_v12  ;;  %v980_v45 = vld [vmem:[%s2330_s13 + $0x510] sm:$0xff]  ;;  %v849_v46 = vld [vmem:[%s2330_s13 + $0xf8] sm:$0xff] }
  0xed   : > { %1231 = vmatprep.mubr.f32.mxu1 %v2478_v11  ;;  %1161 = vmatmul.mubr.f32.vlgmr.msra.gmra.mxu0 %v2458_v63  ;;  %v977_v47 = vld [vmem:[%s2330_s13 + $0x4f8] sm:$0xff]  ;;  %v976_v49 = vld [vmem:[%s2330_s13 + $0x4f0] sm:$0xff] }
  0xee   : > { %1232 = vmatmul.mubr.f32.vlgmr.msra.gmra.mxu1 %v2463_v2  ;;  %1238 = vmatprep.subr.mxu0 %v881_v13  ;;  %v845_v50 = vld [vmem:[%s2330_s13 + $0xd8] sm:$0xff]  ;;  %v844_v52 = vld [vmem:[%s2330_s13 + $0xd0] sm:$0xff] }
  0xef   : > { %1309 = vmatprep.subr.mxu1 %v1009_v14  ;;  %1239 = vmatpush1.msra.mxu0 %v880_v15  ;;  %v973_v51 = vld [vmem:[%s2330_s13 + $0x4d8] sm:$0xff]  ;;  %v972_v54 = vld [vmem:[%s2330_s13 + $0x4d0] sm:$0xff] }
  0xf0   : > { %1310 = vmatpush1.msra.mxu1 %v1008_v16  ;;  %1240 = vmatprep.subr.mxu0 %v877_v17  ;;  %v841_v55 = vld [vmem:[%s2330_s13 + $0xb8] sm:$0xff]  ;;  %v840_v57 = vld [vmem:[%s2330_s13 + $0xb0] sm:$0xff] }
  0xf1   : > { %1311 = vmatprep.subr.mxu1 %v1005_v18  ;;  %1241 = vmatpush1.msra.mxu0 %v876_v19  ;;  %v968_v58 = vld [vmem:[%s2330_s13 + $0x4b0] sm:$0xff]  ;;  %v837_v59 = vld [vmem:[%s2330_s13 + $0x98] sm:$0xff] }
  0xf2   : > { %1312 = vmatpush1.msra.mxu1 %v1004_v20  ;;  %1242 = vmatprep.subr.mxu0 %v873_v21  ;;  %v965_v60 = vld [vmem:[%s2330_s13 + $0x498] sm:$0xff]  ;;  %v836_v61 = vld [vmem:[%s2330_s13 + $0x90] sm:$0xff] }
  0xf3   : > { %1313 = vmatprep.subr.mxu1 %v1001_v22  ;;  %1243 = vmatpush1.msra.mxu0 %v872_v23  ;;  %v964_v62 = vld [vmem:[%s2330_s13 + $0x490] sm:$0xff]  ;;  %v833_v0 = vld [vmem:[%s2330_s13 + $0x78] sm:$0xff] }
  0xf4   : > { %1314 = vmatpush1.msra.mxu1 %v1000_v24  ;;  %1244 = vmatprep.subr.mxu0 %v869_v25  ;;  %v961_v1 = vld [vmem:[%s2330_s13 + $0x478] sm:$0xff]  ;;  %v832_v3 = vld [vmem:[%s2330_s13 + $0x70] sm:$0xff] }
  0xf5   : > { %1315 = vmatprep.subr.mxu1 %v997_v26  ;;  %1245 = vmatpush1.msra.mxu0 %v868_v27  ;;  %v960_v4 = vld [vmem:[%s2330_s13 + $0x470] sm:$0xff]  ;;  %v829_v5 = vld [vmem:[%s2330_s13 + $0x58] sm:$0xff] }
  0xf6   : > { %1316 = vmatpush1.msra.mxu1 %v996_v28  ;;  %1246 = vmatprep.subr.mxu0 %v865_v29  ;;  %v957_v6 = vld [vmem:[%s2330_s13 + $0x458] sm:$0xff]  ;;  %v828_v7 = vld [vmem:[%s2330_s13 + $0x50] sm:$0xff] }
  0xf7   : > { %1317 = vmatprep.subr.mxu1 %v993_v30  ;;  %1247 = vmatpush1.msra.mxu0 %v864_v31  ;;  %v956_v8 = vld [vmem:[%s2330_s13 + $0x450] sm:$0xff]  ;;  %v825_v10 = vld [vmem:[%s2330_s13 + $0x38] sm:$0xff] }
  0xf8   : > { %1318 = vmatpush1.msra.mxu1 %v992_v32  ;;  %1248 = vmatprep.subr.mxu0 %v861_v33  ;;  %v953_v12 = vld [vmem:[%s2330_s13 + $0x438] sm:$0xff]  ;;  %v824_v13 = vld [vmem:[%s2330_s13 + $0x30] sm:$0xff] }
  0xf9   : > { %1319 = vmatprep.subr.mxu1 %v989_v34  ;;  %1249 = vmatpush1.msra.mxu0 %v860_v35  ;;  %v952_v14 = vld [vmem:[%s2330_s13 + $0x430] sm:$0xff]  ;;  %v821_v15 = vld [vmem:[%s2330_s13 + $0x18] sm:$0xff] }
  0xfa   : > { %1320 = vmatpush1.msra.mxu1 %v988_v36  ;;  %1250 = vmatprep.subr.mxu0 %v857_v37  ;;  %v949_v16 = vld [vmem:[%s2330_s13 + $0x418] sm:$0xff]  ;;  %v820_v17 = vld [vmem:[%s2330_s13 + $0x10] sm:$0xff] }
  0xfb   : > { %1321 = vmatprep.subr.mxu1 %v985_v38  ;;  %1251 = vmatpush1.msra.mxu0 %v856_v39  ;;  %v948_v18 = vld [vmem:[%s2330_s13 + $0x410] sm:$0xff]  ;;  %v945_v19 = vld [vmem:[%s2330_s13 + $0x3f8] sm:$0xff] }
  0xfc   : > { %1322 = vmatpush1.msra.mxu1 %v984_v40  ;;  %1252 = vmatprep.subr.mxu0 %v853_v41  ;;  %v1073_v20 = vld [vmem:[%s2330_s13 + $0x7f8] sm:$0xff]  ;;  %v944_v21 = vld [vmem:[%s2330_s13 + $0x3f0] sm:$0xff] }
  0xfd   : > { %1323 = vmatprep.subr.mxu1 %v981_v42  ;;  %1253 = vmatpush1.msra.mxu0 %v852_v44  ;;  %v1072_v22 = vld [vmem:[%s2330_s13 + $0x7f0] sm:$0xff]  ;;  %v941_v23 = vld [vmem:[%s2330_s13 + $0x3d8] sm:$0xff] }
  0xfe   : > { %1324 = vmatpush1.msra.mxu1 %v980_v45  ;;  %1254 = vmatprep.subr.mxu0 %v849_v46  ;;  %v1069_v24 = vld [vmem:[%s2330_s13 + $0x7d8] sm:$0xff]  ;;  %v940_v25 = vld [vmem:[%s2330_s13 + $0x3d0] sm:$0xff] }
  0xff   : > { %1325 = vmatprep.subr.mxu1 %v977_v47  ;;  %1255 = vmatpush1.msra.mxu0 %v848_v48  ;;  %v1068_v26 = vld [vmem:[%s2330_s13 + $0x7d0] sm:$0xff]  ;;  %v937_v27 = vld [vmem:[%s2330_s13 + $0x3b8] sm:$0xff] }
 0x100   : > { %1326 = vmatpush1.msra.mxu1 %v976_v49  ;;  %1256 = vmatprep.subr.mxu0 %v845_v50  ;;  %v1065_v28 = vld [vmem:[%s2330_s13 + $0x7b8] sm:$0xff]  ;;  %v936_v29 = vld [vmem:[%s2330_s13 + $0x3b0] sm:$0xff] }
 0x101   : > { %1327 = vmatprep.subr.mxu1 %v973_v51  ;;  %1257 = vmatpush1.msra.mxu0 %v844_v52  ;;  %v1064_v30 = vld [vmem:[%s2330_s13 + $0x7b0] sm:$0xff]  ;;  %v933_v31 = vld [vmem:[%s2330_s13 + $0x398] sm:$0xff] }
 0x102   : > { %1328 = vmatpush1.msra.mxu1 %v972_v54  ;;  %1258 = vmatprep.subr.mxu0 %v841_v55  ;;  %v1061_v32 = vld [vmem:[%s2330_s13 + $0x798] sm:$0xff]  ;;  %v932_v33 = vld [vmem:[%s2330_s13 + $0x390] sm:$0xff] }
 0x103   : > { %1329 = vmatprep.subr.mxu1 %v969_v56  ;;  %1259 = vmatpush1.msra.mxu0 %v840_v57  ;;  %v1060_v34 = vld [vmem:[%s2330_s13 + $0x790] sm:$0xff]  ;;  %v929_v35 = vld [vmem:[%s2330_s13 + $0x378] sm:$0xff] }
 0x104   : > { %1330 = vmatpush1.msra.mxu1 %v968_v58  ;;  %1260 = vmatprep.subr.mxu0 %v837_v59  ;;  %v1057_v36 = vld [vmem:[%s2330_s13 + $0x778] sm:$0xff]  ;;  %v928_v37 = vld [vmem:[%s2330_s13 + $0x370] sm:$0xff] }
 0x105   : > { %1331 = vmatprep.subr.mxu1 %v965_v60  ;;  %1261 = vmatpush1.msra.mxu0 %v836_v61  ;;  %v1056_v38 = vld [vmem:[%s2330_s13 + $0x770] sm:$0xff]  ;;  %v925_v39 = vld [vmem:[%s2330_s13 + $0x358] sm:$0xff] }
 0x106   : > { %1332 = vmatpush1.msra.mxu1 %v964_v62  ;;  %1262 = vmatprep.subr.mxu0 %v833_v0  ;;  %v1053_v40 = vld [vmem:[%s2330_s13 + $0x758] sm:$0xff]  ;;  %v924_v41 = vld [vmem:[%s2330_s13 + $0x350] sm:$0xff] }
 0x107   : > { %1333 = vmatprep.subr.mxu1 %v961_v1  ;;  %1263 = vmatpush1.msra.mxu0 %v832_v3  ;;  %v1052_v42 = vld [vmem:[%s2330_s13 + $0x750] sm:$0xff]  ;;  %v921_v44 = vld [vmem:[%s2330_s13 + $0x338] sm:$0xff] }
 0x108   : > { %1334 = vmatpush1.msra.mxu1 %v960_v4  ;;  %1264 = vmatprep.subr.mxu0 %v829_v5  ;;  %v1049_v45 = vld [vmem:[%s2330_s13 + $0x738] sm:$0xff]  ;;  %v920_v46 = vld [vmem:[%s2330_s13 + $0x330] sm:$0xff] }
 0x109   : > { %1335 = vmatprep.subr.mxu1 %v957_v6  ;;  %1265 = vmatpush1.msra.mxu0 %v828_v7  ;;  %v1048_v47 = vld [vmem:[%s2330_s13 + $0x730] sm:$0xff]  ;;  %v917_v48 = vld [vmem:[%s2330_s13 + $0x318] sm:$0xff] }
 0x10a   : > { %1336 = vmatpush1.msra.mxu1 %v956_v8  ;;  %1266 = vmatprep.subr.mxu0 %v825_v10  ;;  %v1045_v49 = vld [vmem:[%s2330_s13 + $0x718] sm:$0xff]  ;;  %v916_v50 = vld [vmem:[%s2330_s13 + $0x310] sm:$0xff] }
 0x10b   : > { %1337 = vmatprep.subr.mxu1 %v953_v12  ;;  %1267 = vmatpush1.msra.mxu0 %v824_v13  ;;  %v1044_v51 = vld [vmem:[%s2330_s13 + $0x710] sm:$0xff]  ;;  %v913_v52 = vld [vmem:[%s2330_s13 + $0x2f8] sm:$0xff] }
 0x10c   : > { %1338 = vmatpush1.msra.mxu1 %v952_v14  ;;  %1268 = vmatprep.subr.mxu0 %v821_v15  ;;  %v1041_v54 = vld [vmem:[%s2330_s13 + $0x6f8] sm:$0xff]  ;;  %v912_v55 = vld [vmem:[%s2330_s13 + $0x2f0] sm:$0xff] }
 0x10d   : > { %1339 = vmatprep.subr.mxu1 %v949_v16  ;;  %1269 = vmatpush1.msra.mxu0 %v820_v17  ;;  %v1040_v56 = vld [vmem:[%s2330_s13 + $0x6f0] sm:$0xff]  ;;  %v909_v57 = vld [vmem:[%s2330_s13 + $0x2d8] sm:$0xff] }
 0x10e   : > { %1340 = vmatpush1.msra.mxu1 %v948_v18  ;;  %1270 = vmatprep.subr.mxu0 %v945_v19  ;;  %v1037_v58 = vld [vmem:[%s2330_s13 + $0x6d8] sm:$0xff]  ;;  %v908_v59 = vld [vmem:[%s2330_s13 + $0x2d0] sm:$0xff] }
 0x10f   : > { %1341 = vmatprep.subr.mxu1 %v1073_v20  ;;  %1271 = vmatpush2.msra.mxu0 %v944_v21  ;;  %v1036_v60 = vld [vmem:[%s2330_s13 + $0x6d0] sm:$0xff]  ;;  %v905_v61 = vld [vmem:[%s2330_s13 + $0x2b8] sm:$0xff] }
 0x110   : > { %1342 = vmatpush2.msra.mxu1 %v1072_v22  ;;  %1272 = vmatprep.subr.mxu0 %v941_v23  ;;  %v1033_v62 = vld [vmem:[%s2330_s13 + $0x6b8] sm:$0xff]  ;;  %v904_v0 = vld [vmem:[%s2330_s13 + $0x2b0] sm:$0xff] }
 0x111   : > { %1343 = vmatprep.subr.mxu1 %v1069_v24  ;;  %1273 = vmatpush2.msra.mxu0 %v940_v25  ;;  %v1032_v1 = vld [vmem:[%s2330_s13 + $0x6b0] sm:$0xff]  ;;  %v901_v3 = vld [vmem:[%s2330_s13 + $0x298] sm:$0xff] }
 0x112   : > { %1344 = vmatpush2.msra.mxu1 %v1068_v26  ;;  %1274 = vmatprep.subr.mxu0 %v937_v27  ;;  %v1029_v4 = vld [vmem:[%s2330_s13 + $0x698] sm:$0xff]  ;;  %v900_v5 = vld [vmem:[%s2330_s13 + $0x290] sm:$0xff] }
 0x113   : > { %1345 = vmatprep.subr.mxu1 %v1065_v28  ;;  %1275 = vmatpush2.msra.mxu0 %v936_v29  ;;  %v1028_v6 = vld [vmem:[%s2330_s13 + $0x690] sm:$0xff]  ;;  %v897_v7 = vld [vmem:[%s2330_s13 + $0x278] sm:$0xff] }
 0x114   : > { %1346 = vmatpush2.msra.mxu1 %v1064_v30  ;;  %1276 = vmatprep.subr.mxu0 %v933_v31  ;;  %v1025_v8 = vld [vmem:[%s2330_s13 + $0x678] sm:$0xff]  ;;  %v896_v10 = vld [vmem:[%s2330_s13 + $0x270] sm:$0xff] }
 0x115   : > { %1347 = vmatprep.subr.mxu1 %v1061_v32  ;;  %1277 = vmatpush2.msra.mxu0 %v932_v33  ;;  %v1024_v12 = vld [vmem:[%s2330_s13 + $0x670] sm:$0xff]  ;;  %v893_v13 = vld [vmem:[%s2330_s13 + $0x258] sm:$0xff] }
 0x116   : > { %1348 = vmatpush2.msra.mxu1 %v1060_v34  ;;  %1278 = vmatprep.subr.mxu0 %v929_v35  ;;  %v1021_v14 = vld [vmem:[%s2330_s13 + $0x658] sm:$0xff]  ;;  %v892_v15 = vld [vmem:[%s2330_s13 + $0x250] sm:$0xff] }
 0x117   : > { %1349 = vmatprep.subr.mxu1 %v1057_v36  ;;  %1279 = vmatpush2.msra.mxu0 %v928_v37  ;;  %v1020_v16 = vld [vmem:[%s2330_s13 + $0x650] sm:$0xff]  ;;  %v889_v17 = vld [vmem:[%s2330_s13 + $0x238] sm:$0xff] }
 0x118   : > { %1350 = vmatpush2.msra.mxu1 %v1056_v38  ;;  %1280 = vmatprep.subr.mxu0 %v925_v39  ;;  %v1017_v18 = vld [vmem:[%s2330_s13 + $0x638] sm:$0xff]  ;;  %v888_v19 = vld [vmem:[%s2330_s13 + $0x230] sm:$0xff] }
 0x119   : > { %1351 = vmatprep.subr.mxu1 %v1053_v40  ;;  %1281 = vmatpush2.msra.mxu0 %v924_v41  ;;  %v1016_v20 = vld [vmem:[%s2330_s13 + $0x630] sm:$0xff]  ;;  %v885_v21 = vld [vmem:[%s2330_s13 + $0x218] sm:$0xff] }
 0x11a   : > { %1352 = vmatpush2.msra.mxu1 %v1052_v42  ;;  %1282 = vmatprep.subr.mxu0 %v921_v44  ;;  %v1013_v22 = vld [vmem:[%s2330_s13 + $0x618] sm:$0xff]  ;;  %v884_v23 = vld [vmem:[%s2330_s13 + $0x210] sm:$0xff] }
 0x11b   : > { %1353 = vmatprep.subr.mxu1 %v1049_v45  ;;  %1283 = vmatpush2.msra.mxu0 %v920_v46  ;;  %v1012_v24 = vld [vmem:[%s2330_s13 + $0x610] sm:$0xff]  ;;  %v816_v38 = vld [vmem:[#allocation2] sm:$0xff] }
 0x11c   : > { %1354 = vmatpush2.msra.mxu1 %v1048_v47  ;;  %1284 = vmatprep.subr.mxu0 %v917_v48 }
 0x11d   : > { %1355 = vmatprep.subr.mxu1 %v1045_v49  ;;  %1285 = vmatpush2.msra.mxu0 %v916_v50 }
 0x11e   : > { %1356 = vmatpush2.msra.mxu1 %v1044_v51  ;;  %1286 = vmatprep.subr.mxu0 %v913_v52 }
 0x11f   : > { %1357 = vmatprep.subr.mxu1 %v1041_v54  ;;  %1287 = vmatpush2.msra.mxu0 %v912_v55 }
 0x120   : > { %1358 = vmatpush2.msra.mxu1 %v1040_v56  ;;  %1288 = vmatprep.subr.mxu0 %v909_v57 }
 0x121   : > { %1359 = vmatprep.subr.mxu1 %v1037_v58  ;;  %1289 = vmatpush2.msra.mxu0 %v908_v59 }
 0x122   : > { %1360 = vmatpush2.msra.mxu1 %v1036_v60  ;;  %1290 = vmatprep.subr.mxu0 %v905_v61 }
 0x123   : > { %1361 = vmatprep.subr.mxu1 %v1033_v62  ;;  %1291 = vmatpush2.msra.mxu0 %v904_v0 }
 0x124   : > { %1362 = vmatpush2.msra.mxu1 %v1032_v1  ;;  %1292 = vmatprep.subr.mxu0 %v901_v3 }
 0x125   : > { %1363 = vmatprep.subr.mxu1 %v1029_v4  ;;  %1293 = vmatpush2.msra.mxu0 %v900_v5 }
 0x126   : > { %1364 = vmatpush2.msra.mxu1 %v1028_v6  ;;  %1294 = vmatprep.subr.mxu0 %v897_v7 }
 0x127   : > { %1365 = vmatprep.subr.mxu1 %v1025_v8  ;;  %1295 = vmatpush2.msra.mxu0 %v896_v10 }
 0x128   : > { %1366 = vmatpush2.msra.mxu1 %v1024_v12  ;;  %1296 = vmatprep.subr.mxu0 %v893_v13 }
 0x129   : > { %1367 = vmatprep.subr.mxu1 %v1021_v14  ;;  %1297 = vmatpush2.msra.mxu0 %v892_v15 }
 0x12a   : > { %1368 = vmatpush2.msra.mxu1 %v1020_v16  ;;  %1298 = vmatprep.subr.mxu0 %v889_v17 }
 0x12b   : > { %1369 = vmatprep.subr.mxu1 %v1017_v18  ;;  %1299 = vmatpush2.msra.mxu0 %v888_v19 }
 0x12c   : > { %1370 = vmatpush2.msra.mxu1 %v1016_v20  ;;  %1300 = vmatprep.subr.mxu0 %v885_v21 }
 0x12d   : > { %1371 = vmatprep.subr.mxu1 %v1013_v22  ;;  %1301 = vmatpush2.msra.mxu0 %v884_v23 }
 0x12e   : > { %1302 = vmatprep.mubr.f32.mxu0 %v2473_v9  ;;  %1372 = vmatpush2.msra.mxu1 %v1012_v24 }
 0x12f   : > { %1373 = vmatprep.mubr.f32.mxu1 %v2478_v11  ;;  %1303 = vmatmul.mubr.f32.vlgmr.msra.gmra.mxu0 %v2458_v63 }
 0x130   : > { %1374 = vmatmul.mubr.f32.vlgmr.msra.gmra.mxu1 %v2463_v2 }
 0x1ad   : > { %v1162_v25 = vpop.f32.mrf.mxu0 }
 0x1ae   : > { %v1233_v26 = vpop.f32.mrf.mxu1 }
 0x1af   : > { %v1164_v27 = vpop.f32.mrf.mxu0  ;;  %v1234_v29 = vadd.f32 %v1233_v26, %v1162_v25 }
 0x1b0   : > { %v1235_v28 = vpop.f32.mrf.mxu1 }
 0x1b1   : > { %v1236_v30 = vadd.f32 %v1235_v28, %v1164_v27 }
 0x1b3   : > { %v1384_v35 = vcombine.low %v1234_v29, %v1236_v30 }
 0x1b5   : > { %v1392_v11 = vrot.slane %v1384_v35, %v2447_v53 }
 0x1ef   : > { %v1304_v31 = vpop.f32.mrf.mxu0 }
 0x1f0   : > { %v1375_v32 = vpop.f32.mrf.mxu1 }
 0x1f1   : > { %v1306_v33 = vpop.f32.mrf.mxu0  ;;  %v1376_v36 = vadd.f32 %v1375_v32, %v1304_v31 }
 0x1f2   : > { %v1377_v34 = vpop.f32.mrf.mxu1 }
 0x1f3   : > { %v1378_v9 = vadd.f32 %v1377_v34, %v1306_v33 }
 0x1f5   : > { %v1385_v37 = vcombine.low %v1376_v36, %v1378_v9 }
 0x1f7   : > { %v1399_v63 = vrot.slane %v1385_v37, %v2447_v53 }
 0x1f9   : > { %v1400_v2 = vcombine.low %v1392_v11, %v1399_v63  ;;  %1407 = sbr.rel (%p1581_p13) target bundleno = 528 (0x210), region = 67 }
 0x1fb   : > { %v1402_v39 = vadd.f32 %v1400_v2, %v816_v38 }
 0x1fd   : > { %1403 = vst [vmem:[#allocation2] sm:$0xff] %v1402_v39 }
 0x1fe   : > { %v1409_v40 = vld [vmem:[%s797_s15] sm:$0xf]  ;;  %v1413_v41 = vsub.s32 0, %v2435_v43  ;;  %v1417_v42 = vsub.s32 1, %v2435_v43  ;;  %v1421_v44 = vsub.s32 2, %v2435_v43  ;;  %v1425_v45 = vsub.s32 3, %v2435_v43 }
 0x1ff   : > { %v1449_v59 = vld [vmem:[%s2323_s18] sm:$0xff] }
 0x200   : > { %v1414_v46 = vrot.slane %v1409_v40, %v1413_v41  ;;  %v1418_v47 = vrot.slane %v1409_v40, %v1417_v42  ;;  %v1422_v48 = vrot.slane %v1409_v40, %v1421_v44  ;;  %v1426_v49 = vrot.slane %v1409_v40, %v1425_v45 }
 0x202   : > { %v1427_v50 = vcombine.low %v1414_v46, %v1418_v47  ;;  %v1428_v51 = vcombine.low %v1422_v48, %v1426_v49 }
 0x204   : > { %v1435_v52 = vrot.slane %v1427_v50, %v2447_v53  ;;  %v1442_v54 = vrot.slane %v1428_v51, %v2447_v53  ;;  %v1408_v55 = vld [vmem:[#allocation2] sm:$0xff] }
 0x206   : > { %v1443_v56 = vcombine.low %v1435_v52, %v1442_v54 }
 0x208   : > { %v1445_v57 = vadd.f32 %v1443_v56, %v1408_v55 }
 0x20a   : > { %vm1446_vm0 = vcmp.gt.f32.partialorder %v1445_v57, 0.0  ;;  %v1447_v58 = vmul.f32 0.01, %v1445_v57 }
 0x20c   : > { %v1448_v60 = vsel %vm1446_vm0, %v1445_v57, %v1447_v58 }
 0x20d   : > { %v1450_v61 = vmul.f32 %v1449_v59, %v1448_v60 }
 0x20f   : > { %1451 = vst [vmem:[%s2328_s12] sm:$0xff] %v1450_v61 }
 0x210 PF: > { %s14_s21 = sadd.s32 1, %s1698_s21   ;;  %s2659_s15 = smov %s1678_s16 }
 0x211   : > { %p11_p0 = scmp.ge.s32.totalorder %s14_s21, 20   ;;  %s2660_s16 = smov %s1778_s28 }
 0x212   : > { %s2661_s17 = smov %s1690_s19  ;;  %s2662_s18 = smov %s1694_s20 }
 0x213   : > { %s2663_s19 = smov %s2666_s22  ;;  %s2664_s20 = smov %s2670_s23 }
 0x214   :  { %13 = sbr.rel (!%p11_p0) target bundleno = 4 (0x4), region = 111 }

// kernel: encoder_forward.9
= control target key start
LH: loop header
LB: loop body
LE: loop exit
PB: predicated region body
PF: predicated region fallthrough
CT: control target
= control target key end

     0   :  { %12 = vsyncpa [#allocation3], 0  ;;  %s2996_s0 = inlined_call_operand.vmem [shape: f32[2,1024], index: 0, kind: input, shape index: {}]   ;;  %s2997_s1 = inlined_call_operand.vmem [shape: f32[1024,512], index: 1, kind: input, shape index: {}]   ;;  %s2998_s2 = inlined_call_operand.vmem [shape: f32[1,512], index: 2, kind: input, shape index: {}]   ;;  %s2999_s3 = inlined_call_operand.vmem [shape: f32[2,256], index: 3, kind: input, shape index: {}]   ;;  %s3000_s4 = inlined_call_operand.hbm [shape: f32[2,256], index: 4, kind: output, shape index: {0}]   ;;  %s3001_s5 = inlined_call_operand.hbm [shape: f32[2,256], index: 5, kind: output, shape index: {1}]   ;;  %s3002_s6 = inlined_call_operand.hbm [shape: f32[2,256], index: 6, kind: output, shape index: {2}]  }
   0x1   :  { %v85_v0 = vld [vmem:[%s2997_s1 + $0x1e8] sm:$0xff]  ;;  %v84_v2 = vld [vmem:[%s2997_s1 + $0x1e0] sm:$0xff] }
   0x2   :  { %v213_v1 = vld [vmem:[%s2997_s1 + $0x5e8] sm:$0xff]  ;;  %602 = vmatprep.subr.mxu0 %v85_v0  ;;  %v212_v3 = vld [vmem:[%s2997_s1 + $0x5e0] sm:$0xff] }
   0x3   :  { %673 = vmatprep.subr.mxu1 %v213_v1  ;;  %v81_v4 = vld [vmem:[%s2997_s1 + $0x1c8] sm:$0xff]  ;;  %603 = vmatpush1.msra.mxu0 %v84_v2  ;;  %v80_v6 = vld [vmem:[%s2997_s1 + $0x1c0] sm:$0xff] }
   0x4   :  { %v209_v5 = vld [vmem:[%s2997_s1 + $0x5c8] sm:$0xff]  ;;  %674 = vmatpush1.msra.mxu1 %v212_v3  ;;  %v208_v7 = vld [vmem:[%s2997_s1 + $0x5c0] sm:$0xff]  ;;  %604 = vmatprep.subr.mxu0 %v81_v4 }
   0x5   :  { %v77_v8 = vld [vmem:[%s2997_s1 + $0x1a8] sm:$0xff]  ;;  %675 = vmatprep.subr.mxu1 %v209_v5  ;;  %v76_v10 = vld [vmem:[%s2997_s1 + $0x1a0] sm:$0xff]  ;;  %605 = vmatpush1.msra.mxu0 %v80_v6 }
   0x6   :  { %v205_v9 = vld [vmem:[%s2997_s1 + $0x5a8] sm:$0xff]  ;;  %v204_v11 = vld [vmem:[%s2997_s1 + $0x5a0] sm:$0xff]  ;;  %676 = vmatpush1.msra.mxu1 %v208_v7  ;;  %606 = vmatprep.subr.mxu0 %v77_v8 }
   0x7   :  { %v73_v12 = vld [vmem:[%s2997_s1 + $0x188] sm:$0xff]  ;;  %677 = vmatprep.subr.mxu1 %v205_v9  ;;  %v72_v14 = vld [vmem:[%s2997_s1 + $0x180] sm:$0xff]  ;;  %607 = vmatpush1.msra.mxu0 %v76_v10 }
   0x8   :  { %v201_v13 = vld [vmem:[%s2997_s1 + $0x588] sm:$0xff]  ;;  %v200_v15 = vld [vmem:[%s2997_s1 + $0x580] sm:$0xff]  ;;  %678 = vmatpush1.msra.mxu1 %v204_v11  ;;  %608 = vmatprep.subr.mxu0 %v73_v12 }
   0x9   :  { %v69_v16 = vld [vmem:[%s2997_s1 + $0x168] sm:$0xff]  ;;  %679 = vmatprep.subr.mxu1 %v201_v13  ;;  %v68_v18 = vld [vmem:[%s2997_s1 + $0x160] sm:$0xff]  ;;  %609 = vmatpush1.msra.mxu0 %v72_v14 }
   0xa   :  { %v197_v17 = vld [vmem:[%s2997_s1 + $0x568] sm:$0xff]  ;;  %v196_v19 = vld [vmem:[%s2997_s1 + $0x560] sm:$0xff]  ;;  %680 = vmatpush1.msra.mxu1 %v200_v15  ;;  %610 = vmatprep.subr.mxu0 %v69_v16 }
   0xb   :  { %v65_v20 = vld [vmem:[%s2997_s1 + $0x148] sm:$0xff]  ;;  %681 = vmatprep.subr.mxu1 %v197_v17  ;;  %v64_v22 = vld [vmem:[%s2997_s1 + $0x140] sm:$0xff]  ;;  %611 = vmatpush1.msra.mxu0 %v68_v18 }
   0xc   :  { %v193_v21 = vld [vmem:[%s2997_s1 + $0x548] sm:$0xff]  ;;  %v192_v23 = vld [vmem:[%s2997_s1 + $0x540] sm:$0xff]  ;;  %682 = vmatpush1.msra.mxu1 %v196_v19  ;;  %612 = vmatprep.subr.mxu0 %v65_v20 }
   0xd   :  { %v61_v24 = vld [vmem:[%s2997_s1 + $0x128] sm:$0xff]  ;;  %683 = vmatprep.subr.mxu1 %v193_v21  ;;  %v60_v26 = vld [vmem:[%s2997_s1 + $0x120] sm:$0xff]  ;;  %613 = vmatpush1.msra.mxu0 %v64_v22 }
   0xe   :  { %v189_v25 = vld [vmem:[%s2997_s1 + $0x528] sm:$0xff]  ;;  %v188_v27 = vld [vmem:[%s2997_s1 + $0x520] sm:$0xff]  ;;  %684 = vmatpush1.msra.mxu1 %v192_v23  ;;  %614 = vmatprep.subr.mxu0 %v61_v24 }
   0xf   :  { %v57_v28 = vld [vmem:[%s2997_s1 + $0x108] sm:$0xff]  ;;  %685 = vmatprep.subr.mxu1 %v189_v25  ;;  %v56_v30 = vld [vmem:[%s2997_s1 + $0x100] sm:$0xff]  ;;  %615 = vmatpush1.msra.mxu0 %v60_v26 }
  0x10   :  { %v185_v29 = vld [vmem:[%s2997_s1 + $0x508] sm:$0xff]  ;;  %v184_v31 = vld [vmem:[%s2997_s1 + $0x500] sm:$0xff]  ;;  %686 = vmatpush1.msra.mxu1 %v188_v27  ;;  %616 = vmatprep.subr.mxu0 %v57_v28 }
  0x11   :  { %v53_v32 = vld [vmem:[%s2997_s1 + $0xe8] sm:$0xff]  ;;  %687 = vmatprep.subr.mxu1 %v185_v29  ;;  %v52_v34 = vld [vmem:[%s2997_s1 + $0xe0] sm:$0xff]  ;;  %617 = vmatpush1.msra.mxu0 %v56_v30  ;;  %v538_v30 = vlaneseq }
  0x12   :  { %v181_v33 = vld [vmem:[%s2997_s1 + $0x4e8] sm:$0xff]  ;;  %v180_v35 = vld [vmem:[%s2997_s1 + $0x4e0] sm:$0xff]  ;;  %688 = vmatpush1.msra.mxu1 %v184_v31  ;;  %618 = vmatprep.subr.mxu0 %v53_v32  ;;  %v1347_v31 = vmov 1983009808  }
  0x13   :  { %v49_v36 = vld [vmem:[%s2997_s1 + $0xc8] sm:$0xff]  ;;  %689 = vmatprep.subr.mxu1 %v181_v33  ;;  %v48_v38 = vld [vmem:[%s2997_s1 + $0xc0] sm:$0xff]  ;;  %619 = vmatpush1.msra.mxu0 %v52_v34  ;;  %v562_v32 = vunpack.c.l.s4 %v1347_v31 }
  0x14   :  { %v177_v37 = vld [vmem:[%s2997_s1 + $0x4c8] sm:$0xff]  ;;  %v176_v39 = vld [vmem:[%s2997_s1 + $0x4c0] sm:$0xff]  ;;  %690 = vmatpush1.msra.mxu1 %v180_v35  ;;  %620 = vmatprep.subr.mxu0 %v49_v36 }
  0x15   :  { %v45_v40 = vld [vmem:[%s2997_s1 + $0xa8] sm:$0xff]  ;;  %691 = vmatprep.subr.mxu1 %v177_v37  ;;  %v44_v42 = vld [vmem:[%s2997_s1 + $0xa0] sm:$0xff]  ;;  %621 = vmatpush1.msra.mxu0 %v48_v38 }
  0x16   :  { %v173_v41 = vld [vmem:[%s2997_s1 + $0x4a8] sm:$0xff]  ;;  %v172_v43 = vld [vmem:[%s2997_s1 + $0x4a0] sm:$0xff]  ;;  %692 = vmatpush1.msra.mxu1 %v176_v39  ;;  %622 = vmatprep.subr.mxu0 %v45_v40 }
  0x17   :  { %v41_v44 = vld [vmem:[%s2997_s1 + $0x88] sm:$0xff]  ;;  %693 = vmatprep.subr.mxu1 %v173_v41  ;;  %v40_v46 = vld [vmem:[%s2997_s1 + $0x80] sm:$0xff]  ;;  %623 = vmatpush1.msra.mxu0 %v44_v42  ;;  %v1692_v41 = vshrl.u32 %v538_v30, 7  ;;  %v563_v42 = vunpack.c.0.s8 %v562_v32 }
  0x18   :  { %v169_v45 = vld [vmem:[%s2997_s1 + $0x488] sm:$0xff]  ;;  %v168_v47 = vld [vmem:[%s2997_s1 + $0x480] sm:$0xff]  ;;  %694 = vmatpush1.msra.mxu1 %v172_v43  ;;  %624 = vmatprep.subr.mxu0 %v41_v44 }
  0x19   :  { %v37_v48 = vld [vmem:[%s2997_s1 + $0x68] sm:$0xff]  ;;  %695 = vmatprep.subr.mxu1 %v169_v45  ;;  %v36_v50 = vld [vmem:[%s2997_s1 + $0x60] sm:$0xff]  ;;  %625 = vmatpush1.msra.mxu0 %v40_v46 }
  0x1a   :  { %v165_v49 = vld [vmem:[%s2997_s1 + $0x468] sm:$0xff]  ;;  %v164_v51 = vld [vmem:[%s2997_s1 + $0x460] sm:$0xff]  ;;  %696 = vmatpush1.msra.mxu1 %v168_v47  ;;  %626 = vmatprep.subr.mxu0 %v37_v48 }
  0x1b   :  { %v33_v52 = vld [vmem:[%s2997_s1 + $0x48] sm:$0xff]  ;;  %697 = vmatprep.subr.mxu1 %v165_v49  ;;  %v32_v54 = vld [vmem:[%s2997_s1 + $0x40] sm:$0xff]  ;;  %627 = vmatpush1.msra.mxu0 %v36_v50 }
  0x1c   :  { %v161_v53 = vld [vmem:[%s2997_s1 + $0x448] sm:$0xff]  ;;  %v160_v55 = vld [vmem:[%s2997_s1 + $0x440] sm:$0xff]  ;;  %698 = vmatpush1.msra.mxu1 %v164_v51  ;;  %628 = vmatprep.subr.mxu0 %v33_v52  ;;  %v1722_v52 = vsub.s32 %v563_v42, %v1692_v41 }
  0x1d   :  { %v29_v56 = vld [vmem:[%s2997_s1 + $0x28] sm:$0xff]  ;;  %699 = vmatprep.subr.mxu1 %v161_v53  ;;  %v28_v58 = vld [vmem:[%s2997_s1 + $0x20] sm:$0xff]  ;;  %629 = vmatpush1.msra.mxu0 %v32_v54 }
  0x1e   :  { %v157_v57 = vld [vmem:[%s2997_s1 + $0x428] sm:$0xff]  ;;  %v156_v59 = vld [vmem:[%s2997_s1 + $0x420] sm:$0xff]  ;;  %700 = vmatpush1.msra.mxu1 %v160_v55  ;;  %630 = vmatprep.subr.mxu0 %v29_v56 }
  0x1f   :  { %v25_v60 = vld [vmem:[%s2997_s1 + $0x8] sm:$0xff]  ;;  %701 = vmatprep.subr.mxu1 %v157_v57  ;;  %v24_v62 = vld [vmem:[%s2997_s1] sm:$0xff]  ;;  %631 = vmatpush1.msra.mxu0 %v28_v58 }
  0x20   :  { %v153_v61 = vld [vmem:[%s2997_s1 + $0x408] sm:$0xff]  ;;  %v152_v63 = vld [vmem:[%s2997_s1 + $0x400] sm:$0xff]  ;;  %702 = vmatpush1.msra.mxu1 %v156_v59  ;;  %632 = vmatprep.subr.mxu0 %v25_v60 }
  0x21   :  { %v149_v0 = vld [vmem:[%s2997_s1 + $0x3e8] sm:$0xff]  ;;  %703 = vmatprep.subr.mxu1 %v153_v61  ;;  %v148_v2 = vld [vmem:[%s2997_s1 + $0x3e0] sm:$0xff]  ;;  %633 = vmatpush1.msra.mxu0 %v24_v62 }
  0x22   :  { %v277_v1 = vld [vmem:[%s2997_s1 + $0x7e8] sm:$0xff]  ;;  %v276_v3 = vld [vmem:[%s2997_s1 + $0x7e0] sm:$0xff]  ;;  %704 = vmatpush1.msra.mxu1 %v152_v63  ;;  %634 = vmatprep.subr.mxu0 %v149_v0 }
  0x23   :  { %v145_v4 = vld [vmem:[%s2997_s1 + $0x3c8] sm:$0xff]  ;;  %705 = vmatprep.subr.mxu1 %v277_v1  ;;  %v144_v6 = vld [vmem:[%s2997_s1 + $0x3c0] sm:$0xff]  ;;  %635 = vmatpush2.msra.mxu0 %v148_v2 }
  0x24   :  { %v273_v5 = vld [vmem:[%s2997_s1 + $0x7c8] sm:$0xff]  ;;  %v272_v7 = vld [vmem:[%s2997_s1 + $0x7c0] sm:$0xff]  ;;  %706 = vmatpush2.msra.mxu1 %v276_v3  ;;  %636 = vmatprep.subr.mxu0 %v145_v4 }
  0x25   :  { %v141_v8 = vld [vmem:[%s2997_s1 + $0x3a8] sm:$0xff]  ;;  %707 = vmatprep.subr.mxu1 %v273_v5  ;;  %v140_v10 = vld [vmem:[%s2997_s1 + $0x3a0] sm:$0xff]  ;;  %637 = vmatpush2.msra.mxu0 %v144_v6 }
  0x26   :  { %v269_v9 = vld [vmem:[%s2997_s1 + $0x7a8] sm:$0xff]  ;;  %v268_v11 = vld [vmem:[%s2997_s1 + $0x7a0] sm:$0xff]  ;;  %708 = vmatpush2.msra.mxu1 %v272_v7  ;;  %638 = vmatprep.subr.mxu0 %v141_v8 }
  0x27   :  { %v137_v12 = vld [vmem:[%s2997_s1 + $0x388] sm:$0xff]  ;;  %709 = vmatprep.subr.mxu1 %v269_v9  ;;  %v136_v14 = vld [vmem:[%s2997_s1 + $0x380] sm:$0xff]  ;;  %639 = vmatpush2.msra.mxu0 %v140_v10 }
  0x28   :  { %v265_v13 = vld [vmem:[%s2997_s1 + $0x788] sm:$0xff]  ;;  %v264_v15 = vld [vmem:[%s2997_s1 + $0x780] sm:$0xff]  ;;  %710 = vmatpush2.msra.mxu1 %v268_v11  ;;  %640 = vmatprep.subr.mxu0 %v137_v12 }
  0x29   :  { %v133_v16 = vld [vmem:[%s2997_s1 + $0x368] sm:$0xff]  ;;  %711 = vmatprep.subr.mxu1 %v265_v13  ;;  %v132_v18 = vld [vmem:[%s2997_s1 + $0x360] sm:$0xff]  ;;  %641 = vmatpush2.msra.mxu0 %v136_v14 }
  0x2a   :  { %v261_v17 = vld [vmem:[%s2997_s1 + $0x768] sm:$0xff]  ;;  %v260_v19 = vld [vmem:[%s2997_s1 + $0x760] sm:$0xff]  ;;  %712 = vmatpush2.msra.mxu1 %v264_v15  ;;  %642 = vmatprep.subr.mxu0 %v133_v16 }
  0x2b   :  { %v129_v20 = vld [vmem:[%s2997_s1 + $0x348] sm:$0xff]  ;;  %713 = vmatprep.subr.mxu1 %v261_v17  ;;  %v128_v22 = vld [vmem:[%s2997_s1 + $0x340] sm:$0xff]  ;;  %643 = vmatpush2.msra.mxu0 %v132_v18 }
  0x2c   :  { %v257_v21 = vld [vmem:[%s2997_s1 + $0x748] sm:$0xff]  ;;  %v256_v23 = vld [vmem:[%s2997_s1 + $0x740] sm:$0xff]  ;;  %714 = vmatpush2.msra.mxu1 %v260_v19  ;;  %644 = vmatprep.subr.mxu0 %v129_v20 }
  0x2d   :  { %v125_v24 = vld [vmem:[%s2997_s1 + $0x328] sm:$0xff]  ;;  %715 = vmatprep.subr.mxu1 %v257_v21  ;;  %v124_v26 = vld [vmem:[%s2997_s1 + $0x320] sm:$0xff]  ;;  %645 = vmatpush2.msra.mxu0 %v128_v22 }
  0x2e   :  { %v253_v25 = vld [vmem:[%s2997_s1 + $0x728] sm:$0xff]  ;;  %v252_v27 = vld [vmem:[%s2997_s1 + $0x720] sm:$0xff]  ;;  %716 = vmatpush2.msra.mxu1 %v256_v23  ;;  %646 = vmatprep.subr.mxu0 %v125_v24 }
  0x2f   :  { %v121_v28 = vld [vmem:[%s2997_s1 + $0x308] sm:$0xff]  ;;  %717 = vmatprep.subr.mxu1 %v253_v25  ;;  %v120_v33 = vld [vmem:[%s2997_s1 + $0x300] sm:$0xff]  ;;  %647 = vmatpush2.msra.mxu0 %v124_v26 }
  0x30   :  { %v249_v29 = vld [vmem:[%s2997_s1 + $0x708] sm:$0xff]  ;;  %v248_v34 = vld [vmem:[%s2997_s1 + $0x700] sm:$0xff]  ;;  %718 = vmatpush2.msra.mxu1 %v252_v27  ;;  %648 = vmatprep.subr.mxu0 %v121_v28 }
  0x31   :  { %v117_v35 = vld [vmem:[%s2997_s1 + $0x2e8] sm:$0xff]  ;;  %719 = vmatprep.subr.mxu1 %v249_v29  ;;  %v116_v37 = vld [vmem:[%s2997_s1 + $0x2e0] sm:$0xff]  ;;  %649 = vmatpush2.msra.mxu0 %v120_v33 }
  0x32   :  { %v245_v36 = vld [vmem:[%s2997_s1 + $0x6e8] sm:$0xff]  ;;  %v244_v38 = vld [vmem:[%s2997_s1 + $0x6e0] sm:$0xff]  ;;  %720 = vmatpush2.msra.mxu1 %v248_v34  ;;  %650 = vmatprep.subr.mxu0 %v117_v35 }
  0x33   :  { %v113_v39 = vld [vmem:[%s2997_s1 + $0x2c8] sm:$0xff]  ;;  %721 = vmatprep.subr.mxu1 %v245_v36  ;;  %v112_v43 = vld [vmem:[%s2997_s1 + $0x2c0] sm:$0xff]  ;;  %651 = vmatpush2.msra.mxu0 %v116_v37 }
  0x34   :  { %v241_v40 = vld [vmem:[%s2997_s1 + $0x6c8] sm:$0xff]  ;;  %v240_v44 = vld [vmem:[%s2997_s1 + $0x6c0] sm:$0xff]  ;;  %722 = vmatpush2.msra.mxu1 %v244_v38  ;;  %652 = vmatprep.subr.mxu0 %v113_v39 }
  0x35   :  { %v109_v45 = vld [vmem:[%s2997_s1 + $0x2a8] sm:$0xff]  ;;  %723 = vmatprep.subr.mxu1 %v241_v40  ;;  %v108_v47 = vld [vmem:[%s2997_s1 + $0x2a0] sm:$0xff]  ;;  %653 = vmatpush2.msra.mxu0 %v112_v43 }
  0x36   :  { %v237_v46 = vld [vmem:[%s2997_s1 + $0x6a8] sm:$0xff]  ;;  %v236_v48 = vld [vmem:[%s2997_s1 + $0x6a0] sm:$0xff]  ;;  %724 = vmatpush2.msra.mxu1 %v240_v44  ;;  %654 = vmatprep.subr.mxu0 %v109_v45 }
  0x37   :  { %v22_v49 = vld [vmem:[%s2996_s0] sm:$0xff]  ;;  %v105_v50 = vld [vmem:[%s2997_s1 + $0x288] sm:$0xff]  ;;  %725 = vmatprep.subr.mxu1 %v237_v46  ;;  %655 = vmatpush2.msra.mxu0 %v108_v47 }
  0x38   :  { %v233_v51 = vld [vmem:[%s2997_s1 + $0x688] sm:$0xff]  ;;  %v104_v53 = vld [vmem:[%s2997_s1 + $0x280] sm:$0xff]  ;;  %726 = vmatpush2.msra.mxu1 %v236_v48  ;;  %v560_v57 = vcombine.high %v22_v49, %v22_v49  ;;  %656 = vmatprep.subr.mxu0 %v105_v50  ;;  %v1749_v62 = vrot.slane %v22_v49, %v1722_v52 }
  0x39   :  { %v232_v54 = vld [vmem:[%s2997_s1 + $0x680] sm:$0xff]  ;;  %v101_v55 = vld [vmem:[%s2997_s1 + $0x268] sm:$0xff]  ;;  %727 = vmatprep.subr.mxu1 %v233_v51  ;;  %657 = vmatpush2.msra.mxu0 %v104_v53 }
  0x3a   :  { %v229_v56 = vld [vmem:[%s2997_s1 + $0x668] sm:$0xff]  ;;  %v100_v58 = vld [vmem:[%s2997_s1 + $0x260] sm:$0xff]  ;;  %728 = vmatpush2.msra.mxu1 %v232_v54  ;;  %658 = vmatprep.subr.mxu0 %v101_v55  ;;  %v1764_v3 = vrot.slane %v560_v57, %v1722_v52  ;;  %v1780_v8 = vcombine.high %v1749_v62, %v1749_v62 }
  0x3b   :  { %v228_v59 = vld [vmem:[%s2997_s1 + $0x660] sm:$0xff]  ;;  %v97_v60 = vld [vmem:[%s2997_s1 + $0x248] sm:$0xff]  ;;  %729 = vmatprep.subr.mxu1 %v229_v56  ;;  %659 = vmatpush2.msra.mxu0 %v100_v58 }
  0x3c   :  { %v225_v61 = vld [vmem:[%s2997_s1 + $0x648] sm:$0xff]  ;;  %v96_v63 = vld [vmem:[%s2997_s1 + $0x240] sm:$0xff]  ;;  %730 = vmatpush2.msra.mxu1 %v228_v59  ;;  %660 = vmatprep.subr.mxu0 %v97_v60  ;;  %v1790_v11 = vcombine.high %v1764_v3, %v1764_v3 }
  0x3d   :  { %v224_v0 = vld [vmem:[%s2997_s1 + $0x640] sm:$0xff]  ;;  %v93_v1 = vld [vmem:[%s2997_s1 + $0x228] sm:$0xff]  ;;  %731 = vmatprep.subr.mxu1 %v225_v61  ;;  %661 = vmatpush2.msra.mxu0 %v96_v63 }
  0x3e   :  { %v221_v2 = vld [vmem:[%s2997_s1 + $0x628] sm:$0xff]  ;;  %v92_v4 = vld [vmem:[%s2997_s1 + $0x220] sm:$0xff]  ;;  %732 = vmatpush2.msra.mxu1 %v224_v0  ;;  %662 = vmatprep.subr.mxu0 %v93_v1 }
  0x3f   :  { %v220_v5 = vld [vmem:[%s2997_s1 + $0x620] sm:$0xff]  ;;  %v89_v6 = vld [vmem:[%s2997_s1 + $0x208] sm:$0xff]  ;;  %733 = vmatprep.subr.mxu1 %v221_v2  ;;  %663 = vmatpush2.msra.mxu0 %v92_v4 }
  0x40   :  { %v217_v7 = vld [vmem:[%s2997_s1 + $0x608] sm:$0xff]  ;;  %v88_v9 = vld [vmem:[%s2997_s1 + $0x200] sm:$0xff]  ;;  %734 = vmatpush2.msra.mxu1 %v220_v5  ;;  %664 = vmatprep.subr.mxu0 %v89_v6 }
  0x41   :  { %v216_v10 = vld [vmem:[%s2997_s1 + $0x600] sm:$0xff]  ;;  %735 = vmatprep.subr.mxu1 %v217_v7  ;;  %v341_v12 = vld [vmem:[%s2997_s1 + $0x9e8] sm:$0xff]  ;;  %665 = vmatpush2.msra.mxu0 %v88_v9 }
  0x42   :  { %666 = vmatprep.mubr.f32.mxu0 %v1780_v8  ;;  %v469_v13 = vld [vmem:[%s2997_s1 + $0xde8] sm:$0xff]  ;;  %736 = vmatpush2.msra.mxu1 %v216_v10  ;;  %v340_v14 = vld [vmem:[%s2997_s1 + $0x9e0] sm:$0xff] }
  0x43   :  { %667 = vmatmul.mubr.f32.vlgmr.msra.gmra.mxu0 %v1749_v62  ;;  %v468_v15 = vld [vmem:[%s2997_s1 + $0xde0] sm:$0xff]  ;;  %737 = vmatprep.mubr.f32.mxu1 %v1790_v11  ;;  %v337_v16 = vld [vmem:[%s2997_s1 + $0x9c8] sm:$0xff] }
  0x44   :  { %744 = vmatprep.subr.mxu0 %v341_v12  ;;  %v465_v17 = vld [vmem:[%s2997_s1 + $0xdc8] sm:$0xff]  ;;  %815 = vmatprep.subr.mxu1 %v469_v13  ;;  %v336_v18 = vld [vmem:[%s2997_s1 + $0x9c0] sm:$0xff] }
  0x45   :  { %738 = vmatmul.mubr.f32.vlgmr.msra.gmra.mxu1 %v1764_v3  ;;  %v464_v19 = vld [vmem:[%s2997_s1 + $0xdc0] sm:$0xff]  ;;  %745 = vmatpush1.msra.mxu0 %v340_v14  ;;  %v333_v20 = vld [vmem:[%s2997_s1 + $0x9a8] sm:$0xff] }
  0x46   :  { %816 = vmatpush1.msra.mxu1 %v468_v15  ;;  %v461_v21 = vld [vmem:[%s2997_s1 + $0xda8] sm:$0xff]  ;;  %746 = vmatprep.subr.mxu0 %v337_v16  ;;  %v332_v22 = vld [vmem:[%s2997_s1 + $0x9a0] sm:$0xff] }
  0x47   :  { %817 = vmatprep.subr.mxu1 %v465_v17  ;;  %v460_v23 = vld [vmem:[%s2997_s1 + $0xda0] sm:$0xff]  ;;  %747 = vmatpush1.msra.mxu0 %v336_v18  ;;  %v329_v24 = vld [vmem:[%s2997_s1 + $0x988] sm:$0xff] }
  0x48   :  { %818 = vmatpush1.msra.mxu1 %v464_v19  ;;  %v457_v25 = vld [vmem:[%s2997_s1 + $0xd88] sm:$0xff]  ;;  %748 = vmatprep.subr.mxu0 %v333_v20  ;;  %v328_v26 = vld [vmem:[%s2997_s1 + $0x980] sm:$0xff] }
  0x49   :  { %819 = vmatprep.subr.mxu1 %v461_v21  ;;  %v456_v27 = vld [vmem:[%s2997_s1 + $0xd80] sm:$0xff]  ;;  %749 = vmatpush1.msra.mxu0 %v332_v22  ;;  %v325_v28 = vld [vmem:[%s2997_s1 + $0x968] sm:$0xff] }
  0x4a   :  { %820 = vmatpush1.msra.mxu1 %v460_v23  ;;  %v453_v29 = vld [vmem:[%s2997_s1 + $0xd68] sm:$0xff]  ;;  %750 = vmatprep.subr.mxu0 %v329_v24  ;;  %v324_v30 = vld [vmem:[%s2997_s1 + $0x960] sm:$0xff] }
  0x4b   :  { %821 = vmatprep.subr.mxu1 %v457_v25  ;;  %v452_v31 = vld [vmem:[%s2997_s1 + $0xd60] sm:$0xff]  ;;  %751 = vmatpush1.msra.mxu0 %v328_v26  ;;  %v321_v32 = vld [vmem:[%s2997_s1 + $0x948] sm:$0xff] }
  0x4c   :  { %822 = vmatpush1.msra.mxu1 %v456_v27  ;;  %v449_v33 = vld [vmem:[%s2997_s1 + $0xd48] sm:$0xff]  ;;  %752 = vmatprep.subr.mxu0 %v325_v28  ;;  %v320_v34 = vld [vmem:[%s2997_s1 + $0x940] sm:$0xff] }
  0x4d   :  { %823 = vmatprep.subr.mxu1 %v453_v29  ;;  %v448_v35 = vld [vmem:[%s2997_s1 + $0xd40] sm:$0xff]  ;;  %753 = vmatpush1.msra.mxu0 %v324_v30  ;;  %v317_v36 = vld [vmem:[%s2997_s1 + $0x928] sm:$0xff] }
  0x4e   :  { %824 = vmatpush1.msra.mxu1 %v452_v31  ;;  %v445_v37 = vld [vmem:[%s2997_s1 + $0xd28] sm:$0xff]  ;;  %754 = vmatprep.subr.mxu0 %v321_v32  ;;  %v316_v38 = vld [vmem:[%s2997_s1 + $0x920] sm:$0xff] }
  0x4f   :  { %825 = vmatprep.subr.mxu1 %v449_v33  ;;  %v444_v39 = vld [vmem:[%s2997_s1 + $0xd20] sm:$0xff]  ;;  %755 = vmatpush1.msra.mxu0 %v320_v34  ;;  %v313_v40 = vld [vmem:[%s2997_s1 + $0x908] sm:$0xff] }
  0x50   :  { %826 = vmatpush1.msra.mxu1 %v448_v35  ;;  %v441_v42 = vld [vmem:[%s2997_s1 + $0xd08] sm:$0xff]  ;;  %756 = vmatprep.subr.mxu0 %v317_v36  ;;  %v312_v43 = vld [vmem:[%s2997_s1 + $0x900] sm:$0xff] }
  0x51   :  { %827 = vmatprep.subr.mxu1 %v445_v37  ;;  %v440_v44 = vld [vmem:[%s2997_s1 + $0xd00] sm:$0xff]  ;;  %757 = vmatpush1.msra.mxu0 %v316_v38  ;;  %v309_v45 = vld [vmem:[%s2997_s1 + $0x8e8] sm:$0xff] }
  0x52   :  { %828 = vmatpush1.msra.mxu1 %v444_v39  ;;  %v437_v46 = vld [vmem:[%s2997_s1 + $0xce8] sm:$0xff]  ;;  %758 = vmatprep.subr.mxu0 %v313_v40  ;;  %v308_v47 = vld [vmem:[%s2997_s1 + $0x8e0] sm:$0xff] }
  0x53   :  { %829 = vmatprep.subr.mxu1 %v441_v42  ;;  %v436_v48 = vld [vmem:[%s2997_s1 + $0xce0] sm:$0xff]  ;;  %759 = vmatpush1.msra.mxu0 %v312_v43  ;;  %v305_v49 = vld [vmem:[%s2997_s1 + $0x8c8] sm:$0xff] }
  0x54   :  { %830 = vmatpush1.msra.mxu1 %v440_v44  ;;  %v433_v50 = vld [vmem:[%s2997_s1 + $0xcc8] sm:$0xff]  ;;  %760 = vmatprep.subr.mxu0 %v309_v45  ;;  %v304_v51 = vld [vmem:[%s2997_s1 + $0x8c0] sm:$0xff] }
  0x55   :  { %831 = vmatprep.subr.mxu1 %v437_v46  ;;  %v432_v53 = vld [vmem:[%s2997_s1 + $0xcc0] sm:$0xff]  ;;  %761 = vmatpush1.msra.mxu0 %v308_v47  ;;  %v301_v54 = vld [vmem:[%s2997_s1 + $0x8a8] sm:$0xff] }
  0x56   :  { %832 = vmatpush1.msra.mxu1 %v436_v48  ;;  %v429_v55 = vld [vmem:[%s2997_s1 + $0xca8] sm:$0xff]  ;;  %762 = vmatprep.subr.mxu0 %v305_v49  ;;  %v300_v56 = vld [vmem:[%s2997_s1 + $0x8a0] sm:$0xff] }
  0x57   :  { %833 = vmatprep.subr.mxu1 %v433_v50  ;;  %v428_v57 = vld [vmem:[%s2997_s1 + $0xca0] sm:$0xff]  ;;  %763 = vmatpush1.msra.mxu0 %v304_v51  ;;  %v297_v58 = vld [vmem:[%s2997_s1 + $0x888] sm:$0xff] }
  0x58   :  { %834 = vmatpush1.msra.mxu1 %v432_v53  ;;  %v425_v59 = vld [vmem:[%s2997_s1 + $0xc88] sm:$0xff]  ;;  %764 = vmatprep.subr.mxu0 %v301_v54  ;;  %v296_v60 = vld [vmem:[%s2997_s1 + $0x880] sm:$0xff] }
  0x59   :  { %835 = vmatprep.subr.mxu1 %v429_v55  ;;  %v424_v61 = vld [vmem:[%s2997_s1 + $0xc80] sm:$0xff]  ;;  %765 = vmatpush1.msra.mxu0 %v300_v56  ;;  %v293_v63 = vld [vmem:[%s2997_s1 + $0x868] sm:$0xff] }
  0x5a   :  { %836 = vmatpush1.msra.mxu1 %v428_v57  ;;  %v421_v0 = vld [vmem:[%s2997_s1 + $0xc68] sm:$0xff]  ;;  %766 = vmatprep.subr.mxu0 %v297_v58  ;;  %v292_v1 = vld [vmem:[%s2997_s1 + $0x860] sm:$0xff] }
  0x5b   :  { %837 = vmatprep.subr.mxu1 %v425_v59  ;;  %v420_v2 = vld [vmem:[%s2997_s1 + $0xc60] sm:$0xff]  ;;  %767 = vmatpush1.msra.mxu0 %v296_v60  ;;  %v289_v4 = vld [vmem:[%s2997_s1 + $0x848] sm:$0xff] }
  0x5c   :  { %838 = vmatpush1.msra.mxu1 %v424_v61  ;;  %v417_v5 = vld [vmem:[%s2997_s1 + $0xc48] sm:$0xff]  ;;  %768 = vmatprep.subr.mxu0 %v293_v63  ;;  %v288_v6 = vld [vmem:[%s2997_s1 + $0x840] sm:$0xff] }
  0x5d   :  { %839 = vmatprep.subr.mxu1 %v421_v0  ;;  %v416_v7 = vld [vmem:[%s2997_s1 + $0xc40] sm:$0xff]  ;;  %769 = vmatpush1.msra.mxu0 %v292_v1  ;;  %v285_v9 = vld [vmem:[%s2997_s1 + $0x828] sm:$0xff] }
  0x5e   :  { %840 = vmatpush1.msra.mxu1 %v420_v2  ;;  %v413_v10 = vld [vmem:[%s2997_s1 + $0xc28] sm:$0xff]  ;;  %770 = vmatprep.subr.mxu0 %v289_v4  ;;  %v284_v12 = vld [vmem:[%s2997_s1 + $0x820] sm:$0xff] }
  0x5f   :  { %841 = vmatprep.subr.mxu1 %v417_v5  ;;  %v412_v13 = vld [vmem:[%s2997_s1 + $0xc20] sm:$0xff]  ;;  %771 = vmatpush1.msra.mxu0 %v288_v6  ;;  %v281_v14 = vld [vmem:[%s2997_s1 + $0x808] sm:$0xff] }
  0x60   :  { %842 = vmatpush1.msra.mxu1 %v416_v7  ;;  %v409_v15 = vld [vmem:[%s2997_s1 + $0xc08] sm:$0xff]  ;;  %772 = vmatprep.subr.mxu0 %v285_v9  ;;  %v280_v16 = vld [vmem:[%s2997_s1 + $0x800] sm:$0xff] }
  0x61   :  { %843 = vmatprep.subr.mxu1 %v413_v10  ;;  %v408_v17 = vld [vmem:[%s2997_s1 + $0xc00] sm:$0xff]  ;;  %773 = vmatpush1.msra.mxu0 %v284_v12  ;;  %v405_v18 = vld [vmem:[%s2997_s1 + $0xbe8] sm:$0xff] }
  0x62   :  { %844 = vmatpush1.msra.mxu1 %v412_v13  ;;  %v533_v19 = vld [vmem:[%s2997_s1 + $0xfe8] sm:$0xff]  ;;  %774 = vmatprep.subr.mxu0 %v281_v14  ;;  %v404_v20 = vld [vmem:[%s2997_s1 + $0xbe0] sm:$0xff] }
  0x63   :  { %845 = vmatprep.subr.mxu1 %v409_v15  ;;  %v532_v21 = vld [vmem:[%s2997_s1 + $0xfe0] sm:$0xff]  ;;  %775 = vmatpush1.msra.mxu0 %v280_v16  ;;  %v401_v22 = vld [vmem:[%s2997_s1 + $0xbc8] sm:$0xff] }
  0x64   :  { %846 = vmatpush1.msra.mxu1 %v408_v17  ;;  %v529_v23 = vld [vmem:[%s2997_s1 + $0xfc8] sm:$0xff]  ;;  %776 = vmatprep.subr.mxu0 %v405_v18  ;;  %v400_v24 = vld [vmem:[%s2997_s1 + $0xbc0] sm:$0xff] }
  0x65   :  { %847 = vmatprep.subr.mxu1 %v533_v19  ;;  %v528_v25 = vld [vmem:[%s2997_s1 + $0xfc0] sm:$0xff]  ;;  %777 = vmatpush2.msra.mxu0 %v404_v20  ;;  %v397_v26 = vld [vmem:[%s2997_s1 + $0xba8] sm:$0xff] }
  0x66   :  { %848 = vmatpush2.msra.mxu1 %v532_v21  ;;  %v525_v27 = vld [vmem:[%s2997_s1 + $0xfa8] sm:$0xff]  ;;  %778 = vmatprep.subr.mxu0 %v401_v22  ;;  %v396_v28 = vld [vmem:[%s2997_s1 + $0xba0] sm:$0xff] }
  0x67   :  { %849 = vmatprep.subr.mxu1 %v529_v23  ;;  %v524_v29 = vld [vmem:[%s2997_s1 + $0xfa0] sm:$0xff]  ;;  %779 = vmatpush2.msra.mxu0 %v400_v24  ;;  %v393_v30 = vld [vmem:[%s2997_s1 + $0xb88] sm:$0xff] }
  0x68   :  { %850 = vmatpush2.msra.mxu1 %v528_v25  ;;  %v521_v31 = vld [vmem:[%s2997_s1 + $0xf88] sm:$0xff]  ;;  %780 = vmatprep.subr.mxu0 %v397_v26  ;;  %v392_v32 = vld [vmem:[%s2997_s1 + $0xb80] sm:$0xff] }
  0x69   :  { %851 = vmatprep.subr.mxu1 %v525_v27  ;;  %v520_v33 = vld [vmem:[%s2997_s1 + $0xf80] sm:$0xff]  ;;  %781 = vmatpush2.msra.mxu0 %v396_v28  ;;  %v389_v34 = vld [vmem:[%s2997_s1 + $0xb68] sm:$0xff] }
  0x6a   :  { %852 = vmatpush2.msra.mxu1 %v524_v29  ;;  %v517_v35 = vld [vmem:[%s2997_s1 + $0xf68] sm:$0xff]  ;;  %782 = vmatprep.subr.mxu0 %v393_v30  ;;  %v388_v36 = vld [vmem:[%s2997_s1 + $0xb60] sm:$0xff]  ;;  %v87_v29 = vld [vmem:[%s2997_s1 + $0x1f8] sm:$0xff] }
  0x6b   :  { %853 = vmatprep.subr.mxu1 %v521_v31  ;;  %v516_v37 = vld [vmem:[%s2997_s1 + $0xf60] sm:$0xff]  ;;  %783 = vmatpush2.msra.mxu0 %v392_v32  ;;  %v385_v38 = vld [vmem:[%s2997_s1 + $0xb48] sm:$0xff]  ;;  %v215_v30 = vld [vmem:[%s2997_s1 + $0x5f8] sm:$0xff] }
  0x6c   :  { %854 = vmatpush2.msra.mxu1 %v520_v33  ;;  %v513_v39 = vld [vmem:[%s2997_s1 + $0xf48] sm:$0xff]  ;;  %784 = vmatprep.subr.mxu0 %v389_v34  ;;  %v384_v40 = vld [vmem:[%s2997_s1 + $0xb40] sm:$0xff]  ;;  %v86_v31 = vld [vmem:[%s2997_s1 + $0x1f0] sm:$0xff] }
  0x6d   :  { %855 = vmatprep.subr.mxu1 %v517_v35  ;;  %v512_v42 = vld [vmem:[%s2997_s1 + $0xf40] sm:$0xff]  ;;  %785 = vmatpush2.msra.mxu0 %v388_v36  ;;  %v381_v43 = vld [vmem:[%s2997_s1 + $0xb28] sm:$0xff]  ;;  %v214_v32 = vld [vmem:[%s2997_s1 + $0x5f0] sm:$0xff] }
  0x6e   :  { %856 = vmatpush2.msra.mxu1 %v516_v37  ;;  %v509_v44 = vld [vmem:[%s2997_s1 + $0xf28] sm:$0xff]  ;;  %786 = vmatprep.subr.mxu0 %v385_v38  ;;  %v380_v45 = vld [vmem:[%s2997_s1 + $0xb20] sm:$0xff]  ;;  %v83_v33 = vld [vmem:[%s2997_s1 + $0x1d8] sm:$0xff] }
  0x6f   :  { %857 = vmatprep.subr.mxu1 %v513_v39  ;;  %v508_v46 = vld [vmem:[%s2997_s1 + $0xf20] sm:$0xff]  ;;  %787 = vmatpush2.msra.mxu0 %v384_v40  ;;  %v377_v47 = vld [vmem:[%s2997_s1 + $0xb08] sm:$0xff]  ;;  %v211_v34 = vld [vmem:[%s2997_s1 + $0x5d8] sm:$0xff] }
  0x70   :  { %858 = vmatpush2.msra.mxu1 %v512_v42  ;;  %v505_v48 = vld [vmem:[%s2997_s1 + $0xf08] sm:$0xff]  ;;  %788 = vmatprep.subr.mxu0 %v381_v43  ;;  %v376_v49 = vld [vmem:[%s2997_s1 + $0xb00] sm:$0xff]  ;;  %v82_v35 = vld [vmem:[%s2997_s1 + $0x1d0] sm:$0xff] }
  0x71   :  { %859 = vmatprep.subr.mxu1 %v509_v44  ;;  %v504_v50 = vld [vmem:[%s2997_s1 + $0xf00] sm:$0xff]  ;;  %789 = vmatpush2.msra.mxu0 %v380_v45  ;;  %v373_v51 = vld [vmem:[%s2997_s1 + $0xae8] sm:$0xff]  ;;  %v210_v36 = vld [vmem:[%s2997_s1 + $0x5d0] sm:$0xff] }
  0x72   :  { %860 = vmatpush2.msra.mxu1 %v508_v46  ;;  %v501_v53 = vld [vmem:[%s2997_s1 + $0xee8] sm:$0xff]  ;;  %790 = vmatprep.subr.mxu0 %v377_v47  ;;  %v372_v54 = vld [vmem:[%s2997_s1 + $0xae0] sm:$0xff]  ;;  %v79_v37 = vld [vmem:[%s2997_s1 + $0x1b8] sm:$0xff] }
  0x73   :  { %861 = vmatprep.subr.mxu1 %v505_v48  ;;  %v500_v55 = vld [vmem:[%s2997_s1 + $0xee0] sm:$0xff]  ;;  %791 = vmatpush2.msra.mxu0 %v376_v49  ;;  %v369_v56 = vld [vmem:[%s2997_s1 + $0xac8] sm:$0xff]  ;;  %v207_v38 = vld [vmem:[%s2997_s1 + $0x5b8] sm:$0xff] }
  0x74   :  { %862 = vmatpush2.msra.mxu1 %v504_v50  ;;  %v497_v57 = vld [vmem:[%s2997_s1 + $0xec8] sm:$0xff]  ;;  %792 = vmatprep.subr.mxu0 %v373_v51  ;;  %v368_v58 = vld [vmem:[%s2997_s1 + $0xac0] sm:$0xff]  ;;  %v78_v39 = vld [vmem:[%s2997_s1 + $0x1b0] sm:$0xff] }
  0x75   :  { %863 = vmatprep.subr.mxu1 %v501_v53  ;;  %v496_v59 = vld [vmem:[%s2997_s1 + $0xec0] sm:$0xff]  ;;  %793 = vmatpush2.msra.mxu0 %v372_v54  ;;  %v365_v60 = vld [vmem:[%s2997_s1 + $0xaa8] sm:$0xff]  ;;  %v206_v40 = vld [vmem:[%s2997_s1 + $0x5b0] sm:$0xff] }
  0x76   :  { %864 = vmatpush2.msra.mxu1 %v500_v55  ;;  %v493_v61 = vld [vmem:[%s2997_s1 + $0xea8] sm:$0xff]  ;;  %794 = vmatprep.subr.mxu0 %v369_v56  ;;  %v364_v63 = vld [vmem:[%s2997_s1 + $0xaa0] sm:$0xff]  ;;  %v75_v42 = vld [vmem:[%s2997_s1 + $0x198] sm:$0xff] }
  0x77   :  { %865 = vmatprep.subr.mxu1 %v497_v57  ;;  %v492_v0 = vld [vmem:[%s2997_s1 + $0xea0] sm:$0xff]  ;;  %v23_v1 = vld [vmem:[%s2996_s0 + $0x8] sm:$0xff]  ;;  %795 = vmatpush2.msra.mxu0 %v368_v58  ;;  %v203_v43 = vld [vmem:[%s2997_s1 + $0x598] sm:$0xff] }
  0x78   :  { %866 = vmatpush2.msra.mxu1 %v496_v59  ;;  %v361_v2 = vld [vmem:[%s2997_s1 + $0xa88] sm:$0xff]  ;;  %796 = vmatprep.subr.mxu0 %v365_v60  ;;  %v360_v5 = vld [vmem:[%s2997_s1 + $0xa80] sm:$0xff]  ;;  %v577_v10 = vcombine.high %v23_v1, %v23_v1  ;;  %v2154_v16 = vrot.slane %v23_v1, %v1722_v52  ;;  %v74_v44 = vld [vmem:[%s2997_s1 + $0x190] sm:$0xff] }
  0x79   :  { %v489_v4 = vld [vmem:[%s2997_s1 + $0xe88] sm:$0xff]  ;;  %867 = vmatprep.subr.mxu1 %v493_v61  ;;  %v488_v6 = vld [vmem:[%s2997_s1 + $0xe80] sm:$0xff]  ;;  %797 = vmatpush2.msra.mxu0 %v364_v63  ;;  %v202_v45 = vld [vmem:[%s2997_s1 + $0x590] sm:$0xff] }
  0x7a   :  { %868 = vmatpush2.msra.mxu1 %v492_v0  ;;  %v357_v7 = vld [vmem:[%s2997_s1 + $0xa68] sm:$0xff]  ;;  %798 = vmatprep.subr.mxu0 %v361_v2  ;;  %v356_v12 = vld [vmem:[%s2997_s1 + $0xa60] sm:$0xff]  ;;  %v2169_v21 = vrot.slane %v577_v10, %v1722_v52  ;;  %v2185_v25 = vcombine.high %v2154_v16, %v2154_v16  ;;  %v71_v46 = vld [vmem:[%s2997_s1 + $0x178] sm:$0xff] }
  0x7b   :  { %v485_v9 = vld [vmem:[%s2997_s1 + $0xe68] sm:$0xff]  ;;  %869 = vmatprep.subr.mxu1 %v489_v4  ;;  %v484_v13 = vld [vmem:[%s2997_s1 + $0xe60] sm:$0xff]  ;;  %799 = vmatpush2.msra.mxu0 %v360_v5  ;;  %v199_v47 = vld [vmem:[%s2997_s1 + $0x578] sm:$0xff] }
  0x7c   :  { %870 = vmatpush2.msra.mxu1 %v488_v6  ;;  %v353_v14 = vld [vmem:[%s2997_s1 + $0xa48] sm:$0xff]  ;;  %800 = vmatprep.subr.mxu0 %v357_v7  ;;  %v352_v17 = vld [vmem:[%s2997_s1 + $0xa40] sm:$0xff]  ;;  %v2195_v28 = vcombine.high %v2169_v21, %v2169_v21  ;;  %v70_v48 = vld [vmem:[%s2997_s1 + $0x170] sm:$0xff] }
  0x7d   :  { %v481_v15 = vld [vmem:[%s2997_s1 + $0xe48] sm:$0xff]  ;;  %871 = vmatprep.subr.mxu1 %v485_v9  ;;  %v480_v18 = vld [vmem:[%s2997_s1 + $0xe40] sm:$0xff]  ;;  %801 = vmatpush2.msra.mxu0 %v356_v12  ;;  %v198_v49 = vld [vmem:[%s2997_s1 + $0x570] sm:$0xff] }
  0x7e   :  { %872 = vmatpush2.msra.mxu1 %v484_v13  ;;  %v349_v19 = vld [vmem:[%s2997_s1 + $0xa28] sm:$0xff]  ;;  %802 = vmatprep.subr.mxu0 %v353_v14  ;;  %v348_v22 = vld [vmem:[%s2997_s1 + $0xa20] sm:$0xff]  ;;  %v67_v50 = vld [vmem:[%s2997_s1 + $0x158] sm:$0xff] }
  0x7f   :  { %v477_v20 = vld [vmem:[%s2997_s1 + $0xe28] sm:$0xff]  ;;  %873 = vmatprep.subr.mxu1 %v481_v15  ;;  %v476_v23 = vld [vmem:[%s2997_s1 + $0xe20] sm:$0xff]  ;;  %803 = vmatpush2.msra.mxu0 %v352_v17  ;;  %v195_v51 = vld [vmem:[%s2997_s1 + $0x558] sm:$0xff] }
  0x80   :  { %874 = vmatpush2.msra.mxu1 %v480_v18  ;;  %v345_v24 = vld [vmem:[%s2997_s1 + $0xa08] sm:$0xff]  ;;  %804 = vmatprep.subr.mxu0 %v349_v19  ;;  %v344_v26 = vld [vmem:[%s2997_s1 + $0xa00] sm:$0xff]  ;;  %v66_v53 = vld [vmem:[%s2997_s1 + $0x150] sm:$0xff] }
  0x81   :  { %v473_v52 = vld [vmem:[%s2997_s1 + $0xe08] sm:$0xff]  ;;  %875 = vmatprep.subr.mxu1 %v477_v20  ;;  %805 = vmatpush2.msra.mxu0 %v348_v22  ;;  %v472_v27 = vld [vmem:[%s2997_s1 + $0xe00] sm:$0xff]  ;;  %v194_v54 = vld [vmem:[%s2997_s1 + $0x550] sm:$0xff] }
  0x82   :  { %876 = vmatpush2.msra.mxu1 %v476_v23  ;;  %806 = vmatprep.subr.mxu0 %v345_v24  ;;  %v63_v55 = vld [vmem:[%s2997_s1 + $0x138] sm:$0xff]  ;;  %v62_v57 = vld [vmem:[%s2997_s1 + $0x130] sm:$0xff] }
  0x83   :  { %877 = vmatprep.subr.mxu1 %v473_v52  ;;  %807 = vmatpush2.msra.mxu0 %v344_v26  ;;  %v191_v56 = vld [vmem:[%s2997_s1 + $0x538] sm:$0xff]  ;;  %v190_v58 = vld [vmem:[%s2997_s1 + $0x530] sm:$0xff] }
  0x84   :  { %808 = vmatprep.mubr.f32.mxu0 %v2185_v25  ;;  %878 = vmatpush2.msra.mxu1 %v472_v27  ;;  %v59_v59 = vld [vmem:[%s2997_s1 + $0x118] sm:$0xff]  ;;  %v58_v61 = vld [vmem:[%s2997_s1 + $0x110] sm:$0xff] }
  0x85   :  { %809 = vmatmul.mubr.f32.vlgmr.msra.gmra.mxu0 %v2154_v16  ;;  %879 = vmatprep.mubr.f32.mxu1 %v2195_v28  ;;  %v187_v60 = vld [vmem:[%s2997_s1 + $0x518] sm:$0xff]  ;;  %v186_v63 = vld [vmem:[%s2997_s1 + $0x510] sm:$0xff] }
  0x86   :  { %886 = vmatprep.subr.mxu0 %v87_v29  ;;  %957 = vmatprep.subr.mxu1 %v215_v30  ;;  %v55_v0 = vld [vmem:[%s2997_s1 + $0xf8] sm:$0xff]  ;;  %v54_v2 = vld [vmem:[%s2997_s1 + $0xf0] sm:$0xff] }
  0x87   :  { %880 = vmatmul.mubr.f32.vlgmr.msra.gmra.mxu1 %v2169_v21  ;;  %887 = vmatpush1.msra.mxu0 %v86_v31  ;;  %v183_v1 = vld [vmem:[%s2997_s1 + $0x4f8] sm:$0xff]  ;;  %v182_v4 = vld [vmem:[%s2997_s1 + $0x4f0] sm:$0xff] }
  0x88   :  { %958 = vmatpush1.msra.mxu1 %v214_v32  ;;  %888 = vmatprep.subr.mxu0 %v83_v33  ;;  %v51_v5 = vld [vmem:[%s2997_s1 + $0xd8] sm:$0xff]  ;;  %v50_v7 = vld [vmem:[%s2997_s1 + $0xd0] sm:$0xff] }
  0x89   :  { %959 = vmatprep.subr.mxu1 %v211_v34  ;;  %889 = vmatpush1.msra.mxu0 %v82_v35  ;;  %v179_v6 = vld [vmem:[%s2997_s1 + $0x4d8] sm:$0xff]  ;;  %v178_v9 = vld [vmem:[%s2997_s1 + $0x4d0] sm:$0xff] }
  0x8a   :  { %960 = vmatpush1.msra.mxu1 %v210_v36  ;;  %890 = vmatprep.subr.mxu0 %v79_v37  ;;  %v47_v10 = vld [vmem:[%s2997_s1 + $0xb8] sm:$0xff]  ;;  %v46_v13 = vld [vmem:[%s2997_s1 + $0xb0] sm:$0xff] }
  0x8b   :  { %961 = vmatprep.subr.mxu1 %v207_v38  ;;  %891 = vmatpush1.msra.mxu0 %v78_v39  ;;  %v175_v12 = vld [vmem:[%s2997_s1 + $0x4b8] sm:$0xff]  ;;  %v174_v14 = vld [vmem:[%s2997_s1 + $0x4b0] sm:$0xff] }
  0x8c   :  { %962 = vmatpush1.msra.mxu1 %v206_v40  ;;  %892 = vmatprep.subr.mxu0 %v75_v42  ;;  %v43_v15 = vld [vmem:[%s2997_s1 + $0x98] sm:$0xff]  ;;  %v42_v18 = vld [vmem:[%s2997_s1 + $0x90] sm:$0xff] }
  0x8d   :  { %963 = vmatprep.subr.mxu1 %v203_v43  ;;  %893 = vmatpush1.msra.mxu0 %v74_v44  ;;  %v171_v17 = vld [vmem:[%s2997_s1 + $0x498] sm:$0xff]  ;;  %v170_v19 = vld [vmem:[%s2997_s1 + $0x490] sm:$0xff] }
  0x8e   :  { %964 = vmatpush1.msra.mxu1 %v202_v45  ;;  %894 = vmatprep.subr.mxu0 %v71_v46  ;;  %v39_v20 = vld [vmem:[%s2997_s1 + $0x78] sm:$0xff]  ;;  %v38_v23 = vld [vmem:[%s2997_s1 + $0x70] sm:$0xff] }
  0x8f   :  { %965 = vmatprep.subr.mxu1 %v199_v47  ;;  %895 = vmatpush1.msra.mxu0 %v70_v48  ;;  %v167_v22 = vld [vmem:[%s2997_s1 + $0x478] sm:$0xff]  ;;  %v166_v24 = vld [vmem:[%s2997_s1 + $0x470] sm:$0xff] }
  0x90   :  { %966 = vmatpush1.msra.mxu1 %v198_v49  ;;  %896 = vmatprep.subr.mxu0 %v67_v50  ;;  %v35_v52 = vld [vmem:[%s2997_s1 + $0x58] sm:$0xff]  ;;  %v34_v27 = vld [vmem:[%s2997_s1 + $0x50] sm:$0xff] }
  0x91   :  { %967 = vmatprep.subr.mxu1 %v195_v51  ;;  %897 = vmatpush1.msra.mxu0 %v66_v53  ;;  %v163_v26 = vld [vmem:[%s2997_s1 + $0x458] sm:$0xff]  ;;  %v162_v29 = vld [vmem:[%s2997_s1 + $0x450] sm:$0xff] }
  0x92   :  { %968 = vmatpush1.msra.mxu1 %v194_v54  ;;  %898 = vmatprep.subr.mxu0 %v63_v55  ;;  %v31_v30 = vld [vmem:[%s2997_s1 + $0x38] sm:$0xff]  ;;  %v30_v32 = vld [vmem:[%s2997_s1 + $0x30] sm:$0xff] }
  0x93   :  { %969 = vmatprep.subr.mxu1 %v191_v56  ;;  %899 = vmatpush1.msra.mxu0 %v62_v57  ;;  %v159_v31 = vld [vmem:[%s2997_s1 + $0x438] sm:$0xff]  ;;  %v158_v33 = vld [vmem:[%s2997_s1 + $0x430] sm:$0xff] }
  0x94   :  { %970 = vmatpush1.msra.mxu1 %v190_v58  ;;  %900 = vmatprep.subr.mxu0 %v59_v59  ;;  %v27_v34 = vld [vmem:[%s2997_s1 + $0x18] sm:$0xff]  ;;  %v26_v36 = vld [vmem:[%s2997_s1 + $0x10] sm:$0xff] }
  0x95   :  { %971 = vmatprep.subr.mxu1 %v187_v60  ;;  %901 = vmatpush1.msra.mxu0 %v58_v61  ;;  %v155_v35 = vld [vmem:[%s2997_s1 + $0x418] sm:$0xff]  ;;  %v154_v37 = vld [vmem:[%s2997_s1 + $0x410] sm:$0xff] }
  0x96   :  { %972 = vmatpush1.msra.mxu1 %v186_v63  ;;  %902 = vmatprep.subr.mxu0 %v55_v0  ;;  %v151_v38 = vld [vmem:[%s2997_s1 + $0x3f8] sm:$0xff]  ;;  %v150_v40 = vld [vmem:[%s2997_s1 + $0x3f0] sm:$0xff] }
  0x97   :  { %973 = vmatprep.subr.mxu1 %v183_v1  ;;  %903 = vmatpush1.msra.mxu0 %v54_v2  ;;  %v279_v39 = vld [vmem:[%s2997_s1 + $0x7f8] sm:$0xff]  ;;  %v278_v42 = vld [vmem:[%s2997_s1 + $0x7f0] sm:$0xff] }
  0x98   :  { %974 = vmatpush1.msra.mxu1 %v182_v4  ;;  %904 = vmatprep.subr.mxu0 %v51_v5  ;;  %v147_v43 = vld [vmem:[%s2997_s1 + $0x3d8] sm:$0xff]  ;;  %v146_v45 = vld [vmem:[%s2997_s1 + $0x3d0] sm:$0xff] }
  0x99   :  { %975 = vmatprep.subr.mxu1 %v179_v6  ;;  %905 = vmatpush1.msra.mxu0 %v50_v7  ;;  %v275_v44 = vld [vmem:[%s2997_s1 + $0x7d8] sm:$0xff]  ;;  %v274_v46 = vld [vmem:[%s2997_s1 + $0x7d0] sm:$0xff] }
  0x9a   :  { %976 = vmatpush1.msra.mxu1 %v178_v9  ;;  %906 = vmatprep.subr.mxu0 %v47_v10  ;;  %v143_v47 = vld [vmem:[%s2997_s1 + $0x3b8] sm:$0xff]  ;;  %v142_v49 = vld [vmem:[%s2997_s1 + $0x3b0] sm:$0xff] }
  0x9b   :  { %977 = vmatprep.subr.mxu1 %v175_v12  ;;  %907 = vmatpush1.msra.mxu0 %v46_v13  ;;  %v271_v48 = vld [vmem:[%s2997_s1 + $0x7b8] sm:$0xff]  ;;  %v270_v50 = vld [vmem:[%s2997_s1 + $0x7b0] sm:$0xff] }
  0x9c   :  { %978 = vmatpush1.msra.mxu1 %v174_v14  ;;  %908 = vmatprep.subr.mxu0 %v43_v15  ;;  %v139_v51 = vld [vmem:[%s2997_s1 + $0x398] sm:$0xff]  ;;  %v138_v54 = vld [vmem:[%s2997_s1 + $0x390] sm:$0xff] }
  0x9d   :  { %979 = vmatprep.subr.mxu1 %v171_v17  ;;  %909 = vmatpush1.msra.mxu0 %v42_v18  ;;  %v267_v53 = vld [vmem:[%s2997_s1 + $0x798] sm:$0xff]  ;;  %v266_v55 = vld [vmem:[%s2997_s1 + $0x790] sm:$0xff] }
  0x9e   :  { %980 = vmatpush1.msra.mxu1 %v170_v19  ;;  %910 = vmatprep.subr.mxu0 %v39_v20  ;;  %v135_v56 = vld [vmem:[%s2997_s1 + $0x378] sm:$0xff]  ;;  %v134_v58 = vld [vmem:[%s2997_s1 + $0x370] sm:$0xff] }
  0x9f   :  { %981 = vmatprep.subr.mxu1 %v167_v22  ;;  %911 = vmatpush1.msra.mxu0 %v38_v23  ;;  %v263_v57 = vld [vmem:[%s2997_s1 + $0x778] sm:$0xff]  ;;  %v262_v59 = vld [vmem:[%s2997_s1 + $0x770] sm:$0xff] }
  0xa0   :  { %982 = vmatpush1.msra.mxu1 %v166_v24  ;;  %912 = vmatprep.subr.mxu0 %v35_v52 }
  0xa1   :  { %983 = vmatprep.subr.mxu1 %v163_v26  ;;  %913 = vmatpush1.msra.mxu0 %v34_v27 }
  0xa2   :  { %984 = vmatpush1.msra.mxu1 %v162_v29  ;;  %914 = vmatprep.subr.mxu0 %v31_v30 }
  0xa3   :  { %985 = vmatprep.subr.mxu1 %v159_v31  ;;  %915 = vmatpush1.msra.mxu0 %v30_v32 }
  0xa4   :  { %986 = vmatpush1.msra.mxu1 %v158_v33  ;;  %916 = vmatprep.subr.mxu0 %v27_v34 }
  0xa5   :  { %987 = vmatprep.subr.mxu1 %v155_v35  ;;  %917 = vmatpush1.msra.mxu0 %v26_v36 }
  0xa6   :  { %988 = vmatpush1.msra.mxu1 %v154_v37  ;;  %918 = vmatprep.subr.mxu0 %v151_v38 }
  0xa7   :  { %989 = vmatprep.subr.mxu1 %v279_v39  ;;  %919 = vmatpush2.msra.mxu0 %v150_v40 }
  0xa8   :  { %990 = vmatpush2.msra.mxu1 %v278_v42  ;;  %920 = vmatprep.subr.mxu0 %v147_v43 }
  0xa9   :  { %991 = vmatprep.subr.mxu1 %v275_v44  ;;  %921 = vmatpush2.msra.mxu0 %v146_v45 }
  0xaa   :  { %992 = vmatpush2.msra.mxu1 %v274_v46  ;;  %922 = vmatprep.subr.mxu0 %v143_v47 }
  0xab   :  { %993 = vmatprep.subr.mxu1 %v271_v48  ;;  %923 = vmatpush2.msra.mxu0 %v142_v49 }
  0xac   :  { %994 = vmatpush2.msra.mxu1 %v270_v50  ;;  %924 = vmatprep.subr.mxu0 %v139_v51 }
  0xad   :  { %995 = vmatprep.subr.mxu1 %v267_v53 }
  0xae   :  { %13 = vsyncpa [#allocation5], 0  ;;  %925 = vmatpush2.msra.mxu0 %v138_v54  ;;  %996 = vmatpush2.msra.mxu1 %v266_v55  ;;  %v131_v60 = vld [vmem:[%s2997_s1 + $0x358] sm:$0xff]  ;;  %v130_v63 = vld [vmem:[%s2997_s1 + $0x350] sm:$0xff] }
  0xaf   :  { %v259_v61 = vld [vmem:[%s2997_s1 + $0x758] sm:$0xff]  ;;  %926 = vmatprep.subr.mxu0 %v135_v56  ;;  %997 = vmatprep.subr.mxu1 %v263_v57  ;;  %v258_v0 = vld [vmem:[%s2997_s1 + $0x750] sm:$0xff] }
  0xb0   :  { %927 = vmatpush2.msra.mxu0 %v134_v58  ;;  %998 = vmatpush2.msra.mxu1 %v262_v59  ;;  %v127_v1 = vld [vmem:[%s2997_s1 + $0x338] sm:$0xff]  ;;  %v126_v4 = vld [vmem:[%s2997_s1 + $0x330] sm:$0xff] }
  0xb1   :  { %v255_v2 = vld [vmem:[%s2997_s1 + $0x738] sm:$0xff]  ;;  %928 = vmatprep.subr.mxu0 %v131_v60  ;;  %999 = vmatprep.subr.mxu1 %v259_v61  ;;  %v254_v5 = vld [vmem:[%s2997_s1 + $0x730] sm:$0xff] }
  0xb2   :  { %929 = vmatpush2.msra.mxu0 %v130_v63  ;;  %1000 = vmatpush2.msra.mxu1 %v258_v0  ;;  %v123_v6 = vld [vmem:[%s2997_s1 + $0x318] sm:$0xff]  ;;  %v122_v9 = vld [vmem:[%s2997_s1 + $0x310] sm:$0xff] }
  0xb3   :  { %v251_v7 = vld [vmem:[%s2997_s1 + $0x718] sm:$0xff]  ;;  %930 = vmatprep.subr.mxu0 %v127_v1  ;;  %1001 = vmatprep.subr.mxu1 %v255_v2  ;;  %v250_v10 = vld [vmem:[%s2997_s1 + $0x710] sm:$0xff] }
  0xb4   :  { %931 = vmatpush2.msra.mxu0 %v126_v4  ;;  %1002 = vmatpush2.msra.mxu1 %v254_v5  ;;  %v119_v12 = vld [vmem:[%s2997_s1 + $0x2f8] sm:$0xff]  ;;  %v118_v14 = vld [vmem:[%s2997_s1 + $0x2f0] sm:$0xff] }
  0xb5   :  { %v247_v13 = vld [vmem:[%s2997_s1 + $0x6f8] sm:$0xff]  ;;  %932 = vmatprep.subr.mxu0 %v123_v6  ;;  %1003 = vmatprep.subr.mxu1 %v251_v7  ;;  %v246_v15 = vld [vmem:[%s2997_s1 + $0x6f0] sm:$0xff] }
  0xb6   :  { %933 = vmatpush2.msra.mxu0 %v122_v9  ;;  %1004 = vmatpush2.msra.mxu1 %v250_v10  ;;  %v115_v17 = vld [vmem:[%s2997_s1 + $0x2d8] sm:$0xff]  ;;  %v114_v19 = vld [vmem:[%s2997_s1 + $0x2d0] sm:$0xff] }
  0xb7   :  { %v243_v18 = vld [vmem:[%s2997_s1 + $0x6d8] sm:$0xff]  ;;  %934 = vmatprep.subr.mxu0 %v119_v12  ;;  %1005 = vmatprep.subr.mxu1 %v247_v13  ;;  %v242_v20 = vld [vmem:[%s2997_s1 + $0x6d0] sm:$0xff] }
  0xb8   :  { %935 = vmatpush2.msra.mxu0 %v118_v14  ;;  %1006 = vmatpush2.msra.mxu1 %v246_v15  ;;  %v111_v22 = vld [vmem:[%s2997_s1 + $0x2b8] sm:$0xff]  ;;  %v110_v24 = vld [vmem:[%s2997_s1 + $0x2b0] sm:$0xff] }
  0xb9   :  { %v239_v23 = vld [vmem:[%s2997_s1 + $0x6b8] sm:$0xff]  ;;  %936 = vmatprep.subr.mxu0 %v115_v17  ;;  %1007 = vmatprep.subr.mxu1 %v243_v18  ;;  %v238_v52 = vld [vmem:[%s2997_s1 + $0x6b0] sm:$0xff] }
  0xba   :  { %937 = vmatpush2.msra.mxu0 %v114_v19  ;;  %1008 = vmatpush2.msra.mxu1 %v242_v20  ;;  %v107_v26 = vld [vmem:[%s2997_s1 + $0x298] sm:$0xff]  ;;  %v106_v29 = vld [vmem:[%s2997_s1 + $0x290] sm:$0xff] }
  0xbb   :  { %v235_v27 = vld [vmem:[%s2997_s1 + $0x698] sm:$0xff]  ;;  %938 = vmatprep.subr.mxu0 %v111_v22  ;;  %1009 = vmatprep.subr.mxu1 %v239_v23  ;;  %v234_v30 = vld [vmem:[%s2997_s1 + $0x690] sm:$0xff] }
  0xbc   :  { %939 = vmatpush2.msra.mxu0 %v110_v24  ;;  %1010 = vmatpush2.msra.mxu1 %v238_v52  ;;  %v103_v31 = vld [vmem:[%s2997_s1 + $0x278] sm:$0xff]  ;;  %v102_v33 = vld [vmem:[%s2997_s1 + $0x270] sm:$0xff] }
  0xbd   :  { %v231_v32 = vld [vmem:[%s2997_s1 + $0x678] sm:$0xff]  ;;  %940 = vmatprep.subr.mxu0 %v107_v26  ;;  %1011 = vmatprep.subr.mxu1 %v235_v27  ;;  %v230_v34 = vld [vmem:[%s2997_s1 + $0x670] sm:$0xff] }
  0xbe   :  { %941 = vmatpush2.msra.mxu0 %v106_v29  ;;  %1012 = vmatpush2.msra.mxu1 %v234_v30  ;;  %v99_v35 = vld [vmem:[%s2997_s1 + $0x258] sm:$0xff]  ;;  %v98_v37 = vld [vmem:[%s2997_s1 + $0x250] sm:$0xff] }
  0xbf   :  { %v227_v36 = vld [vmem:[%s2997_s1 + $0x658] sm:$0xff]  ;;  %942 = vmatprep.subr.mxu0 %v103_v31  ;;  %1013 = vmatprep.subr.mxu1 %v231_v32  ;;  %v226_v38 = vld [vmem:[%s2997_s1 + $0x650] sm:$0xff] }
  0xc0   :  { %943 = vmatpush2.msra.mxu0 %v102_v33  ;;  %1014 = vmatpush2.msra.mxu1 %v230_v34  ;;  %v95_v39 = vld [vmem:[%s2997_s1 + $0x238] sm:$0xff]  ;;  %v94_v42 = vld [vmem:[%s2997_s1 + $0x230] sm:$0xff] }
  0xc1   :  { %v223_v40 = vld [vmem:[%s2997_s1 + $0x638] sm:$0xff]  ;;  %944 = vmatprep.subr.mxu0 %v99_v35  ;;  %1015 = vmatprep.subr.mxu1 %v227_v36  ;;  %v222_v43 = vld [vmem:[%s2997_s1 + $0x630] sm:$0xff] }
  0xc2   :  { %945 = vmatpush2.msra.mxu0 %v98_v37  ;;  %1016 = vmatpush2.msra.mxu1 %v226_v38  ;;  %v91_v44 = vld [vmem:[%s2997_s1 + $0x218] sm:$0xff]  ;;  %v90_v46 = vld [vmem:[%s2997_s1 + $0x210] sm:$0xff] }
  0xc3   :  { %v219_v45 = vld [vmem:[%s2997_s1 + $0x618] sm:$0xff]  ;;  %946 = vmatprep.subr.mxu0 %v95_v39  ;;  %1017 = vmatprep.subr.mxu1 %v223_v40  ;;  %v218_v47 = vld [vmem:[%s2997_s1 + $0x610] sm:$0xff] }
  0xc4   :  { %947 = vmatpush2.msra.mxu0 %v94_v42  ;;  %1018 = vmatpush2.msra.mxu1 %v222_v43  ;;  %v343_v48 = vld [vmem:[%s2997_s1 + $0x9f8] sm:$0xff]  ;;  %v342_v50 = vld [vmem:[%s2997_s1 + $0x9f0] sm:$0xff] }
  0xc5   :  { %948 = vmatprep.subr.mxu0 %v91_v44  ;;  %1019 = vmatprep.subr.mxu1 %v219_v45  ;;  %v471_v49 = vld [vmem:[%s2997_s1 + $0xdf8] sm:$0xff]  ;;  %v470_v51 = vld [vmem:[%s2997_s1 + $0xdf0] sm:$0xff] }
  0xc6   :  { %949 = vmatpush2.msra.mxu0 %v90_v46  ;;  %950 = vmatprep.mubr.f32.mxu0 %v1780_v8  ;;  %v339_v8 = vld [vmem:[%s2997_s1 + $0x9d8] sm:$0xff]  ;;  %v462_v56 = vld [vmem:[%s2997_s1 + $0xdb0] sm:$0xff] }
  0xc7   :  { %1020 = vmatpush2.msra.mxu1 %v218_v47  ;;  %951 = vmatmul.mubr.f32.vlgmr.msra.gmra.mxu0 %v1749_v62  ;;  %v467_v53 = vld [vmem:[%s2997_s1 + $0xdd8] sm:$0xff]  ;;  %v338_v62 = vld [vmem:[%s2997_s1 + $0x9d0] sm:$0xff] }
  0xc8   :  { %1021 = vmatprep.mubr.f32.mxu1 %v1790_v11  ;;  %1028 = vmatprep.subr.mxu0 %v343_v48  ;;  %v466_v11 = vld [vmem:[%s2997_s1 + $0xdd0] sm:$0xff]  ;;  %v335_v54 = vld [vmem:[%s2997_s1 + $0x9b8] sm:$0xff] }
  0xc9   :  { %1099 = vmatprep.subr.mxu1 %v471_v49  ;;  %1022 = vmatmul.mubr.f32.vlgmr.msra.gmra.mxu1 %v1764_v3  ;;  %v463_v55 = vld [vmem:[%s2997_s1 + $0xdb8] sm:$0xff]  ;;  %v334_v3 = vld [vmem:[%s2997_s1 + $0x9b0] sm:$0xff] }
  0xca   :  { %1029 = vmatpush1.msra.mxu0 %v342_v50  ;;  %1100 = vmatpush1.msra.mxu1 %v470_v51  ;;  %v331_v57 = vld [vmem:[%s2997_s1 + $0x998] sm:$0xff]  ;;  %v330_v59 = vld [vmem:[%s2997_s1 + $0x990] sm:$0xff] }
  0xcb   :  { %1030 = vmatprep.subr.mxu0 %v339_v8  ;;  %1101 = vmatprep.subr.mxu1 %v467_v53  ;;  %v459_v58 = vld [vmem:[%s2997_s1 + $0xd98] sm:$0xff]  ;;  %v458_v60 = vld [vmem:[%s2997_s1 + $0xd90] sm:$0xff] }
  0xcc   :  { %1031 = vmatpush1.msra.mxu0 %v338_v62  ;;  %1102 = vmatpush1.msra.mxu1 %v466_v11  ;;  %v327_v61 = vld [vmem:[%s2997_s1 + $0x978] sm:$0xff]  ;;  %v326_v0 = vld [vmem:[%s2997_s1 + $0x970] sm:$0xff] }
  0xcd   :  { %1032 = vmatprep.subr.mxu0 %v335_v54  ;;  %1103 = vmatprep.subr.mxu1 %v463_v55  ;;  %v455_v63 = vld [vmem:[%s2997_s1 + $0xd78] sm:$0xff]  ;;  %v454_v1 = vld [vmem:[%s2997_s1 + $0xd70] sm:$0xff] }
  0xce   :  { %1033 = vmatpush1.msra.mxu0 %v334_v3  ;;  %1104 = vmatpush1.msra.mxu1 %v462_v56  ;;  %v323_v2 = vld [vmem:[%s2997_s1 + $0x958] sm:$0xff]  ;;  %v322_v5 = vld [vmem:[%s2997_s1 + $0x950] sm:$0xff] }
  0xcf   :  { %1034 = vmatprep.subr.mxu0 %v331_v57  ;;  %1105 = vmatprep.subr.mxu1 %v459_v58  ;;  %v451_v4 = vld [vmem:[%s2997_s1 + $0xd58] sm:$0xff]  ;;  %v450_v6 = vld [vmem:[%s2997_s1 + $0xd50] sm:$0xff] }
  0xd0   :  { %1035 = vmatpush1.msra.mxu0 %v330_v59  ;;  %1106 = vmatpush1.msra.mxu1 %v458_v60  ;;  %v319_v7 = vld [vmem:[%s2997_s1 + $0x938] sm:$0xff]  ;;  %v318_v10 = vld [vmem:[%s2997_s1 + $0x930] sm:$0xff] }
  0xd1   :  { %1036 = vmatprep.subr.mxu0 %v327_v61  ;;  %1107 = vmatprep.subr.mxu1 %v455_v63  ;;  %v447_v9 = vld [vmem:[%s2997_s1 + $0xd38] sm:$0xff]  ;;  %v446_v12 = vld [vmem:[%s2997_s1 + $0xd30] sm:$0xff] }
  0xd2   :  { %1037 = vmatpush1.msra.mxu0 %v326_v0  ;;  %1108 = vmatpush1.msra.mxu1 %v454_v1  ;;  %v315_v13 = vld [vmem:[%s2997_s1 + $0x918] sm:$0xff]  ;;  %v314_v15 = vld [vmem:[%s2997_s1 + $0x910] sm:$0xff] }
  0xd3   :  { %1038 = vmatprep.subr.mxu0 %v323_v2  ;;  %1109 = vmatprep.subr.mxu1 %v451_v4  ;;  %v443_v14 = vld [vmem:[%s2997_s1 + $0xd18] sm:$0xff]  ;;  %v442_v17 = vld [vmem:[%s2997_s1 + $0xd10] sm:$0xff] }
  0xd4   :  { %1039 = vmatpush1.msra.mxu0 %v322_v5  ;;  %1110 = vmatpush1.msra.mxu1 %v450_v6  ;;  %v311_v18 = vld [vmem:[%s2997_s1 + $0x8f8] sm:$0xff]  ;;  %v310_v20 = vld [vmem:[%s2997_s1 + $0x8f0] sm:$0xff] }
  0xd5   :  { %1040 = vmatprep.subr.mxu0 %v319_v7  ;;  %1111 = vmatprep.subr.mxu1 %v447_v9  ;;  %v439_v19 = vld [vmem:[%s2997_s1 + $0xcf8] sm:$0xff]  ;;  %v438_v22 = vld [vmem:[%s2997_s1 + $0xcf0] sm:$0xff] }
  0xd6   :  { %1041 = vmatpush1.msra.mxu0 %v318_v10  ;;  %1112 = vmatpush1.msra.mxu1 %v446_v12  ;;  %v307_v23 = vld [vmem:[%s2997_s1 + $0x8d8] sm:$0xff]  ;;  %v306_v52 = vld [vmem:[%s2997_s1 + $0x8d0] sm:$0xff] }
  0xd7   :  { %1042 = vmatprep.subr.mxu0 %v315_v13  ;;  %1113 = vmatprep.subr.mxu1 %v443_v14  ;;  %v435_v24 = vld [vmem:[%s2997_s1 + $0xcd8] sm:$0xff]  ;;  %v434_v26 = vld [vmem:[%s2997_s1 + $0xcd0] sm:$0xff] }
  0xd8   :  { %1043 = vmatpush1.msra.mxu0 %v314_v15  ;;  %1114 = vmatpush1.msra.mxu1 %v442_v17  ;;  %v303_v27 = vld [vmem:[%s2997_s1 + $0x8b8] sm:$0xff]  ;;  %v302_v30 = vld [vmem:[%s2997_s1 + $0x8b0] sm:$0xff] }
  0xd9   :  { %1044 = vmatprep.subr.mxu0 %v311_v18  ;;  %1115 = vmatprep.subr.mxu1 %v439_v19  ;;  %v431_v29 = vld [vmem:[%s2997_s1 + $0xcb8] sm:$0xff]  ;;  %v430_v31 = vld [vmem:[%s2997_s1 + $0xcb0] sm:$0xff] }
  0xda   :  { %1045 = vmatpush1.msra.mxu0 %v310_v20  ;;  %1116 = vmatpush1.msra.mxu1 %v438_v22  ;;  %v299_v32 = vld [vmem:[%s2997_s1 + $0x898] sm:$0xff]  ;;  %v298_v34 = vld [vmem:[%s2997_s1 + $0x890] sm:$0xff] }
  0xdb   :  { %1046 = vmatprep.subr.mxu0 %v307_v23  ;;  %1117 = vmatprep.subr.mxu1 %v435_v24  ;;  %v427_v33 = vld [vmem:[%s2997_s1 + $0xc98] sm:$0xff]  ;;  %v426_v35 = vld [vmem:[%s2997_s1 + $0xc90] sm:$0xff] }
  0xdc   :  { %1047 = vmatpush1.msra.mxu0 %v306_v52  ;;  %1118 = vmatpush1.msra.mxu1 %v434_v26  ;;  %v295_v36 = vld [vmem:[%s2997_s1 + $0x878] sm:$0xff]  ;;  %v294_v38 = vld [vmem:[%s2997_s1 + $0x870] sm:$0xff] }
  0xdd   :  { %1048 = vmatprep.subr.mxu0 %v303_v27  ;;  %1119 = vmatprep.subr.mxu1 %v431_v29  ;;  %v423_v37 = vld [vmem:[%s2997_s1 + $0xc78] sm:$0xff]  ;;  %v422_v39 = vld [vmem:[%s2997_s1 + $0xc70] sm:$0xff] }
  0xde   :  { %1049 = vmatpush1.msra.mxu0 %v302_v30  ;;  %1120 = vmatpush1.msra.mxu1 %v430_v31  ;;  %v291_v40 = vld [vmem:[%s2997_s1 + $0x858] sm:$0xff]  ;;  %v290_v43 = vld [vmem:[%s2997_s1 + $0x850] sm:$0xff] }
  0xdf   :  { %1050 = vmatprep.subr.mxu0 %v299_v32  ;;  %1121 = vmatprep.subr.mxu1 %v427_v33  ;;  %v419_v42 = vld [vmem:[%s2997_s1 + $0xc58] sm:$0xff]  ;;  %v418_v44 = vld [vmem:[%s2997_s1 + $0xc50] sm:$0xff] }
  0xe0   :  { %1051 = vmatpush1.msra.mxu0 %v298_v34  ;;  %1122 = vmatpush1.msra.mxu1 %v426_v35  ;;  %v287_v45 = vld [vmem:[%s2997_s1 + $0x838] sm:$0xff]  ;;  %v286_v47 = vld [vmem:[%s2997_s1 + $0x830] sm:$0xff] }
  0xe1   :  { %1052 = vmatprep.subr.mxu0 %v295_v36  ;;  %1123 = vmatprep.subr.mxu1 %v423_v37  ;;  %v415_v46 = vld [vmem:[%s2997_s1 + $0xc38] sm:$0xff]  ;;  %v414_v48 = vld [vmem:[%s2997_s1 + $0xc30] sm:$0xff] }
  0xe2   :  { %1053 = vmatpush1.msra.mxu0 %v294_v38  ;;  %1124 = vmatpush1.msra.mxu1 %v422_v39  ;;  %v283_v49 = vld [vmem:[%s2997_s1 + $0x818] sm:$0xff]  ;;  %v282_v51 = vld [vmem:[%s2997_s1 + $0x810] sm:$0xff] }
  0xe3   :  { %1054 = vmatprep.subr.mxu0 %v291_v40  ;;  %1125 = vmatprep.subr.mxu1 %v419_v42  ;;  %v411_v50 = vld [vmem:[%s2997_s1 + $0xc18] sm:$0xff]  ;;  %v410_v8 = vld [vmem:[%s2997_s1 + $0xc10] sm:$0xff] }
  0xe4   :  { %1055 = vmatpush1.msra.mxu0 %v290_v43  ;;  %1126 = vmatpush1.msra.mxu1 %v418_v44  ;;  %v407_v53 = vld [vmem:[%s2997_s1 + $0xbf8] sm:$0xff]  ;;  %v406_v11 = vld [vmem:[%s2997_s1 + $0xbf0] sm:$0xff] }
  0xe5   :  { %1056 = vmatprep.subr.mxu0 %v287_v45  ;;  %1127 = vmatprep.subr.mxu1 %v415_v46  ;;  %v535_v62 = vld [vmem:[%s2997_s1 + $0xff8] sm:$0xff]  ;;  %v534_v54 = vld [vmem:[%s2997_s1 + $0xff0] sm:$0xff] }
  0xe6   :  { %1057 = vmatpush1.msra.mxu0 %v286_v47  ;;  %1128 = vmatpush1.msra.mxu1 %v414_v48  ;;  %v403_v55 = vld [vmem:[%s2997_s1 + $0xbd8] sm:$0xff]  ;;  %v402_v56 = vld [vmem:[%s2997_s1 + $0xbd0] sm:$0xff] }
  0xe7   :  { %1058 = vmatprep.subr.mxu0 %v283_v49  ;;  %1129 = vmatprep.subr.mxu1 %v411_v50  ;;  %v531_v3 = vld [vmem:[%s2997_s1 + $0xfd8] sm:$0xff]  ;;  %v530_v57 = vld [vmem:[%s2997_s1 + $0xfd0] sm:$0xff] }
  0xe8   :  { %1059 = vmatpush1.msra.mxu0 %v282_v51  ;;  %1130 = vmatpush1.msra.mxu1 %v410_v8  ;;  %v399_v58 = vld [vmem:[%s2997_s1 + $0xbb8] sm:$0xff]  ;;  %v398_v60 = vld [vmem:[%s2997_s1 + $0xbb0] sm:$0xff] }
  0xe9   :  { %1060 = vmatprep.subr.mxu0 %v407_v53  ;;  %1131 = vmatprep.subr.mxu1 %v535_v62  ;;  %v527_v59 = vld [vmem:[%s2997_s1 + $0xfb8] sm:$0xff]  ;;  %v526_v61 = vld [vmem:[%s2997_s1 + $0xfb0] sm:$0xff] }
  0xea   :  { %1061 = vmatpush2.msra.mxu0 %v406_v11  ;;  %1132 = vmatpush2.msra.mxu1 %v534_v54  ;;  %v395_v63 = vld [vmem:[%s2997_s1 + $0xb98] sm:$0xff]  ;;  %v394_v1 = vld [vmem:[%s2997_s1 + $0xb90] sm:$0xff] }
  0xeb   :  { %1062 = vmatprep.subr.mxu0 %v403_v55  ;;  %1133 = vmatprep.subr.mxu1 %v531_v3  ;;  %v523_v0 = vld [vmem:[%s2997_s1 + $0xf98] sm:$0xff]  ;;  %v522_v2 = vld [vmem:[%s2997_s1 + $0xf90] sm:$0xff]  ;;  %v540_v3 = vsub.s32 0, %v1692_v41 }
  0xec   :  { %1063 = vmatpush2.msra.mxu0 %v402_v56  ;;  %1134 = vmatpush2.msra.mxu1 %v530_v57  ;;  %v391_v4 = vld [vmem:[%s2997_s1 + $0xb78] sm:$0xff]  ;;  %v390_v6 = vld [vmem:[%s2997_s1 + $0xb70] sm:$0xff]  ;;  %v536_v56 = vld [vmem:[%s2998_s2] sm:$0xf]  ;;  %v544_v57 = vsub.s32 1, %v1692_v41 }
  0xed   :  { %1064 = vmatprep.subr.mxu0 %v399_v58  ;;  %1135 = vmatprep.subr.mxu1 %v527_v59  ;;  %v519_v5 = vld [vmem:[%s2997_s1 + $0xf78] sm:$0xff]  ;;  %v518_v7 = vld [vmem:[%s2997_s1 + $0xf70] sm:$0xff]  ;;  %v541_v59 = vrot.slane %v536_v56, %v540_v3 }
  0xee   :  { %1065 = vmatpush2.msra.mxu0 %v398_v60  ;;  %1136 = vmatpush2.msra.mxu1 %v526_v61  ;;  %v387_v9 = vld [vmem:[%s2997_s1 + $0xb58] sm:$0xff]  ;;  %v386_v12 = vld [vmem:[%s2997_s1 + $0xb50] sm:$0xff]  ;;  %v545_v60 = vrot.slane %v536_v56, %v544_v57 }
  0xef   :  { %1066 = vmatprep.subr.mxu0 %v395_v63  ;;  %1137 = vmatprep.subr.mxu1 %v523_v0  ;;  %v515_v10 = vld [vmem:[%s2997_s1 + $0xf58] sm:$0xff]  ;;  %v514_v13 = vld [vmem:[%s2997_s1 + $0xf50] sm:$0xff] }
  0xf0   :  { %1067 = vmatpush2.msra.mxu0 %v394_v1  ;;  %1138 = vmatpush2.msra.mxu1 %v522_v2  ;;  %v383_v14 = vld [vmem:[%s2997_s1 + $0xb38] sm:$0xff]  ;;  %v382_v17 = vld [vmem:[%s2997_s1 + $0xb30] sm:$0xff] }
  0xf1   :  { %1068 = vmatprep.subr.mxu0 %v391_v4  ;;  %1139 = vmatprep.subr.mxu1 %v519_v5  ;;  %v511_v15 = vld [vmem:[%s2997_s1 + $0xf38] sm:$0xff]  ;;  %v510_v18 = vld [vmem:[%s2997_s1 + $0xf30] sm:$0xff] }
  0xf2   :  { %1069 = vmatpush2.msra.mxu0 %v390_v6  ;;  %1140 = vmatpush2.msra.mxu1 %v518_v7  ;;  %v379_v19 = vld [vmem:[%s2997_s1 + $0xb18] sm:$0xff]  ;;  %v378_v22 = vld [vmem:[%s2997_s1 + $0xb10] sm:$0xff] }
  0xf3   :  { %1070 = vmatprep.subr.mxu0 %v387_v9  ;;  %1141 = vmatprep.subr.mxu1 %v515_v10  ;;  %v507_v20 = vld [vmem:[%s2997_s1 + $0xf18] sm:$0xff]  ;;  %v506_v23 = vld [vmem:[%s2997_s1 + $0xf10] sm:$0xff] }
  0xf4   :  { %1071 = vmatpush2.msra.mxu0 %v386_v12  ;;  %1142 = vmatpush2.msra.mxu1 %v514_v13  ;;  %v375_v24 = vld [vmem:[%s2997_s1 + $0xaf8] sm:$0xff]  ;;  %v374_v26 = vld [vmem:[%s2997_s1 + $0xaf0] sm:$0xff] }
  0xf5   :  { %1072 = vmatprep.subr.mxu0 %v383_v14  ;;  %1143 = vmatprep.subr.mxu1 %v511_v15  ;;  %v503_v52 = vld [vmem:[%s2997_s1 + $0xef8] sm:$0xff]  ;;  %v502_v27 = vld [vmem:[%s2997_s1 + $0xef0] sm:$0xff] }
  0xf6   :  { %1073 = vmatpush2.msra.mxu0 %v382_v17  ;;  %1144 = vmatpush2.msra.mxu1 %v510_v18  ;;  %v371_v29 = vld [vmem:[%s2997_s1 + $0xad8] sm:$0xff]  ;;  %v370_v31 = vld [vmem:[%s2997_s1 + $0xad0] sm:$0xff] }
  0xf7   :  { %1074 = vmatprep.subr.mxu0 %v379_v19  ;;  %1145 = vmatprep.subr.mxu1 %v507_v20  ;;  %v499_v30 = vld [vmem:[%s2997_s1 + $0xed8] sm:$0xff]  ;;  %v498_v32 = vld [vmem:[%s2997_s1 + $0xed0] sm:$0xff] }
  0xf8   :  { %1075 = vmatpush2.msra.mxu0 %v378_v22  ;;  %1146 = vmatpush2.msra.mxu1 %v506_v23  ;;  %v367_v33 = vld [vmem:[%s2997_s1 + $0xab8] sm:$0xff]  ;;  %v366_v35 = vld [vmem:[%s2997_s1 + $0xab0] sm:$0xff] }
  0xf9   :  { %1076 = vmatprep.subr.mxu0 %v375_v24  ;;  %1147 = vmatprep.subr.mxu1 %v503_v52  ;;  %v495_v34 = vld [vmem:[%s2997_s1 + $0xeb8] sm:$0xff]  ;;  %v494_v36 = vld [vmem:[%s2997_s1 + $0xeb0] sm:$0xff] }
  0xfa   :  { %1077 = vmatpush2.msra.mxu0 %v374_v26  ;;  %1148 = vmatpush2.msra.mxu1 %v502_v27  ;;  %v363_v37 = vld [vmem:[%s2997_s1 + $0xa98] sm:$0xff]  ;;  %v362_v39 = vld [vmem:[%s2997_s1 + $0xa90] sm:$0xff] }
  0xfb   :  { %1078 = vmatprep.subr.mxu0 %v371_v29  ;;  %1149 = vmatprep.subr.mxu1 %v499_v30  ;;  %v491_v38 = vld [vmem:[%s2997_s1 + $0xe98] sm:$0xff]  ;;  %v490_v40 = vld [vmem:[%s2997_s1 + $0xe90] sm:$0xff] }
  0xfc   :  { %1079 = vmatpush2.msra.mxu0 %v370_v31  ;;  %1150 = vmatpush2.msra.mxu1 %v498_v32  ;;  %v359_v42 = vld [vmem:[%s2997_s1 + $0xa78] sm:$0xff]  ;;  %v358_v44 = vld [vmem:[%s2997_s1 + $0xa70] sm:$0xff] }
  0xfd   :  { %1080 = vmatprep.subr.mxu0 %v367_v33  ;;  %1151 = vmatprep.subr.mxu1 %v495_v34  ;;  %v487_v43 = vld [vmem:[%s2997_s1 + $0xe78] sm:$0xff]  ;;  %v486_v45 = vld [vmem:[%s2997_s1 + $0xe70] sm:$0xff] }
  0xfe   :  { %1081 = vmatpush2.msra.mxu0 %v366_v35  ;;  %1152 = vmatpush2.msra.mxu1 %v494_v36  ;;  %v355_v46 = vld [vmem:[%s2997_s1 + $0xa58] sm:$0xff]  ;;  %v354_v48 = vld [vmem:[%s2997_s1 + $0xa50] sm:$0xff] }
  0xff   :  { %1082 = vmatprep.subr.mxu0 %v363_v37  ;;  %1153 = vmatprep.subr.mxu1 %v491_v38  ;;  %v483_v47 = vld [vmem:[%s2997_s1 + $0xe58] sm:$0xff]  ;;  %v482_v49 = vld [vmem:[%s2997_s1 + $0xe50] sm:$0xff] }
 0x100   :  { %1083 = vmatpush2.msra.mxu0 %v362_v39  ;;  %1154 = vmatpush2.msra.mxu1 %v490_v40  ;;  %v351_v50 = vld [vmem:[%s2997_s1 + $0xa38] sm:$0xff]  ;;  %v350_v8 = vld [vmem:[%s2997_s1 + $0xa30] sm:$0xff] }
 0x101   :  { %1084 = vmatprep.subr.mxu0 %v359_v42  ;;  %1155 = vmatprep.subr.mxu1 %v487_v43  ;;  %v479_v51 = vld [vmem:[%s2997_s1 + $0xe38] sm:$0xff]  ;;  %v478_v53 = vld [vmem:[%s2997_s1 + $0xe30] sm:$0xff] }
 0x102   :  { %1085 = vmatpush2.msra.mxu0 %v358_v44  ;;  %1156 = vmatpush2.msra.mxu1 %v486_v45  ;;  %v347_v62 = vld [vmem:[%s2997_s1 + $0xa18] sm:$0xff]  ;;  %v346_v54 = vld [vmem:[%s2997_s1 + $0xa10] sm:$0xff] }
 0x103   :  { %1086 = vmatprep.subr.mxu0 %v355_v46  ;;  %1157 = vmatprep.subr.mxu1 %v483_v47  ;;  %v475_v11 = vld [vmem:[%s2997_s1 + $0xe18] sm:$0xff]  ;;  %v474_v55 = vld [vmem:[%s2997_s1 + $0xe10] sm:$0xff]  ;;  %v668_v58 = vpop.f32.mrf.mxu0  ;;  %s1348_s1 = smov [#allocation4]  }
 0x104   :  { %1087 = vmatpush2.msra.mxu0 %v354_v48  ;;  %1158 = vmatpush2.msra.mxu1 %v482_v49  ;;  %v669_v63 = vadd.f32 %v668_v58, %v541_v59  ;;  %s1244_s2 = sshll.u32 %s1348_s1, 4  ;;  %s1245_s2 = int_to_ptr.vmem [resolvable:$true] %s1244_s2 }
 0x105   :  { %1088 = vmatprep.subr.mxu0 %v351_v50  ;;  %1159 = vmatprep.subr.mxu1 %v479_v51  ;;  %v739_v61 = vpop.f32.mrf.mxu1  ;;  %s1283_s21 = scalar_lea.vmem %s1245_s2, 64  ;;  %p1288_p1 = scmp.lt.s32.totalorder %s1245_s2, %s1245_s2 }
 0x106   :  { %1089 = vmatpush2.msra.mxu0 %v350_v8  ;;  %1160 = vmatpush2.msra.mxu1 %v478_v53  ;;  %v740_v1 = vadd.f32 %v739_v61, %v669_v63  ;;  %p1284_p0 = scmp.ne.s32.totalorder %s1245_s2, %s1283_s21  ;;  %p1289_p2 = scmp.lt.s32.totalorder %s1283_s21, %s1283_s21 }
 0x107   :  { %1090 = vmatprep.subr.mxu0 %v347_v62  ;;  %1161 = vmatprep.subr.mxu1 %v475_v11 }
 0x108   :  { %1091 = vmatpush2.msra.mxu0 %v346_v54  ;;  %1092 = vmatprep.mubr.f32.mxu0 %v2185_v25  ;;  %v670_v25 = vpop.f32.mrf.mxu0  ;;  %p1290_p3 = por %p1289_p2, %p1288_p1 }
 0x109   :  { %1162 = vmatpush2.msra.mxu1 %v474_v55  ;;  %1163 = vmatprep.mubr.f32.mxu1 %v2195_v28  ;;  %v671_v0 = vadd.f32 %v670_v25, %v545_v60  ;;  %v741_v28 = vpop.f32.mrf.mxu1 }
 0x10a   :  { %1093 = vmatmul.mubr.f32.vlgmr.msra.gmra.mxu0 %v2154_v16  ;;  %1164 = vmatmul.mubr.f32.vlgmr.msra.gmra.mxu1 %v2169_v21  ;;  %p1291_p4 = pnand %p1290_p3, %p1284_p0 }
 0x10b   :  { %v742_v2 = vadd.f32 %v741_v28, %v671_v0 }
 0x145   :  { %v810_v16 = vpop.f32.mrf.mxu0 }
 0x146   :  { %v811_v21 = vadd.f32 %v810_v16, %v740_v1 }
 0x147   :  { %v881_v4 = vpop.f32.mrf.mxu1  ;;  %v812_v5 = vpop.f32.mrf.mxu0 }
 0x148   :  { %v813_v6 = vadd.f32 %v812_v5, %v742_v2  ;;  %v882_v9 = vadd.f32 %v881_v4, %v811_v21 }
 0x149   :  { %v883_v7 = vpop.f32.mrf.mxu1 }
 0x14a   :  { %v884_v10 = vadd.f32 %v883_v7, %v813_v6 }
 0x14c   :  { %v1172_v12 = vcombine.low %v882_v9, %v884_v10 }
 0x14e   :  { %1269 = vst.sshfl [vmem:[#allocation4] sm:$0x33 pattern:$0x76325410] %v1172_v12 }
 0x14f   :  { %1294 = shalt.err (!%p1291_p4)
}
 0x150   :  { %1247 = dma.vmem_to_hbm [thread:$0]  %s1245_s2, 64, %s3001_s5, [#allocation5]   ;;  %v548_v13 = vsub.s32 2, %v1692_v41  ;;  %v552_v14 = vsub.s32 3, %v1692_v41 }
 0x151   :  { %s1349_s5 = smov [#allocation6]  }
 0x152   :  { %v549_v17 = vrot.slane %v536_v56, %v548_v13  ;;  %v553_v18 = vrot.slane %v536_v56, %v552_v14  ;;  %s1254_s24 = sshll.u32 %s1349_s5, 4  ;;  %s1255_s24 = int_to_ptr.vmem [resolvable:$true] %s1254_s24 }
 0x153   :  { %s1303_s0 = scalar_lea.vmem %s1255_s24, 64  ;;  %p1308_p6 = scmp.lt.s32.totalorder %s1255_s24, %s1255_s24 }
 0x154   :  { %p1304_p5 = scmp.ne.s32.totalorder %s1255_s24, %s1303_s0  ;;  %p1309_p7 = scmp.lt.s32.totalorder %s1303_s0, %s1303_s0 }
 0x156   :  { %p1310_p8 = por %p1309_p7, %p1308_p6 }
 0x158   :  { %p1311_p9 = pnand %p1310_p8, %p1304_p5 }
 0x187   :  { %v952_v15 = vpop.f32.mrf.mxu0 }
 0x188   :  { %v953_v22 = vadd.f32 %v952_v15, %v549_v17 }
 0x189   :  { %v1023_v19 = vpop.f32.mrf.mxu1  ;;  %v954_v20 = vpop.f32.mrf.mxu0 }
 0x18a   :  { %v955_v23 = vadd.f32 %v954_v20, %v553_v18  ;;  %v1024_v52 = vadd.f32 %v1023_v19, %v953_v22 }
 0x18b   :  { %v1025_v24 = vpop.f32.mrf.mxu1 }
 0x18c   :  { %v1026_v29 = vadd.f32 %v1025_v24, %v955_v23 }
 0x1ca   :  { %v1094_v26 = vpop.f32.mrf.mxu0  ;;  %v1165_v27 = vpop.f32.mrf.mxu1 }
 0x1cb   :  { %v1095_v30 = vadd.f32 %v1094_v26, %v1024_v52 }
 0x1cc   :  { %v1096_v31 = vpop.f32.mrf.mxu0  ;;  %v1167_v34 = vpop.f32.mrf.mxu1 }
 0x1cd   :  { %v1166_v32 = vadd.f32 %v1165_v27, %v1095_v30  ;;  %v1097_v33 = vadd.f32 %v1096_v31, %v1026_v29 }
 0x1cf   :  { %v1194_v41 = vmul.f32 0.5, %v1166_v32  ;;  %v1168_v35 = vadd.f32 %v1167_v34, %v1097_v33 }
 0x1d1   :  { %v1196_v36 = vmul.f32 1.442695, %v1194_v41  ;;  %v1195_v37 = vmul.f32 0.5, %v1168_v35  ;;  %v1184_v38 = vcombine.low %v1166_v32, %v1168_v35 }
 0x1d3   :  { %1279 = vpow2.f32 %v1196_v36  ;;  %v1198_v39 = vmul.f32 1.442695, %v1195_v37  ;;  %1270 = vst.sshfl [vmem:[#allocation6] sm:$0x33 pattern:$0x76325410] %v1184_v38 }
 0x1d4   :  { %1314 = shalt.err (!%p1311_p9)
}
 0x1d5   :  { %1257 = dma.vmem_to_hbm [thread:$0]  %s1255_s24, 64, %s3002_s6, [#allocation5]   ;;  %1281 = vpow2.f32 %v1198_v39  ;;  %v1271_v40 = vld.sshfl [vmem:[%s2999_s3] sm:$0x33 pattern:$0x76325410] }
 0x1d6   :  { %v1209_v42 = vcombine.high %v1271_v40, %v1271_v40  ;;  %s1350_s29 = smov [#allocation2]  }
 0x1d7   :  { %s1234_s30 = sshll.u32 %s1350_s29, 4  ;;  %s1235_s30 = int_to_ptr.vmem [resolvable:$true] %s1234_s30 }
 0x1d8   :  { %s1323_s7 = scalar_lea.vmem %s1235_s30, 64  ;;  %p1328_p11 = scmp.lt.s32.totalorder %s1235_s30, %s1235_s30 }
 0x1d9   :  { %p1324_p10 = scmp.ne.s32.totalorder %s1235_s30, %s1323_s7  ;;  %p1329_p12 = scmp.lt.s32.totalorder %s1323_s7, %s1323_s7 }
 0x1db   :  { %p1330_p13 = por %p1329_p12, %p1328_p11 }
 0x1dd   :  { %p1331_p0 = pnand %p1330_p13, %p1324_p10 }
 0x1e0   :  { %v1280_v43 = vpop.eup %1279 }
 0x1e1   :  { %v1212_v44 = vmul.f32 %v1280_v43, %v1271_v40 }
 0x1e2   :  { %v1282_v45 = vpop.eup %1281 }
 0x1e3   :  { %v1213_v46 = vmul.f32 %v1282_v45, %v1209_v42  ;;  %v1214_v47 = vadd.f32 %v1212_v44, %v882_v9 }
 0x1e5   :  { %v1215_v48 = vadd.f32 %v1213_v46, %v884_v10 }
 0x1e7   :  { %v1218_v49 = vcombine.low %v1214_v47, %v1215_v48 }
 0x1e9   :  { %1272 = vst.sshfl [vmem:[#allocation2] sm:$0x33 pattern:$0x76325410] %v1218_v49 }
 0x1ea   :  { %1334 = shalt.err (!%p1331_p0)
}
 0x1eb   :  { %1237 = dma.vmem_to_hbm [thread:$0]  %s1235_s30, 64, %s3000_s4, [#allocation3]  }
 0x1ec   :  { %1343 = dma.done.wait [#allocation3], 64  }
 0x1ed   :  { %1344 = vsyncadd [#allocation3], 4294967232 }
 0x1ee   :  { %1345 = dma.done.wait [#allocation5], 128  }
 0x1ef   :  { %1346 = vsyncadd [#allocation5], 4294967168 }
 0x1f0   :  { %1267 = vsyncpa [#allocation3], 1 }
 0x1f1   :  { %1268 = vsyncpa [#allocation5], 1 }

</bundles_post_ra>
